<compile_context>
chip_gen: v6e
topology: v6e:2x2x1
jax: 0.10.0
libtpu: 0.0.40
codegen_flags: <defaults>
</compile_context>

<pallas_src>
import functools
import math

import jax
import jax.numpy as jnp
from jax.experimental import pallas as pl
from jax.experimental.pallas import tpu as pltpu

# mirrors CINN.cmut_size (set in forward before tracing, read by MsgPass)
CMUT = [None]

_VMEM_LIMIT = 48 * 1024 * 1024      # <= 64 MiB physical VMEM on v7x


def _pick_tile_n(N, M):
    """Output-channel tile: full block when small, else a 128-multiple divisor."""
    if N <= 512:
        return N
    for t in ((512, 384, 256, 128) if M <= 128 else (256, 128)):
        if N % t == 0:
            return t
    return N


# ----------------------------------------------------------------------------
# Pallas kernel 1: matmul + bias + optional fused ReLU (1x1 convs, projections)
#   - bf16 MXU inputs, f32 accumulation / epilogue
# ----------------------------------------------------------------------------
def _mm_kernel_1k(x_ref, w_ref, b_ref, o_ref, *, act):
    # single K step: no scratch accumulator needed
    r = jnp.dot(x_ref[...].astype(jnp.bfloat16),
                w_ref[...].astype(jnp.bfloat16),
                preferred_element_type=jnp.float32)
    r = r + b_ref[...]
    if act == "relu":
        r = jnp.maximum(r, 0.0)
    o_ref[...] = r.astype(o_ref.dtype)


def _mm_kernel_acc(x_ref, w_ref, b_ref, o_ref, acc_ref, *, act):
    k = pl.program_id(2)

    @pl.when(k == 0)
    def _():
        acc_ref[...] = jnp.zeros_like(acc_ref)

    acc_ref[...] += jnp.dot(x_ref[...].astype(jnp.bfloat16),
                            w_ref[...].astype(jnp.bfloat16),
                            preferred_element_type=jnp.float32)

    @pl.when(k == pl.num_programs(2) - 1)
    def _():
        r = acc_ref[...] + b_ref[...]
        if act == "relu":
            r = jnp.maximum(r, 0.0)
        o_ref[...] = r.astype(o_ref.dtype)


@functools.partial(jax.jit, static_argnames=("act",))
def matmul_bias_act(x, w, b, act="none"):
    """(M,K) @ (K,N) + b with optional fused ReLU.  w is pre-cast bf16, b is
    (1,N) f32.  Blocks are chosen so no HBM-side padding is ever needed."""
    M, K = x.shape
    _, N = w.shape
    tm = 128 if (M % 128 == 0 and M > 128) else M
    if K <= 2048:
        tk = K
    elif K % 512 == 0:
        tk = 512
    elif K % 128 == 0:
        tk = 128
    else:
        tk = K
    tn = _pick_tile_n(N, M)
    nm, nn, nk = M // tm, N // tn, K // tk

    if nk == 1:
        return pl.pallas_call(
            functools.partial(_mm_kernel_1k, act=act),
            out_shape=jax.ShapeDtypeStruct((M, N), x.dtype),
            grid_spec=pltpu.PrefetchScalarGridSpec(
                num_scalar_prefetch=0,
                grid=(nm, nn),
                in_specs=[
                    pl.BlockSpec((tm, K), lambda i, j: (i, 0)),
                    pl.BlockSpec((K, tn), lambda i, j: (0, j)),
                    pl.BlockSpec((1, tn), lambda i, j: (0, j)),
                ],
                out_specs=pl.BlockSpec((tm, tn), lambda i, j: (i, j)),
            ),
            compiler_params=pltpu.CompilerParams(
                dimension_semantics=("parallel", "parallel"),
                vmem_limit_bytes=_VMEM_LIMIT),
        )(x, w, b)

    return pl.pallas_call(
        functools.partial(_mm_kernel_acc, act=act),
        out_shape=jax.ShapeDtypeStruct((M, N), x.dtype),
        grid_spec=pltpu.PrefetchScalarGridSpec(
            num_scalar_prefetch=0,
            grid=(nm, nn, nk),
            in_specs=[
                pl.BlockSpec((tm, tk), lambda i, j, k: (i, k)),
                pl.BlockSpec((tk, tn), lambda i, j, k: (k, j)),
                pl.BlockSpec((1, tn), lambda i, j, k: (0, j)),
            ],
            out_specs=pl.BlockSpec((tm, tn), lambda i, j, k: (i, j)),
            scratch_shapes=[pltpu.VMEM((tm, tn), jnp.float32)],
        ),
        compiler_params=pltpu.CompilerParams(
            dimension_semantics=("parallel", "parallel", "arbitrary"),
            vmem_limit_bytes=_VMEM_LIMIT),
    )(x, w, b)


# ----------------------------------------------------------------------------
# Pallas kernel 2: 3x3 conv, padding=1 — 9 shifted-window matmuls fused in VMEM
#   (no HBM im2col), bf16 MXU, f32 accumulate + fused bias/ReLU.
# ----------------------------------------------------------------------------
def _conv3x3_kernel(x_ref, w_ref, b_ref, o_ref, *, act):
    # x_ref: (1, H+2, W+2, Cin) f32   (padded activation, one batch element)
    # w_ref: (9, Cin, tn)       bf16  (taps on the leading axis)
    # b_ref: (1, tn)            f32
    # o_ref: (1, H, W, tn)      f32
    _, H, W, tn = o_ref.shape
    cin = x_ref.shape[-1]
    x = x_ref[0].astype(jnp.bfloat16)                    # (H+2, W+2, Cin)
    acc = jnp.zeros((H * W, tn), jnp.float32)
    for dh in range(3):
        for dw in range(3):
            win = x[dh:dh + H, dw:dw + W, :].reshape(H * W, cin)
            acc = acc + jnp.dot(win,
                                w_ref[dh * 3 + dw].astype(jnp.bfloat16),
                                preferred_element_type=jnp.float32)
    r = acc + b_ref[...]
    if act == "relu":
        r = jnp.maximum(r, 0.0)
    o_ref[...] = r.reshape(1, H, W, tn).astype(o_ref.dtype)


@functools.partial(jax.jit, static_argnames=("act",))
def conv3x3(x, w9, b, act="none"):
    """x: (N,H,W,Cin) f32, w9: (9,Cin,Cout) bf16, b: (1,Cout) f32."""
    n, h, wd, cin = x.shape
    cout = w9.shape[-1]
    xp = jnp.pad(x, ((0, 0), (1, 1), (1, 1), (0, 0)))
    tn = _pick_tile_n(cout, n * h * wd)
    return pl.pallas_call(
        functools.partial(_conv3x3_kernel, act=act),
        out_shape=jax.ShapeDtypeStruct((n, h, wd, cout), x.dtype),
        grid_spec=pltpu.PrefetchScalarGridSpec(
            num_scalar_prefetch=0,
            grid=(n, cout // tn),
            in_specs=[
                pl.BlockSpec((1, h + 2, wd + 2, cin), lambda i, j: (i, 0, 0, 0)),
                pl.BlockSpec((9, cin, tn), lambda i, j: (0, 0, j)),
                pl.BlockSpec((1, tn), lambda i, j: (0, j)),
            ],
            out_specs=pl.BlockSpec((1, h, wd, tn), lambda i, j: (i, 0, 0, j)),
        ),
        compiler_params=pltpu.CompilerParams(
            dimension_semantics=("parallel", "parallel"),
            vmem_limit_bytes=_VMEM_LIMIT),
    )(xp, w9, b)


def conv1x1(x, wmat, b, act="none"):
    n, h, wd, c = x.shape
    y = matmul_bias_act(x.reshape(n * h * wd, c), wmat, b, act=act)
    return y.reshape(n, h, wd, -1)


# ----------------------------------------------------------------------------
# Pallas kernel 3: small-sequence self-attention, gridded over batch*heads
# ----------------------------------------------------------------------------
def _attn_kernel(q_ref, k_ref, v_ref, o_ref, *, scale_sq):
    q = q_ref[...]                                        # (1, S, D) f32
    k = k_ref[...]
    v = v_ref[...]
    s = jnp.einsum("bqd,bkd->bqk", q, k,
                   preferred_element_type=jnp.float32) * scale_sq
    mx = jnp.max(s, axis=-1, keepdims=True)
    p = jnp.exp(s - mx)
    denom = jnp.sum(p, axis=-1, keepdims=True)
    p = p * pl.reciprocal(denom, approx=True)             # EUP, frees the VALU
    o_ref[...] = jnp.einsum("bqk,bkd->bqd", p, v,
                            preferred_element_type=jnp.float32).astype(o_ref.dtype)


@jax.jit
def attention_core(q, k, v):
    # q, k, v: (B, S, D) with B = n * n_head; S and D need no padding because
    # full-extent block dims are always legal.
    B, S, D = q.shape
    scale_sq = 1.0 / math.sqrt(float(D))                  # (D**-0.25)**2 on q@k^T
    spec = pl.BlockSpec((1, S, D), lambda b: (b, 0, 0))
    return pl.pallas_call(
        functools.partial(_attn_kernel, scale_sq=scale_sq),
        out_shape=jax.ShapeDtypeStruct((B, S, D), q.dtype),
        grid_spec=pltpu.PrefetchScalarGridSpec(
            num_scalar_prefetch=0,
            grid=(B,),
            in_specs=[spec, spec, spec],
            out_specs=spec,
        ),
        compiler_params=pltpu.CompilerParams(
            dimension_semantics=("parallel",)),
    )(q, k, v)


# ----------------------------------------------------------------------------
# Pallas kernel 4: MsgPass softmax-over-cmut + weighted reduction
#   channels stay on the lane axis -> no host-side transposes.
# ----------------------------------------------------------------------------
def _msgpass_kernel(g_ref, f_ref, o_ref):
    g = g_ref[...]                                        # (1, cmut, tm, 1)
    mx = jnp.max(g, axis=1, keepdims=True)
    e = jnp.exp(g - mx)
    wt = e * pl.reciprocal(jnp.sum(e, axis=1, keepdims=True), approx=True)
    f = f_ref[...]                                        # (1, cmut, tm, C)
    o_ref[...] = jnp.sum(f * wt, axis=1).astype(o_ref.dtype)   # (1, tm, C)


@jax.jit
def msgpass_weighted_sum(gate, feat):
    # gate: (B, cmut, M, 1) f32, feat: (B, cmut, M, C) f32 -> (B, M, C) f32
    B, cmut, M, _ = gate.shape
    C = feat.shape[-1]
    tm = 512 if (M > 512 and M % 512 == 0) else M
    return pl.pallas_call(
        _msgpass_kernel,
        out_shape=jax.ShapeDtypeStruct((B, M, C), feat.dtype),
        grid_spec=pltpu.PrefetchScalarGridSpec(
            num_scalar_prefetch=0,
            grid=(B, M // tm),
            in_specs=[
                pl.BlockSpec((1, cmut, tm, 1), lambda b, m: (b, 0, m, 0)),
                pl.BlockSpec((1, cmut, tm, C), lambda b, m: (b, 0, m, 0)),
            ],
            out_specs=pl.BlockSpec((1, tm, C), lambda b, m: (b, m, 0)),
        ),
        compiler_params=pltpu.CompilerParams(
            dimension_semantics=("parallel", "parallel")),
    )(gate, feat)


# ----------------------------------------------------------------------------
# Pooling / upsampling / warp glue (plain JAX)
# ----------------------------------------------------------------------------
def avg_pool2(x):                                # nn.AvgPool2d(2)
    n, h, w, c = x.shape
    return x.reshape(n, h // 2, 2, w // 2, 2, c).mean(axis=(2, 4))


def upsample2(x):                                # nn.Upsample(2, 'nearest')
    return jnp.repeat(jnp.repeat(x, 2, axis=1), 2, axis=2)


def bilinear_warp_border(img, flow):
    # grid_sample(mode='bilinear', padding_mode='border', align_corners=True).
    # With align_corners=True the normalized grid + flow/((W-1)/2) in PyTorch is
    # exactly pixel_index + flow in pixel units, which is what we compute here;
    # clamping all four gather indices reproduces 'border' padding.
    # TODO(synk): the data-dependent per-pixel gather stays in plain JAX (no
    # clean Pallas TPU equivalent for arbitrary gathers).
    n, h, w, c = img.shape
    xs = jnp.arange(w, dtype=img.dtype)[None, None, :] + flow[..., 0]
    ys = jnp.arange(h, dtype=img.dtype)[None, :, None] + flow[..., 1]
    x0 = jnp.floor(xs)
    y0 = jnp.floor(ys)
    wx = (xs - x0)[..., None]
    wy = (ys - y0)[..., None]
    x0i = jnp.clip(x0.astype(jnp.int32), 0, w - 1)
    x1i = jnp.clip(x0.astype(jnp.int32) + 1, 0, w - 1)
    y0i = jnp.clip(y0.astype(jnp.int32), 0, h - 1)
    y1i = jnp.clip(y0.astype(jnp.int32) + 1, 0, h - 1)
    flat = img.reshape(n, h * w, c)

    def gather(yi, xi):
        idx = (yi * w + xi).reshape(n, h * w, 1)
        return jnp.take_along_axis(flat, idx, axis=1).reshape(n, h, w, c)

    g00, g01 = gather(y0i, x0i), gather(y0i, x1i)
    g10, g11 = gather(y1i, x0i), gather(y1i, x1i)
    top = g00 * (1.0 - wx) + g01 * wx
    bot = g10 * (1.0 - wx) + g11 * wx
    return top * (1.0 - wy) + bot * wy


# ----------------------------------------------------------------------------
# Deterministic parameter construction + functional modules
# ----------------------------------------------------------------------------
class ParamRng:
    def __init__(self, key):
        self._key = key
        self._n = 0

    def next(self):
        self._n += 1
        return jax.random.fold_in(self._key, self._n)


def conv_w(rng, kh, kw, cin, cout):
    fan_in = kh * kw * cin
    return (jax.random.normal(rng.next(), (kh, kw, cin, cout), jnp.float32)
            * (0.5 / math.sqrt(fan_in)))


def conv_b(rng, cout):
    return jax.random.normal(rng.next(), (cout,), jnp.float32) * 0.01


def _prep_w1x1(w):           # (1,1,cin,cout) -> (cin,cout) bf16, once at build
    return w.reshape(w.shape[2], w.shape[3]).astype(jnp.bfloat16)


def _prep_w3x3(w):           # (3,3,cin,cout) -> (9,cin,cout) bf16, once at build
    return w.reshape(9, w.shape[2], w.shape[3]).astype(jnp.bfloat16)


def _prep_b(b):              # (cout,) -> (1,cout) f32 (epilogue stays f32)
    return b.reshape(1, -1).astype(jnp.float32)


def make_seq(fns):
    def apply(x):
        for f in fns:
            x = f(x)
        return x
    return apply


def make_skip(main_fns):                         # SkipBlock (skip=Identity)
    main = make_seq(main_fns)

    def apply(x):
        return jnp.concatenate([x, main(x)], axis=-1)
    return apply


def make_resconv(rng, c_in, c_mid, c_out):       # ResConv2d
    w1, b1 = _prep_w3x3(conv_w(rng, 3, 3, c_in, c_mid)), _prep_b(conv_b(rng, c_mid))
    w2, b2 = _prep_w3x3(conv_w(rng, 3, 3, c_mid, c_out)), _prep_b(conv_b(rng, c_out))
    wskip = None if c_in == c_out else _prep_w1x1(conv_w(rng, 1, 1, c_in, c_out))
    zb = jnp.zeros((1, c_out), jnp.float32)      # skip conv has bias=False

    def apply(x):
        h = conv3x3(x, w1, b1, act="relu")
        h = conv3x3(h, w2, b2, act="relu")
        s = x if wskip is None else conv1x1(x, wskip, zb)
        return h + s
    return apply


def make_selfatt(rng, c_in, n_head):             # SelfAtt2d
    assert c_in % n_head == 0
    wqkv = _prep_w1x1(conv_w(rng, 1, 1, c_in, 3 * c_in))
    bqkv = _prep_b(conv_b(rng, 3 * c_in))
    wout = _prep_w1x1(conv_w(rng, 1, 1, c_in, c_in))
    bout = _prep_b(conv_b(rng, c_in))

    def apply(x):
        n, h, w, c = x.shape
        d = c // n_head
        qkv = conv1x1(x, wqkv, bqkv)                              # (n,h,w,3c)
        qkv = qkv.reshape(n, h * w, 3 * n_head, d).transpose(0, 2, 1, 3)
        q = qkv[:, :n_head].reshape(n * n_head, h * w, d)
        k = qkv[:, n_head:2 * n_head].reshape(n * n_head, h * w, d)
        v = qkv[:, 2 * n_head:].reshape(n * n_head, h * w, d)
        y = attention_core(q, k, v)
        y = y.reshape(n, n_head, h * w, d).transpose(0, 2, 1, 3).reshape(n, h, w, c)
        return x + conv1x1(y, wout, bout)
    return apply


def make_msgpass(rng, c_in, heads=1, chns_div=4):  # MsgPass
    wg = _prep_w1x1(conv_w(rng, 1, 1, c_in, heads))
    bg = _prep_b(conv_b(rng, heads))

    def apply(x):
        cmut = CMUT[0]
        n, h, w, c = x.shape
        B = n // cmut
        M = h * w
        gate = conv1x1(x, wg, bg)                                 # (n,h,w,1)
        c_msg = c // chns_div
        xg = x.reshape(B, cmut, M, c)                             # no transpose
        feat = xg[..., :c_msg]                                    # (B,cmut,M,c_msg)
        g = gate.reshape(B, cmut, M, 1)
        msg = msgpass_weighted_sum(g, feat)                       # (B,M,c_msg)
        msg = jnp.broadcast_to(msg[:, None], (B, cmut, M, c_msg))
        out = jnp.concatenate([msg, xg[..., c_msg:]], axis=-1)
        return out.reshape(n, h, w, c)
    return apply


def make_defconv(rng, c_in, n_head):             # DefConv
    w1 = _prep_w1x1(conv_w(rng, 1, 1, c_in, c_in))
    b1 = _prep_b(conv_b(rng, c_in))
    w2 = _prep_w1x1(conv_w(rng, 1, 1, c_in, 2 * n_head))
    b2 = _prep_b(conv_b(rng, 2 * n_head))

    def apply(x):
        n, h, w, c = x.shape
        cpg = c // n_head
        flow = conv1x1(conv1x1(x, w1, b1, act="relu"), w2, b2)    # (n,h,w,2*heads)
        xi = x.reshape(n, h, w, n_head, cpg).transpose(0, 3, 1, 2, 4) \
              .reshape(n * n_head, h, w, cpg)
        fl = flow.reshape(n, h, w, n_head, 2).transpose(0, 3, 1, 2, 4) \
                 .reshape(n * n_head, h, w, 2)
        feat = bilinear_warp_border(xi, fl)
        return feat.reshape(n, n_head, h, w, cpg).transpose(0, 2, 3, 1, 4) \
                   .reshape(n, h, w, c)
    return apply


# ----------------------------------------------------------------------------
# CINN network assembly (mirrors the nested SkipBlock structure exactly)
# ----------------------------------------------------------------------------
def build_cinn(rng, inp_chns, out_chns, c):
    cs = [c, c * 2, c * 2, c * 4, c * 4, c * 8]
    down, up = avg_pool2, upsample2

    L5 = make_skip([
        down,
        make_resconv(rng, cs[4], cs[5], cs[5]),
        make_msgpass(rng, cs[5]), make_selfatt(rng, cs[5], cs[5] // 128),
        make_resconv(rng, cs[5], cs[5], cs[5]),
        make_msgpass(rng, cs[5]), make_selfatt(rng, cs[5], cs[5] // 128),
        make_resconv(rng, cs[5], cs[5], cs[5]),
        make_msgpass(rng, cs[5]), make_selfatt(rng, cs[5], cs[5] // 128),
        make_resconv(rng, cs[5], cs[5], cs[4]),
        make_msgpass(rng, cs[4]), make_selfatt(rng, cs[4], cs[4] // 128),
        up,
    ])
    L4 = make_skip([
        down,
        make_resconv(rng, cs[3], cs[4], cs[4]),
        make_resconv(rng, cs[4], cs[4], cs[4]),
        L5,
        make_resconv(rng, cs[4] + cs[4], cs[4], cs[4] * 3),
        make_msgpass(rng, cs[3] * 3),
        make_resconv(rng, cs[4] * 3, cs[4], cs[4]),
        make_selfatt(rng, cs[4], cs[4] // 128),
        make_resconv(rng, cs[4], cs[4], cs[3] * 3),
        make_msgpass(rng, cs[3] * 3),
        make_resconv(rng, cs[3] * 3, cs[3], cs[3]),
        make_selfatt(rng, cs[3], cs[3] // 128),
        up,
    ])
    L3 = make_skip([
        down,
        make_resconv(rng, cs[2], cs[3], cs[3]),
        make_resconv(rng, cs[3], cs[3], cs[3]),
        make_resconv(rng, cs[3], cs[3], cs[3]),
        L4,
        make_resconv(rng, cs[3] + cs[3], cs[3], cs[3] * 3),
        make_msgpass(rng, cs[3] * 3),
        make_resconv(rng, cs[3] * 3, cs[3], cs[3]),
        make_selfatt(rng, cs[3], cs[3] // 128),
        make_resconv(rng, cs[3], cs[3], cs[2] * 3),
        make_msgpass(rng, cs[2] * 3),
        make_resconv(rng, cs[2] * 3, cs[2], cs[2]),
        make_selfatt(rng, cs[2], cs[2] // 128),
        up,
    ])
    L2 = make_skip([
        down,
        make_resconv(rng, cs[1], cs[2], cs[2]),
        make_resconv(rng, cs[2], cs[2], cs[2]),
        make_resconv(rng, cs[2], cs[2], cs[2]),
        L3,
        make_resconv(rng, cs[2] + cs[2], cs[2], cs[2] * 3),
        make_defconv(rng, cs[2] * 3, cs[2] // 16),
        make_resconv(rng, cs[2] * 3, cs[2], cs[2] * 3),
        make_msgpass(rng, cs[2] * 3),
        make_resconv(rng, cs[2] * 3, cs[2], cs[1]),
        up,
    ])
    L1 = make_skip([
        down,
        make_resconv(rng, cs[0], cs[1], cs[1]),
        make_resconv(rng, cs[1], cs[1], cs[1]),
        make_resconv(rng, cs[1], cs[1], cs[1]),
        L2,
        make_resconv(rng, cs[1] + cs[1], cs[1], cs[1] * 3),
        make_defconv(rng, cs[1] * 3, cs[1] // 16),
        make_resconv(rng, cs[1] * 3, cs[1], cs[1] * 3),
        make_msgpass(rng, cs[1] * 3),
        make_resconv(rng, cs[1] * 3, cs[1], cs[0]),
        up,
    ])
    net = make_seq([
        make_resconv(rng, inp_chns, cs[0], cs[0]),
        make_resconv(rng, cs[0], cs[0], cs[0]),
        make_resconv(rng, cs[0], cs[0], cs[0]),
        L1,
        make_resconv(rng, cs[0] + cs[0], cs[0], cs[0] * 3),
        make_defconv(rng, cs[0] * 3, cs[0] // 16),
        make_resconv(rng, cs[0] * 3, cs[0], out_chns),
    ])
    return net


def cinn_forward(net_apply, target, inp):
    # target: (B, Ct, H, W) NCHW,  inp: (B, cmut, Ci, H, W)
    B, cmut, Ci, H, W = inp.shape
    # CMUT is a Python int fixed before tracing (same caveat as the PyTorch
    # module's mutable cmut_size list).
    CMUT[0] = int(cmut)
    if target is not None:
        interm = jnp.broadcast_to(target[:, None], (B, cmut, target.shape[1], H, W))
        x = jnp.concatenate([inp, interm], axis=2)
    else:
        x = inp
    x = x.reshape(B * cmut, -1, H, W)
    x = jnp.transpose(x, (0, 2, 3, 1))           # NCHW -> NHWC for the kernel path
    y = net_apply(x)
    y = jnp.transpose(y, (0, 3, 1, 2))           # NHWC -> NCHW
    return y.reshape(B, cmut, -1, H, W)


# ----------------------------------------------------------------------------
if __name__ == "__main__":
    key = jax.random.PRNGKey(0)
    # c=64 is the smallest width for which every SelfAtt2d(cs[i], cs[i] // 128)
    # has >= 1 head; H=W=32 is the smallest spatial size surviving the 5
    # AvgPool2d(2) stages.
    B, cmut, C_in, C_tgt, H, W = 1, 2, 3, 3, 32, 32
    c = 64
    inp_chns = C_in + C_tgt
    out_chns = 3

    k_param, k_tgt, k_inp = jax.random.split(key, 3)
    net_apply = build_cinn(ParamRng(k_param), inp_chns, out_chns, c)

    target = jax.random.normal(k_tgt, (B, C_tgt, H, W), jnp.float32)
    inputs = jax.random.normal(k_inp, (B, cmut, C_in, H, W), jnp.float32)

    out = cinn_forward(net_apply, target, inputs)
    out = jax.block_until_ready(out)
    assert out.shape == (B, cmut, out_chns, H, W), out.shape
    print("KERNEL_OK")
</pallas_src>

<mosaic_0001>
module attributes {stable_mosaic.version = 11 : i64} {
  func.func @_conv3x3_kernel(%arg0: i32, %arg1: i32, %arg2: memref<1x34x34x6xf32, #tpu.memory_space<vmem>>, %arg3: memref<9x6x64xbf16, #tpu.memory_space<vmem>>, %arg4: memref<1x64xf32, #tpu.memory_space<vmem>>, %arg5: memref<1x32x32x64xf32, #tpu.memory_space<vmem>>) attributes {dimension_semantics = [#tpu.dimension_semantics<parallel>, #tpu.dimension_semantics<parallel>], iteration_bounds = array<i64: 2, 1>, scalar_prefetch = 0 : i64, scratch_operands = 0 : i64, tpu.core_type = #tpu.core_type<tc>, window_params = [{transform_indices = @transform_0, window_bounds = array<i64: 1, 34, 34, 6>}, {transform_indices = @transform_1, window_bounds = array<i64: 9, 6, 64>}, {transform_indices = @transform_2, window_bounds = array<i64: 1, 64>}, {transform_indices = @transform_3, window_bounds = array<i64: 1, 32, 32, 64>}]} {
    %c0 = arith.constant 0 : index
    %c0_0 = arith.constant 0 : index
    %c0_1 = arith.constant 0 : index
    %c0_2 = arith.constant 0 : index
    %0 = vector.load %arg2[%c0, %c0_0, %c0_1, %c0_2] : memref<1x34x34x6xf32, #tpu.memory_space<vmem>>, vector<1x34x34x6xf32>
    %1 = vector.shape_cast %0 : vector<1x34x34x6xf32> to vector<34x34x6xf32>
    %2 = arith.truncf %1 : vector<34x34x6xf32> to vector<34x34x6xbf16>
    %cst = arith.constant 0.000000e+00 : f32
    %3 = vector.broadcast %cst : f32 to vector<1024x64xf32>
    %4 = vector.extract_strided_slice %2 {offsets = [0, 0, 0], sizes = [32, 32, 6], strides = [1, 1, 1]} : vector<34x34x6xbf16> to vector<32x32x6xbf16>
    %5 = vector.shape_cast %4 : vector<32x32x6xbf16> to vector<1024x6xbf16>
    %c0_3 = arith.constant 0 : index
    %c0_4 = arith.constant 0 : index
    %c0_5 = arith.constant 0 : index
    %6 = vector.load %arg3[%c0_3, %c0_4, %c0_5] : memref<9x6x64xbf16, #tpu.memory_space<vmem>>, vector<1x6x64xbf16>
    %7 = vector.shape_cast %6 : vector<1x6x64xbf16> to vector<6x64xbf16>
    %cst_6 = arith.constant dense<0.000000e+00> : vector<1024x64xf32>
    %8 = tpu.matmul %5, %7, %cst_6 {dimension_numbers = #tpu.dot_dimension_numbers<[1], [0], [0], [1], [0, 0, 1, 1], [], []>} : vector<1024x6xbf16>, vector<6x64xbf16>, vector<1024x64xf32> -> vector<1024x64xf32>
    %9 = arith.addf %3, %8 : vector<1024x64xf32>
    %10 = vector.extract_strided_slice %2 {offsets = [0, 1, 0], sizes = [32, 32, 6], strides = [1, 1, 1]} : vector<34x34x6xbf16> to vector<32x32x6xbf16>
    %11 = vector.shape_cast %10 : vector<32x32x6xbf16> to vector<1024x6xbf16>
    %c1 = arith.constant 1 : index
    %c0_7 = arith.constant 0 : index
    %c0_8 = arith.constant 0 : index
    %12 = vector.load %arg3[%c1, %c0_7, %c0_8] : memref<9x6x64xbf16, #tpu.memory_space<vmem>>, vector<1x6x64xbf16>
    %13 = vector.shape_cast %12 : vector<1x6x64xbf16> to vector<6x64xbf16>
    %cst_9 = arith.constant dense<0.000000e+00> : vector<1024x64xf32>
    %14 = tpu.matmul %11, %13, %cst_9 {dimension_numbers = #tpu.dot_dimension_numbers<[1], [0], [0], [1], [0, 0, 1, 1], [], []>} : vector<1024x6xbf16>, vector<6x64xbf16>, vector<1024x64xf32> -> vector<1024x64xf32>
    %15 = arith.addf %9, %14 : vector<1024x64xf32>
    %16 = vector.extract_strided_slice %2 {offsets = [0, 2, 0], sizes = [32, 32, 6], strides = [1, 1, 1]} : vector<34x34x6xbf16> to vector<32x32x6xbf16>
    %17 = vector.shape_cast %16 : vector<32x32x6xbf16> to vector<1024x6xbf16>
    %c2 = arith.constant 2 : index
    %c0_10 = arith.constant 0 : index
    %c0_11 = arith.constant 0 : index
    %18 = vector.load %arg3[%c2, %c0_10, %c0_11] : memref<9x6x64xbf16, #tpu.memory_space<vmem>>, vector<1x6x64xbf16>
    %19 = vector.shape_cast %18 : vector<1x6x64xbf16> to vector<6x64xbf16>
    %cst_12 = arith.constant dense<0.000000e+00> : vector<1024x64xf32>
    %20 = tpu.matmul %17, %19, %cst_12 {dimension_numbers = #tpu.dot_dimension_numbers<[1], [0], [0], [1], [0, 0, 1, 1], [], []>} : vector<1024x6xbf16>, vector<6x64xbf16>, vector<1024x64xf32> -> vector<1024x64xf32>
    %21 = arith.addf %15, %20 : vector<1024x64xf32>
    %22 = vector.extract_strided_slice %2 {offsets = [1, 0, 0], sizes = [32, 32, 6], strides = [1, 1, 1]} : vector<34x34x6xbf16> to vector<32x32x6xbf16>
    %23 = vector.shape_cast %22 : vector<32x32x6xbf16> to vector<1024x6xbf16>
    %c3 = arith.constant 3 : index
    %c0_13 = arith.constant 0 : index
    %c0_14 = arith.constant 0 : index
    %24 = vector.load %arg3[%c3, %c0_13, %c0_14] : memref<9x6x64xbf16, #tpu.memory_space<vmem>>, vector<1x6x64xbf16>
    %25 = vector.shape_cast %24 : vector<1x6x64xbf16> to vector<6x64xbf16>
    %cst_15 = arith.constant dense<0.000000e+00> : vector<1024x64xf32>
    %26 = tpu.matmul %23, %25, %cst_15 {dimension_numbers = #tpu.dot_dimension_numbers<[1], [0], [0], [1], [0, 0, 1, 1], [], []>} : vector<1024x6xbf16>, vector<6x64xbf16>, vector<1024x64xf32> -> vector<1024x64xf32>
    %27 = arith.addf %21, %26 : vector<1024x64xf32>
    %28 = vector.extract_strided_slice %2 {offsets = [1, 1, 0], sizes = [32, 32, 6], strides = [1, 1, 1]} : vector<34x34x6xbf16> to vector<32x32x6xbf16>
    %29 = vector.shape_cast %28 : vector<32x32x6xbf16> to vector<1024x6xbf16>
    %c4 = arith.constant 4 : index
    %c0_16 = arith.constant 0 : index
    %c0_17 = arith.constant 0 : index
    %30 = vector.load %arg3[%c4, %c0_16, %c0_17] : memref<9x6x64xbf16, #tpu.memory_space<vmem>>, vector<1x6x64xbf16>
    %31 = vector.shape_cast %30 : vector<1x6x64xbf16> to vector<6x64xbf16>
    %cst_18 = arith.constant dense<0.000000e+00> : vector<1024x64xf32>
    %32 = tpu.matmul %29, %31, %cst_18 {dimension_numbers = #tpu.dot_dimension_numbers<[1], [0], [0], [1], [0, 0, 1, 1], [], []>} : vector<1024x6xbf16>, vector<6x64xbf16>, vector<1024x64xf32> -> vector<1024x64xf32>
    %33 = arith.addf %27, %32 : vector<1024x64xf32>
    %34 = vector.extract_strided_slice %2 {offsets = [1, 2, 0], sizes = [32, 32, 6], strides = [1, 1, 1]} : vector<34x34x6xbf16> to vector<32x32x6xbf16>
    %35 = vector.shape_cast %34 : vector<32x32x6xbf16> to vector<1024x6xbf16>
    %c5 = arith.constant 5 : index
    %c0_19 = arith.constant 0 : index
    %c0_20 = arith.constant 0 : index
    %36 = vector.load %arg3[%c5, %c0_19, %c0_20] : memref<9x6x64xbf16, #tpu.memory_space<vmem>>, vector<1x6x64xbf16>
    %37 = vector.shape_cast %36 : vector<1x6x64xbf16> to vector<6x64xbf16>
    %cst_21 = arith.constant dense<0.000000e+00> : vector<1024x64xf32>
    %38 = tpu.matmul %35, %37, %cst_21 {dimension_numbers = #tpu.dot_dimension_numbers<[1], [0], [0], [1], [0, 0, 1, 1], [], []>} : vector<1024x6xbf16>, vector<6x64xbf16>, vector<1024x64xf32> -> vector<1024x64xf32>
    %39 = arith.addf %33, %38 : vector<1024x64xf32>
    %40 = vector.extract_strided_slice %2 {offsets = [2, 0, 0], sizes = [32, 32, 6], strides = [1, 1, 1]} : vector<34x34x6xbf16> to vector<32x32x6xbf16>
    %41 = vector.shape_cast %40 : vector<32x32x6xbf16> to vector<1024x6xbf16>
    %c6 = arith.constant 6 : index
    %c0_22 = arith.constant 0 : index
    %c0_23 = arith.constant 0 : index
    %42 = vector.load %arg3[%c6, %c0_22, %c0_23] : memref<9x6x64xbf16, #tpu.memory_space<vmem>>, vector<1x6x64xbf16>
    %43 = vector.shape_cast %42 : vector<1x6x64xbf16> to vector<6x64xbf16>
    %cst_24 = arith.constant dense<0.000000e+00> : vector<1024x64xf32>
    %44 = tpu.matmul %41, %43, %cst_24 {dimension_numbers = #tpu.dot_dimension_numbers<[1], [0], [0], [1], [0, 0, 1, 1], [], []>} : vector<1024x6xbf16>, vector<6x64xbf16>, vector<1024x64xf32> -> vector<1024x64xf32>
    %45 = arith.addf %39, %44 : vector<1024x64xf32>
    %46 = vector.extract_strided_slice %2 {offsets = [2, 1, 0], sizes = [32, 32, 6], strides = [1, 1, 1]} : vector<34x34x6xbf16> to vector<32x32x6xbf16>
    %47 = vector.shape_cast %46 : vector<32x32x6xbf16> to vector<1024x6xbf16>
    %c7 = arith.constant 7 : index
    %c0_25 = arith.constant 0 : index
    %c0_26 = arith.constant 0 : index
    %48 = vector.load %arg3[%c7, %c0_25, %c0_26] : memref<9x6x64xbf16, #tpu.memory_space<vmem>>, vector<1x6x64xbf16>
    %49 = vector.shape_cast %48 : vector<1x6x64xbf16> to vector<6x64xbf16>
    %cst_27 = arith.constant dense<0.000000e+00> : vector<1024x64xf32>
    %50 = tpu.matmul %47, %49, %cst_27 {dimension_numbers = #tpu.dot_dimension_numbers<[1], [0], [0], [1], [0, 0, 1, 1], [], []>} : vector<1024x6xbf16>, vector<6x64xbf16>, vector<1024x64xf32> -> vector<1024x64xf32>
    %51 = arith.addf %45, %50 : vector<1024x64xf32>
    %52 = vector.extract_strided_slice %2 {offsets = [2, 2, 0], sizes = [32, 32, 6], strides = [1, 1, 1]} : vector<34x34x6xbf16> to vector<32x32x6xbf16>
    %53 = vector.shape_cast %52 : vector<32x32x6xbf16> to vector<1024x6xbf16>
    %c8 = arith.constant 8 : index
    %c0_28 = arith.constant 0 : index
    %c0_29 = arith.constant 0 : index
    %54 = vector.load %arg3[%c8, %c0_28, %c0_29] : memref<9x6x64xbf16, #tpu.memory_space<vmem>>, vector<1x6x64xbf16>
    %55 = vector.shape_cast %54 : vector<1x6x64xbf16> to vector<6x64xbf16>
    %cst_30 = arith.constant dense<0.000000e+00> : vector<1024x64xf32>
    %56 = tpu.matmul %53, %55, %cst_30 {dimension_numbers = #tpu.dot_dimension_numbers<[1], [0], [0], [1], [0, 0, 1, 1], [], []>} : vector<1024x6xbf16>, vector<6x64xbf16>, vector<1024x64xf32> -> vector<1024x64xf32>
    %57 = arith.addf %51, %56 : vector<1024x64xf32>
    %c0_31 = arith.constant 0 : index
    %c0_32 = arith.constant 0 : index
    %58 = vector.load %arg4[%c0_31, %c0_32] : memref<1x64xf32, #tpu.memory_space<vmem>>, vector<1x64xf32>
    %59 = vector.broadcast %58 : vector<1x64xf32> to vector<1024x64xf32>
    %60 = arith.addf %57, %59 : vector<1024x64xf32>
    %cst_33 = arith.constant 0.000000e+00 : f32
    %61 = vector.broadcast %cst_33 : f32 to vector<1024x64xf32>
    %62 = arith.maximumf %60, %61 : vector<1024x64xf32>
    %63 = vector.shape_cast %62 : vector<1024x64xf32> to vector<1x32x32x64xf32>
    %c0_34 = arith.constant 0 : index
    %c0_35 = arith.constant 0 : index
    %c0_36 = arith.constant 0 : index
    %c0_37 = arith.constant 0 : index
    %64 = vector.load %arg5[%c0_34, %c0_35, %c0_36, %c0_37] : memref<1x32x32x64xf32, #tpu.memory_space<vmem>>, vector<1x32x32x64xf32>
    tpu.vector_store %arg5[%c0_34, %c0_35, %c0_36, %c0_37], %63 {strides = array<i32>} : memref<1x32x32x64xf32, #tpu.memory_space<vmem>>, vector<1x32x32x64xf32>,
    return
  }
  func.func @transform_0(%arg0: i32, %arg1: i32) -> (i32, i32, i32, i32) {
    %c0_i32 = arith.constant 0 : i32
    %c0_i32_0 = arith.constant 0 : i32
    %c0_i32_1 = arith.constant 0 : i32
    %c0_i32_2 = arith.constant 0 : i32
    return %arg0, %c0_i32, %c0_i32_0, %c0_i32_1 : i32, i32, i32, i32
  }
  func.func @transform_1(%arg0: i32, %arg1: i32) -> (i32, i32, i32) {
    %c0_i32 = arith.constant 0 : i32
    %c0_i32_0 = arith.constant 0 : i32
    %c0_i32_1 = arith.constant 0 : i32
    return %c0_i32, %c0_i32_0, %arg1 : i32, i32, i32
  }
  func.func @transform_2(%arg0: i32, %arg1: i32) -> (i32, i32) {
    %c0_i32 = arith.constant 0 : i32
    %c0_i32_0 = arith.constant 0 : i32
    return %c0_i32, %arg1 : i32, i32
  }
  func.func @transform_3(%arg0: i32, %arg1: i32) -> (i32, i32, i32, i32) {
    %c0_i32 = arith.constant 0 : i32
    %c0_i32_0 = arith.constant 0 : i32
    %c0_i32_1 = arith.constant 0 : i32
    return %arg0, %c0_i32, %c0_i32_0, %arg1 : i32, i32, i32, i32
  }
}

</mosaic_0001>

<bundles_post_ra>
// kernel: conv3x3.1
= control target key start
LH: loop header
LB: loop body
LE: loop exit
PB: predicated region body
PF: predicated region fallthrough
CT: control target
= control target key end

     0   :  { %8 = vsyncpa [#allocation3], 0  ;;  %s15169_s0 = inlined_call_operand.vmem [shape: f32[2,34,34,6], index: 0, kind: input, shape index: {}]   ;;  %s15170_s1 = inlined_call_operand.vmem [shape: bf16[9,6,64], index: 1, kind: input, shape index: {}]   ;;  %s15171_s2 = inlined_call_operand.vmem [shape: f32[1,64], index: 2, kind: input, shape index: {}]   ;;  %s15172_s3 = inlined_call_operand.hbm [shape: f32[2,32,32,64], index: 3, kind: output, shape index: {}]  }
   0x1   :  { %10 = vsyncpa [#allocation3 + $0x1], 0  ;;  %s10865_s12 = smov 0   ;;  %s10867_s13 = smov 0  }
   0x2   :  { %s10869_s14 = smov 0   ;;  %s10871_s15 = smov 0  }
   0x3   :  { %s10873_s16 = smov 0   ;;  %s10875_s17 = smov 0  }
   0x4 LB: > { %s8338_s18 = sadd.s32 4294967295, %s10840_s17   ;;  %s8339_s19 = sadd.s32 4294967294, %s10840_s17   ;;  %s10840_s17 = sphi %s10875_s17, %s16_s17   ;;  %s10836_s16 = sphi %s10873_s16, %s16938_s16   ;;  %s10832_s15 = sphi %s10871_s15, %s16937_s15   ;;  %s10828_s14 = sphi %s10869_s14, %s16936_s14   ;;  %s10824_s13 = sphi %s10867_s13, %s16935_s13   ;;  %s10820_s12 = sphi %s10865_s12, %s16934_s12  }
   0x5   : > { %s28_s20 = sadd.s32 1, %s10836_s16  ;;  %s115_s21 = sadd.s32 1, %s10828_s14 }
   0x6   : > { %p30_p0 = scmp.ge.s32.totalorder %s28_s20, 2  ;;  %p125_p1 = scmp.ne.s32.totalorder %s10828_s14, %s10824_s13 }
   0x7   : > { %p126_p2 = scmp.eq.s32.totalorder %s8338_s18, 1  ;;  %p131_p3 = scmp.ne.s32.totalorder %s10824_s13, %s10820_s12 }
   0x8   : > { %s16940_s20 = smov (%p30_p0, %s28_s20), 0  ;;  %p132_p5 = scmp.eq.s32.totalorder %s8339_s19, 1 }
   0x9   : > { %p10905_p4 = por %p126_p2, %p125_p1  ;;  %s110_s23 = ssub.s32 %s10836_s16, %s16940_s20 }
   0xa   : > { %p8344_p6 = scmp.ge.s32.totalorder %s10840_s17, 1  ;;  %p113_p7 = scmp.eq.s32.totalorder %s110_s23, 0 }
   0xb   : > { %p10912_p8 = por %p132_p5, %p131_p3  ;;  %p171_p9 = scmp.lt.s32.totalorder %s10840_s17, 3 }
   0xc   : > { %s10918_s25 = scalar_select %p113_p7, %s10828_s14, %s115_s21  }
   0xd   : > { %p172_p10 = pnand %p8344_p6, %p171_p9 }
   0xf   : > { %175 = sbr.rel (%p172_p10) target bundleno = 1405 (0x57d), region = 32 }
  0x14   : > { %v8347_v0 = vld [vmem:[%s15170_s1 + $0x4] sm:$0x7]  ;;  %vm1324_vm0 = vcmask 1042432   ;;  %p202_p11 = scmp.lt.s32.totalorder %s10832_s15, 1  ;;  %v487_v2 = vld [vmem:[%s15170_s1] sm:$0x7] }
  0x15   : > { %10696 = vmatprep.subr.msk.bf16.mxu1 %vm1324_vm0, %v8347_v0  ;;  %10695 = vmatprep.subr.msk.bf16.mxu0 %vm1324_vm0, %v8347_v0  ;;  %v1326_v1 = vsel %vm1324_vm0, %v8347_v0, 0  ;;  %v8476_v3 = vld [vmem:[%s15170_s1 + $0x8] sm:$0x7]  ;;  %vm488_vm1 = vsmask.f32 7424  ;;  %vm1131_vm2 = vcmask 48128  }
  0x16   : > { %10694 = vmatpush3.bf16.msra.mxu1 %v1326_v1  ;;  %9524 = vmatpush3.bf16.msra.mxu0 %v1326_v1  ;;  %s203_s5 = scalar_select %p202_p11, %s10832_s15, 1  ;;  %v10957_v16 = vsel %vm1324_vm0, %v487_v2, 0  ;;  %v3001_v31 = vsel %vm1324_vm0, %v8476_v3, 0  ;;  %vm2645_vm3 = vcmask 1046528   ;;  %vm8095_vm4 = vcmask 523264  }
  0x17   : > { %10697 = vmatprep.subr.msk.bf16.mxu1 %vm1324_vm0, %v487_v2  ;;  %10698 = vmatprep.subr.msk.bf16.mxu0 %vm1324_vm0, %v8476_v3  ;;  %s8937_s18 = sshll.u32 %s10832_s15, 14  ;;  %s10842_s28 = smov [#allocation2]  }
  0x18   : > { %s10705_s6 = smul.u32 1360, %s203_s5  ;;  %s199_s5 = sand.u32 1, %s10824_s13  }
  0x19   : > { %s8345_s8 = sshll.u32 %s199_s5, 10  ;;  %s15114_s26 = scalar_lea.hbm %s15172_s3, %s8937_s18 }
  0x1a   : > { %s10939_s9 = scalar_lea.vmem %s15169_s0, %s10705_s6  ;;  %s14547_s10 = scalar_lea.vmem [#allocation2], %s8345_s8 }
  0x1b   : > { %v215_v4 = vld [vmem:[%s10939_s9] sm:$0xff]  ;;  %v216_v5 = vld [vmem:[%s10939_s9 + $0x8] sm:$0xff]  ;;  %v217_v6 = vld [vmem:[%s10939_s9 + $0x10] sm:$0xff]  ;;  %s8239_s19 = sshll.u32 %s14547_s10, 4  ;;  %s15124_s15 = scalar_lea.sflag [#allocation3], %s199_s5  ;;  %s15116_s19 = int_to_ptr.vmem [resolvable:$true] %s8239_s19 }
  0x1c   : > { %v218_v7 = vld [vmem:[%s10939_s9 + $0x18] sm:$0xff]  ;;  %v10945_v8 = vpack.c.bf16 %v216_v5, %v215_v4  ;;  %v295_v9 = vld [vmem:[%s10939_s9 + $0x280] sm:$0xff]  ;;  %v296_v10 = vld [vmem:[%s10939_s9 + $0x288] sm:$0xff]  ;;  %s10764_s27 = scalar_lea.vmem %s15116_s19, 16384  ;;  %s10768_s29 = sshll.u32 %s10842_s28, 4  ;;  %s10769_s29 = int_to_ptr.vmem [resolvable:$false] %s10768_s29 }
  0x1d   : > { %v10949_v11 = vpack.c.bf16 %v218_v7, %v217_v6  ;;  %v297_v12 = vld [vmem:[%s10939_s9 + $0x290] sm:$0xff]  ;;  %v298_v13 = vld [vmem:[%s10939_s9 + $0x298] sm:$0xff]  ;;  %v10953_v14 = vpack.c.bf16 %v296_v10, %v295_v9  ;;  %v219_v15 = vld [vmem:[%s10939_s9 + $0x20] sm:$0x3]  ;;  %p10765_p12 = scmp.ne.s32.totalorder %s15116_s19, %s10764_s27  ;;  %s10770_s30 = scalar_lea.vmem %s10769_s29, 32768 }
  0x1e   : > { %v490_v17 = vshrl.u32 %v10945_v8, 16  ;;  %v492_v18 = vshll.u32 %v10945_v8, 16  ;;  %v10961_v19 = vpack.c.bf16 %v298_v13, %v297_v12  ;;  %v10963_v20 = vpack.c.bf16 %v219_v15, %v219_v15  ;;  %v299_v21 = vld [vmem:[%s10939_s9 + $0x2a0] sm:$0x3]  ;;  %v220_v26 = vld [vmem:[%s10939_s9 + $0x28] sm:$0xff]  ;;  %v221_v27 = vld [vmem:[%s10939_s9 + $0x30] sm:$0xff]  ;;  %p10771_p1 = scmp.lt.s32.totalorder %s15116_s19, %s10769_s29  ;;  %p10772_p2 = scmp.lt.s32.totalorder %s10770_s30, %s10764_s27 }
  0x1f   : > { %15580 = vst [vmem:[#allocation5_spill] sm:$0xff] %v10953_v14  ;;  %v497_v22 = vshll.u32 %v10949_v11, 16  ;;  %v501_v23 = vshrl.u32 %v10949_v11, 16  ;;  %v810_v24 = vshrl.u32 %v10953_v14, 16  ;;  %v812_v25 = vshll.u32 %v10953_v14, 16  ;;  %v222_v32 = vld [vmem:[%s10939_s9 + $0x38] sm:$0xff]  ;;  %p10766_p13 = pnand %p10765_p12, %p10905_p4 }
  0x20   : > { %15581 = vst [vmem:[#allocation6_spill] sm:$0xff] %v10961_v19  ;;  %v494_v28 = vrot.slane %v492_v18, 1  ;;  %v817_v29 = vshll.u32 %v10961_v19, 16  ;;  %v505_v30 = vshll.u32 %v10963_v20, 16  ;;  %v223_v33 = vld [vmem:[%s10939_s9 + $0x40] sm:$0xff]  ;;  %v10977_v36 = vpack.c.bf16 %v299_v21, %v299_v21  ;;  %v300_v42 = vld [vmem:[%s10939_s9 + $0x2a8] sm:$0xff]  ;;  %p10773_p3 = por %p10772_p2, %p10771_p1 }
  0x21   : > { %v499_v34 = vrot.slane %v497_v22, 1  ;;  %v814_v35 = vrot.slane %v812_v25, 1  ;;  %v821_v37 = vshrl.u32 %v10961_v19, 16  ;;  %v10980_v41 = vpack.c.bf16 %v221_v27, %v220_v26  ;;  %v301_v43 = vld [vmem:[%s10939_s9 + $0x2b0] sm:$0xff]  ;;  %v302_v48 = vld [vmem:[%s10939_s9 + $0x2b8] sm:$0xff]  ;;  %v303_v49 = vld [vmem:[%s10939_s9 + $0x2c0] sm:$0xff]  ;;  %p10767_p0 = pneg %p10766_p13 }
  0x22   : > { %15582 = vst [vmem:[#allocation7_spill] sm:$0xff] %v10977_v36  ;;  %v495_v38 = vor.u32 %v494_v28, %v490_v17  ;;  %v819_v39 = vrot.slane %v817_v29, 1  ;;  %v507_v40 = vrot.slane %v505_v30, 1  ;;  %v825_v46 = vshll.u32 %v10977_v36, 16  ;;  %v224_v50 = vld [vmem:[%s10939_s9 + $0x48] sm:$0x3] }
  0x23   : > { %v503_v44 = vor.u32 %v501_v23, %v499_v34  ;;  %v815_v45 = vor.u32 %v814_v35, %v810_v24  ;;  %v10985_v47 = vpack.c.bf16 %v223_v33, %v222_v32  ;;  %v510_v53 = vshrl.u32 %v10980_v41, 16  ;;  %v304_v55 = vld [vmem:[%s10939_s9 + $0x2c8] sm:$0x3]  ;;  %v225_v4 = vld [vmem:[%s10939_s9 + $0x50] sm:$0xff]  ;;  %v226_v5 = vld [vmem:[%s10939_s9 + $0x58] sm:$0xff]  ;;  %p10774_p5 = pnand %p10773_p3, %p10767_p0 }
  0x24   : > { %v500_v51 = vsel %vm488_vm1, %v495_v38, %v499_v34  ;;  %v823_v52 = vor.u32 %v821_v37, %v819_v39  ;;  %v512_v54 = vshll.u32 %v10980_v41, 16  ;;  %v827_v58 = vrot.slane %v825_v46, 1  ;;  %v227_v6 = vld [vmem:[%s10939_s9 + $0x60] sm:$0xff]  ;;  %v228_v13 = vld [vmem:[%s10939_s9 + $0x68] sm:$0xff]  ;;  %v305_v15 = vld [vmem:[%s10939_s9 + $0x2d0] sm:$0xff] }
  0x25   : > { %9525 = vmatprep.mubr.msk.bf16.mxu0 %vm1131_vm2, %v500_v51  ;;  %v10996_v56 = vsel %vm488_vm1, %v815_v45, %v819_v39  ;;  %v508_v57 = vsel %vm488_vm1, %v503_v44, %v507_v40  ;;  %v517_v59 = vshll.u32 %v10985_v47, 16  ;;  %v11003_v61 = vpack.c.bf16 %v301_v43, %v300_v42  ;;  %v306_v17 = vld [vmem:[%s10939_s9 + $0x2d8] sm:$0xff]  ;;  %v307_v28 = vld [vmem:[%s10939_s9 + $0x2e0] sm:$0xff]  ;;  %v308_v29 = vld [vmem:[%s10939_s9 + $0x2e8] sm:$0xff] }
  0x26   : > { %15583 = vst [vmem:[#allocation8_spill] sm:$0xff] %v10996_v56  ;;  %9589 = vmatprep.mubr.msk.bf16.mxu1 %vm1131_vm2, %v10996_v56  ;;  %9526 = vmatmul.mubr.msk.bf16.vlgmr.msra.gmra.mxu0 %vm1131_vm2, %v508_v57  ;;  %v514_v60 = vrot.slane %v512_v54, 1  ;;  %v11005_v62 = vpack.c.bf16 %v303_v49, %v302_v48  ;;  %v11007_v63 = vpack.c.bf16 %v224_v50, %v224_v50  ;;  %v521_v2 = vshrl.u32 %v10985_v47, 16  ;;  %v229_v38 = vld [vmem:[%s10939_s9 + $0x70] sm:$0x3]  ;;  %v230_v50 = vld [vmem:[%s10939_s9 + $0x78] sm:$0xff] }
  0x27   : > { %15584 = vst [vmem:[#allocation9_spill] sm:$0xff] %v11003_v61  ;;  %v11010_v0 = vsel %vm488_vm1, %v823_v52, %v827_v58  ;;  %9784 = vmatpush3.bf16.msra.mxu0 %v3001_v31  ;;  %v519_v1 = vrot.slane %v517_v59, 1  ;;  %v11013_v3 = vpack.c.bf16 %v304_v55, %v304_v55  ;;  %v830_v9 = vshrl.u32 %v11003_v61, 16  ;;  %v309_v44 = vld [vmem:[%s10939_s9 + $0x2f0] sm:$0x3]  ;;  %v231_v51 = vld [vmem:[%s10939_s9 + $0x80] sm:$0xff] }
  0x28   : > { %15585 = vst [vmem:[#allocation10_spill] sm:$0xff] %v11005_v62  ;;  %15586 = vst [vmem:[#allocation11_spill] sm:$0xff] %v11010_v0  ;;  %9590 = vmatmul.mubr.msk.bf16.vlgmr.msra.gmra.mxu1 %vm1131_vm2, %v11010_v0  ;;  %v515_v7 = vor.u32 %v514_v60, %v510_v53  ;;  %v832_v10 = vshll.u32 %v11003_v61, 16  ;;  %v837_v12 = vshll.u32 %v11005_v62, 16  ;;  %v525_v21 = vshll.u32 %v11007_v63, 16  ;;  %v232_v57 = vld [vmem:[%s10939_s9 + $0x88] sm:$0xff] }
  0x29   : > { %15587 = vst [vmem:[#allocation12_spill] sm:$0xff] %v11013_v3  ;;  %9654 = vmatpush3.bf16.msra.mxu1 %v10957_v16  ;;  %v523_v18 = vor.u32 %v521_v2, %v519_v1  ;;  %v841_v22 = vshrl.u32 %v11005_v62, 16  ;;  %v845_v23 = vshll.u32 %v11013_v3, 16  ;;  %v11033_v27 = vpack.c.bf16 %v226_v5, %v225_v4  ;;  %v233_v58 = vld [vmem:[%s10939_s9 + $0x90] sm:$0xff]  ;;  %v351_v62 = vld [vmem:[%s10939_s9 + $0x440] sm:$0xff]  ;;  %v352_v61 = vld [vmem:[%s10939_s9 + $0x448] sm:$0xff] }
  0x2a   : > { %v11031_v24 = vsel %vm488_vm1, %v515_v7, %v519_v1  ;;  %v834_v25 = vrot.slane %v832_v10, 1  ;;  %v839_v26 = vrot.slane %v837_v12, 1  ;;  %v527_v16 = vrot.slane %v525_v21, 1  ;;  %v311_v10 = vld [vmem:[%s10939_s9 + $0x300] sm:$0xff]  ;;  %v313_v21 = vld [vmem:[%s10939_s9 + $0x310] sm:$0xff] }
  0x2b   : > { %15588 = vst [vmem:[#allocation13_spill] sm:$0xff] %v11031_v24  ;;  %9529 = vmatprep.mubr.msk.bf16.mxu0 %vm1131_vm2, %v11031_v24  ;;  %v847_v30 = vrot.slane %v845_v23, 1  ;;  %v11039_v31 = vpack.c.bf16 %v228_v13, %v227_v6  ;;  %v11041_v32 = vpack.c.bf16 %v306_v17, %v305_v15  ;;  %v530_v35 = vshrl.u32 %v11033_v27, 16  ;;  %v325_v56 = vld [vmem:[%s10939_s9 + $0x370] sm:$0xff]  ;;  %v330_v24 = vld [vmem:[%s10939_s9 + $0x398] sm:$0xff] }
  0x2c   : > { %v835_v33 = vor.u32 %v834_v25, %v830_v9  ;;  %v843_v34 = vor.u32 %v841_v22, %v839_v26  ;;  %v532_v37 = vshll.u32 %v11033_v27, 16  ;;  %v11047_v39 = vsel %vm488_vm1, %v523_v18, %v527_v16  ;;  %v310_v9 = vld [vmem:[%s10939_s9 + $0x2f8] sm:$0xff]  ;;  %v312_v18 = vld [vmem:[%s10939_s9 + $0x308] sm:$0xff]  ;;  %v353_v36 = vld [vmem:[%s10939_s9 + $0x450] sm:$0xff] }
  0x2d   : > { %15589 = vst [vmem:[#allocation14_spill] sm:$0xff] %v11039_v31  ;;  %15590 = vst [vmem:[#allocation15_spill] sm:$0xff] %v11041_v32  ;;  %v537_v40 = vshll.u32 %v11039_v31, 16  ;;  %v11050_v42 = vpack.c.bf16 %v308_v29, %v307_v28  ;;  %v850_v43 = vshrl.u32 %v11041_v32, 16  ;;  %v852_v49 = vshll.u32 %v11041_v32, 16  ;;  %v347_v32 = vld [vmem:[%s10939_s9 + $0x420] sm:$0xff] }
  0x2e   : > { %15591 = vst [vmem:[#allocation16_spill] sm:$0xff] %v11047_v39  ;;  %v11055_v45 = vsel %vm488_vm1, %v835_v33, %v839_v26  ;;  %9530 = vmatmul.mubr.msk.bf16.gmra.mxu0 %vm1131_vm2, %v11047_v39  ;;  %v11060_v46 = vsel %vm488_vm1, %v843_v34, %v847_v30  ;;  %v534_v48 = vrot.slane %v532_v37, 1  ;;  %v11068_v54 = vpack.c.bf16 %v229_v38, %v229_v38  ;;  %v234_v22 = vld [vmem:[%s10939_s9 + $0x98] sm:$0x3]  ;;  %v357_v14 = vld [vmem:[%s10939_s9 + $0x470] sm:$0xff] }
  0x2f   : > { %15592 = vst [vmem:[#allocation17_spill] sm:$0xff] %v11050_v42  ;;  %15593 = vst [vmem:[#allocation18_spill] sm:$0xff] %v11055_v45  ;;  %9593 = vmatprep.mubr.msk.bf16.mxu1 %vm1131_vm2, %v11055_v45  ;;  %v539_v52 = vrot.slane %v537_v40, 1  ;;  %v857_v53 = vshll.u32 %v11050_v42, 16  ;;  %v541_v55 = vshrl.u32 %v11039_v31, 16  ;;  %v854_v60 = vrot.slane %v852_v49, 1 }
  0x30   : > { %15594 = vst [vmem:[#allocation19_spill] sm:$0xff] %v11060_v46  ;;  %9594 = vmatmul.mubr.msk.bf16.gmra.mxu1 %vm1131_vm2, %v11060_v46  ;;  %v535_v59 = vor.u32 %v534_v48, %v530_v35  ;;  %v11075_v1 = vpack.c.bf16 %v309_v44, %v309_v44  ;;  %v861_v2 = vshrl.u32 %v11050_v42, 16  ;;  %v545_v6 = vshll.u32 %v11068_v54, 16  ;;  %v314_v40 = vld [vmem:[%s10939_s9 + $0x318] sm:$0x3]  ;;  %v236_v44 = vld [vmem:[%s10939_s9 + $0xa8] sm:$0xff] }
  0x31   : > { %v859_v4 = vrot.slane %v857_v53, 1  ;;  %v543_v5 = vor.u32 %v541_v55, %v539_v52  ;;  %v11079_v7 = vpack.c.bf16 %v231_v51, %v230_v50  ;;  %v855_v13 = vor.u32 %v854_v60, %v850_v43  ;;  %v235_v43 = vld [vmem:[%s10939_s9 + $0xa0] sm:$0xff]  ;;  %v244_v46 = vld [vmem:[%s10939_s9 + $0xe8] sm:$0x3] }
  0x32   : > { %15595 = vst [vmem:[#allocation20_spill] sm:$0xff] %v11075_v1  ;;  %v11084_v12 = vsel %vm488_vm1, %v535_v59, %v539_v52  ;;  %v865_v15 = vshll.u32 %v11075_v1, 16  ;;  %v11087_v17 = vpack.c.bf16 %v233_v58, %v232_v57  ;;  %v547_v23 = vrot.slane %v545_v6, 1  ;;  %v237_v58 = vld [vmem:[%s10939_s9 + $0xb0] sm:$0xff]  ;;  %v238_v59 = vld [vmem:[%s10939_s9 + $0xb8] sm:$0xff]  ;;  %v315_v6 = vld [vmem:[%s10939_s9 + $0x320] sm:$0xff] }
  0x33   : > { %15596 = vst [vmem:[#allocation21_spill] sm:$0xff] %v11079_v7  ;;  %15597 = vst [vmem:[#allocation22_spill] sm:$0xff] %v11084_v12  ;;  %9533 = vmatprep.mubr.msk.bf16.mxu0 %vm1131_vm2, %v11084_v12  ;;  %v863_v25 = vor.u32 %v861_v2, %v859_v4  ;;  %v550_v26 = vshrl.u32 %v11079_v7, 16  ;;  %v552_v28 = vshll.u32 %v11079_v7, 16  ;;  %v11097_v29 = vsel %vm488_vm1, %v855_v13, %v859_v4  ;;  %v343_v1 = vld [vmem:[%s10939_s9 + $0x400] sm:$0xff] }
  0x34   : > { %15598 = vst [vmem:[#allocation23_spill] sm:$0xff] %v11087_v17  ;;  %15599 = vst [vmem:[#allocation24_spill] sm:$0xff] %v11097_v29  ;;  %v867_v16 = vrot.slane %v865_v15, 1  ;;  %v557_v30 = vshll.u32 %v11087_v17, 16  ;;  %v11100_v33 = vpack.c.bf16 %v311_v10, %v310_v9  ;;  %9597 = vmatprep.mubr.msk.bf16.mxu1 %vm1131_vm2, %v11097_v29  ;;  %v11105_v34 = vsel %vm488_vm1, %v543_v5, %v547_v23  ;;  %v316_v9 = vld [vmem:[%s10939_s9 + $0x328] sm:$0xff]  ;;  %v323_v29 = vld [vmem:[%s10939_s9 + $0x360] sm:$0xff] }
  0x35   : > { %15601 = vst [vmem:[#allocation26_spill] sm:$0xff] %v11105_v34  ;;  %v554_v35 = vrot.slane %v552_v28, 1  ;;  %v11107_v37 = vpack.c.bf16 %v313_v21, %v312_v18  ;;  %v11109_v38 = vpack.c.bf16 %v234_v22, %v234_v22  ;;  %v561_v55 = vshrl.u32 %v11087_v17, 16  ;;  %v317_v21 = vld [vmem:[%s10939_s9 + $0x330] sm:$0xff]  ;;  %v318_v22 = vld [vmem:[%s10939_s9 + $0x338] sm:$0xff] }
  0x36   : > { %15600 = vst [vmem:[#allocation25_spill] sm:$0xff] %v11100_v33  ;;  %9534 = vmatmul.mubr.msk.bf16.gmra.mxu0 %vm1131_vm2, %v11105_v34  ;;  %v11117_v48 = vsel %vm488_vm1, %v863_v25, %v867_v16  ;;  %v559_v49 = vrot.slane %v557_v30, 1  ;;  %v870_v50 = vshrl.u32 %v11100_v33, 16  ;;  %v872_v51 = vshll.u32 %v11100_v33, 16  ;;  %v239_v16 = vld [vmem:[%s10939_s9 + $0xc0] sm:$0x3] }
  0x37   : > { %15602 = vst [vmem:[#allocation27_spill] sm:$0xff] %v11107_v37  ;;  %15603 = vst [vmem:[#allocation28_spill] sm:$0xff] %v11117_v48  ;;  %v555_v52 = vor.u32 %v554_v35, %v550_v26  ;;  %v877_v53 = vshll.u32 %v11107_v37, 16  ;;  %v565_v57 = vshll.u32 %v11109_v38, 16  ;;  %v11128_v2 = vpack.c.bf16 %v314_v40, %v314_v40  ;;  %v342_v33 = vld [vmem:[%s10939_s9 + $0x3f8] sm:$0xff] }
  0x38   : > { %9598 = vmatmul.mubr.msk.bf16.gmra.mxu1 %vm1131_vm2, %v11117_v48  ;;  %v874_v60 = vrot.slane %v872_v51, 1  ;;  %v881_v4 = vshrl.u32 %v11107_v37, 16  ;;  %v11131_v5 = vpack.c.bf16 %v236_v44, %v235_v43  ;;  %v563_v15 = vor.u32 %v561_v55, %v559_v49  ;;  %v322_v48 = vld [vmem:[%s10939_s9 + $0x358] sm:$0xff]  ;;  %v264_v42 = vld [vmem:[%s10939_s9 + $0x188] sm:$0x3] }
  0x39   : > { %15604 = vst [vmem:[#allocation29_spill] sm:$0xff] %v11128_v2  ;;  %v11136_v10 = vsel %vm488_vm1, %v555_v52, %v559_v49  ;;  %v879_v13 = vrot.slane %v877_v53, 1  ;;  %v567_v18 = vrot.slane %v565_v57, 1  ;;  %v885_v25 = vshll.u32 %v11128_v2, 16  ;;  %v319_v52 = vld [vmem:[%s10939_s9 + $0x340] sm:$0x3] }
  0x3a   : > { %15605 = vst [vmem:[#allocation30_spill] sm:$0xff] %v11131_v5  ;;  %15606 = vst [vmem:[#allocation31_spill] sm:$0xff] %v11136_v10  ;;  %9537 = vmatprep.mubr.msk.bf16.mxu0 %vm1131_vm2, %v11136_v10  ;;  %v875_v23 = vor.u32 %v874_v60, %v870_v50  ;;  %v11143_v26 = vpack.c.bf16 %v238_v59, %v237_v58  ;;  %v570_v28 = vshrl.u32 %v11131_v5, 16  ;;  %v572_v40 = vshll.u32 %v11131_v5, 16  ;;  %v240_v59 = vld [vmem:[%s10939_s9 + $0xc8] sm:$0xff]  ;;  %v241_v60 = vld [vmem:[%s10939_s9 + $0xd0] sm:$0xff] }
  0x3b   : > { %v11148_v30 = vsel %vm488_vm1, %v563_v15, %v567_v18  ;;  %v883_v35 = vor.u32 %v881_v4, %v879_v13  ;;  %v11151_v43 = vpack.c.bf16 %v316_v9, %v315_v6  ;;  %v887_v49 = vrot.slane %v885_v25, 1  ;;  %v243_v25 = vld [vmem:[%s10939_s9 + $0xe0] sm:$0xff] }
  0x3c   : > { %15607 = vst [vmem:[#allocation32_spill] sm:$0xff] %v11143_v26  ;;  %15608 = vst [vmem:[#allocation33_spill] sm:$0xff] %v11148_v30  ;;  %v11154_v44 = vsel %vm488_vm1, %v875_v23, %v879_v13  ;;  %v577_v50 = vshll.u32 %v11143_v26, 16  ;;  %v11157_v51 = vpack.c.bf16 %v318_v22, %v317_v21  ;;  %v574_v53 = vrot.slane %v572_v40, 1  ;;  %v242_v23 = vld [vmem:[%s10939_s9 + $0xd8] sm:$0xff] }
  0x3d   : > { %15609 = vst [vmem:[#allocation34_spill] sm:$0xff] %v11151_v43  ;;  %15610 = vst [vmem:[#allocation35_spill] sm:$0xff] %v11154_v44  ;;  %9601 = vmatprep.mubr.msk.bf16.mxu1 %vm1131_vm2, %v11154_v44  ;;  %v890_v55 = vshrl.u32 %v11151_v43, 16  ;;  %v892_v57 = vshll.u32 %v11151_v43, 16  ;;  %v11164_v58 = vpack.c.bf16 %v239_v16, %v239_v16  ;;  %v11171_v4 = vsel %vm488_vm1, %v883_v35, %v887_v49 }
  0x3e   : > { %15611 = vst [vmem:[#allocation36_spill] sm:$0xff] %v11157_v51  ;;  %9538 = vmatmul.mubr.msk.bf16.gmra.mxu0 %vm1131_vm2, %v11148_v30  ;;  %15612 = vst [vmem:[#allocation37_spill] sm:$0xff] %v11171_v4  ;;  %v579_v6 = vrot.slane %v577_v50, 1  ;;  %v897_v9 = vshll.u32 %v11157_v51, 16  ;;  %v581_v13 = vshrl.u32 %v11143_v26, 16  ;;  %v575_v15 = vor.u32 %v574_v53, %v570_v28  ;;  %v320_v28 = vld [vmem:[%s10939_s9 + $0x348] sm:$0xff] }
  0x3f   : > { %v894_v18 = vrot.slane %v892_v57, 1  ;;  %v585_v21 = vshll.u32 %v11164_v58, 16  ;;  %v11176_v22 = vpack.c.bf16 %v319_v52, %v319_v52  ;;  %v901_v40 = vshrl.u32 %v11157_v51, 16  ;;  %v321_v50 = vld [vmem:[%s10939_s9 + $0x350] sm:$0xff]  ;;  %v327_v30 = vld [vmem:[%s10939_s9 + $0x380] sm:$0xff] }
  0x40   : > { %9602 = vmatmul.mubr.msk.bf16.gmra.mxu1 %vm1131_vm2, %v11171_v4  ;;  %v899_v16 = vrot.slane %v897_v9, 1  ;;  %v583_v35 = vor.u32 %v581_v13, %v579_v6  ;;  %v11183_v49 = vpack.c.bf16 %v241_v60, %v240_v59  ;;  %v11188_v53 = vsel %vm488_vm1, %v575_v15, %v579_v6  ;;  %v246_v4 = vld [vmem:[%s10939_s9 + $0xf8] sm:$0xff]  ;;  %v263_v51 = vld [vmem:[%s10939_s9 + $0x180] sm:$0xff] }
  0x41   : > { %15613 = vst [vmem:[#allocation38_spill] sm:$0xff] %v11176_v22  ;;  %15615 = vst [vmem:[#allocation40_spill] sm:$0xff] %v11188_v53  ;;  %v895_v57 = vor.u32 %v894_v18, %v890_v55  ;;  %v587_v52 = vrot.slane %v585_v21, 1  ;;  %v905_v44 = vshll.u32 %v11176_v22, 16  ;;  %9541 = vmatprep.mubr.msk.bf16.mxu0 %vm1131_vm2, %v11188_v53  ;;  %v11196_v60 = vpack.c.bf16 %v243_v25, %v242_v23 }
  0x42   : > { %15614 = vst [vmem:[#allocation39_spill] sm:$0xff] %v11183_v49  ;;  %v903_v59 = vor.u32 %v901_v40, %v899_v16  ;;  %v590_v9 = vshrl.u32 %v11183_v49, 16  ;;  %v592_v6 = vshll.u32 %v11183_v49, 16  ;;  %v11206_v18 = vpack.c.bf16 %v321_v50, %v320_v28 }
  0x43   : > { %15616 = vst [vmem:[#allocation41_spill] sm:$0xff] %v11196_v60  ;;  %v11201_v55 = vsel %vm488_vm1, %v895_v57, %v899_v16  ;;  %v11204_v13 = vsel %vm488_vm1, %v583_v35, %v587_v52  ;;  %v907_v15 = vrot.slane %v905_v44, 1  ;;  %v597_v23 = vshll.u32 %v11196_v60, 16  ;;  %v324_v16 = vld [vmem:[%s10939_s9 + $0x368] sm:$0x3]  ;;  %v245_v57 = vld [vmem:[%s10939_s9 + $0xf0] sm:$0xff] }
  0x44   : > { %15617 = vst [vmem:[#allocation42_spill] sm:$0xff] %v11201_v55  ;;  %15618 = vst [vmem:[#allocation43_spill] sm:$0xff] %v11204_v13  ;;  %9605 = vmatprep.mubr.msk.bf16.mxu1 %vm1131_vm2, %v11201_v55  ;;  %v594_v21 = vrot.slane %v592_v6, 1  ;;  %v11211_v25 = vpack.c.bf16 %v323_v29, %v322_v48  ;;  %v11213_v40 = vpack.c.bf16 %v244_v46, %v244_v46  ;;  %v910_v35 = vshrl.u32 %v11206_v18, 16  ;;  %v248_v6 = vld [vmem:[%s10939_s9 + $0x108] sm:$0xff] }
  0x45   : > { %15619 = vst [vmem:[#allocation44_spill] sm:$0xff] %v11206_v18  ;;  %v11219_v44 = vsel %vm488_vm1, %v903_v59, %v907_v15  ;;  %v912_v28 = vshll.u32 %v11206_v18, 16  ;;  %v601_v50 = vshrl.u32 %v11196_v60, 16  ;;  %v599_v46 = vrot.slane %v597_v23, 1  ;;  %v247_v59 = vld [vmem:[%s10939_s9 + $0x100] sm:$0xff] }
  0x46   : > { %15620 = vst [vmem:[#allocation45_spill] sm:$0xff] %v11211_v25  ;;  %15621 = vst [vmem:[#allocation46_spill] sm:$0xff] %v11219_v44  ;;  %9542 = vmatmul.mubr.msk.bf16.gmra.mxu0 %vm1131_vm2, %v11204_v13  ;;  %v595_v29 = vor.u32 %v594_v21, %v590_v9  ;;  %v917_v48 = vshll.u32 %v11211_v25, 16  ;;  %v605_v52 = vshll.u32 %v11213_v40, 16  ;;  %v11230_v55 = vpack.c.bf16 %v324_v16, %v324_v16  ;;  %v326_v13 = vld [vmem:[%s10939_s9 + $0x378] sm:$0xff]  ;;  %v328_v16 = vld [vmem:[%s10939_s9 + $0x388] sm:$0xff] }
  0x47   : > { %v914_v15 = vrot.slane %v912_v28, 1  ;;  %v921_v45 = vshrl.u32 %v11211_v25, 16  ;;  %v11233_v0 = vpack.c.bf16 %v246_v4, %v245_v57  ;;  %v603_v23 = vor.u32 %v601_v50, %v599_v46 }
  0x48   : > { %15622 = vst [vmem:[#allocation47_spill] sm:$0xff] %v11230_v55  ;;  %9606 = vmatmul.mubr.msk.bf16.gmra.mxu1 %vm1131_vm2, %v11219_v44  ;;  %v11240_v9 = vsel %vm488_vm1, %v595_v29, %v599_v46  ;;  %v919_v21 = vrot.slane %v917_v48, 1  ;;  %v607_v53 = vrot.slane %v605_v52, 1  ;;  %v925_v4 = vshll.u32 %v11230_v55, 16  ;;  %v249_v44 = vld [vmem:[%s10939_s9 + $0x110] sm:$0x3] }
  0x49   : > { %15623 = vst [vmem:[#allocation48_spill] sm:$0xff] %v11233_v0  ;;  %15624 = vst [vmem:[#allocation49_spill] sm:$0xff] %v11240_v9  ;;  %9545 = vmatprep.mubr.msk.bf16.mxu0 %vm1131_vm2, %v11240_v9  ;;  %v915_v28 = vor.u32 %v914_v15, %v910_v35  ;;  %v11247_v57 = vpack.c.bf16 %v248_v6, %v247_v59  ;;  %v610_v10 = vshrl.u32 %v11233_v0, 16  ;;  %v612_v46 = vshll.u32 %v11233_v0, 16  ;;  %v329_v15 = vld [vmem:[%s10939_s9 + $0x390] sm:$0x3] }
  0x4a   : > { %v11252_v29 = vsel %vm488_vm1, %v603_v23, %v607_v53  ;;  %v923_v50 = vor.u32 %v921_v45, %v919_v21  ;;  %v11255_v48 = vpack.c.bf16 %v326_v13, %v325_v56  ;;  %v927_v35 = vrot.slane %v925_v4, 1  ;;  %v251_v23 = vld [vmem:[%s10939_s9 + $0x120] sm:$0xff]  ;;  %v333_v55 = vld [vmem:[%s10939_s9 + $0x3b0] sm:$0xff] }
  0x4b   : > { %15625 = vst [vmem:[#allocation50_spill] sm:$0xff] %v11247_v57  ;;  %15626 = vst [vmem:[#allocation51_spill] sm:$0xff] %v11252_v29  ;;  %v11258_v52 = vsel %vm488_vm1, %v915_v28, %v919_v21  ;;  %v617_v59 = vshll.u32 %v11247_v57, 16  ;;  %v11261_v6 = vpack.c.bf16 %v328_v16, %v327_v30  ;;  %v614_v53 = vrot.slane %v612_v46, 1  ;;  %v250_v21 = vld [vmem:[%s10939_s9 + $0x118] sm:$0xff] }
  0x4c   : > { %15627 = vst [vmem:[#allocation52_spill] sm:$0xff] %v11255_v48  ;;  %15628 = vst [vmem:[#allocation53_spill] sm:$0xff] %v11258_v52  ;;  %9609 = vmatprep.mubr.msk.bf16.mxu1 %vm1131_vm2, %v11258_v52  ;;  %v930_v45 = vshrl.u32 %v11255_v48, 16  ;;  %v932_v56 = vshll.u32 %v11255_v48, 16  ;;  %v11268_v13 = vpack.c.bf16 %v249_v44, %v249_v44  ;;  %v11273_v28 = vsel %vm488_vm1, %v923_v50, %v927_v35  ;;  %v252_v50 = vld [vmem:[%s10939_s9 + $0x128] sm:$0xff]  ;;  %v253_v35 = vld [vmem:[%s10939_s9 + $0x130] sm:$0xff] }
  0x4d   : > { %15629 = vst [vmem:[#allocation54_spill] sm:$0xff] %v11261_v6  ;;  %15630 = vst [vmem:[#allocation55_spill] sm:$0xff] %v11273_v28  ;;  %v619_v30 = vrot.slane %v617_v59, 1  ;;  %v937_v16 = vshll.u32 %v11261_v6, 16  ;;  %v621_v4 = vshrl.u32 %v11247_v57, 16  ;;  %v615_v46 = vor.u32 %v614_v53, %v610_v10  ;;  %v331_v48 = vld [vmem:[%s10939_s9 + $0x3a0] sm:$0xff] }
  0x4e   : > { %9546 = vmatmul.mubr.msk.bf16.gmra.mxu0 %vm1131_vm2, %v11252_v29  ;;  %v934_v52 = vrot.slane %v932_v56, 1  ;;  %v625_v44 = vshll.u32 %v11268_v13, 16  ;;  %v11280_v9 = vpack.c.bf16 %v329_v15, %v329_v15  ;;  %v941_v12 = vshrl.u32 %v11261_v6, 16  ;;  %v332_v29 = vld [vmem:[%s10939_s9 + $0x3a8] sm:$0xff]  ;;  %v11351_v6 = vld [vmem:[%s15170_s1 + $0x10] sm:$0x7] }
  0x4f   : > { %v939_v34 = vrot.slane %v937_v16, 1  ;;  %v623_v59 = vor.u32 %v621_v4, %v619_v30  ;;  %v11285_v39 = vpack.c.bf16 %v251_v23, %v250_v21  ;;  %v11292_v10 = vsel %vm488_vm1, %v615_v46, %v619_v30  ;;  %v254_v16 = vld [vmem:[%s10939_s9 + $0x138] sm:$0x3]  ;;  %10700 = vmatprep.subr.msk.bf16.mxu0 %vm1324_vm0, %v11351_v6 }
  0x50   : > { %15631 = vst [vmem:[#allocation56_spill] sm:$0xff] %v11280_v9  ;;  %9610 = vmatmul.mubr.msk.bf16.gmra.mxu1 %vm1131_vm2, %v11273_v28  ;;  %15633 = vst [vmem:[#allocation58_spill] sm:$0xff] %v11292_v10  ;;  %v935_v53 = vor.u32 %v934_v52, %v930_v45  ;;  %v627_v15 = vrot.slane %v625_v44, 1  ;;  %v945_v56 = vshll.u32 %v11280_v9, 16  ;;  %9549 = vmatprep.mubr.msk.bf16.mxu0 %vm1131_vm2, %v11292_v10  ;;  %v256_v10 = vld [vmem:[%s10939_s9 + $0x148] sm:$0xff] }
  0x51   : > { %15632 = vst [vmem:[#allocation57_spill] sm:$0xff] %v11285_v39  ;;  %v943_v21 = vor.u32 %v941_v12, %v939_v34  ;;  %v11300_v23 = vpack.c.bf16 %v253_v35, %v252_v50  ;;  %v630_v4 = vshrl.u32 %v11285_v39, 16  ;;  %v632_v30 = vshll.u32 %v11285_v39, 16  ;;  %v336_v9 = vld [vmem:[%s10939_s9 + $0x3c8] sm:$0xff] }
  0x52   : > { %v11305_v52 = vsel %vm488_vm1, %v935_v53, %v939_v34  ;;  %v11308_v45 = vsel %vm488_vm1, %v623_v59, %v627_v15  ;;  %v947_v46 = vrot.slane %v945_v56, 1  ;;  %v11310_v44 = vpack.c.bf16 %v331_v48, %v330_v24  ;;  %v334_v34 = vld [vmem:[%s10939_s9 + $0x3b8] sm:$0x3]  ;;  %v255_v53 = vld [vmem:[%s10939_s9 + $0x140] sm:$0xff]  ;;  %v257_v56 = vld [vmem:[%s10939_s9 + $0x150] sm:$0xff] }
  0x53   : > { %15634 = vst [vmem:[#allocation59_spill] sm:$0xff] %v11300_v23  ;;  %15635 = vst [vmem:[#allocation60_spill] sm:$0xff] %v11305_v52  ;;  %9613 = vmatprep.mubr.msk.bf16.mxu1 %vm1131_vm2, %v11305_v52  ;;  %v634_v12 = vrot.slane %v632_v30, 1  ;;  %v637_v50 = vshll.u32 %v11300_v23, 16  ;;  %v11315_v35 = vpack.c.bf16 %v333_v55, %v332_v29  ;;  %v11317_v28 = vpack.c.bf16 %v254_v16, %v254_v16  ;;  %v258_v52 = vld [vmem:[%s10939_s9 + $0x158] sm:$0xff] }
  0x54   : > { %15636 = vst [vmem:[#allocation61_spill] sm:$0xff] %v11308_v45  ;;  %15637 = vst [vmem:[#allocation62_spill] sm:$0xff] %v11310_v44  ;;  %v11323_v59 = vsel %vm488_vm1, %v943_v21, %v947_v46  ;;  %v950_v24 = vshrl.u32 %v11310_v44, 16  ;;  %v952_v48 = vshll.u32 %v11310_v44, 16  ;;  %v641_v15 = vshrl.u32 %v11300_v23, 16 }
  0x55   : > { %15638 = vst [vmem:[#allocation63_spill] sm:$0xff] %v11315_v35  ;;  %15639 = vst [vmem:[#allocation64_spill] sm:$0xff] %v11323_v59  ;;  %v635_v30 = vor.u32 %v634_v12, %v630_v4  ;;  %v639_v55 = vrot.slane %v637_v50, 1  ;;  %v957_v29 = vshll.u32 %v11315_v35, 16  ;;  %v645_v16 = vshll.u32 %v11317_v28, 16  ;;  %v335_v50 = vld [vmem:[%s10939_s9 + $0x3c0] sm:$0xff] }
  0x56   : > { %v11335_v21 = vld [vmem:[%s15170_s1 + $0xc] sm:$0x7]  ;;  %9550 = vmatmul.mubr.msk.bf16.gmra.mxu0 %vm1131_vm2, %v11308_v45  ;;  %v954_v46 = vrot.slane %v952_v48, 1  ;;  %v11339_v44 = vpack.c.bf16 %v334_v34, %v334_v34  ;;  %v961_v4 = vshrl.u32 %v11315_v35, 16  ;;  %v11342_v12 = vpack.c.bf16 %v256_v10, %v255_v53  ;;  %v337_v35 = vld [vmem:[%s10939_s9 + $0x3d0] sm:$0xff]  ;;  %v338_v10 = vld [vmem:[%s10939_s9 + $0x3d8] sm:$0xff] }
  0x57   : > { %10699 = vmatprep.subr.msk.bf16.mxu1 %vm1324_vm0, %v11335_v21  ;;  %v11354_v45 = vsel %vm488_vm1, %v635_v30, %v639_v55  ;;  %v959_v34 = vrot.slane %v957_v29, 1  ;;  %v643_v48 = vor.u32 %v641_v15, %v639_v55  ;;  %v647_v25 = vrot.slane %v645_v16, 1  ;;  %v259_v55 = vld [vmem:[%s10939_s9 + $0x160] sm:$0x3] }
  0x58   : > { %15640 = vst [vmem:[#allocation65_spill] sm:$0xff] %v11339_v44  ;;  %15641 = vst [vmem:[#allocation66_spill] sm:$0xff] %v11342_v12  ;;  %9614 = vmatmul.mubr.msk.bf16.gmra.mxu1 %vm1131_vm2, %v11323_v59  ;;  %9553 = vmatprep.mubr.msk.bf16.mxu0 %vm1131_vm2, %v11354_v45  ;;  %v955_v53 = vor.u32 %v954_v46, %v950_v24  ;;  %v965_v18 = vshll.u32 %v11339_v44, 16  ;;  %v11365_v30 = vpack.c.bf16 %v258_v52, %v257_v56  ;;  %v339_v46 = vld [vmem:[%s10939_s9 + $0x3e0] sm:$0x3] }
  0x59   : > { %15642 = vst [vmem:[#allocation67_spill] sm:$0xff] %v11354_v45  ;;  %v650_v15 = vshrl.u32 %v11342_v12, 16  ;;  %v11370_v29 = vsel %vm488_vm1, %v643_v48, %v647_v25  ;;  %v963_v16 = vor.u32 %v961_v4, %v959_v34  ;;  %v652_v22 = vshll.u32 %v11342_v12, 16  ;;  %v261_v48 = vld [vmem:[%s10939_s9 + $0x170] sm:$0xff] }
  0x5a   : > { %15643 = vst [vmem:[#allocation68_spill] sm:$0xff] %v11365_v30  ;;  %15644 = vst [vmem:[#allocation69_spill] sm:$0xff] %v11370_v29  ;;  %v11373_v59 = vpack.c.bf16 %v336_v9, %v335_v50  ;;  %v11376_v45 = vsel %vm488_vm1, %v955_v53, %v959_v34  ;;  %v967_v24 = vrot.slane %v965_v18, 1  ;;  %v657_v52 = vshll.u32 %v11365_v30, 16  ;;  %v260_v34 = vld [vmem:[%s10939_s9 + $0x168] sm:$0xff] }
  0x5b   : > { %15646 = vst [vmem:[#allocation71_spill] sm:$0xff] %v11376_v45  ;;  %v11379_v56 = vpack.c.bf16 %v338_v10, %v337_v35  ;;  %9617 = vmatprep.mubr.msk.bf16.mxu1 %vm1131_vm2, %v11376_v45  ;;  %v654_v25 = vrot.slane %v652_v22, 1  ;;  %v11386_v50 = vpack.c.bf16 %v259_v55, %v259_v55  ;;  %v661_v53 = vshrl.u32 %v11365_v30, 16 }
  0x5c   : > { %15645 = vst [vmem:[#allocation70_spill] sm:$0xff] %v11373_v59  ;;  %v970_v4 = vshrl.u32 %v11373_v59, 16  ;;  %v972_v9 = vshll.u32 %v11373_v59, 16  ;;  %v11391_v18 = vsel %vm488_vm1, %v963_v16, %v967_v24  ;;  %v659_v35 = vrot.slane %v657_v52, 1  ;;  %v262_v59 = vld [vmem:[%s10939_s9 + $0x178] sm:$0xff] }
  0x5d   : > { %15647 = vst [vmem:[#allocation72_spill] sm:$0xff] %v11379_v56  ;;  %15648 = vst [vmem:[#allocation73_spill] sm:$0xff] %v11391_v18  ;;  %v977_v10 = vshll.u32 %v11379_v56, 16  ;;  %v655_v45 = vor.u32 %v654_v25, %v650_v15  ;;  %v665_v44 = vshll.u32 %v11386_v50, 16  ;;  %v11396_v55 = vpack.c.bf16 %v339_v46, %v339_v46  ;;  %v340_v15 = vld [vmem:[%s10939_s9 + $0x3e8] sm:$0xff]  ;;  %v341_v25 = vld [vmem:[%s10939_s9 + $0x3f0] sm:$0xff] }
  0x5e   : > { %v974_v22 = vrot.slane %v972_v9, 1  ;;  %9554 = vmatmul.mubr.msk.bf16.gmra.mxu0 %vm1131_vm2, %v11370_v29  ;;  %v663_v24 = vor.u32 %v661_v53, %v659_v35  ;;  %v981_v52 = vshrl.u32 %v11379_v56, 16  ;;  %v11403_v43 = vpack.c.bf16 %v261_v48, %v260_v34 }
  0x5f   : > { %15649 = vst [vmem:[#allocation74_spill] sm:$0xff] %v11396_v55  ;;  %v979_v16 = vrot.slane %v977_v10, 1  ;;  %v11408_v9 = vsel %vm488_vm1, %v655_v45, %v659_v35  ;;  %v667_v46 = vrot.slane %v665_v44, 1  ;;  %v985_v37 = vshll.u32 %v11396_v55, 16  ;;  %v346_v55 = vld [vmem:[%s10939_s9 + $0x418] sm:$0xff] }
  0x60   : > { %15650 = vst [vmem:[#allocation75_spill] sm:$0xff] %v11403_v43  ;;  %15651 = vst [vmem:[#allocation76_spill] sm:$0xff] %v11408_v9  ;;  %v975_v2 = vor.u32 %v974_v22, %v970_v4  ;;  %9618 = vmatmul.mubr.msk.bf16.gmra.mxu1 %vm1131_vm2, %v11391_v18  ;;  %9557 = vmatprep.mubr.msk.bf16.mxu0 %vm1131_vm2, %v11408_v9  ;;  %v11418_v48 = vpack.c.bf16 %v263_v51, %v262_v59  ;;  %v670_v45 = vshrl.u32 %v11403_v43, 16  ;;  %v268_v18 = vld [vmem:[%s10939_s9 + $0x1a8] sm:$0xff] }
  0x61   : > { %v983_v34 = vor.u32 %v981_v52, %v979_v16  ;;  %v672_v44 = vshll.u32 %v11403_v43, 16  ;;  %v11426_v35 = vsel %vm488_vm1, %v663_v24, %v667_v46  ;;  %v987_v10 = vrot.slane %v985_v37, 1  ;;  %v266_v24 = vld [vmem:[%s10939_s9 + $0x198] sm:$0xff] }
  0x62   : > { %15652 = vst [vmem:[#allocation77_spill] sm:$0xff] %v11418_v48  ;;  %v11423_v4 = vsel %vm488_vm1, %v975_v2, %v979_v16  ;;  %15654 = vst [vmem:[#allocation79_spill] sm:$0xff] %v11426_v35  ;;  %v11428_v53 = vpack.c.bf16 %v341_v25, %v340_v15  ;;  %v677_v51 = vshll.u32 %v11418_v48, 16  ;;  %v11433_v59 = vpack.c.bf16 %v343_v1, %v342_v33  ;;  %v344_v2 = vld [vmem:[%s10939_s9 + $0x408] sm:$0x3]  ;;  %v265_v16 = vld [vmem:[%s10939_s9 + $0x190] sm:$0xff] }
  0x63   : > { %15653 = vst [vmem:[#allocation78_spill] sm:$0xff] %v11423_v4  ;;  %9621 = vmatprep.mubr.msk.bf16.mxu1 %vm1131_vm2, %v11423_v4  ;;  %v674_v22 = vrot.slane %v672_v44, 1  ;;  %v11435_v52 = vpack.c.bf16 %v264_v42, %v264_v42  ;;  %v11441_v37 = vsel %vm488_vm1, %v983_v34, %v987_v10  ;;  %v681_v46 = vshrl.u32 %v11418_v48, 16  ;;  %v267_v33 = vld [vmem:[%s10939_s9 + $0x1a0] sm:$0xff] }
  0x64   : > { %15655 = vst [vmem:[#allocation80_spill] sm:$0xff] %v11428_v53  ;;  %15656 = vst [vmem:[#allocation81_spill] sm:$0xff] %v11433_v59  ;;  %v990_v15 = vshrl.u32 %v11428_v53, 16  ;;  %v992_v25 = vshll.u32 %v11428_v53, 16  ;;  %v679_v4 = vrot.slane %v677_v51, 1  ;;  %v997_v42 = vshll.u32 %v11433_v59, 16 }
  0x65   : > { %15657 = vst [vmem:[#allocation82_spill] sm:$0xff] %v11441_v37  ;;  %v675_v44 = vor.u32 %v674_v22, %v670_v45  ;;  %v685_v1 = vshll.u32 %v11435_v52, 16  ;;  %v11450_v29 = vpack.c.bf16 %v344_v2, %v344_v2  ;;  %v1001_v34 = vshrl.u32 %v11433_v59, 16  ;;  %v345_v53 = vld [vmem:[%s10939_s9 + $0x410] sm:$0xff] }
  0x66   : > { %v994_v9 = vrot.slane %v992_v25, 1  ;;  %v11453_v10 = vpack.c.bf16 %v266_v24, %v265_v16  ;;  %9558 = vmatmul.mubr.msk.bf16.gmra.mxu0 %vm1131_vm2, %v11426_v35  ;;  %v999_v22 = vrot.slane %v997_v42, 1  ;;  %v683_v51 = vor.u32 %v681_v46, %v679_v4  ;;  %v348_v25 = vld [vmem:[%s10939_s9 + $0x428] sm:$0xff]  ;;  %v269_v35 = vld [vmem:[%s10939_s9 + $0x1b0] sm:$0x3] }
  0x67   : > { %15658 = vst [vmem:[#allocation83_spill] sm:$0xff] %v11450_v29  ;;  %v11460_v45 = vsel %vm488_vm1, %v675_v44, %v679_v4  ;;  %v687_v56 = vrot.slane %v685_v1, 1  ;;  %v1005_v16 = vshll.u32 %v11450_v29, 16  ;;  %v11467_v24 = vpack.c.bf16 %v268_v18, %v267_v33  ;;  %v349_v33 = vld [vmem:[%s10939_s9 + $0x430] sm:$0x3] }
  0x68   : > { %15659 = vst [vmem:[#allocation84_spill] sm:$0xff] %v11453_v10  ;;  %15660 = vst [vmem:[#allocation85_spill] sm:$0xff] %v11460_v45  ;;  %9561 = vmatprep.mubr.msk.bf16.mxu0 %vm1131_vm2, %v11460_v45  ;;  %v995_v2 = vor.u32 %v994_v9, %v990_v15  ;;  %v690_v59 = vshrl.u32 %v11453_v10, 16  ;;  %9622 = vmatmul.mubr.msk.bf16.gmra.mxu1 %vm1131_vm2, %v11441_v37  ;;  %v1003_v46 = vor.u32 %v1001_v34, %v999_v22  ;;  %v272_v45 = vld [vmem:[%s10939_s9 + $0x1c8] sm:$0xff] }
  0x69   : > { %15661 = vst [vmem:[#allocation86_spill] sm:$0xff] %v11467_v24  ;;  %v11474_v4 = vsel %vm488_vm1, %v683_v51, %v687_v56  ;;  %v692_v44 = vshll.u32 %v11453_v10, 16  ;;  %v11477_v42 = vpack.c.bf16 %v346_v55, %v345_v53  ;;  %v1007_v18 = vrot.slane %v1005_v16, 1  ;;  %v271_v51 = vld [vmem:[%s10939_s9 + $0x1c0] sm:$0xff] }
  0x6a   : > { %15662 = vst [vmem:[#allocation87_spill] sm:$0xff] %v11474_v4  ;;  %v11480_v9 = vsel %vm488_vm1, %v995_v2, %v999_v22  ;;  %v697_v15 = vshll.u32 %v11467_v24, 16  ;;  %v11483_v1 = vpack.c.bf16 %v348_v25, %v347_v32  ;;  %v11490_v53 = vpack.c.bf16 %v269_v35, %v269_v35  ;;  %v270_v22 = vld [vmem:[%s10939_s9 + $0x1b8] sm:$0xff] }
  0x6b   : > { %15663 = vst [vmem:[#allocation88_spill] sm:$0xff] %v11477_v42  ;;  %15664 = vst [vmem:[#allocation89_spill] sm:$0xff] %v11480_v9  ;;  %9625 = vmatprep.mubr.msk.bf16.mxu1 %vm1131_vm2, %v11480_v9  ;;  %v694_v56 = vrot.slane %v692_v44, 1  ;;  %v1010_v34 = vshrl.u32 %v11477_v42, 16  ;;  %v1012_v55 = vshll.u32 %v11477_v42, 16  ;;  %v11495_v32 = vsel %vm488_vm1, %v1003_v46, %v1007_v18  ;;  %v273_v42 = vld [vmem:[%s10939_s9 + $0x1d0] sm:$0xff] }
  0x6c   : > { %15665 = vst [vmem:[#allocation90_spill] sm:$0xff] %v11483_v1  ;;  %15666 = vst [vmem:[#allocation91_spill] sm:$0xff] %v11495_v32  ;;  %v699_v25 = vrot.slane %v697_v15, 1  ;;  %v1017_v2 = vshll.u32 %v11483_v1, 16  ;;  %v701_v16 = vshrl.u32 %v11467_v24, 16  ;;  %v705_v37 = vshll.u32 %v11490_v53, 16 }
  0x6d   : > { %v695_v9 = vor.u32 %v694_v56, %v690_v59  ;;  %v1014_v44 = vrot.slane %v1012_v55, 1  ;;  %v11500_v35 = vpack.c.bf16 %v349_v33, %v349_v33  ;;  %v1021_v46 = vshrl.u32 %v11483_v1, 16  ;;  %v350_v15 = vld [vmem:[%s10939_s9 + $0x438] sm:$0xff]  ;;  %v356_v1 = vld [vmem:[%s10939_s9 + $0x468] sm:$0xff] }
  0x6e   : > { %v1019_v29 = vrot.slane %v1017_v2, 1  ;;  %v703_v3 = vor.u32 %v701_v16, %v699_v25  ;;  %v11505_v18 = vpack.c.bf16 %v271_v51, %v270_v22  ;;  %9562 = vmatmul.mubr.msk.bf16.gmra.mxu0 %vm1131_vm2, %v11474_v4  ;;  %v707_v33 = vrot.slane %v705_v37, 1  ;;  %v274_v2 = vld [vmem:[%s10939_s9 + $0x1d8] sm:$0x3] }
  0x6f   : > { %15667 = vst [vmem:[#allocation92_spill] sm:$0xff] %v11500_v35  ;;  %v11512_v59 = vsel %vm488_vm1, %v695_v9, %v699_v25  ;;  %v1015_v56 = vor.u32 %v1014_v44, %v1010_v34  ;;  %v1025_v55 = vshll.u32 %v11500_v35, 16  ;;  %v11520_v51 = vpack.c.bf16 %v273_v42, %v272_v45 }
  0x70   : > { %15668 = vst [vmem:[#allocation93_spill] sm:$0xff] %v11505_v18  ;;  %15669 = vst [vmem:[#allocation94_spill] sm:$0xff] %v11512_v59  ;;  %9565 = vmatprep.mubr.msk.bf16.mxu0 %vm1131_vm2, %v11512_v59  ;;  %v1023_v22 = vor.u32 %v1021_v46, %v1019_v29  ;;  %v710_v16 = vshrl.u32 %v11505_v18, 16  ;;  %v712_v9 = vshll.u32 %v11505_v18, 16  ;;  %9626 = vmatmul.mubr.msk.bf16.gmra.mxu1 %vm1131_vm2, %v11495_v32  ;;  %v278_v59 = vld [vmem:[%s10939_s9 + $0x1f8] sm:$0xff] }
  0x71   : > { %15670 = vst [vmem:[#allocation95_spill] sm:$0xff] %v11520_v51  ;;  %v11527_v37 = vsel %vm488_vm1, %v1015_v56, %v1019_v29  ;;  %v11530_v34 = vsel %vm488_vm1, %v703_v3, %v707_v33  ;;  %v1027_v25 = vrot.slane %v1025_v55, 1  ;;  %v11532_v44 = vpack.c.bf16 %v351_v62, %v350_v15  ;;  %v354_v29 = vld [vmem:[%s10939_s9 + $0x458] sm:$0x3]  ;;  %v275_v56 = vld [vmem:[%s10939_s9 + $0x1e0] sm:$0xff]  ;;  %v276_v3 = vld [vmem:[%s10939_s9 + $0x1e8] sm:$0xff] }
  0x72   : > { %15671 = vst [vmem:[#allocation96_spill] sm:$0xff] %v11527_v37  ;;  %15672 = vst [vmem:[#allocation97_spill] sm:$0xff] %v11530_v34  ;;  %9629 = vmatprep.mubr.msk.bf16.mxu1 %vm1131_vm2, %v11527_v37  ;;  %v714_v45 = vrot.slane %v712_v9, 1  ;;  %v717_v42 = vshll.u32 %v11520_v51, 16  ;;  %v11537_v46 = vpack.c.bf16 %v353_v36, %v352_v61  ;;  %v11539_v32 = vpack.c.bf16 %v274_v2, %v274_v2  ;;  %v277_v37 = vld [vmem:[%s10939_s9 + $0x1f0] sm:$0xff] }
  0x73   : > { %15673 = vst [vmem:[#allocation98_spill] sm:$0xff] %v11532_v44  ;;  %v11545_v62 = vsel %vm488_vm1, %v1023_v22, %v1027_v25  ;;  %v1030_v15 = vshrl.u32 %v11532_v44, 16  ;;  %v1032_v33 = vshll.u32 %v11532_v44, 16  ;;  %v721_v55 = vshrl.u32 %v11520_v51, 16  ;;  %v355_v44 = vld [vmem:[%s10939_s9 + $0x460] sm:$0xff] }
  0x74   : > { %15674 = vst [vmem:[#allocation99_spill] sm:$0xff] %v11537_v46  ;;  %15675 = vst [vmem:[#allocation100_spill] sm:$0xff] %v11539_v32  ;;  %v715_v9 = vor.u32 %v714_v45, %v710_v16  ;;  %v719_v36 = vrot.slane %v717_v42, 1  ;;  %v1037_v61 = vshll.u32 %v11537_v46, 16  ;;  %v725_v2 = vshll.u32 %v11539_v32, 16  ;;  %v358_v32 = vld [vmem:[%s10939_s9 + $0x478] sm:$0xff] }
  0x75   : > { %15676 = vst [vmem:[#allocation101_spill] sm:$0xff] %v11545_v62  ;;  %v1034_v4 = vrot.slane %v1032_v33, 1  ;;  %v11554_v35 = vpack.c.bf16 %v354_v29, %v354_v29  ;;  %v1041_v22 = vshrl.u32 %v11537_v46, 16  ;;  %v11557_v25 = vpack.c.bf16 %v276_v3, %v275_v56  ;;  %v279_v3 = vld [vmem:[%s10939_s9 + $0x200] sm:$0x3] }
  0x76   : > { %v11562_v16 = vsel %vm488_vm1, %v715_v9, %v719_v36  ;;  %v1039_v45 = vrot.slane %v1037_v61, 1  ;;  %v723_v42 = vor.u32 %v721_v55, %v719_v36  ;;  %v727_v19 = vrot.slane %v725_v2, 1  ;;  %9566 = vmatmul.mubr.msk.bf16.gmra.mxu0 %vm1131_vm2, %v11530_v34  ;;  %v359_v2 = vld [vmem:[%s10939_s9 + $0x480] sm:$0x3]  ;;  %v284_v51 = vld [vmem:[%s10939_s9 + $0x228] sm:$0x3] }
  0x77   : > { %15677 = vst [vmem:[#allocation102_spill] sm:$0xff] %v11554_v35  ;;  %15678 = vst [vmem:[#allocation103_spill] sm:$0xff] %v11557_v25  ;;  %v1035_v29 = vor.u32 %v1034_v4, %v1030_v15  ;;  %v1045_v33 = vshll.u32 %v11554_v35, 16  ;;  %v11569_v46 = vpack.c.bf16 %v278_v59, %v277_v37  ;;  %v730_v56 = vshrl.u32 %v11557_v25, 16  ;;  %9569 = vmatprep.mubr.msk.bf16.mxu0 %vm1131_vm2, %v11562_v16  ;;  %v283_v34 = vld [vmem:[%s10939_s9 + $0x220] sm:$0xff] }
  0x78   : > { %15679 = vst [vmem:[#allocation104_spill] sm:$0xff] %v11562_v16  ;;  %v11576_v55 = vsel %vm488_vm1, %v723_v42, %v727_v19  ;;  %v1043_v9 = vor.u32 %v1041_v22, %v1039_v45  ;;  %v732_v36 = vshll.u32 %v11557_v25, 16  ;;  %v11579_v61 = vpack.c.bf16 %v356_v1, %v355_v44  ;;  %9630 = vmatmul.mubr.msk.bf16.gmra.mxu1 %vm1131_vm2, %v11545_v62  ;;  %v281_v42 = vld [vmem:[%s10939_s9 + $0x210] sm:$0xff]  ;;  %v282_v16 = vld [vmem:[%s10939_s9 + $0x218] sm:$0xff] }
  0x79   : > { %15680 = vst [vmem:[#allocation105_spill] sm:$0xff] %v11569_v46  ;;  %15681 = vst [vmem:[#allocation106_spill] sm:$0xff] %v11576_v55  ;;  %v11584_v4 = vsel %vm488_vm1, %v1035_v29, %v1039_v45  ;;  %v1047_v59 = vrot.slane %v1045_v33, 1  ;;  %v737_v37 = vshll.u32 %v11569_v46, 16  ;;  %v11587_v15 = vpack.c.bf16 %v358_v32, %v357_v14  ;;  %v280_v45 = vld [vmem:[%s10939_s9 + $0x208] sm:$0xff]  ;;  %v361_v25 = vld [vmem:[%s10939_s9 + $0x490] sm:$0xff] }
  0x7a   : > { %15682 = vst [vmem:[#allocation107_spill] sm:$0xff] %v11579_v61  ;;  %15683 = vst [vmem:[#allocation108_spill] sm:$0xff] %v11584_v4  ;;  %9633 = vmatprep.mubr.msk.bf16.mxu1 %vm1131_vm2, %v11584_v4  ;;  %v734_v19 = vrot.slane %v732_v36, 1  ;;  %v1050_v1 = vshrl.u32 %v11579_v61, 16  ;;  %v1052_v44 = vshll.u32 %v11579_v61, 16  ;;  %v11594_v22 = vpack.c.bf16 %v279_v3, %v279_v3 }
  0x7b   : > { %15684 = vst [vmem:[#allocation109_spill] sm:$0xff] %v11587_v15  ;;  %v11599_v14 = vsel %vm488_vm1, %v1043_v9, %v1047_v59  ;;  %v739_v32 = vrot.slane %v737_v37, 1  ;;  %v1057_v29 = vshll.u32 %v11587_v15, 16  ;;  %v741_v33 = vshrl.u32 %v11569_v46, 16  ;;  %v360_v37 = vld [vmem:[%s10939_s9 + $0x488] sm:$0xff]  ;;  %v362_v46 = vld [vmem:[%s10939_s9 + $0x498] sm:$0xff] }
  0x7c   : > { %15685 = vst [vmem:[#allocation110_spill] sm:$0xff] %v11594_v22  ;;  %15686 = vst [vmem:[#allocation111_spill] sm:$0xff] %v11599_v14  ;;  %v735_v4 = vor.u32 %v734_v19, %v730_v56  ;;  %v1054_v36 = vrot.slane %v1052_v44, 1  ;;  %v745_v62 = vshll.u32 %v11594_v22, 16  ;;  %v11604_v3 = vpack.c.bf16 %v359_v2, %v359_v2  ;;  %v363_v2 = vld [vmem:[%s10939_s9 + $0x4a0] sm:$0xff] }
  0x7d   : > { %v1059_v61 = vrot.slane %v1057_v29, 1  ;;  %v743_v35 = vor.u32 %v741_v33, %v739_v32  ;;  %v1061_v9 = vshrl.u32 %v11587_v15, 16  ;;  %v11609_v59 = vpack.c.bf16 %v281_v42, %v280_v45  ;;  %v366_v15 = vld [vmem:[%s10939_s9 + $0x4b8] sm:$0xff] }
  0x7e   : > { %15687 = vst [vmem:[#allocation112_spill] sm:$0xff] %v11604_v3  ;;  %v11614_v56 = vsel %vm488_vm1, %v735_v4, %v739_v32  ;;  %v1055_v19 = vor.u32 %v1054_v36, %v1050_v1  ;;  %v747_v44 = vrot.slane %v745_v62, 1  ;;  %v1065_v22 = vshll.u32 %v11604_v3, 16  ;;  %9570 = vmatmul.mubr.msk.bf16.gmra.mxu0 %vm1131_vm2, %v11576_v55  ;;  %v285_v55 = vld [vmem:[%s10939_s9 + $0x230] sm:$0xff] }
  0x7f   : > { %15688 = vst [vmem:[#allocation113_spill] sm:$0xff] %v11609_v59  ;;  %15689 = vst [vmem:[#allocation114_spill] sm:$0xff] %v11614_v56  ;;  %v11622_v45 = vpack.c.bf16 %v283_v34, %v282_v16  ;;  %v750_v42 = vshrl.u32 %v11609_v59, 16  ;;  %v752_v4 = vshll.u32 %v11609_v59, 16  ;;  %9573 = vmatprep.mubr.msk.bf16.mxu0 %vm1131_vm2, %v11614_v56  ;;  %v1063_v1 = vor.u32 %v1061_v9, %v1059_v61  ;;  %v364_v56 = vld [vmem:[%s10939_s9 + $0x4a8] sm:$0x3] }
  0x80   : > { %v11629_v62 = vsel %vm488_vm1, %v1055_v19, %v1059_v61  ;;  %v1067_v32 = vrot.slane %v1065_v22, 1  ;;  %v11631_v29 = vpack.c.bf16 %v361_v25, %v360_v37  ;;  %9634 = vmatmul.mubr.msk.bf16.gmra.mxu1 %vm1131_vm2, %v11599_v14  ;;  %v11636_v16 = vpack.c.bf16 %v363_v2, %v362_v46  ;;  %v286_v19 = vld [vmem:[%s10939_s9 + $0x238] sm:$0xff]  ;;  %v368_v59 = vld [vmem:[%s10939_s9 + $0x4c8] sm:$0xff] }
  0x81   : > { %15690 = vst [vmem:[#allocation115_spill] sm:$0xff] %v11622_v45  ;;  %15691 = vst [vmem:[#allocation116_spill] sm:$0xff] %v11629_v62  ;;  %v754_v33 = vrot.slane %v752_v4, 1  ;;  %v757_v34 = vshll.u32 %v11622_v45, 16  ;;  %v11638_v36 = vpack.c.bf16 %v284_v51, %v284_v51  ;;  %9637 = vmatprep.mubr.msk.bf16.mxu1 %vm1131_vm2, %v11629_v62  ;;  %v11646_v25 = vsel %vm488_vm1, %v743_v35, %v747_v44  ;;  %v287_v4 = vld [vmem:[%s10939_s9 + $0x240] sm:$0xff]  ;;  %v288_v62 = vld [vmem:[%s10939_s9 + $0x248] sm:$0xff] }
  0x82   : > { %15692 = vst [vmem:[#allocation117_spill] sm:$0xff] %v11631_v29  ;;  %15693 = vst [vmem:[#allocation118_spill] sm:$0xff] %v11636_v16  ;;  %v1070_v61 = vshrl.u32 %v11631_v29, 16  ;;  %v1072_v22 = vshll.u32 %v11631_v29, 16  ;;  %v761_v46 = vshrl.u32 %v11622_v45, 16  ;;  %v1077_v37 = vshll.u32 %v11636_v16, 16 }
  0x83   : > { %15694 = vst [vmem:[#allocation119_spill] sm:$0xff] %v11638_v36  ;;  %15695 = vst [vmem:[#allocation120_spill] sm:$0xff] %v11646_v25  ;;  %v755_v9 = vor.u32 %v754_v33, %v750_v42  ;;  %v759_v51 = vrot.slane %v757_v34, 1  ;;  %v765_v2 = vshll.u32 %v11638_v36, 16  ;;  %v11655_v35 = vpack.c.bf16 %v364_v56, %v364_v56  ;;  %v365_v29 = vld [vmem:[%s10939_s9 + $0x4b0] sm:$0xff]  ;;  %v367_v45 = vld [vmem:[%s10939_s9 + $0x4c0] sm:$0xff] }
  0x84   : > { %v1074_v14 = vrot.slane %v1072_v22, 1  ;;  %v1081_v44 = vshrl.u32 %v11636_v16, 16  ;;  %v11658_v3 = vpack.c.bf16 %v286_v19, %v285_v55  ;;  %v11663_v42 = vsel %vm488_vm1, %v1063_v1, %v1067_v32  ;;  %v289_v55 = vld [vmem:[%s10939_s9 + $0x250] sm:$0x3] }
  0x85   : > { %15696 = vst [vmem:[#allocation121_spill] sm:$0xff] %v11655_v35  ;;  %15698 = vst [vmem:[#allocation123_spill] sm:$0xff] %v11663_v42  ;;  %v11666_v33 = vsel %vm488_vm1, %v755_v9, %v759_v51  ;;  %v1079_v34 = vrot.slane %v1077_v37, 1  ;;  %v763_v36 = vor.u32 %v761_v46, %v759_v51  ;;  %v767_v56 = vrot.slane %v765_v2, 1  ;;  %v369_v51 = vld [vmem:[%s10939_s9 + $0x4d0] sm:$0x3] }
  0x86   : > { %15697 = vst [vmem:[#allocation122_spill] sm:$0xff] %v11658_v3  ;;  %15699 = vst [vmem:[#allocation124_spill] sm:$0xff] %v11666_v33  ;;  %v1075_v22 = vor.u32 %v1074_v14, %v1070_v61  ;;  %v1085_v18 = vshll.u32 %v11655_v35, 16  ;;  %v11671_v16 = vpack.c.bf16 %v288_v62, %v287_v4  ;;  %9574 = vmatmul.mubr.msk.bf16.gmra.mxu0 %vm1131_vm2, %v11646_v25  ;;  %v770_v32 = vshrl.u32 %v11658_v3, 16  ;;  %v290_v4 = vld [vmem:[%s10939_s9 + $0x258] sm:$0xff]  ;;  %v371_v35 = vld [vmem:[%s10939_s9 + $0x4e0] sm:$0xff] }
  0x87   : > { %v1083_v1 = vor.u32 %v1081_v44, %v1079_v34  ;;  %v772_v19 = vshll.u32 %v11658_v3, 16  ;;  %v11678_v46 = vpack.c.bf16 %v366_v15, %v365_v29  ;;  %9577 = vmatprep.mubr.msk.bf16.mxu0 %vm1131_vm2, %v11666_v33  ;;  %v11686_v9 = vpack.c.bf16 %v368_v59, %v367_v45  ;;  %v293_v33 = vld [vmem:[%s10939_s9 + $0x270] sm:$0xff]  ;;  %v294_v3 = vld [vmem:[%s10939_s9 + $0x278] sm:$0x3] }
  0x88   : > { %15700 = vst [vmem:[#allocation125_spill] sm:$0xff] %v11671_v16  ;;  %v11683_v14 = vsel %vm488_vm1, %v1075_v22, %v1079_v34  ;;  %v1087_v62 = vrot.slane %v1085_v18, 1  ;;  %v777_v61 = vshll.u32 %v11671_v16, 16  ;;  %9638 = vmatmul.mubr.msk.bf16.gmra.mxu1 %vm1131_vm2, %v11663_v42  ;;  %v11693_v2 = vpack.c.bf16 %v289_v55, %v289_v55  ;;  %v291_v18 = vld [vmem:[%s10939_s9 + $0x260] sm:$0xff]  ;;  %v292_v42 = vld [vmem:[%s10939_s9 + $0x268] sm:$0xff] }
  0x89   : > { %15701 = vst [vmem:[#allocation126_spill] sm:$0xff] %v11678_v46  ;;  %15702 = vst [vmem:[#allocation127_spill] sm:$0xff] %v11683_v14  ;;  %v774_v37 = vrot.slane %v772_v19, 1  ;;  %v1090_v15 = vshrl.u32 %v11678_v46, 16  ;;  %v1092_v29 = vshll.u32 %v11678_v46, 16  ;;  %9641 = vmatprep.mubr.msk.bf16.mxu1 %vm1131_vm2, %v11683_v14  ;;  %v1097_v45 = vshll.u32 %v11686_v9, 16 }
  0x8a   : > { %15703 = vst [vmem:[#allocation128_spill] sm:$0xff] %v11693_v2  ;;  %v779_v59 = vrot.slane %v777_v61, 1  ;;  %v781_v44 = vshrl.u32 %v11671_v16, 16  ;;  %v785_v55 = vshll.u32 %v11693_v2, 16  ;;  %v11702_v19 = vpack.c.bf16 %v369_v51, %v369_v51  ;;  %v370_v46 = vld [vmem:[%s10939_s9 + $0x4d8] sm:$0xff]  ;;  %v373_v2 = vld [vmem:[%s10939_s9 + $0x4f0] sm:$0xff] }
  0x8b   : > { %v775_v34 = vor.u32 %v774_v37, %v770_v32  ;;  %v1094_v22 = vrot.slane %v1092_v29, 1  ;;  %v11707_v25 = vsel %vm488_vm1, %v763_v36, %v767_v56  ;;  %v1099_v14 = vrot.slane %v1097_v45, 1  ;;  %v372_v29 = vld [vmem:[%s10939_s9 + $0x4e8] sm:$0xff] }
  0x8c   : > { %15704 = vst [vmem:[#allocation129_spill] sm:$0xff] %v11702_v19  ;;  %15705 = vst [vmem:[#allocation130_spill] sm:$0xff] %v11707_v25  ;;  %v11709_v61 = vpack.c.bf16 %v291_v18, %v290_v4  ;;  %v11714_v16 = vsel %vm488_vm1, %v1083_v1, %v1087_v62  ;;  %v1101_v51 = vshrl.u32 %v11686_v9, 16  ;;  %v1105_v36 = vshll.u32 %v11702_v19, 16  ;;  %v374_v19 = vld [vmem:[%s10939_s9 + $0x4f8] sm:$0x3] }
  0x8d   : > { %15707 = vst [vmem:[#allocation132_spill] sm:$0xff] %v11714_v16  ;;  %v11717_v32 = vsel %vm488_vm1, %v775_v34, %v779_v59  ;;  %v1095_v37 = vor.u32 %v1094_v22, %v1090_v15  ;;  %v11724_v56 = vpack.c.bf16 %v293_v33, %v292_v42  ;;  %v783_v62 = vor.u32 %v781_v44, %v779_v59 }
  0x8e   : > { %15706 = vst [vmem:[#allocation131_spill] sm:$0xff] %v11709_v61  ;;  %15708 = vst [vmem:[#allocation133_spill] sm:$0xff] %v11717_v32  ;;  %v790_v4 = vshrl.u32 %v11709_v61, 16  ;;  %v792_v18 = vshll.u32 %v11709_v61, 16  ;;  %9578 = vmatmul.mubr.msk.bf16.gmra.mxu0 %vm1131_vm2, %v11707_v25  ;;  %v787_v15 = vrot.slane %v785_v55, 1  ;;  %v11733_v45 = vpack.c.bf16 %v371_v35, %v370_v46 }
  0x8f   : > { %15709 = vst [vmem:[#allocation134_spill] sm:$0xff] %v11724_v56  ;;  %v11731_v1 = vsel %vm488_vm1, %v1095_v37, %v1099_v14  ;;  %9581 = vmatprep.mubr.msk.bf16.mxu0 %vm1131_vm2, %v11717_v32  ;;  %v797_v42 = vshll.u32 %v11724_v56, 16  ;;  %v11738_v33 = vpack.c.bf16 %v373_v2, %v372_v29  ;;  %v11740_v22 = vpack.c.bf16 %v294_v3, %v294_v3 }
  0x90   : > { %15710 = vst [vmem:[#allocation135_spill] sm:$0xff] %v11731_v1  ;;  %v794_v34 = vrot.slane %v792_v18, 1  ;;  %9642 = vmatmul.mubr.msk.bf16.gmra.mxu1 %vm1131_vm2, %v11714_v16  ;;  %v1103_v37 = vor.u32 %v1101_v51, %v1099_v14  ;;  %v1110_v59 = vshrl.u32 %v11733_v45, 16  ;;  %v1112_v35 = vshll.u32 %v11733_v45, 16 }
  0x91   : > { %9645 = vmatprep.mubr.msk.bf16.mxu1 %vm1131_vm2, %v11731_v1  ;;  %v1107_v46 = vrot.slane %v1105_v36, 1  ;;  %v799_v55 = vrot.slane %v797_v42, 1  ;;  %v1117_v2 = vshll.u32 %v11738_v33, 16  ;;  %v11750_v3 = vpack.c.bf16 %v374_v19, %v374_v19 }
  0x92   : > { %v795_v44 = vor.u32 %v794_v34, %v790_v4  ;;  %v1114_v29 = vrot.slane %v1112_v35, 1  ;;  %v11753_v18 = vsel %vm488_vm1, %v783_v62, %v787_v15  ;;  %v801_v14 = vshrl.u32 %v11724_v56, 16 }
  0x93   : > { %15711 = vst [vmem:[#allocation136_spill] sm:$0xff] %v11753_v18  ;;  %v1119_v16 = vrot.slane %v1117_v2, 1  ;;  %v805_v51 = vshll.u32 %v11740_v22, 16  ;;  %v11761_v36 = vsel %vm488_vm1, %v1103_v37, %v1107_v46  ;;  %v1121_v4 = vshrl.u32 %v11738_v33, 16 }
  0x94   : > { %v11758_v32 = vsel %vm488_vm1, %v795_v44, %v799_v55  ;;  %v1115_v1 = vor.u32 %v1114_v29, %v1110_v59  ;;  %15713 = vst [vmem:[#allocation138_spill] sm:$0xff] %v11761_v36  ;;  %v1125_v19 = vshll.u32 %v11750_v3, 16  ;;  %v803_v15 = vor.u32 %v801_v14, %v799_v55 }
  0x95   : > { %15712 = vst [vmem:[#allocation137_spill] sm:$0xff] %v11758_v32  ;;  %v807_v34 = vrot.slane %v805_v51, 1  ;;  %v2646_v42 = vrot.slane %v10945_v8, 1  ;;  %v2647_v37 = vrot.slane %v10949_v11, 1  ;;  %v1123_v59 = vor.u32 %v1121_v4, %v1119_v16 }
  0x96   : > { %9582 = vmatmul.mubr.msk.bf16.gmra.mxu0 %vm1131_vm2, %v11753_v18  ;;  %v11768_v62 = vsel %vm488_vm1, %v1115_v1, %v1119_v16  ;;  %v1127_v35 = vrot.slane %v1125_v19, 1  ;;  %v2649_v55 = vrot.slane %v10963_v20, 1  ;;  %v2651_v16 = vrot.slane %v10980_v41, 1  ;;  %v15757_v18 = vld [vmem:[#allocation110_spill] sm:$0xff] }
  0x97   : > { %15714 = vst [vmem:[#allocation139_spill] sm:$0xff] %v11768_v62  ;;  %9585 = vmatprep.mubr.msk.bf16.mxu0 %vm1131_vm2, %v11758_v32  ;;  %v11779_v1 = vsel %vm488_vm1, %v803_v15, %v807_v34  ;;  %v2648_v46 = vsel %vm2645_vm3, %v2646_v42, %v2647_v37  ;;  %v2652_v2 = vrot.slane %v10985_v47, 1  ;;  %v4387_v14 = vsel %vm1324_vm0, %v11351_v6, 0 }
  0x98   : > { %9646 = vmatmul.mubr.msk.bf16.gmra.mxu1 %vm1131_vm2, %v11761_v36  ;;  %15715 = vst [vmem:[#allocation140_spill] sm:$0xff] %v11779_v1  ;;  %v11783_v44 = vsel %vm488_vm1, %v1123_v59, %v1127_v35  ;;  %v2650_v29 = vsel %vm2645_vm3, %v2647_v37, %v2649_v55  ;;  %v3685_v20 = vsel %vm1324_vm0, %v11335_v21, 0  ;;  %v2654_v4 = vrot.slane %v11007_v63, 1 }
  0x99   : > { %9649 = vmatprep.mubr.msk.bf16.mxu1 %vm1131_vm2, %v11768_v62  ;;  %15716 = vst [vmem:[#allocation141_spill] sm:$0xff] %v11783_v44  ;;  %v11799_v51 = vsel %vm2645_vm3, %v2651_v16, %v2652_v2  ;;  %v2657_v6 = vrot.slane %v11039_v31, 1  ;;  %v2661_v63 = vrot.slane %v11079_v7, 1  ;;  %v2662_v15 = vrot.slane %v11087_v17, 1 }
  0x9a   : > { %15717 = vst [vmem:[#allocation142_spill] sm:$0xff] %v11799_v51  ;;  %v11814_v19 = vsel %vm2645_vm3, %v2652_v2, %v2654_v4  ;;  %v2666_v37 = vrot.slane %v11131_v5, 1  ;;  %v2667_v59 = vrot.slane %v11143_v26, 1  ;;  %v2671_v55 = vrot.slane %v11183_v49, 1 }
  0x9b   : > { %15718 = vst [vmem:[#allocation143_spill] sm:$0xff] %v11814_v19  ;;  %v11834_v42 = vsel %vm2645_vm3, %v2661_v63, %v2662_v15  ;;  %v2672_v16 = vrot.slane %v11196_v60, 1 }
  0x9c   : > { %15721 = vst [vmem:[#allocation146_spill] sm:$0xff] %v11834_v42 }
  0x9e   : > { %9586 = vmatmul.mubr.msk.bf16.gmra.mxu0 %vm1131_vm2, %v11779_v1 }
  0x9f   : > { %9785 = vmatprep.mubr.msk.bf16.mxu0 %vm1131_vm2, %v2648_v46  ;;  %v11851_v46 = vsel %vm2645_vm3, %v2666_v37, %v2667_v59  ;;  %v2687_v37 = vrot.slane %v11365_v30, 1 }
  0xa0   : > { %9650 = vmatmul.mubr.msk.bf16.gmra.mxu1 %vm1131_vm2, %v11783_v44  ;;  %15723 = vst [vmem:[#allocation148_spill] sm:$0xff] %v11851_v46 }
  0xa1   : > { %9655 = vmatprep.mubr.msk.bf16.mxu1 %vm1131_vm2, %v10945_v8  ;;  %v2656_v8 = vrot.slane %v11033_v27, 1 }
  0xa3   : > { %v11817_v21 = vsel %vm2645_vm3, %v2656_v8, %v2657_v6 }
  0xa4   : > { %15719 = vst [vmem:[#allocation144_spill] sm:$0xff] %v11817_v21 }
  0xa6   : > { %9786 = vmatmul.mubr.msk.bf16.vlgmr.msra.gmra.mxu0 %vm1131_vm2, %v2650_v29  ;;  %v11868_v29 = vsel %vm2645_vm3, %v2671_v55, %v2672_v16  ;;  %v2691_v55 = vrot.slane %v11403_v43, 1 }
  0xa7   : > { %10044 = vmatpush3.bf16.msra.mxu0 %v4387_v14  ;;  %9789 = vmatprep.mubr.msk.bf16.mxu0 %vm1131_vm2, %v11799_v51  ;;  %15725 = vst [vmem:[#allocation150_spill] sm:$0xff] %v11868_v29  ;;  %v2676_v14 = vrot.slane %v11233_v0, 1 }
  0xa8   : > { %9656 = vmatmul.mubr.msk.bf16.vlgmr.msra.gmra.mxu1 %vm1131_vm2, %v10949_v11  ;;  %v2659_v11 = vrot.slane %v11068_v54, 1  ;;  %v2664_v54 = vrot.slane %v11109_v38, 1  ;;  %v2669_v38 = vrot.slane %v11164_v58, 1  ;;  %v2674_v58 = vrot.slane %v11213_v40, 1 }
  0xa9   : > { %9914 = vmatpush3.bf16.msra.mxu1 %v3685_v20  ;;  %9659 = vmatprep.mubr.msk.bf16.mxu1 %vm1131_vm2, %v10980_v41  ;;  %v2677_v20 = vrot.slane %v11247_v57, 1  ;;  %v2679_v40 = vrot.slane %v11268_v13, 1  ;;  %v2684_v13 = vrot.slane %v11317_v28, 1  ;;  %v2689_v28 = vrot.slane %v11386_v50, 1 }
  0xaa   : > { %v11831_v34 = vsel %vm2645_vm3, %v2657_v6, %v2659_v11  ;;  %v11848_v35 = vsel %vm2645_vm3, %v2662_v15, %v2664_v54  ;;  %v11865_v2 = vsel %vm2645_vm3, %v2667_v59, %v2669_v38  ;;  %v11882_v4 = vsel %vm2645_vm3, %v2672_v16, %v2674_v58 }
  0xab   : > { %15720 = vst [vmem:[#allocation145_spill] sm:$0xff] %v11831_v34  ;;  %15722 = vst [vmem:[#allocation147_spill] sm:$0xff] %v11848_v35  ;;  %v11885_v8 = vsel %vm2645_vm3, %v2676_v14, %v2677_v20  ;;  %v2681_v6 = vrot.slane %v11285_v39, 1  ;;  %v2682_v11 = vrot.slane %v11300_v23, 1  ;;  %v11899_v63 = vsel %vm2645_vm3, %v2677_v20, %v2679_v40 }
  0xac   : > { %15724 = vst [vmem:[#allocation149_spill] sm:$0xff] %v11865_v2  ;;  %15726 = vst [vmem:[#allocation151_spill] sm:$0xff] %v11882_v4  ;;  %v2686_v54 = vrot.slane %v11342_v12, 1  ;;  %v2692_v16 = vrot.slane %v11418_v48, 1  ;;  %v11933_v58 = vsel %vm2645_vm3, %v2687_v37, %v2689_v28  ;;  %v2694_v50 = vrot.slane %v11435_v52, 1 }
  0xad   : > { %15727 = vst [vmem:[#allocation152_spill] sm:$0xff] %v11885_v8  ;;  %15728 = vst [vmem:[#allocation153_spill] sm:$0xff] %v11899_v63  ;;  %v11902_v15 = vsel %vm2645_vm3, %v2681_v6, %v2682_v11  ;;  %v11916_v59 = vsel %vm2645_vm3, %v2682_v11, %v2684_v13  ;;  %v2696_v11 = vrot.slane %v11453_v10, 1  ;;  %v2697_v13 = vrot.slane %v11467_v24, 1 }
  0xae   : > { %9790 = vmatmul.mubr.msk.bf16.gmra.mxu0 %vm1131_vm2, %v11814_v19  ;;  %15729 = vst [vmem:[#allocation154_spill] sm:$0xff] %v11902_v15  ;;  %15730 = vst [vmem:[#allocation155_spill] sm:$0xff] %v11916_v59  ;;  %v11919_v38 = vsel %vm2645_vm3, %v2686_v54, %v2687_v37  ;;  %v11936_v14 = vsel %vm2645_vm3, %v2691_v55, %v2692_v16  ;;  %v11960_v52 = vsel %vm2645_vm3, %v2692_v16, %v2694_v50  ;;  %v15751_v19 = vld [vmem:[#allocation105_spill] sm:$0xff] }
  0xaf   : > { %9793 = vmatprep.mubr.msk.bf16.mxu0 %vm1131_vm2, %v11817_v21  ;;  %15731 = vst [vmem:[#allocation156_spill] sm:$0xff] %v11919_v38  ;;  %15732 = vst [vmem:[#allocation157_spill] sm:$0xff] %v11933_v58  ;;  %v2699_v16 = vrot.slane %v11490_v53, 1  ;;  %v2707_v51 = vrot.slane %v15751_v19, 1 }
  0xb0   : > { %9660 = vmatmul.mubr.msk.bf16.gmra.mxu1 %vm1131_vm2, %v10985_v47  ;;  %15733 = vst [vmem:[#allocation158_spill] sm:$0xff] %v11936_v14  ;;  %15736 = vst [vmem:[#allocation161_spill] sm:$0xff] %v11960_v52 }
  0xb1   : > { %9663 = vmatprep.mubr.msk.bf16.mxu1 %vm1131_vm2, %v11033_v27  ;;  %v11993_v53 = vsel %vm2645_vm3, %v2697_v13, %v2699_v16 }
  0xb2   : > { %15744 = vst [vmem:[#allocation167_spill] sm:$0xff] %v11993_v53 }
  0xb6   : > { %9794 = vmatmul.mubr.msk.bf16.gmra.mxu0 %vm1131_vm2, %v11831_v34 }
  0xb7   : > { %9797 = vmatprep.mubr.msk.bf16.mxu0 %vm1131_vm2, %v11834_v42  ;;  %v15748_v42 = vld [vmem:[#allocation100_spill] sm:$0xff] }
  0xb8   : > { %9664 = vmatmul.mubr.msk.bf16.gmra.mxu1 %vm1131_vm2, %v11039_v31 }
  0xb9   : > { %9667 = vmatprep.mubr.msk.bf16.mxu1 %vm1131_vm2, %v11079_v7 }
  0xbe   : > { %9798 = vmatmul.mubr.msk.bf16.gmra.mxu0 %vm1131_vm2, %v11848_v35 }
  0xbf   : > { %9801 = vmatprep.mubr.msk.bf16.mxu0 %vm1131_vm2, %v11851_v46 }
  0xc0   : > { %9668 = vmatmul.mubr.msk.bf16.gmra.mxu1 %vm1131_vm2, %v11087_v17 }
  0xc1   : > { %9671 = vmatprep.mubr.msk.bf16.mxu1 %vm1131_vm2, %v11131_v5 }
  0xc6   : > { %9802 = vmatmul.mubr.msk.bf16.gmra.mxu0 %vm1131_vm2, %v11865_v2 }
  0xc7   : > { %9805 = vmatprep.mubr.msk.bf16.mxu0 %vm1131_vm2, %v11868_v29 }
  0xc8   : > { %9672 = vmatmul.mubr.msk.bf16.gmra.mxu1 %vm1131_vm2, %v11143_v26 }
  0xc9   : > { %9675 = vmatprep.mubr.msk.bf16.mxu1 %vm1131_vm2, %v11183_v49 }
  0xce   : > { %9806 = vmatmul.mubr.msk.bf16.gmra.mxu0 %vm1131_vm2, %v11882_v4 }
  0xcf   : > { %9809 = vmatprep.mubr.msk.bf16.mxu0 %vm1131_vm2, %v11885_v8 }
  0xd0   : > { %9676 = vmatmul.mubr.msk.bf16.gmra.mxu1 %vm1131_vm2, %v11196_v60  ;;  %v15814_v60 = vld [vmem:[#allocation25_spill] sm:$0xff] }
  0xd1   : > { %9679 = vmatprep.mubr.msk.bf16.mxu1 %vm1131_vm2, %v11233_v0  ;;  %v2741_v49 = vrot.slane %v15814_v60, 1 }
  0xd6   : > { %9810 = vmatmul.mubr.msk.bf16.gmra.mxu0 %vm1131_vm2, %v11899_v63  ;;  %v15742_v63 = vld [vmem:[#allocation95_spill] sm:$0xff] }
  0xd7   : > { %9813 = vmatprep.mubr.msk.bf16.mxu0 %vm1131_vm2, %v11902_v15  ;;  %v2702_v8 = vrot.slane %v15742_v63, 1 }
  0xd8   : > { %9680 = vmatmul.mubr.msk.bf16.gmra.mxu1 %vm1131_vm2, %v11247_v57 }
  0xd9   : > { %9683 = vmatprep.mubr.msk.bf16.mxu1 %vm1131_vm2, %v11285_v39 }
  0xde   : > { %9814 = vmatmul.mubr.msk.bf16.gmra.mxu0 %vm1131_vm2, %v11916_v59 }
  0xdf   : > { %9817 = vmatprep.mubr.msk.bf16.mxu0 %vm1131_vm2, %v11919_v38 }
  0xe0   : > { %9684 = vmatmul.mubr.msk.bf16.gmra.mxu1 %vm1131_vm2, %v11300_v23 }
  0xe1   : > { %9687 = vmatprep.mubr.msk.bf16.mxu1 %vm1131_vm2, %v11342_v12 }
  0xe6   : > { %v11938_v20 = vpop.f32.mrf.mxu0  ;;  %9818 = vmatmul.mubr.msk.bf16.gmra.mxu0 %vm1131_vm2, %v11933_v58 }
  0xe7   : > { %9821 = vmatprep.mubr.msk.bf16.mxu0 %vm1131_vm2, %v11936_v14  ;;  %v11967_v14 = vsel %vm2645_vm3, %v2696_v11, %v2697_v13  ;;  %v15741_v11 = vld [vmem:[#allocation93_spill] sm:$0xff]  ;;  %v2704_v13 = vrot.slane %v15748_v42, 1 }
  0xe8   : > { %v11945_v40 = vpop.f32.mrf.mxu1  ;;  %9688 = vmatmul.mubr.msk.bf16.gmra.mxu1 %vm1131_vm2, %v11365_v30  ;;  %v11949_v6 = vpop.f32.mrf.mxu0  ;;  %15738 = vst [vmem:[#allocation163_spill] sm:$0xff] %v11967_v14  ;;  %v2701_v15 = vrot.slane %v15741_v11, 1 }
  0xe9   : > { %15734 = vst [vmem:[#allocation159_spill] sm:$0xff] %v11945_v40  ;;  %9691 = vmatprep.mubr.msk.bf16.mxu1 %vm1131_vm2, %v11403_v43  ;;  %v12026_v42 = vsel %vm2645_vm3, %v2702_v8, %v2704_v13 }
  0xea   : > { %v11955_v54 = vpop.f32.mrf.mxu1  ;;  %v11957_v37 = vpop.f32.mrf.mxu0  ;;  %v12000_v2 = vsel %vm2645_vm3, %v2701_v15, %v2702_v8  ;;  %v15750_v15 = vld [vmem:[#allocation103_spill] sm:$0xff]  ;;  %15753 = vst [vmem:[#allocation172_spill] sm:$0xff] %v12026_v42  ;;  %v2709_v8 = vrot.slane %v15757_v18, 1 }
  0xeb   : > { %15735 = vst [vmem:[#allocation160_spill] sm:$0xff] %v11955_v54  ;;  %15746 = vst [vmem:[#allocation169_spill] sm:$0xff] %v12000_v2  ;;  %v2706_v21 = vrot.slane %v15750_v15, 1 }
  0xec   : > { %v11962_v28 = vpop.f32.mrf.mxu1  ;;  %v11964_v55 = vpop.f32.mrf.mxu0  ;;  %v12059_v18 = vsel %vm2645_vm3, %v2707_v51, %v2709_v8 }
  0xed   : > { %15737 = vst [vmem:[#allocation162_spill] sm:$0xff] %v11962_v28  ;;  %v12033_v36 = vsel %vm2645_vm3, %v2706_v21, %v2707_v51  ;;  %v15759_v21 = vld [vmem:[#allocation113_spill] sm:$0xff]  ;;  %15762 = vst [vmem:[#allocation177_spill] sm:$0xff] %v12059_v18 }
  0xee   : > { %v11969_v58 = vpop.f32.mrf.mxu1  ;;  %v11971_v38 = vpop.f32.mrf.mxu0  ;;  %9822 = vmatmul.mubr.msk.bf16.gmra.mxu0 %vm1131_vm2, %v11960_v52  ;;  %15755 = vst [vmem:[#allocation174_spill] sm:$0xff] %v12033_v36 }
  0xef   : > { %15739 = vst [vmem:[#allocation164_spill] sm:$0xff] %v11969_v58  ;;  %9825 = vmatprep.mubr.msk.bf16.mxu0 %vm1131_vm2, %v11967_v14 }
  0xf0   : > { %v11978_v50 = vpop.f32.mrf.mxu1  ;;  %9692 = vmatmul.mubr.msk.bf16.gmra.mxu1 %vm1131_vm2, %v11418_v48  ;;  %v11982_v59 = vpop.f32.mrf.mxu0 }
  0xf1   : > { %15740 = vst [vmem:[#allocation165_spill] sm:$0xff] %v11978_v50  ;;  %9695 = vmatprep.mubr.msk.bf16.mxu1 %vm1131_vm2, %v11453_v10 }
  0xf2   : > { %v11988_v52 = vpop.f32.mrf.mxu1  ;;  %v11990_v4 = vpop.f32.mrf.mxu0 }
  0xf3   : > { %15743 = vst [vmem:[#allocation166_spill] sm:$0xff] %v11988_v52 }
  0xf4   : > { %v11995_v14 = vpop.f32.mrf.mxu1  ;;  %v11997_v29 = vpop.f32.mrf.mxu0 }
  0xf5   : > { %15745 = vst [vmem:[#allocation168_spill] sm:$0xff] %v11995_v14 }
  0xf6   : > { %v12002_v46 = vpop.f32.mrf.mxu1  ;;  %v12004_v35 = vpop.f32.mrf.mxu0  ;;  %9826 = vmatmul.mubr.msk.bf16.gmra.mxu0 %vm1131_vm2, %v11993_v53 }
  0xf7   : > { %15747 = vst [vmem:[#allocation170_spill] sm:$0xff] %v12002_v46  ;;  %9829 = vmatprep.mubr.msk.bf16.mxu0 %vm1131_vm2, %v12000_v2 }
  0xf8   : > { %v12011_v16 = vpop.f32.mrf.mxu1  ;;  %9696 = vmatmul.mubr.msk.bf16.gmra.mxu1 %vm1131_vm2, %v11467_v24  ;;  %v12015_v34 = vpop.f32.mrf.mxu0 }
  0xf9   : > { %15749 = vst [vmem:[#allocation100_spill] sm:$0xff] %v12011_v16  ;;  %9699 = vmatprep.mubr.msk.bf16.mxu1 %vm1131_vm2, %v15741_v11 }
  0xfa   : > { %v12021_v53 = vpop.f32.mrf.mxu1  ;;  %v12023_v44 = vpop.f32.mrf.mxu0 }
  0xfb   : > { %15752 = vst [vmem:[#allocation171_spill] sm:$0xff] %v12021_v53 }
  0xfc   : > { %v12028_v2 = vpop.f32.mrf.mxu1  ;;  %v12030_v62 = vpop.f32.mrf.mxu0 }
  0xfd   : > { %15754 = vst [vmem:[#allocation173_spill] sm:$0xff] %v12028_v2  ;;  %v2711_v2 = vrot.slane %v15759_v21, 1 }
  0xfe   : > { %v12035_v1 = vpop.f32.mrf.mxu1  ;;  %v12037_v32 = vpop.f32.mrf.mxu0  ;;  %9830 = vmatmul.mubr.msk.bf16.gmra.mxu0 %vm1131_vm2, %v12026_v42 }
  0xff   : > { %15756 = vst [vmem:[#allocation175_spill] sm:$0xff] %v12035_v1  ;;  %9833 = vmatprep.mubr.msk.bf16.mxu0 %vm1131_vm2, %v12033_v36  ;;  %v15760_v1 = vld [vmem:[#allocation115_spill] sm:$0xff] }
 0x100   : > { %v12044_v13 = vpop.f32.mrf.mxu1  ;;  %9700 = vmatmul.mubr.msk.bf16.gmra.mxu1 %vm1131_vm2, %v15742_v63  ;;  %v12048_v25 = vpop.f32.mrf.mxu0  ;;  %v2712_v53 = vrot.slane %v15760_v1, 1 }
 0x101   : > { %15758 = vst [vmem:[#allocation110_spill] sm:$0xff] %v12044_v13  ;;  %9703 = vmatprep.mubr.msk.bf16.mxu1 %vm1131_vm2, %v15750_v15 }
 0x102   : > { %v12054_v42 = vpop.f32.mrf.mxu1  ;;  %v12056_v16 = vpop.f32.mrf.mxu0  ;;  %v12066_v63 = vsel %vm2645_vm3, %v2711_v2, %v2712_v53  ;;  %v15768_v2 = vld [vmem:[#allocation122_spill] sm:$0xff] }
 0x103   : > { %15761 = vst [vmem:[#allocation176_spill] sm:$0xff] %v12054_v42  ;;  %15764 = vst [vmem:[#allocation179_spill] sm:$0xff] %v12066_v63  ;;  %v15766_v42 = vld [vmem:[#allocation119_spill] sm:$0xff]  ;;  %v2716_v15 = vrot.slane %v15768_v2, 1 }
 0x104   : > { %v12061_v36 = vpop.f32.mrf.mxu1  ;;  %v12063_v13 = vpop.f32.mrf.mxu0  ;;  %v2714_v51 = vrot.slane %v15766_v42, 1 }
 0x105   : > { %15763 = vst [vmem:[#allocation178_spill] sm:$0xff] %v12061_v36 }
 0x106   : > { %v12068_v46 = vpop.f32.mrf.mxu1  ;;  %v12070_v14 = vpop.f32.mrf.mxu0  ;;  %9834 = vmatmul.mubr.msk.bf16.gmra.mxu0 %vm1131_vm2, %v12059_v18  ;;  %v12092_v42 = vsel %vm2645_vm3, %v2712_v53, %v2714_v51 }
 0x107   : > { %15765 = vst [vmem:[#allocation180_spill] sm:$0xff] %v12068_v46  ;;  %9837 = vmatprep.mubr.msk.bf16.mxu0 %vm1131_vm2, %v12066_v63  ;;  %v15769_v46 = vld [vmem:[#allocation125_spill] sm:$0xff]  ;;  %15771 = vst [vmem:[#allocation182_spill] sm:$0xff] %v12092_v42 }
 0x108   : > { %v12077_v8 = vpop.f32.mrf.mxu1  ;;  %9704 = vmatmul.mubr.msk.bf16.gmra.mxu1 %vm1131_vm2, %v15751_v19  ;;  %v12081_v36 = vpop.f32.mrf.mxu0  ;;  %v2717_v52 = vrot.slane %v15769_v46, 1 }
 0x109   : > { %15767 = vst [vmem:[#allocation119_spill] sm:$0xff] %v12077_v8  ;;  %9707 = vmatprep.mubr.msk.bf16.mxu1 %vm1131_vm2, %v15759_v21 }
 0x10a   : > { %v12087_v18 = vpop.f32.mrf.mxu1  ;;  %v12089_v11 = vpop.f32.mrf.mxu0  ;;  %v12099_v19 = vsel %vm2645_vm3, %v2716_v15, %v2717_v52  ;;  %v2721_v15 = vrot.slane %v11709_v61, 1 }
 0x10b   : > { %15770 = vst [vmem:[#allocation181_spill] sm:$0xff] %v12087_v18  ;;  %15773 = vst [vmem:[#allocation184_spill] sm:$0xff] %v12099_v19  ;;  %v15775_v18 = vld [vmem:[#allocation128_spill] sm:$0xff] }
 0x10c   : > { %v12094_v63 = vpop.f32.mrf.mxu1  ;;  %v12096_v8 = vpop.f32.mrf.mxu0  ;;  %v2719_v53 = vrot.slane %v15775_v18, 1 }
 0x10d   : > { %15772 = vst [vmem:[#allocation183_spill] sm:$0xff] %v12094_v63 }
 0x10e   : > { %v12101_v50 = vpop.f32.mrf.mxu1  ;;  %v12103_v24 = vpop.f32.mrf.mxu0  ;;  %9838 = vmatmul.mubr.msk.bf16.gmra.mxu0 %vm1131_vm2, %v12092_v42  ;;  %v12125_v18 = vsel %vm2645_vm3, %v2717_v52, %v2719_v53  ;;  %v2724_v52 = vrot.slane %v11740_v22, 1 }
 0x10f   : > { %15774 = vst [vmem:[#allocation185_spill] sm:$0xff] %v12101_v50  ;;  %9841 = vmatprep.mubr.msk.bf16.mxu0 %vm1131_vm2, %v12099_v19  ;;  %v2722_v50 = vrot.slane %v11724_v56, 1  ;;  %15778 = vst [vmem:[#allocation187_spill] sm:$0xff] %v12125_v18 }
 0x110   : > { %v12110_v51 = vpop.f32.mrf.mxu1  ;;  %9708 = vmatmul.mubr.msk.bf16.gmra.mxu1 %vm1131_vm2, %v15760_v1  ;;  %v12114_v63 = vpop.f32.mrf.mxu0 }
 0x111   : > { %15776 = vst [vmem:[#allocation128_spill] sm:$0xff] %v12110_v51  ;;  %9711 = vmatprep.mubr.msk.bf16.mxu1 %vm1131_vm2, %v15768_v2  ;;  %v12132_v1 = vsel %vm2645_vm3, %v2721_v15, %v2722_v50  ;;  %v15783_v15 = vld [vmem:[#allocation5_spill] sm:$0xff]  ;;  %v12158_v22 = vsel %vm2645_vm3, %v2722_v50, %v2724_v52 }
 0x112   : > { %v12120_v42 = vpop.f32.mrf.mxu1  ;;  %v12122_v21 = vpop.f32.mrf.mxu0  ;;  %15780 = vst [vmem:[#allocation189_spill] sm:$0xff] %v12132_v1  ;;  %15786 = vst [vmem:[#allocation193_spill] sm:$0xff] %v12158_v22 }
 0x113   : > { %15777 = vst [vmem:[#allocation186_spill] sm:$0xff] %v12120_v42  ;;  %v2726_v42 = vrot.slane %v15783_v15, 1 }
 0x114   : > { %v12127_v19 = vpop.f32.mrf.mxu1  ;;  %v12129_v51 = vpop.f32.mrf.mxu0 }
 0x115   : > { %15779 = vst [vmem:[#allocation188_spill] sm:$0xff] %v12127_v19 }
 0x116   : > { %v12134_v58 = vpop.f32.mrf.mxu1  ;;  %v12136_v28 = vpop.f32.mrf.mxu0  ;;  %9842 = vmatmul.mubr.msk.bf16.gmra.mxu0 %vm1131_vm2, %v12125_v18 }
 0x117   : > { %15781 = vst [vmem:[#allocation190_spill] sm:$0xff] %v12134_v58  ;;  %9845 = vmatprep.mubr.msk.bf16.mxu0 %vm1131_vm2, %v12132_v1  ;;  %v15784_v58 = vld [vmem:[#allocation6_spill] sm:$0xff] }
 0x118   : > { %v12143_v53 = vpop.f32.mrf.mxu1  ;;  %9712 = vmatmul.mubr.msk.bf16.gmra.mxu1 %vm1131_vm2, %v15769_v46  ;;  %v12147_v19 = vpop.f32.mrf.mxu0  ;;  %v2727_v2 = vrot.slane %v15784_v58, 1 }
 0x119   : > { %15782 = vst [vmem:[#allocation191_spill] sm:$0xff] %v12143_v53  ;;  %9715 = vmatprep.mubr.msk.bf16.mxu1 %vm1131_vm2, %v11709_v61 }
 0x11a   : > { %v12153_v18 = vpop.f32.mrf.mxu1  ;;  %v12155_v54 = vpop.f32.mrf.mxu0  ;;  %v12165_v46 = vsel %vm2645_vm3, %v2726_v42, %v2727_v2  ;;  %v15792_v42 = vld [vmem:[#allocation9_spill] sm:$0xff] }
 0x11b   : > { %15785 = vst [vmem:[#allocation192_spill] sm:$0xff] %v12153_v18  ;;  %15788 = vst [vmem:[#allocation195_spill] sm:$0xff] %v12165_v46  ;;  %v15790_v18 = vld [vmem:[#allocation7_spill] sm:$0xff]  ;;  %v2731_v61 = vrot.slane %v15792_v42, 1 }
 0x11c   : > { %v12160_v1 = vpop.f32.mrf.mxu1  ;;  %v12162_v53 = vpop.f32.mrf.mxu0  ;;  %v2729_v50 = vrot.slane %v15790_v18, 1 }
 0x11d   : > { %15787 = vst [vmem:[#allocation194_spill] sm:$0xff] %v12160_v1 }
 0x11e   : > { %v12167_v10 = vpop.f32.mrf.mxu1  ;;  %v12169_v40 = vpop.f32.mrf.mxu0  ;;  %9846 = vmatmul.mubr.msk.bf16.gmra.mxu0 %vm1131_vm2, %v12158_v22  ;;  %v12191_v18 = vsel %vm2645_vm3, %v2727_v2, %v2729_v50 }
 0x11f   : > { %15789 = vst [vmem:[#allocation196_spill] sm:$0xff] %v12167_v10  ;;  %9849 = vmatprep.mubr.msk.bf16.mxu0 %vm1131_vm2, %v12165_v46  ;;  %v15793_v10 = vld [vmem:[#allocation10_spill] sm:$0xff]  ;;  %15795 = vst [vmem:[#allocation198_spill] sm:$0xff] %v12191_v18 }
 0x120   : > { %v12176_v52 = vpop.f32.mrf.mxu1  ;;  %9716 = vmatmul.mubr.msk.bf16.gmra.mxu1 %vm1131_vm2, %v11724_v56  ;;  %v12180_v1 = vpop.f32.mrf.mxu0  ;;  %v2732_v48 = vrot.slane %v15793_v10, 1 }
 0x121   : > { %15791 = vst [vmem:[#allocation7_spill] sm:$0xff] %v12176_v52  ;;  %9719 = vmatprep.mubr.msk.bf16.mxu1 %vm1131_vm2, %v15783_v15 }
 0x122   : > { %v12186_v22 = vpop.f32.mrf.mxu1  ;;  %v12188_v43 = vpop.f32.mrf.mxu0  ;;  %v12198_v56 = vsel %vm2645_vm3, %v2731_v61, %v2732_v48  ;;  %v15801_v61 = vld [vmem:[#allocation15_spill] sm:$0xff] }
 0x123   : > { %15794 = vst [vmem:[#allocation197_spill] sm:$0xff] %v12186_v22  ;;  %15797 = vst [vmem:[#allocation200_spill] sm:$0xff] %v12198_v56  ;;  %v15799_v22 = vld [vmem:[#allocation12_spill] sm:$0xff]  ;;  %v2736_v15 = vrot.slane %v15801_v61, 1 }
 0x124   : > { %v12193_v46 = vpop.f32.mrf.mxu1  ;;  %v12195_v52 = vpop.f32.mrf.mxu0  ;;  %v2734_v2 = vrot.slane %v15799_v22, 1 }
 0x125   : > { %15796 = vst [vmem:[#allocation199_spill] sm:$0xff] %v12193_v46 }
 0x126   : > { %v12200_v30 = vpop.f32.mrf.mxu1  ;;  %v12202_v12 = vpop.f32.mrf.mxu0  ;;  %9850 = vmatmul.mubr.msk.bf16.gmra.mxu0 %vm1131_vm2, %v12191_v18 }
 0x127   : > { %15798 = vst [vmem:[#allocation201_spill] sm:$0xff] %v12200_v30  ;;  %9853 = vmatprep.mubr.msk.bf16.mxu0 %vm1131_vm2, %v12198_v56  ;;  %v15802_v30 = vld [vmem:[#allocation17_spill] sm:$0xff]  ;;  %v12222_v56 = vld [vmem:[%s15170_s1 + $0x14] sm:$0x7] }
 0x128   : > { %v12209_v50 = vpop.f32.mrf.mxu1  ;;  %9720 = vmatmul.mubr.msk.bf16.gmra.mxu1 %vm1131_vm2, %v15784_v58  ;;  %v12213_v46 = vpop.f32.mrf.mxu0  ;;  %v2737_v23 = vrot.slane %v15802_v30, 1  ;;  %10701 = vmatprep.subr.msk.bf16.mxu1 %vm1324_vm0, %v12222_v56  ;;  %v12236_v58 = vld [vmem:[%s15170_s1 + $0x18] sm:$0x7] }
 0x129   : > { %15800 = vst [vmem:[#allocation12_spill] sm:$0xff] %v12209_v50  ;;  %9723 = vmatprep.mubr.msk.bf16.mxu1 %vm1131_vm2, %v15792_v42  ;;  %v12231_v50 = vsel %vm2645_vm3, %v2732_v48, %v2734_v2  ;;  %10702 = vmatprep.subr.msk.bf16.mxu0 %vm1324_vm0, %v12236_v58  ;;  %v15811_v48 = vld [vmem:[#allocation20_spill] sm:$0xff] }
 0x12a   : > { %v12224_v22 = vpop.f32.mrf.mxu1  ;;  %v12226_v18 = vpop.f32.mrf.mxu0  ;;  %15805 = vst [vmem:[#allocation204_spill] sm:$0xff] %v12231_v50  ;;  %v12243_v57 = vsel %vm2645_vm3, %v2736_v15, %v2737_v23  ;;  %v2739_v2 = vrot.slane %v15811_v48, 1 }
 0x12b   : > { %15803 = vst [vmem:[#allocation202_spill] sm:$0xff] %v12224_v22  ;;  %15804 = vst [vmem:[#allocation203_spill] sm:$0xff] %v12226_v18 }
 0x12c   : > { %v12238_v42 = vpop.f32.mrf.mxu1  ;;  %v12240_v39 = vpop.f32.mrf.mxu0  ;;  %15808 = vst [vmem:[#allocation207_spill] sm:$0xff] %v12243_v57  ;;  %v12271_v48 = vsel %vm2645_vm3, %v2737_v23, %v2739_v2 }
 0x12d   : > { %15806 = vst [vmem:[#allocation205_spill] sm:$0xff] %v12238_v42  ;;  %15807 = vst [vmem:[#allocation206_spill] sm:$0xff] %v12240_v39 }
 0x12e   : > { %v12247_v22 = vpop.f32.mrf.mxu1  ;;  %v12249_v0 = vpop.f32.mrf.mxu0  ;;  %9854 = vmatmul.mubr.msk.bf16.gmra.mxu0 %vm1131_vm2, %v12231_v50  ;;  %15818 = vst [vmem:[#allocation213_spill] sm:$0xff] %v12271_v48 }
 0x12f   : > { %15809 = vst [vmem:[#allocation208_spill] sm:$0xff] %v12247_v22  ;;  %15810 = vst [vmem:[#allocation209_spill] sm:$0xff] %v12249_v0  ;;  %9857 = vmatprep.mubr.msk.bf16.mxu0 %vm1131_vm2, %v12243_v57  ;;  %v15815_v22 = vld [vmem:[#allocation27_spill] sm:$0xff] }
 0x130   : > { %v12256_v42 = vpop.f32.mrf.mxu1  ;;  %9724 = vmatmul.mubr.msk.bf16.gmra.mxu1 %vm1131_vm2, %v15793_v10  ;;  %v12260_v15 = vpop.f32.mrf.mxu0  ;;  %v2742_v26 = vrot.slane %v15815_v22, 1 }
 0x131   : > { %15812 = vst [vmem:[#allocation20_spill] sm:$0xff] %v12256_v42  ;;  %15813 = vst [vmem:[#allocation210_spill] sm:$0xff] %v12260_v15  ;;  %9727 = vmatprep.mubr.msk.bf16.mxu1 %vm1131_vm2, %v15801_v61 }
 0x132   : > { %v12266_v50 = vpop.f32.mrf.mxu1  ;;  %v12268_v5 = vpop.f32.mrf.mxu0  ;;  %v12278_v10 = vsel %vm2645_vm3, %v2741_v49, %v2742_v26  ;;  %v15827_v49 = vld [vmem:[#allocation34_spill] sm:$0xff] }
 0x133   : > { %15816 = vst [vmem:[#allocation211_spill] sm:$0xff] %v12266_v50  ;;  %15817 = vst [vmem:[#allocation212_spill] sm:$0xff] %v12268_v5  ;;  %v15824_v50 = vld [vmem:[#allocation29_spill] sm:$0xff]  ;;  %v2746_v61 = vrot.slane %v15827_v49, 1 }
 0x134   : > { %v12273_v57 = vpop.f32.mrf.mxu1  ;;  %v12275_v42 = vpop.f32.mrf.mxu0  ;;  %15821 = vst [vmem:[#allocation216_spill] sm:$0xff] %v12278_v10  ;;  %v2744_v23 = vrot.slane %v15824_v50, 1 }
 0x135   : > { %15819 = vst [vmem:[#allocation214_spill] sm:$0xff] %v12273_v57  ;;  %15820 = vst [vmem:[#allocation215_spill] sm:$0xff] %v12275_v42 }
 0x136   : > { %v12280_v17 = vpop.f32.mrf.mxu1  ;;  %v12282_v15 = vpop.f32.mrf.mxu0  ;;  %9858 = vmatmul.mubr.msk.bf16.gmra.mxu0 %vm1131_vm2, %v12271_v48  ;;  %v12304_v50 = vsel %vm2645_vm3, %v2742_v26, %v2744_v23 }
 0x137   : > { %15822 = vst [vmem:[#allocation217_spill] sm:$0xff] %v12280_v17  ;;  %15823 = vst [vmem:[#allocation218_spill] sm:$0xff] %v12282_v15  ;;  %9861 = vmatprep.mubr.msk.bf16.mxu0 %vm1131_vm2, %v12278_v10  ;;  %v15828_v17 = vld [vmem:[#allocation36_spill] sm:$0xff] }
 0x138   : > { %v12289_v2 = vpop.f32.mrf.mxu1  ;;  %9728 = vmatmul.mubr.msk.bf16.gmra.mxu1 %vm1131_vm2, %v15802_v30  ;;  %v12293_v57 = vpop.f32.mrf.mxu0  ;;  %v2747_v42 = vrot.slane %v15828_v17, 1  ;;  %15831 = vst [vmem:[#allocation222_spill] sm:$0xff] %v12304_v50 }
 0x139   : > { %15825 = vst [vmem:[#allocation29_spill] sm:$0xff] %v12289_v2  ;;  %15826 = vst [vmem:[#allocation219_spill] sm:$0xff] %v12293_v57  ;;  %9731 = vmatprep.mubr.msk.bf16.mxu1 %vm1131_vm2, %v15814_v60 }
 0x13a   : > { %v12299_v48 = vpop.f32.mrf.mxu1  ;;  %v12301_v15 = vpop.f32.mrf.mxu0  ;;  %v12311_v30 = vsel %vm2645_vm3, %v2746_v61, %v2747_v42  ;;  %v15840_v61 = vld [vmem:[#allocation44_spill] sm:$0xff] }
 0x13b   : > { %15829 = vst [vmem:[#allocation220_spill] sm:$0xff] %v12299_v48  ;;  %15830 = vst [vmem:[#allocation221_spill] sm:$0xff] %v12301_v15  ;;  %v15837_v48 = vld [vmem:[#allocation38_spill] sm:$0xff]  ;;  %v2751_v60 = vrot.slane %v15840_v61, 1 }
 0x13c   : > { %v12306_v10 = vpop.f32.mrf.mxu1  ;;  %v12308_v2 = vpop.f32.mrf.mxu0  ;;  %15834 = vst [vmem:[#allocation225_spill] sm:$0xff] %v12311_v30  ;;  %v2749_v26 = vrot.slane %v15837_v48, 1 }
 0x13d   : > { %15832 = vst [vmem:[#allocation223_spill] sm:$0xff] %v12306_v10  ;;  %15833 = vst [vmem:[#allocation224_spill] sm:$0xff] %v12308_v2 }
 0x13e   : > { %v12313_v57 = vpop.f32.mrf.mxu1  ;;  %v12315_v5 = vpop.f32.mrf.mxu0  ;;  %9862 = vmatmul.mubr.msk.bf16.gmra.mxu0 %vm1131_vm2, %v12304_v50  ;;  %v12337_v48 = vsel %vm2645_vm3, %v2747_v42, %v2749_v26 }
 0x13f   : > { %15835 = vst [vmem:[#allocation226_spill] sm:$0xff] %v12313_v57  ;;  %15836 = vst [vmem:[#allocation227_spill] sm:$0xff] %v12315_v5  ;;  %9865 = vmatprep.mubr.msk.bf16.mxu0 %vm1131_vm2, %v12311_v30  ;;  %v15841_v57 = vld [vmem:[#allocation45_spill] sm:$0xff] }
 0x140   : > { %v12322_v23 = vpop.f32.mrf.mxu1  ;;  %9732 = vmatmul.mubr.msk.bf16.gmra.mxu1 %vm1131_vm2, %v15815_v22  ;;  %v12326_v10 = vpop.f32.mrf.mxu0  ;;  %v2752_v2 = vrot.slane %v15841_v57, 1  ;;  %15844 = vst [vmem:[#allocation231_spill] sm:$0xff] %v12337_v48 }
 0x141   : > { %15838 = vst [vmem:[#allocation38_spill] sm:$0xff] %v12322_v23  ;;  %15839 = vst [vmem:[#allocation228_spill] sm:$0xff] %v12326_v10  ;;  %9735 = vmatprep.mubr.msk.bf16.mxu1 %vm1131_vm2, %v15827_v49 }
 0x142   : > { %v12332_v50 = vpop.f32.mrf.mxu1  ;;  %v12334_v5 = vpop.f32.mrf.mxu0  ;;  %v12344_v22 = vsel %vm2645_vm3, %v2751_v60, %v2752_v2  ;;  %v15853_v60 = vld [vmem:[#allocation52_spill] sm:$0xff] }
 0x143   : > { %15842 = vst [vmem:[#allocation229_spill] sm:$0xff] %v12332_v50  ;;  %15843 = vst [vmem:[#allocation230_spill] sm:$0xff] %v12334_v5  ;;  %v15850_v50 = vld [vmem:[#allocation47_spill] sm:$0xff]  ;;  %v2756_v49 = vrot.slane %v15853_v60, 1 }
 0x144   : > { %v12339_v30 = vpop.f32.mrf.mxu1  ;;  %v12341_v23 = vpop.f32.mrf.mxu0  ;;  %15847 = vst [vmem:[#allocation234_spill] sm:$0xff] %v12344_v22  ;;  %v2754_v42 = vrot.slane %v15850_v50, 1 }
 0x145   : > { %15845 = vst [vmem:[#allocation232_spill] sm:$0xff] %v12339_v30  ;;  %15846 = vst [vmem:[#allocation233_spill] sm:$0xff] %v12341_v23 }
 0x146   : > { %v12346_v10 = vpop.f32.mrf.mxu1  ;;  %v12348_v15 = vpop.f32.mrf.mxu0  ;;  %9866 = vmatmul.mubr.msk.bf16.gmra.mxu0 %vm1131_vm2, %v12337_v48  ;;  %v12370_v50 = vsel %vm2645_vm3, %v2752_v2, %v2754_v42 }
 0x147   : > { %15848 = vst [vmem:[#allocation235_spill] sm:$0xff] %v12346_v10  ;;  %15849 = vst [vmem:[#allocation236_spill] sm:$0xff] %v12348_v15  ;;  %9869 = vmatprep.mubr.msk.bf16.mxu0 %vm1131_vm2, %v12344_v22  ;;  %v15854_v10 = vld [vmem:[#allocation54_spill] sm:$0xff] }
 0x148   : > { %v12355_v26 = vpop.f32.mrf.mxu1  ;;  %9736 = vmatmul.mubr.msk.bf16.gmra.mxu1 %vm1131_vm2, %v15828_v17  ;;  %v12359_v30 = vpop.f32.mrf.mxu0  ;;  %v2757_v23 = vrot.slane %v15854_v10, 1  ;;  %15857 = vst [vmem:[#allocation240_spill] sm:$0xff] %v12370_v50 }
 0x149   : > { %15851 = vst [vmem:[#allocation47_spill] sm:$0xff] %v12355_v26  ;;  %15852 = vst [vmem:[#allocation237_spill] sm:$0xff] %v12359_v30  ;;  %9739 = vmatprep.mubr.msk.bf16.mxu1 %vm1131_vm2, %v15840_v61 }
 0x14a   : > { %v12365_v48 = vpop.f32.mrf.mxu1  ;;  %v12367_v15 = vpop.f32.mrf.mxu0  ;;  %v12377_v17 = vsel %vm2645_vm3, %v2756_v49, %v2757_v23  ;;  %v15866_v49 = vld [vmem:[#allocation62_spill] sm:$0xff] }
 0x14b   : > { %15855 = vst [vmem:[#allocation238_spill] sm:$0xff] %v12365_v48  ;;  %15856 = vst [vmem:[#allocation239_spill] sm:$0xff] %v12367_v15  ;;  %v15863_v48 = vld [vmem:[#allocation56_spill] sm:$0xff]  ;;  %v2761_v61 = vrot.slane %v15866_v49, 1 }
 0x14c   : > { %v12372_v22 = vpop.f32.mrf.mxu1  ;;  %v12374_v26 = vpop.f32.mrf.mxu0  ;;  %15860 = vst [vmem:[#allocation243_spill] sm:$0xff] %v12377_v17  ;;  %v2759_v2 = vrot.slane %v15863_v48, 1 }
 0x14d   : > { %15858 = vst [vmem:[#allocation241_spill] sm:$0xff] %v12372_v22  ;;  %15859 = vst [vmem:[#allocation242_spill] sm:$0xff] %v12374_v26 }
 0x14e   : > { %v12379_v30 = vpop.f32.mrf.mxu1  ;;  %v12381_v5 = vpop.f32.mrf.mxu0  ;;  %9870 = vmatmul.mubr.msk.bf16.gmra.mxu0 %vm1131_vm2, %v12370_v50  ;;  %v12403_v48 = vsel %vm2645_vm3, %v2757_v23, %v2759_v2 }
 0x14f   : > { %15861 = vst [vmem:[#allocation244_spill] sm:$0xff] %v12379_v30  ;;  %15862 = vst [vmem:[#allocation245_spill] sm:$0xff] %v12381_v5  ;;  %9873 = vmatprep.mubr.msk.bf16.mxu0 %vm1131_vm2, %v12377_v17  ;;  %v15867_v30 = vld [vmem:[#allocation63_spill] sm:$0xff] }
 0x150   : > { %v12388_v42 = vpop.f32.mrf.mxu1  ;;  %9740 = vmatmul.mubr.msk.bf16.gmra.mxu1 %vm1131_vm2, %v15841_v57  ;;  %v12392_v22 = vpop.f32.mrf.mxu0  ;;  %v2762_v26 = vrot.slane %v15867_v30, 1  ;;  %15870 = vst [vmem:[#allocation249_spill] sm:$0xff] %v12403_v48 }
 0x151   : > { %15864 = vst [vmem:[#allocation56_spill] sm:$0xff] %v12388_v42  ;;  %15865 = vst [vmem:[#allocation246_spill] sm:$0xff] %v12392_v22  ;;  %9743 = vmatprep.mubr.msk.bf16.mxu1 %vm1131_vm2, %v15853_v60 }
 0x152   : > { %v12398_v50 = vpop.f32.mrf.mxu1  ;;  %v12400_v5 = vpop.f32.mrf.mxu0  ;;  %v12410_v57 = vsel %vm2645_vm3, %v2761_v61, %v2762_v26  ;;  %v15879_v61 = vld [vmem:[#allocation70_spill] sm:$0xff] }
 0x153   : > { %15868 = vst [vmem:[#allocation247_spill] sm:$0xff] %v12398_v50  ;;  %15869 = vst [vmem:[#allocation248_spill] sm:$0xff] %v12400_v5  ;;  %v15876_v50 = vld [vmem:[#allocation65_spill] sm:$0xff]  ;;  %v2766_v60 = vrot.slane %v15879_v61, 1 }
 0x154   : > { %v12405_v17 = vpop.f32.mrf.mxu1  ;;  %v12407_v42 = vpop.f32.mrf.mxu0  ;;  %15873 = vst [vmem:[#allocation252_spill] sm:$0xff] %v12410_v57  ;;  %v2764_v23 = vrot.slane %v15876_v50, 1 }
 0x155   : > { %15871 = vst [vmem:[#allocation250_spill] sm:$0xff] %v12405_v17  ;;  %15872 = vst [vmem:[#allocation251_spill] sm:$0xff] %v12407_v42 }
 0x156   : > { %v12412_v22 = vpop.f32.mrf.mxu1  ;;  %v12414_v15 = vpop.f32.mrf.mxu0  ;;  %9874 = vmatmul.mubr.msk.bf16.gmra.mxu0 %vm1131_vm2, %v12403_v48  ;;  %v12436_v50 = vsel %vm2645_vm3, %v2762_v26, %v2764_v23 }
 0x157   : > { %15874 = vst [vmem:[#allocation253_spill] sm:$0xff] %v12412_v22  ;;  %15875 = vst [vmem:[#allocation254_spill] sm:$0xff] %v12414_v15  ;;  %9877 = vmatprep.mubr.msk.bf16.mxu0 %vm1131_vm2, %v12410_v57  ;;  %v15880_v22 = vld [vmem:[#allocation72_spill] sm:$0xff] }
 0x158   : > { %v12421_v2 = vpop.f32.mrf.mxu1  ;;  %9744 = vmatmul.mubr.msk.bf16.gmra.mxu1 %vm1131_vm2, %v15854_v10  ;;  %v12425_v17 = vpop.f32.mrf.mxu0  ;;  %v2767_v42 = vrot.slane %v15880_v22, 1  ;;  %15883 = vst [vmem:[#allocation258_spill] sm:$0xff] %v12436_v50 }
 0x159   : > { %15877 = vst [vmem:[#allocation65_spill] sm:$0xff] %v12421_v2  ;;  %15878 = vst [vmem:[#allocation255_spill] sm:$0xff] %v12425_v17  ;;  %9747 = vmatprep.mubr.msk.bf16.mxu1 %vm1131_vm2, %v15866_v49 }
 0x15a   : > { %v12431_v48 = vpop.f32.mrf.mxu1  ;;  %v12433_v15 = vpop.f32.mrf.mxu0  ;;  %v12443_v10 = vsel %vm2645_vm3, %v2766_v60, %v2767_v42  ;;  %v15892_v60 = vld [vmem:[#allocation80_spill] sm:$0xff] }
 0x15b   : > { %15881 = vst [vmem:[#allocation256_spill] sm:$0xff] %v12431_v48  ;;  %15882 = vst [vmem:[#allocation257_spill] sm:$0xff] %v12433_v15  ;;  %v15889_v48 = vld [vmem:[#allocation74_spill] sm:$0xff]  ;;  %v2771_v49 = vrot.slane %v15892_v60, 1 }
 0x15c   : > { %v12438_v57 = vpop.f32.mrf.mxu1  ;;  %v12440_v2 = vpop.f32.mrf.mxu0  ;;  %15886 = vst [vmem:[#allocation261_spill] sm:$0xff] %v12443_v10  ;;  %v2769_v26 = vrot.slane %v15889_v48, 1 }
 0x15d   : > { %15884 = vst [vmem:[#allocation259_spill] sm:$0xff] %v12438_v57  ;;  %15885 = vst [vmem:[#allocation260_spill] sm:$0xff] %v12440_v2 }
 0x15e   : > { %v12445_v17 = vpop.f32.mrf.mxu1  ;;  %v12447_v5 = vpop.f32.mrf.mxu0  ;;  %9878 = vmatmul.mubr.msk.bf16.gmra.mxu0 %vm1131_vm2, %v12436_v50  ;;  %v12469_v48 = vsel %vm2645_vm3, %v2767_v42, %v2769_v26 }
 0x15f   : > { %15887 = vst [vmem:[#allocation262_spill] sm:$0xff] %v12445_v17  ;;  %15888 = vst [vmem:[#allocation263_spill] sm:$0xff] %v12447_v5  ;;  %9881 = vmatprep.mubr.msk.bf16.mxu0 %vm1131_vm2, %v12443_v10  ;;  %v15893_v17 = vld [vmem:[#allocation81_spill] sm:$0xff] }
 0x160   : > { %v12454_v23 = vpop.f32.mrf.mxu1  ;;  %9748 = vmatmul.mubr.msk.bf16.gmra.mxu1 %vm1131_vm2, %v15867_v30  ;;  %v12458_v57 = vpop.f32.mrf.mxu0  ;;  %v2772_v2 = vrot.slane %v15893_v17, 1  ;;  %15896 = vst [vmem:[#allocation266_spill] sm:$0xff] %v12469_v48 }
 0x161   : > { %15890 = vst [vmem:[#allocation74_spill] sm:$0xff] %v12454_v23  ;;  %15891 = vst [vmem:[#allocation264_spill] sm:$0xff] %v12458_v57  ;;  %9751 = vmatprep.mubr.msk.bf16.mxu1 %vm1131_vm2, %v15879_v61 }
 0x162   : > { %v12464_v50 = vpop.f32.mrf.mxu1  ;;  %v12466_v5 = vpop.f32.mrf.mxu0  ;;  %v12476_v30 = vsel %vm2645_vm3, %v2771_v49, %v2772_v2  ;;  %v15903_v49 = vld [vmem:[#allocation90_spill] sm:$0xff] }
 0x163   : > { %15894 = vst [vmem:[#allocation81_spill] sm:$0xff] %v12464_v50  ;;  %15895 = vst [vmem:[#allocation265_spill] sm:$0xff] %v12466_v5  ;;  %v15901_v50 = vld [vmem:[#allocation83_spill] sm:$0xff]  ;;  %v2777_v5 = vrot.slane %v15903_v49, 1 }
 0x164   : > { %v12471_v10 = vpop.f32.mrf.mxu1  ;;  %v12473_v23 = vpop.f32.mrf.mxu0  ;;  %15899 = vst [vmem:[#allocation269_spill] sm:$0xff] %v12476_v30  ;;  %v2774_v61 = vrot.slane %v15901_v50, 1 }
 0x165   : > { %15897 = vst [vmem:[#allocation267_spill] sm:$0xff] %v12471_v10  ;;  %15898 = vst [vmem:[#allocation268_spill] sm:$0xff] %v12473_v23  ;;  %v15902_v10 = vld [vmem:[#allocation88_spill] sm:$0xff] }
 0x166   : > { %v12478_v57 = vpop.f32.mrf.mxu1  ;;  %v9787_v15 = vpop.f32.mrf.mxu0  ;;  %9882 = vmatmul.mubr.msk.bf16.gmra.mxu0 %vm1131_vm2, %v12469_v48  ;;  %v2776_v23 = vrot.slane %v15902_v10, 1 }
 0x167   : > { %15900 = vst [vmem:[#allocation270_spill] sm:$0xff] %v12478_v57  ;;  %9885 = vmatprep.mubr.msk.bf16.mxu0 %vm1131_vm2, %v12476_v30  ;;  %v12496_v30 = vsel %vm2645_vm3, %v2772_v2, %v2774_v61 }
 0x168   : > { %v9657_v42 = vpop.f32.mrf.mxu1  ;;  %9752 = vmatmul.mubr.msk.bf16.gmra.mxu1 %vm1131_vm2, %v15880_v22  ;;  %v3037_v26 = vpop.f32.mrf.mxu0  ;;  %15904 = vst [vmem:[#allocation83_spill] sm:$0xff] %v12496_v30  ;;  %v12499_v39 = vsel %vm2645_vm3, %v2776_v23, %v2777_v5 }
 0x169   : > { %v2047_v57 = vadd.f32 %v9657_v42, %v11938_v20  ;;  %9755 = vmatprep.mubr.msk.bf16.mxu1 %vm1131_vm2, %v15892_v60  ;;  %15905 = vst [vmem:[#allocation88_spill] sm:$0xff] %v12499_v39 }
 0x16a   : > { %v2038_v48 = vpop.f32.mrf.mxu1  ;;  %v9788_v7 = vpop.f32.mrf.mxu0 }
 0x16b   : > { %v12492_v0 = vadd.f32 %v9787_v15, %v2047_v57  ;;  %v2039_v50 = vadd.f32 %v2038_v48, %v11949_v6  ;;  %v15908_v15 = vld [vmem:[#allocation92_spill] sm:$0xff]  ;;  %v15910_v48 = vld [vmem:[#allocation99_spill] sm:$0xff] }
 0x16c   : > { %v9658_v22 = vpop.f32.mrf.mxu1  ;;  %v3040_v31 = vpop.f32.mrf.mxu0  ;;  %v2779_v2 = vrot.slane %v15908_v15, 1 }
 0x16d   : > { %v12501_v18 = vadd.f32 %v3037_v26, %v2039_v50  ;;  %v2050_v20 = vadd.f32 %v9658_v22, %v11957_v37  ;;  %v15909_v37 = vld [vmem:[#allocation98_spill] sm:$0xff]  ;;  %v2782_v26 = vrot.slane %v15910_v48, 1 }
 0x16e   : > { %v2041_v42 = vpop.f32.mrf.mxu1  ;;  %v9791_v60 = vpop.f32.mrf.mxu0  ;;  %9886 = vmatmul.mubr.msk.bf16.gmra.mxu0 %vm1131_vm2, %v12496_v30  ;;  %v2781_v22 = vrot.slane %v15909_v37, 1 }
 0x16f   : > { %15906 = vst [vmem:[#allocation90_spill] sm:$0xff] %v12501_v18  ;;  %v12506_v57 = vadd.f32 %v9788_v7, %v2050_v20  ;;  %v2042_v6 = vadd.f32 %v2041_v42, %v11964_v55  ;;  %9889 = vmatprep.mubr.msk.bf16.mxu0 %vm1131_vm2, %v12499_v39  ;;  %v12525_v39 = vsel %vm2645_vm3, %v2777_v5, %v2779_v2  ;;  %v15915_v5 = vld [vmem:[#allocation102_spill] sm:$0xff] }
 0x170   : > { %v9661_v61 = vpop.f32.mrf.mxu1  ;;  %9756 = vmatmul.mubr.msk.bf16.gmra.mxu1 %vm1131_vm2, %v15893_v17  ;;  %v3053_v23 = vpop.f32.mrf.mxu0  ;;  %15911 = vst [vmem:[#allocation92_spill] sm:$0xff] %v12525_v39  ;;  %v12528_v18 = vsel %vm2645_vm3, %v2781_v22, %v2782_v26  ;;  %v2784_v2 = vrot.slane %v15915_v5, 1 }
 0x171   : > { %15907 = vst [vmem:[#allocation271_spill] sm:$0xff] %v12506_v57  ;;  %v12516_v50 = vadd.f32 %v3040_v31, %v2042_v6  ;;  %v2063_v7 = vadd.f32 %v9661_v61, %v11971_v38  ;;  %9759 = vmatprep.mubr.msk.bf16.mxu1 %vm1131_vm2, %v15902_v10  ;;  %15912 = vst [vmem:[#allocation98_spill] sm:$0xff] %v12528_v18 }
 0x172   : > { %v2054_v55 = vpop.f32.mrf.mxu1  ;;  %v9792_v20 = vpop.f32.mrf.mxu0 }
 0x173   : > { %v12521_v42 = vadd.f32 %v9791_v60, %v2063_v7  ;;  %v2055_v15 = vadd.f32 %v2054_v55, %v11982_v59  ;;  %v15917_v7 = vld [vmem:[#allocation109_spill] sm:$0xff] }
 0x174   : > { %v9662_v30 = vpop.f32.mrf.mxu1  ;;  %v3056_v57 = vpop.f32.mrf.mxu0  ;;  %v2787_v55 = vrot.slane %v15917_v7, 1 }
 0x175   : > { %v12530_v31 = vadd.f32 %v3053_v23, %v2055_v15  ;;  %v2066_v38 = vadd.f32 %v9662_v30, %v11990_v4  ;;  %v15916_v30 = vld [vmem:[#allocation107_spill] sm:$0xff] }
 0x176   : > { %v2057_v6 = vpop.f32.mrf.mxu1  ;;  %v9795_v61 = vpop.f32.mrf.mxu0  ;;  %9890 = vmatmul.mubr.msk.bf16.gmra.mxu0 %vm1131_vm2, %v12525_v39  ;;  %v2786_v4 = vrot.slane %v15916_v30, 1 }
 0x177   : > { %15913 = vst [vmem:[#allocation99_spill] sm:$0xff] %v12530_v31  ;;  %v12535_v60 = vadd.f32 %v9792_v20, %v2066_v38  ;;  %v2058_v59 = vadd.f32 %v2057_v6, %v11997_v29  ;;  %9893 = vmatprep.mubr.msk.bf16.mxu0 %vm1131_vm2, %v12528_v18  ;;  %v12554_v18 = vsel %vm2645_vm3, %v2782_v26, %v2784_v2  ;;  %v15922_v26 = vld [vmem:[#allocation112_spill] sm:$0xff] }
 0x178   : > { %v9665_v22 = vpop.f32.mrf.mxu1  ;;  %9760 = vmatmul.mubr.msk.bf16.gmra.mxu1 %vm1131_vm2, %v15903_v49  ;;  %v3069_v23 = vpop.f32.mrf.mxu0  ;;  %15918 = vst [vmem:[#allocation102_spill] sm:$0xff] %v12554_v18  ;;  %v12557_v31 = vsel %vm2645_vm3, %v2786_v4, %v2787_v55  ;;  %v2789_v2 = vrot.slane %v15922_v26, 1 }
 0x179   : > { %15914 = vst [vmem:[#allocation272_spill] sm:$0xff] %v12535_v60  ;;  %v12545_v15 = vadd.f32 %v3056_v57, %v2058_v59  ;;  %v2079_v20 = vadd.f32 %v9665_v22, %v12004_v35  ;;  %9763 = vmatprep.mubr.msk.bf16.mxu1 %vm1131_vm2, %v15909_v37  ;;  %15919 = vst [vmem:[#allocation107_spill] sm:$0xff] %v12557_v31 }
 0x17a   : > { %v2070_v29 = vpop.f32.mrf.mxu1  ;;  %v9796_v38 = vpop.f32.mrf.mxu0 }
 0x17b   : > { %v12550_v6 = vadd.f32 %v9795_v61, %v2079_v20  ;;  %v2071_v5 = vadd.f32 %v2070_v29, %v12015_v34  ;;  %v15924_v20 = vld [vmem:[#allocation118_spill] sm:$0xff] }
 0x17c   : > { %v9666_v39 = vpop.f32.mrf.mxu1  ;;  %v3072_v60 = vpop.f32.mrf.mxu0  ;;  %v2792_v29 = vrot.slane %v15924_v20, 1 }
 0x17d   : > { %v12559_v57 = vadd.f32 %v3069_v23, %v2071_v5  ;;  %v2082_v35 = vadd.f32 %v9666_v39, %v12023_v44  ;;  %v15923_v39 = vld [vmem:[#allocation117_spill] sm:$0xff] }
 0x17e   : > { %v2073_v59 = vpop.f32.mrf.mxu1  ;;  %v9799_v22 = vpop.f32.mrf.mxu0  ;;  %9894 = vmatmul.mubr.msk.bf16.gmra.mxu0 %vm1131_vm2, %v12554_v18  ;;  %v2791_v44 = vrot.slane %v15923_v39, 1 }
 0x17f   : > { %15920 = vst [vmem:[#allocation109_spill] sm:$0xff] %v12559_v57  ;;  %v12564_v61 = vadd.f32 %v9796_v38, %v2082_v35  ;;  %v2074_v34 = vadd.f32 %v2073_v59, %v12030_v62  ;;  %9897 = vmatprep.mubr.msk.bf16.mxu0 %vm1131_vm2, %v12557_v31  ;;  %v12583_v31 = vsel %vm2645_vm3, %v2787_v55, %v2789_v2  ;;  %v15928_v55 = vld [vmem:[#allocation121_spill] sm:$0xff] }
 0x180   : > { %v9669_v4 = vpop.f32.mrf.mxu1  ;;  %9764 = vmatmul.mubr.msk.bf16.gmra.mxu1 %vm1131_vm2, %v15910_v48  ;;  %v3085_v23 = vpop.f32.mrf.mxu0  ;;  %15925 = vst [vmem:[#allocation112_spill] sm:$0xff] %v12583_v31  ;;  %v12586_v57 = vsel %vm2645_vm3, %v2791_v44, %v2792_v29  ;;  %v2794_v2 = vrot.slane %v15928_v55, 1 }
 0x181   : > { %15921 = vst [vmem:[#allocation273_spill] sm:$0xff] %v12564_v61  ;;  %v12574_v5 = vadd.f32 %v3072_v60, %v2074_v34  ;;  %v2095_v38 = vadd.f32 %v9669_v4, %v12037_v32  ;;  %9767 = vmatprep.mubr.msk.bf16.mxu1 %vm1131_vm2, %v15916_v30  ;;  %15926 = vst [vmem:[#allocation118_spill] sm:$0xff] %v12586_v57 }
 0x182   : > { %v2086_v62 = vpop.f32.mrf.mxu1  ;;  %v9800_v35 = vpop.f32.mrf.mxu0  ;;  %v12612_v55 = vsel %vm2645_vm3, %v2792_v29, %v2794_v2  ;;  %v15932_v29 = vld [vmem:[#allocation129_spill] sm:$0xff] }
 0x183   : > { %v12579_v59 = vadd.f32 %v9799_v22, %v2095_v38  ;;  %v2087_v26 = vadd.f32 %v2086_v62, %v12048_v25  ;;  %v2797_v38 = vrot.slane %v11686_v9, 1  ;;  %15930 = vst [vmem:[#allocation121_spill] sm:$0xff] %v12612_v55  ;;  %v2799_v2 = vrot.slane %v15932_v29, 1 }
 0x184   : > { %v9670_v18 = vpop.f32.mrf.mxu1  ;;  %v3088_v61 = vpop.f32.mrf.mxu0 }
 0x185   : > { %v12588_v60 = vadd.f32 %v3085_v23, %v2087_v26  ;;  %v2098_v32 = vadd.f32 %v9670_v18, %v12056_v16  ;;  %v15929_v16 = vld [vmem:[#allocation126_spill] sm:$0xff] }
 0x186   : > { %v2089_v34 = vpop.f32.mrf.mxu1  ;;  %v9803_v4 = vpop.f32.mrf.mxu0  ;;  %9898 = vmatmul.mubr.msk.bf16.gmra.mxu0 %vm1131_vm2, %v12583_v31  ;;  %v2796_v18 = vrot.slane %v15929_v16, 1 }
 0x187   : > { %v12593_v22 = vadd.f32 %v9800_v35, %v2098_v32  ;;  %v2090_v25 = vadd.f32 %v2089_v34, %v12063_v13  ;;  %9901 = vmatprep.mubr.msk.bf16.mxu0 %vm1131_vm2, %v12586_v57 }
 0x188   : > { %v9673_v44 = vpop.f32.mrf.mxu1  ;;  %9768 = vmatmul.mubr.msk.bf16.gmra.mxu1 %vm1131_vm2, %v15917_v7  ;;  %v3101_v23 = vpop.f32.mrf.mxu0 }
 0x189   : > { %15927 = vst [vmem:[#allocation274_spill] sm:$0xff] %v12593_v22  ;;  %v12603_v62 = vadd.f32 %v3088_v61, %v2090_v25  ;;  %v2111_v35 = vadd.f32 %v9673_v44, %v12070_v14  ;;  %9771 = vmatprep.mubr.msk.bf16.mxu1 %vm1131_vm2, %v15923_v39  ;;  %v12615_v22 = vsel %vm2645_vm3, %v2796_v18, %v2797_v38 }
 0x18a   : > { %v2102_v13 = vpop.f32.mrf.mxu1  ;;  %v9804_v26 = vpop.f32.mrf.mxu0  ;;  %15931 = vst [vmem:[#allocation126_spill] sm:$0xff] %v12615_v22 }
 0x18b   : > { %v12608_v32 = vadd.f32 %v9803_v4, %v2111_v35  ;;  %v2103_v34 = vadd.f32 %v2102_v13, %v12081_v36 }
 0x18c   : > { %v9674_v57 = vpop.f32.mrf.mxu1  ;;  %v3104_v31 = vpop.f32.mrf.mxu0 }
 0x18d   : > { %v12617_v61 = vadd.f32 %v3101_v23, %v2103_v34  ;;  %v2114_v14 = vadd.f32 %v9674_v57, %v12089_v11  ;;  %v2801_v11 = vrot.slane %v11733_v45, 1  ;;  %v2802_v57 = vrot.slane %v11738_v33, 1 }
 0x18e   : > { %v2105_v25 = vpop.f32.mrf.mxu1  ;;  %v9807_v44 = vpop.f32.mrf.mxu0  ;;  %9902 = vmatmul.mubr.msk.bf16.gmra.mxu0 %vm1131_vm2, %v12612_v55 }
 0x18f   : > { %v12622_v4 = vadd.f32 %v9804_v26, %v2114_v14  ;;  %v2106_v36 = vadd.f32 %v2105_v25, %v12096_v8  ;;  %9905 = vmatprep.mubr.msk.bf16.mxu0 %vm1131_vm2, %v12615_v22  ;;  %v12641_v25 = vsel %vm2645_vm3, %v2797_v38, %v2799_v2  ;;  %v12644_v55 = vsel %vm2645_vm3, %v2801_v11, %v2802_v57 }
 0x190   : > { %v9677_v18 = vpop.f32.mrf.mxu1  ;;  %9772 = vmatmul.mubr.msk.bf16.gmra.mxu1 %vm1131_vm2, %v15924_v20  ;;  %v3117_v23 = vpop.f32.mrf.mxu0  ;;  %15933 = vst [vmem:[#allocation129_spill] sm:$0xff] %v12641_v25  ;;  %15934 = vst [vmem:[#allocation275_spill] sm:$0xff] %v12644_v55  ;;  %v2804_v38 = vrot.slane %v11750_v3, 1 }
 0x191   : > { %v12632_v35 = vadd.f32 %v3104_v31, %v2106_v36  ;;  %v2127_v13 = vadd.f32 %v9677_v18, %v12103_v24  ;;  %9775 = vmatprep.mubr.msk.bf16.mxu1 %vm1131_vm2, %v15929_v16 }
 0x192   : > { %v2118_v8 = vpop.f32.mrf.mxu1  ;;  %v9808_v26 = vpop.f32.mrf.mxu0  ;;  %v12668_v3 = vsel %vm2645_vm3, %v2802_v57, %v2804_v38 }
 0x193   : > { %v12637_v34 = vadd.f32 %v9807_v44, %v2127_v13  ;;  %v2119_v14 = vadd.f32 %v2118_v8, %v12114_v63  ;;  %15935 = vst [vmem:[#allocation276_spill] sm:$0xff] %v12668_v3 }
 0x194   : > { %v9678_v29 = vpop.f32.mrf.mxu1  ;;  %v3120_v22 = vpop.f32.mrf.mxu0 }
 0x195   : > { %v12646_v31 = vadd.f32 %v3117_v23, %v2119_v14  ;;  %v2130_v24 = vadd.f32 %v9678_v29, %v12122_v21 }
 0x196   : > { %v2121_v36 = vpop.f32.mrf.mxu1  ;;  %v9811_v18 = vpop.f32.mrf.mxu0  ;;  %9906 = vmatmul.mubr.msk.bf16.gmra.mxu0 %vm1131_vm2, %v12641_v25 }
 0x197   : > { %v12651_v44 = vadd.f32 %v9808_v26, %v2130_v24  ;;  %v2122_v63 = vadd.f32 %v2121_v36, %v12129_v51  ;;  %9909 = vmatprep.mubr.msk.bf16.mxu0 %vm1131_vm2, %v12644_v55 }
 0x198   : > { %v9681_v2 = vpop.f32.mrf.mxu1  ;;  %9776 = vmatmul.mubr.msk.bf16.gmra.mxu1 %vm1131_vm2, %v11686_v9  ;;  %v3133_v23 = vpop.f32.mrf.mxu0 }
 0x199   : > { %v12659_v21 = vadd.f32 %v3120_v22, %v2122_v63  ;;  %v2143_v11 = vadd.f32 %v9681_v2, %v12136_v28  ;;  %9779 = vmatprep.mubr.msk.bf16.mxu1 %vm1131_vm2, %v11733_v45  ;;  %v15936_v2 = vld [vmem:[#allocation13_spill] sm:$0xff] }
 0x19a   : > { %v2134_v13 = vpop.f32.mrf.mxu1  ;;  %v9812_v8 = vpop.f32.mrf.mxu0 }
 0x19b   : > { %v12664_v51 = vadd.f32 %v9811_v18, %v2143_v11  ;;  %v2135_v26 = vadd.f32 %v2134_v13, %v12147_v19 }
 0x19c   : > { %v9682_v14 = vpop.f32.mrf.mxu1  ;;  %v3136_v29 = vpop.f32.mrf.mxu0 }
 0x19d   : > { %v12670_v24 = vadd.f32 %v3133_v23, %v2135_v26  ;;  %v2146_v22 = vadd.f32 %v9682_v14, %v12155_v54  ;;  %v5763_v14 = vsel %vm1324_vm0, %v12236_v58, 0 }
 0x19e   : > { %v2137_v36 = vpop.f32.mrf.mxu1  ;;  %v9815_v28 = vpop.f32.mrf.mxu0  ;;  %9910 = vmatmul.mubr.msk.bf16.gmra.mxu0 %vm1131_vm2, %v12668_v3 }
 0x19f   : > { %v12675_v63 = vadd.f32 %v9812_v8, %v2146_v22  ;;  %v2138_v18 = vadd.f32 %v2137_v36, %v12162_v53  ;;  %10045 = vmatprep.mubr.msk.bf16.mxu0 %vm1131_vm2, %v15936_v2  ;;  %v15938_v2 = vld [vmem:[#allocation22_spill] sm:$0xff] }
 0x1a0   : > { %v9685_v19 = vpop.f32.mrf.mxu1  ;;  %9780 = vmatmul.mubr.msk.bf16.gmra.mxu1 %vm1131_vm2, %v11738_v33  ;;  %v3149_v57 = vpop.f32.mrf.mxu0 }
 0x1a1   : > { %v12682_v38 = vadd.f32 %v3136_v29, %v2138_v18  ;;  %v2159_v54 = vadd.f32 %v9685_v19, %v12169_v40  ;;  %9915 = vmatprep.mubr.msk.bf16.mxu1 %vm1131_vm2, %v10980_v41  ;;  %v15937_v18 = vld [vmem:[#allocation16_spill] sm:$0xff]  ;;  %v5079_v41 = vsel %vm1324_vm0, %v12222_v56, 0 }
 0x1a2   : > { %v2150_v23 = vpop.f32.mrf.mxu1  ;;  %v9816_v11 = vpop.f32.mrf.mxu0 }
 0x1a3   : > { %v12687_v13 = vadd.f32 %v9815_v28, %v2159_v54  ;;  %v2151_v53 = vadd.f32 %v2150_v23, %v12180_v1 }
 0x1a4   : > { %v9686_v8 = vpop.f32.mrf.mxu1  ;;  %v3152_v26 = vpop.f32.mrf.mxu0 }
 0x1a5   : > { %v12692_v22 = vadd.f32 %v3149_v57, %v2151_v53  ;;  %v2162_v29 = vadd.f32 %v9686_v8, %v12188_v43 }
 0x1a6   : > { %v2153_v36 = vpop.f32.mrf.mxu1  ;;  %v9819_v40 = vpop.f32.mrf.mxu0  ;;  %10046 = vmatmul.mubr.msk.bf16.vlgmr.msra.gmra.mxu0 %vm1131_vm2, %v15937_v18  ;;  %v15943_v18 = vld [vmem:[#allocation206_spill] sm:$0xff] }
 0x1a7   : > { %v12699_v28 = vadd.f32 %v9816_v11, %v2162_v29  ;;  %v2154_v1 = vadd.f32 %v2153_v36, %v12195_v52  ;;  %10304 = vmatpush3.bf16.msra.mxu0 %v5763_v14  ;;  %10049 = vmatprep.mubr.msk.bf16.mxu0 %vm1131_vm2, %v15938_v2  ;;  %v15941_v36 = vld [vmem:[#allocation26_spill] sm:$0xff]  ;;  %v15952_v2 = vld [vmem:[#allocation212_spill] sm:$0xff] }
 0x1a8   : > { %v9689_v58 = vpop.f32.mrf.mxu1  ;;  %9916 = vmatmul.mubr.msk.bf16.vlgmr.msra.gmra.mxu1 %vm1131_vm2, %v10985_v47  ;;  %v3165_v43 = vpop.f32.mrf.mxu0  ;;  %v15940_v47 = vld [vmem:[#allocation203_spill] sm:$0xff] }
 0x1a9   : > { %v12706_v19 = vadd.f32 %v3152_v26, %v2154_v1  ;;  %v2175_v57 = vadd.f32 %v9689_v58, %v12202_v12  ;;  %10174 = vmatpush3.bf16.msra.mxu1 %v5079_v41  ;;  %9919 = vmatprep.mubr.msk.bf16.mxu1 %vm1131_vm2, %v11033_v27  ;;  %v15944_v1 = vld [vmem:[#allocation31_spill] sm:$0xff] }
 0x1aa   : > { %v2166_v56 = vpop.f32.mrf.mxu1  ;;  %v9820_v54 = vpop.f32.mrf.mxu0 }
 0x1ab   : > { %v12711_v52 = vadd.f32 %v9819_v40, %v2175_v57  ;;  %v2167_v23 = vadd.f32 %v2166_v56, %v12213_v46  ;;  %v15945_v46 = vld [vmem:[#allocation14_spill] sm:$0xff]  ;;  %v15947_v57 = vld [vmem:[#allocation209_spill] sm:$0xff] }
 0x1ac   : > { %v9690_v11 = vpop.f32.mrf.mxu1  ;;  %v3168_v53 = vpop.f32.mrf.mxu0 }
 0x1ad   : > { %v12714_v8 = vadd.f32 %v3165_v43, %v2167_v23  ;;  %v2178_v14 = vadd.f32 %v9690_v11, %v15940_v47  ;;  %v15948_v23 = vld [vmem:[#allocation21_spill] sm:$0xff] }
 0x1ae   : > { %v2169_v26 = vpop.f32.mrf.mxu1  ;;  %v9823_v29 = vpop.f32.mrf.mxu0  ;;  %10050 = vmatmul.mubr.msk.bf16.gmra.mxu0 %vm1131_vm2, %v15941_v36 }
 0x1af   : > { %15939 = vst [vmem:[#allocation13_spill] sm:$0xff] %v12714_v8  ;;  %v12719_v12 = vadd.f32 %v9820_v54, %v2178_v14  ;;  %v2170_v41 = vadd.f32 %v2169_v26, %v15943_v18  ;;  %10053 = vmatprep.mubr.msk.bf16.mxu0 %vm1131_vm2, %v15944_v1  ;;  %v15950_v14 = vld [vmem:[#allocation210_spill] sm:$0xff] }
 0x1b0   : > { %v9693_v40 = vpop.f32.mrf.mxu1  ;;  %9920 = vmatmul.mubr.msk.bf16.gmra.mxu1 %vm1131_vm2, %v15945_v46  ;;  %v3181_v58 = vpop.f32.mrf.mxu0 }
 0x1b1   : > { %15942 = vst [vmem:[#allocation16_spill] sm:$0xff] %v12719_v12  ;;  %v12726_v43 = vadd.f32 %v3168_v53, %v2170_v41  ;;  %v2191_v56 = vadd.f32 %v9693_v40, %v15947_v57  ;;  %9923 = vmatprep.mubr.msk.bf16.mxu1 %vm1131_vm2, %v15948_v23  ;;  %v15953_v41 = vld [vmem:[#allocation33_spill] sm:$0xff]  ;;  %v15955_v57 = vld [vmem:[#allocation215_spill] sm:$0xff]  ;;  %v16144_v12 = vld [vmem:[#allocation214_spill] sm:$0xff] }
 0x1b2   : > { %v2182_v11 = vpop.f32.mrf.mxu1  ;;  %v9824_v54 = vpop.f32.mrf.mxu0 }
 0x1b3   : > { %15946 = vst [vmem:[#allocation203_spill] sm:$0xff] %v12726_v43  ;;  %v12731_v47 = vadd.f32 %v9823_v29, %v2191_v56  ;;  %v2183_v26 = vadd.f32 %v2182_v11, %v15950_v14  ;;  %v15956_v43 = vld [vmem:[#allocation40_spill] sm:$0xff]  ;;  %v15957_v56 = vld [vmem:[#allocation23_spill] sm:$0xff] }
 0x1b4   : > { %v9694_v18 = vpop.f32.mrf.mxu1  ;;  %v3184_v1 = vpop.f32.mrf.mxu0 }
 0x1b5   : > { %15949 = vst [vmem:[#allocation206_spill] sm:$0xff] %v12731_v47  ;;  %v12734_v36 = vadd.f32 %v3181_v58, %v2183_v26  ;;  %v2194_v3 = vadd.f32 %v9694_v18, %v15952_v2  ;;  %v15959_v2 = vld [vmem:[#allocation218_spill] sm:$0xff] }
 0x1b6   : > { %v2185_v55 = vpop.f32.mrf.mxu1  ;;  %v9827_v53 = vpop.f32.mrf.mxu0  ;;  %10054 = vmatmul.mubr.msk.bf16.gmra.mxu0 %vm1131_vm2, %v15953_v41  ;;  %v15960_v26 = vld [vmem:[#allocation30_spill] sm:$0xff] }
 0x1b7   : > { %15951 = vst [vmem:[#allocation14_spill] sm:$0xff] %v12734_v36  ;;  %v12739_v40 = vadd.f32 %v9824_v54, %v2194_v3  ;;  %v2186_v25 = vadd.f32 %v2185_v55, %v15955_v57  ;;  %10057 = vmatprep.mubr.msk.bf16.mxu0 %vm1131_vm2, %v15956_v43  ;;  %v15962_v55 = vld [vmem:[#allocation219_spill] sm:$0xff]  ;;  %v15964_v36 = vld [vmem:[#allocation221_spill] sm:$0xff] }
 0x1b8   : > { %v9697_v29 = vpop.f32.mrf.mxu1  ;;  %9924 = vmatmul.mubr.msk.bf16.gmra.mxu1 %vm1131_vm2, %v15957_v56  ;;  %v3197_v58 = vpop.f32.mrf.mxu0 }
 0x1b9   : > { %15954 = vst [vmem:[#allocation209_spill] sm:$0xff] %v12739_v40  ;;  %v12746_v11 = vadd.f32 %v3184_v1, %v2186_v25  ;;  %v2207_v14 = vadd.f32 %v9697_v29, %v15959_v2  ;;  %9927 = vmatprep.mubr.msk.bf16.mxu1 %vm1131_vm2, %v15960_v26  ;;  %v15965_v1 = vld [vmem:[#allocation43_spill] sm:$0xff]  ;;  %v15967_v2 = vld [vmem:[#allocation224_spill] sm:$0xff]  ;;  %v15968_v26 = vld [vmem:[#allocation49_spill] sm:$0xff] }
 0x1ba   : > { %v2198_v18 = vpop.f32.mrf.mxu1  ;;  %v9828_v3 = vpop.f32.mrf.mxu0 }
 0x1bb   : > { %15958 = vst [vmem:[#allocation21_spill] sm:$0xff] %v12746_v11  ;;  %v12751_v54 = vadd.f32 %v9827_v53, %v2207_v14  ;;  %v2199_v57 = vadd.f32 %v2198_v18, %v15962_v55  ;;  %v15969_v14 = vld [vmem:[#allocation32_spill] sm:$0xff]  ;;  %v15972_v55 = vld [vmem:[#allocation39_spill] sm:$0xff] }
 0x1bc   : > { %v9698_v41 = vpop.f32.mrf.mxu1  ;;  %v3200_v43 = vpop.f32.mrf.mxu0 }
 0x1bd   : > { %15961 = vst [vmem:[#allocation210_spill] sm:$0xff] %v12751_v54  ;;  %v12754_v40 = vadd.f32 %v3197_v58, %v2199_v57  ;;  %v2210_v47 = vadd.f32 %v9698_v41, %v15964_v36  ;;  %v15971_v36 = vld [vmem:[#allocation227_spill] sm:$0xff] }
 0x1be   : > { %v2201_v56 = vpop.f32.mrf.mxu1  ;;  %v9831_v25 = vpop.f32.mrf.mxu0  ;;  %10058 = vmatmul.mubr.msk.bf16.gmra.mxu0 %vm1131_vm2, %v15965_v1 }
 0x1bf   : > { %15963 = vst [vmem:[#allocation212_spill] sm:$0xff] %v12754_v40  ;;  %v12759_v29 = vadd.f32 %v9828_v3, %v2210_v47  ;;  %v2202_v11 = vadd.f32 %v2201_v56, %v15967_v2  ;;  %10061 = vmatprep.mubr.msk.bf16.mxu0 %vm1131_vm2, %v15968_v26  ;;  %v15974_v56 = vld [vmem:[#allocation228_spill] sm:$0xff]  ;;  %v15976_v40 = vld [vmem:[#allocation230_spill] sm:$0xff] }
 0x1c0   : > { %v9701_v53 = vpop.f32.mrf.mxu1  ;;  %9928 = vmatmul.mubr.msk.bf16.gmra.mxu1 %vm1131_vm2, %v15969_v14  ;;  %v3213_v58 = vpop.f32.mrf.mxu0 }
 0x1c1   : > { %15966 = vst [vmem:[#allocation215_spill] sm:$0xff] %v12759_v29  ;;  %v12766_v18 = vadd.f32 %v3200_v43, %v2202_v11  ;;  %v2223_v41 = vadd.f32 %v9701_v53, %v15971_v36  ;;  %9931 = vmatprep.mubr.msk.bf16.mxu1 %vm1131_vm2, %v15972_v55  ;;  %v15977_v11 = vld [vmem:[#allocation51_spill] sm:$0xff]  ;;  %v15979_v36 = vld [vmem:[#allocation233_spill] sm:$0xff]  ;;  %v15980_v55 = vld [vmem:[#allocation58_spill] sm:$0xff] }
 0x1c2   : > { %v2214_v57 = vpop.f32.mrf.mxu1  ;;  %v9832_v47 = vpop.f32.mrf.mxu0 }
 0x1c3   : > { %15970 = vst [vmem:[#allocation218_spill] sm:$0xff] %v12766_v18  ;;  %v12771_v3 = vadd.f32 %v9831_v25, %v2223_v41  ;;  %v2215_v2 = vadd.f32 %v2214_v57, %v15974_v56  ;;  %v15981_v41 = vld [vmem:[#allocation41_spill] sm:$0xff]  ;;  %v15984_v56 = vld [vmem:[#allocation48_spill] sm:$0xff] }
 0x1c4   : > { %v9702_v1 = vpop.f32.mrf.mxu1  ;;  %v3216_v26 = vpop.f32.mrf.mxu0 }
 0x1c5   : > { %15973 = vst [vmem:[#allocation219_spill] sm:$0xff] %v12771_v3  ;;  %v12774_v29 = vadd.f32 %v3213_v58, %v2215_v2  ;;  %v2226_v54 = vadd.f32 %v9702_v1, %v15976_v40  ;;  %v15983_v40 = vld [vmem:[#allocation236_spill] sm:$0xff] }
 0x1c6   : > { %v2217_v14 = vpop.f32.mrf.mxu1  ;;  %v9835_v43 = vpop.f32.mrf.mxu0  ;;  %10062 = vmatmul.mubr.msk.bf16.gmra.mxu0 %vm1131_vm2, %v15977_v11 }
 0x1c7   : > { %15975 = vst [vmem:[#allocation221_spill] sm:$0xff] %v12774_v29  ;;  %v12779_v53 = vadd.f32 %v9832_v47, %v2226_v54  ;;  %v2218_v18 = vadd.f32 %v2217_v14, %v15979_v36  ;;  %10065 = vmatprep.mubr.msk.bf16.mxu0 %vm1131_vm2, %v15980_v55  ;;  %v15986_v14 = vld [vmem:[#allocation237_spill] sm:$0xff]  ;;  %v15988_v29 = vld [vmem:[#allocation239_spill] sm:$0xff] }
 0x1c8   : > { %v9705_v25 = vpop.f32.mrf.mxu1  ;;  %9932 = vmatmul.mubr.msk.bf16.gmra.mxu1 %vm1131_vm2, %v15981_v41  ;;  %v3229_v58 = vpop.f32.mrf.mxu0 }
 0x1c9   : > { %15978 = vst [vmem:[#allocation224_spill] sm:$0xff] %v12779_v53  ;;  %v12786_v57 = vadd.f32 %v3216_v26, %v2218_v18  ;;  %v2239_v1 = vadd.f32 %v9705_v25, %v15983_v40  ;;  %9935 = vmatprep.mubr.msk.bf16.mxu1 %vm1131_vm2, %v15984_v56  ;;  %v15989_v18 = vld [vmem:[#allocation61_spill] sm:$0xff]  ;;  %v15991_v40 = vld [vmem:[#allocation242_spill] sm:$0xff]  ;;  %v15992_v56 = vld [vmem:[#allocation67_spill] sm:$0xff] }
 0x1ca   : > { %v2230_v2 = vpop.f32.mrf.mxu1  ;;  %v9836_v54 = vpop.f32.mrf.mxu0 }
 0x1cb   : > { %15982 = vst [vmem:[#allocation227_spill] sm:$0xff] %v12786_v57  ;;  %v12791_v47 = vadd.f32 %v9835_v43, %v2239_v1  ;;  %v2231_v36 = vadd.f32 %v2230_v2, %v15986_v14  ;;  %v15993_v1 = vld [vmem:[#allocation50_spill] sm:$0xff]  ;;  %v15996_v14 = vld [vmem:[#allocation57_spill] sm:$0xff] }
 0x1cc   : > { %v9706_v11 = vpop.f32.mrf.mxu1  ;;  %v3232_v55 = vpop.f32.mrf.mxu0 }
 0x1cd   : > { %15985 = vst [vmem:[#allocation228_spill] sm:$0xff] %v12791_v47  ;;  %v12794_v53 = vadd.f32 %v3229_v58, %v2231_v36  ;;  %v2242_v3 = vadd.f32 %v9706_v11, %v15988_v29  ;;  %v15995_v29 = vld [vmem:[#allocation245_spill] sm:$0xff] }
 0x1ce   : > { %v2233_v41 = vpop.f32.mrf.mxu1  ;;  %v9839_v26 = vpop.f32.mrf.mxu0  ;;  %10066 = vmatmul.mubr.msk.bf16.gmra.mxu0 %vm1131_vm2, %v15989_v18 }
 0x1cf   : > { %15987 = vst [vmem:[#allocation230_spill] sm:$0xff] %v12794_v53  ;;  %v12799_v25 = vadd.f32 %v9836_v54, %v2242_v3  ;;  %v2234_v57 = vadd.f32 %v2233_v41, %v15991_v40  ;;  %10069 = vmatprep.mubr.msk.bf16.mxu0 %vm1131_vm2, %v15992_v56  ;;  %v15998_v41 = vld [vmem:[#allocation246_spill] sm:$0xff]  ;;  %v16000_v53 = vld [vmem:[#allocation248_spill] sm:$0xff] }
 0x1d0   : > { %v9709_v43 = vpop.f32.mrf.mxu1  ;;  %9936 = vmatmul.mubr.msk.bf16.gmra.mxu1 %vm1131_vm2, %v15993_v1  ;;  %v3245_v58 = vpop.f32.mrf.mxu0 }
 0x1d1   : > { %15990 = vst [vmem:[#allocation233_spill] sm:$0xff] %v12799_v25  ;;  %v12806_v2 = vadd.f32 %v3232_v55, %v2234_v57  ;;  %v2255_v11 = vadd.f32 %v9709_v43, %v15995_v29  ;;  %9939 = vmatprep.mubr.msk.bf16.mxu1 %vm1131_vm2, %v15996_v14  ;;  %v16001_v57 = vld [vmem:[#allocation69_spill] sm:$0xff]  ;;  %v16003_v29 = vld [vmem:[#allocation251_spill] sm:$0xff]  ;;  %v16004_v14 = vld [vmem:[#allocation76_spill] sm:$0xff] }
 0x1d2   : > { %v2246_v36 = vpop.f32.mrf.mxu1  ;;  %v9840_v3 = vpop.f32.mrf.mxu0 }
 0x1d3   : > { %15994 = vst [vmem:[#allocation236_spill] sm:$0xff] %v12806_v2  ;;  %v12811_v54 = vadd.f32 %v9839_v26, %v2255_v11  ;;  %v2247_v40 = vadd.f32 %v2246_v36, %v15998_v41  ;;  %v16005_v11 = vld [vmem:[#allocation59_spill] sm:$0xff]  ;;  %v16008_v41 = vld [vmem:[#allocation66_spill] sm:$0xff] }
 0x1d4   : > { %v9710_v18 = vpop.f32.mrf.mxu1  ;;  %v3248_v56 = vpop.f32.mrf.mxu0 }
 0x1d5   : > { %15997 = vst [vmem:[#allocation237_spill] sm:$0xff] %v12811_v54  ;;  %v12814_v25 = vadd.f32 %v3245_v58, %v2247_v40  ;;  %v2258_v47 = vadd.f32 %v9710_v18, %v16000_v53  ;;  %v16007_v53 = vld [vmem:[#allocation254_spill] sm:$0xff] }
 0x1d6   : > { %v2249_v1 = vpop.f32.mrf.mxu1  ;;  %v9843_v55 = vpop.f32.mrf.mxu0  ;;  %10070 = vmatmul.mubr.msk.bf16.gmra.mxu0 %vm1131_vm2, %v16001_v57 }
 0x1d7   : > { %15999 = vst [vmem:[#allocation239_spill] sm:$0xff] %v12814_v25  ;;  %v12819_v43 = vadd.f32 %v9840_v3, %v2258_v47  ;;  %v2250_v2 = vadd.f32 %v2249_v1, %v16003_v29  ;;  %10073 = vmatprep.mubr.msk.bf16.mxu0 %vm1131_vm2, %v16004_v14  ;;  %v16010_v1 = vld [vmem:[#allocation255_spill] sm:$0xff]  ;;  %v16012_v25 = vld [vmem:[#allocation257_spill] sm:$0xff] }
 0x1d8   : > { %v9713_v26 = vpop.f32.mrf.mxu1  ;;  %9940 = vmatmul.mubr.msk.bf16.gmra.mxu1 %vm1131_vm2, %v16005_v11  ;;  %v3261_v58 = vpop.f32.mrf.mxu0 }
 0x1d9   : > { %16002 = vst [vmem:[#allocation242_spill] sm:$0xff] %v12819_v43  ;;  %v12826_v36 = vadd.f32 %v3248_v56, %v2250_v2  ;;  %v2271_v18 = vadd.f32 %v9713_v26, %v16007_v53  ;;  %9943 = vmatprep.mubr.msk.bf16.mxu1 %vm1131_vm2, %v16008_v41  ;;  %v16013_v2 = vld [vmem:[#allocation79_spill] sm:$0xff]  ;;  %v16015_v53 = vld [vmem:[#allocation260_spill] sm:$0xff]  ;;  %v16016_v41 = vld [vmem:[#allocation85_spill] sm:$0xff] }
 0x1da   : > { %v2262_v40 = vpop.f32.mrf.mxu1  ;;  %v9844_v47 = vpop.f32.mrf.mxu0 }
 0x1db   : > { %16006 = vst [vmem:[#allocation245_spill] sm:$0xff] %v12826_v36  ;;  %v12831_v3 = vadd.f32 %v9843_v55, %v2271_v18  ;;  %v2263_v29 = vadd.f32 %v2262_v40, %v16010_v1  ;;  %v16017_v18 = vld [vmem:[#allocation68_spill] sm:$0xff]  ;;  %v16020_v1 = vld [vmem:[#allocation75_spill] sm:$0xff] }
 0x1dc   : > { %v9714_v57 = vpop.f32.mrf.mxu1  ;;  %v3264_v14 = vpop.f32.mrf.mxu0 }
 0x1dd   : > { %16009 = vst [vmem:[#allocation246_spill] sm:$0xff] %v12831_v3  ;;  %v12834_v43 = vadd.f32 %v3261_v58, %v2263_v29  ;;  %v2274_v54 = vadd.f32 %v9714_v57, %v16012_v25  ;;  %v16019_v25 = vld [vmem:[#allocation263_spill] sm:$0xff] }
 0x1de   : > { %v2265_v11 = vpop.f32.mrf.mxu1  ;;  %v9847_v56 = vpop.f32.mrf.mxu0  ;;  %10074 = vmatmul.mubr.msk.bf16.gmra.mxu0 %vm1131_vm2, %v16013_v2 }
 0x1df   : > { %16011 = vst [vmem:[#allocation248_spill] sm:$0xff] %v12834_v43  ;;  %v12839_v26 = vadd.f32 %v9844_v47, %v2274_v54  ;;  %v2266_v36 = vadd.f32 %v2265_v11, %v16015_v53  ;;  %10077 = vmatprep.mubr.msk.bf16.mxu0 %vm1131_vm2, %v16016_v41  ;;  %v16022_v11 = vld [vmem:[#allocation264_spill] sm:$0xff]  ;;  %v16024_v43 = vld [vmem:[#allocation265_spill] sm:$0xff] }
 0x1e0   : > { %v9717_v55 = vpop.f32.mrf.mxu1  ;;  %9944 = vmatmul.mubr.msk.bf16.gmra.mxu1 %vm1131_vm2, %v16017_v18  ;;  %v3277_v58 = vpop.f32.mrf.mxu0 }
 0x1e1   : > { %16014 = vst [vmem:[#allocation251_spill] sm:$0xff] %v12839_v26  ;;  %v12846_v40 = vadd.f32 %v3264_v14, %v2266_v36  ;;  %v2287_v57 = vadd.f32 %v9717_v55, %v16019_v25  ;;  %9947 = vmatprep.mubr.msk.bf16.mxu1 %vm1131_vm2, %v16020_v1  ;;  %v16025_v36 = vld [vmem:[#allocation87_spill] sm:$0xff]  ;;  %v16027_v25 = vld [vmem:[#allocation268_spill] sm:$0xff]  ;;  %v16028_v1 = vld [vmem:[#allocation94_spill] sm:$0xff] }
 0x1e2   : > { %v2278_v29 = vpop.f32.mrf.mxu1  ;;  %v9848_v54 = vpop.f32.mrf.mxu0 }
 0x1e3   : > { %16018 = vst [vmem:[#allocation254_spill] sm:$0xff] %v12846_v40  ;;  %v12851_v47 = vadd.f32 %v9847_v56, %v2287_v57  ;;  %v2279_v53 = vadd.f32 %v2278_v29, %v16022_v11  ;;  %v16029_v57 = vld [vmem:[#allocation77_spill] sm:$0xff]  ;;  %v16032_v11 = vld [vmem:[#allocation84_spill] sm:$0xff] }
 0x1e4   : > { %v9718_v2 = vpop.f32.mrf.mxu1  ;;  %v3280_v41 = vpop.f32.mrf.mxu0 }
 0x1e5   : > { %16021 = vst [vmem:[#allocation255_spill] sm:$0xff] %v12851_v47  ;;  %v12854_v26 = vadd.f32 %v3277_v58, %v2279_v53  ;;  %v2290_v3 = vadd.f32 %v9718_v2, %v16024_v43  ;;  %v16031_v43 = vld [vmem:[#allocation159_spill] sm:$0xff] }
 0x1e6   : > { %v2281_v18 = vpop.f32.mrf.mxu1  ;;  %v9851_v14 = vpop.f32.mrf.mxu0  ;;  %10078 = vmatmul.mubr.msk.bf16.gmra.mxu0 %vm1131_vm2, %v16025_v36 }
 0x1e7   : > { %16023 = vst [vmem:[#allocation257_spill] sm:$0xff] %v12854_v26  ;;  %v12859_v55 = vadd.f32 %v9848_v54, %v2290_v3  ;;  %v2282_v40 = vadd.f32 %v2281_v18, %v16027_v25  ;;  %10081 = vmatprep.mubr.msk.bf16.mxu0 %vm1131_vm2, %v16028_v1  ;;  %v16034_v18 = vld [vmem:[#allocation160_spill] sm:$0xff]  ;;  %v16036_v26 = vld [vmem:[#allocation162_spill] sm:$0xff] }
 0x1e8   : > { %v9721_v56 = vpop.f32.mrf.mxu1  ;;  %9948 = vmatmul.mubr.msk.bf16.gmra.mxu1 %vm1131_vm2, %v16029_v57  ;;  %v3293_v58 = vpop.f32.mrf.mxu0 }
 0x1e9   : > { %16026 = vst [vmem:[#allocation260_spill] sm:$0xff] %v12859_v55  ;;  %v12866_v29 = vadd.f32 %v3280_v41, %v2282_v40  ;;  %v2303_v2 = vadd.f32 %v9721_v56, %v16031_v43  ;;  %9951 = vmatprep.mubr.msk.bf16.mxu1 %vm1131_vm2, %v16032_v11  ;;  %v16037_v40 = vld [vmem:[#allocation97_spill] sm:$0xff]  ;;  %v16039_v43 = vld [vmem:[#allocation164_spill] sm:$0xff] }
 0x1ea   : > { %v2294_v53 = vpop.f32.mrf.mxu1  ;;  %v9852_v3 = vpop.f32.mrf.mxu0  ;;  %v16040_v11 = vld [vmem:[#allocation104_spill] sm:$0xff] }
 0x1eb   : > { %16030 = vst [vmem:[#allocation263_spill] sm:$0xff] %v12866_v29  ;;  %v12871_v54 = vadd.f32 %v9851_v14, %v2303_v2  ;;  %v2295_v25 = vadd.f32 %v2294_v53, %v16034_v18  ;;  %v16041_v2 = vld [vmem:[#allocation86_spill] sm:$0xff]  ;;  %v16044_v18 = vld [vmem:[#allocation93_spill] sm:$0xff] }
 0x1ec   : > { %v9722_v36 = vpop.f32.mrf.mxu1  ;;  %v3296_v1 = vpop.f32.mrf.mxu0 }
 0x1ed   : > { %16033 = vst [vmem:[#allocation264_spill] sm:$0xff] %v12871_v54  ;;  %v12874_v55 = vadd.f32 %v3293_v58, %v2295_v25  ;;  %v2306_v47 = vadd.f32 %v9722_v36, %v16036_v26  ;;  %v16043_v26 = vld [vmem:[#allocation165_spill] sm:$0xff] }
 0x1ee   : > { %v2297_v57 = vpop.f32.mrf.mxu1  ;;  %v9855_v41 = vpop.f32.mrf.mxu0  ;;  %10082 = vmatmul.mubr.msk.bf16.gmra.mxu0 %vm1131_vm2, %v16037_v40 }
 0x1ef   : > { %16035 = vst [vmem:[#allocation265_spill] sm:$0xff] %v12874_v55  ;;  %v12879_v56 = vadd.f32 %v9852_v3, %v2306_v47  ;;  %v2298_v29 = vadd.f32 %v2297_v57, %v16039_v43  ;;  %10085 = vmatprep.mubr.msk.bf16.mxu0 %vm1131_vm2, %v16040_v11  ;;  %v16046_v57 = vld [vmem:[#allocation166_spill] sm:$0xff]  ;;  %v16048_v55 = vld [vmem:[#allocation168_spill] sm:$0xff] }
 0x1f0   : > { %v9725_v14 = vpop.f32.mrf.mxu1  ;;  %9952 = vmatmul.mubr.msk.bf16.gmra.mxu1 %vm1131_vm2, %v16041_v2  ;;  %v3309_v58 = vpop.f32.mrf.mxu0 }
 0x1f1   : > { %16038 = vst [vmem:[#allocation268_spill] sm:$0xff] %v12879_v56  ;;  %v12886_v53 = vadd.f32 %v3296_v1, %v2298_v29  ;;  %v2319_v36 = vadd.f32 %v9725_v14, %v16043_v26  ;;  %9955 = vmatprep.mubr.msk.bf16.mxu1 %vm1131_vm2, %v16044_v18  ;;  %v16049_v29 = vld [vmem:[#allocation106_spill] sm:$0xff] }
 0x1f2   : > { %v2310_v25 = vpop.f32.mrf.mxu1  ;;  %v9856_v47 = vpop.f32.mrf.mxu0  ;;  %v16051_v26 = vld [vmem:[#allocation170_spill] sm:$0xff] }
 0x1f3   : > { %16042 = vst [vmem:[#allocation159_spill] sm:$0xff] %v12886_v53  ;;  %v12891_v3 = vadd.f32 %v9855_v41, %v2319_v36  ;;  %v2311_v43 = vadd.f32 %v2310_v25, %v16046_v57  ;;  %v16052_v18 = vld [vmem:[#allocation114_spill] sm:$0xff]  ;;  %v16053_v36 = vld [vmem:[#allocation95_spill] sm:$0xff] }
 0x1f4   : > { %v9726_v40 = vpop.f32.mrf.mxu1  ;;  %v3312_v11 = vpop.f32.mrf.mxu0  ;;  %v16056_v57 = vld [vmem:[#allocation103_spill] sm:$0xff] }
 0x1f5   : > { %16045 = vst [vmem:[#allocation160_spill] sm:$0xff] %v12891_v3  ;;  %v12894_v56 = vadd.f32 %v3309_v58, %v2311_v43  ;;  %v2322_v54 = vadd.f32 %v9726_v40, %v16048_v55  ;;  %v16055_v55 = vld [vmem:[#allocation100_spill] sm:$0xff] }
 0x1f6   : > { %v2313_v2 = vpop.f32.mrf.mxu1  ;;  %v9859_v1 = vpop.f32.mrf.mxu0  ;;  %10086 = vmatmul.mubr.msk.bf16.gmra.mxu0 %vm1131_vm2, %v16049_v29 }
 0x1f7   : > { %16047 = vst [vmem:[#allocation162_spill] sm:$0xff] %v12894_v56  ;;  %v12899_v14 = vadd.f32 %v9856_v47, %v2322_v54  ;;  %v2314_v53 = vadd.f32 %v2313_v2, %v16051_v26  ;;  %10089 = vmatprep.mubr.msk.bf16.mxu0 %vm1131_vm2, %v16052_v18  ;;  %v16058_v2 = vld [vmem:[#allocation171_spill] sm:$0xff]  ;;  %v16060_v56 = vld [vmem:[#allocation173_spill] sm:$0xff] }
 0x1f8   : > { %v9729_v41 = vpop.f32.mrf.mxu1  ;;  %9956 = vmatmul.mubr.msk.bf16.gmra.mxu1 %vm1131_vm2, %v16053_v36  ;;  %v3325_v58 = vpop.f32.mrf.mxu0 }
 0x1f9   : > { %16050 = vst [vmem:[#allocation164_spill] sm:$0xff] %v12899_v14  ;;  %v12906_v25 = vadd.f32 %v3312_v11, %v2314_v53  ;;  %v2335_v40 = vadd.f32 %v9729_v41, %v16055_v55  ;;  %9959 = vmatprep.mubr.msk.bf16.mxu1 %vm1131_vm2, %v16056_v57  ;;  %v16061_v53 = vld [vmem:[#allocation120_spill] sm:$0xff]  ;;  %v16063_v55 = vld [vmem:[#allocation175_spill] sm:$0xff] }
 0x1fa   : > { %v2326_v43 = vpop.f32.mrf.mxu1  ;;  %v9860_v54 = vpop.f32.mrf.mxu0  ;;  %v16064_v57 = vld [vmem:[#allocation124_spill] sm:$0xff] }
 0x1fb   : > { %16054 = vst [vmem:[#allocation165_spill] sm:$0xff] %v12906_v25  ;;  %v12911_v47 = vadd.f32 %v9859_v1, %v2335_v40  ;;  %v2327_v26 = vadd.f32 %v2326_v43, %v16058_v2  ;;  %v16065_v40 = vld [vmem:[#allocation105_spill] sm:$0xff] }
 0x1fc   : > { %v9730_v29 = vpop.f32.mrf.mxu1  ;;  %v3328_v18 = vpop.f32.mrf.mxu0  ;;  %v16068_v2 = vld [vmem:[#allocation113_spill] sm:$0xff] }
 0x1fd   : > { %16057 = vst [vmem:[#allocation166_spill] sm:$0xff] %v12911_v47  ;;  %v12914_v14 = vadd.f32 %v3325_v58, %v2327_v26  ;;  %v2338_v3 = vadd.f32 %v9730_v29, %v16060_v56  ;;  %v16067_v56 = vld [vmem:[#allocation110_spill] sm:$0xff] }
 0x1fe   : > { %v2329_v36 = vpop.f32.mrf.mxu1  ;;  %v9863_v11 = vpop.f32.mrf.mxu0  ;;  %10090 = vmatmul.mubr.msk.bf16.gmra.mxu0 %vm1131_vm2, %v16061_v53 }
 0x1ff   : > { %16059 = vst [vmem:[#allocation168_spill] sm:$0xff] %v12914_v14  ;;  %v12919_v41 = vadd.f32 %v9860_v54, %v2338_v3  ;;  %v2330_v25 = vadd.f32 %v2329_v36, %v16063_v55  ;;  %10093 = vmatprep.mubr.msk.bf16.mxu0 %vm1131_vm2, %v16064_v57  ;;  %v16070_v36 = vld [vmem:[#allocation176_spill] sm:$0xff]  ;;  %v16072_v14 = vld [vmem:[#allocation178_spill] sm:$0xff] }
 0x200   : > { %v9733_v1 = vpop.f32.mrf.mxu1  ;;  %9960 = vmatmul.mubr.msk.bf16.gmra.mxu1 %vm1131_vm2, %v16065_v40  ;;  %v3341_v58 = vpop.f32.mrf.mxu0 }
 0x201   : > { %16062 = vst [vmem:[#allocation170_spill] sm:$0xff] %v12919_v41  ;;  %v12926_v43 = vadd.f32 %v3328_v18, %v2330_v25  ;;  %v2351_v29 = vadd.f32 %v9733_v1, %v16067_v56  ;;  %9963 = vmatprep.mubr.msk.bf16.mxu1 %vm1131_vm2, %v16068_v2  ;;  %v16073_v25 = vld [vmem:[#allocation130_spill] sm:$0xff]  ;;  %v16075_v56 = vld [vmem:[#allocation180_spill] sm:$0xff]  ;;  %v16076_v2 = vld [vmem:[#allocation133_spill] sm:$0xff] }
 0x202   : > { %v2342_v26 = vpop.f32.mrf.mxu1  ;;  %v9864_v3 = vpop.f32.mrf.mxu0 }
 0x203   : > { %16066 = vst [vmem:[#allocation100_spill] sm:$0xff] %v12926_v43  ;;  %v12931_v54 = vadd.f32 %v9863_v11, %v2351_v29  ;;  %v2343_v55 = vadd.f32 %v2342_v26, %v16070_v36  ;;  %v16077_v29 = vld [vmem:[#allocation115_spill] sm:$0xff]  ;;  %v16080_v36 = vld [vmem:[#allocation122_spill] sm:$0xff] }
 0x204   : > { %v9734_v53 = vpop.f32.mrf.mxu1  ;;  %v3344_v57 = vpop.f32.mrf.mxu0 }
 0x205   : > { %16069 = vst [vmem:[#allocation171_spill] sm:$0xff] %v12931_v54  ;;  %v12934_v41 = vadd.f32 %v3341_v58, %v2343_v55  ;;  %v2354_v47 = vadd.f32 %v9734_v53, %v16072_v14  ;;  %v16079_v14 = vld [vmem:[#allocation119_spill] sm:$0xff] }
 0x206   : > { %v2345_v40 = vpop.f32.mrf.mxu1  ;;  %v9867_v18 = vpop.f32.mrf.mxu0  ;;  %10094 = vmatmul.mubr.msk.bf16.gmra.mxu0 %vm1131_vm2, %v16073_v25 }
 0x207   : > { %16071 = vst [vmem:[#allocation173_spill] sm:$0xff] %v12934_v41  ;;  %v12939_v1 = vadd.f32 %v9864_v3, %v2354_v47  ;;  %v2346_v43 = vadd.f32 %v2345_v40, %v16075_v56  ;;  %10097 = vmatprep.mubr.msk.bf16.mxu0 %vm1131_vm2, %v16076_v2  ;;  %v16082_v40 = vld [vmem:[#allocation181_spill] sm:$0xff]  ;;  %v16084_v41 = vld [vmem:[#allocation183_spill] sm:$0xff] }
 0x208   : > { %v9737_v11 = vpop.f32.mrf.mxu1  ;;  %9964 = vmatmul.mubr.msk.bf16.gmra.mxu1 %vm1131_vm2, %v16077_v29  ;;  %v3357_v58 = vpop.f32.mrf.mxu0 }
 0x209   : > { %16074 = vst [vmem:[#allocation175_spill] sm:$0xff] %v12939_v1  ;;  %v12946_v26 = vadd.f32 %v3344_v57, %v2346_v43  ;;  %v2367_v53 = vadd.f32 %v9737_v11, %v16079_v14  ;;  %9967 = vmatprep.mubr.msk.bf16.mxu1 %vm1131_vm2, %v16080_v36  ;;  %v16085_v43 = vld [vmem:[#allocation136_spill] sm:$0xff]  ;;  %v16087_v14 = vld [vmem:[#allocation185_spill] sm:$0xff] }
 0x20a   : > { %v2358_v55 = vpop.f32.mrf.mxu1  ;;  %v9868_v47 = vpop.f32.mrf.mxu0  ;;  %v16088_v36 = vld [vmem:[#allocation137_spill] sm:$0xff] }
 0x20b   : > { %16078 = vst [vmem:[#allocation110_spill] sm:$0xff] %v12946_v26  ;;  %v12951_v3 = vadd.f32 %v9867_v18, %v2367_v53  ;;  %v2359_v56 = vadd.f32 %v2358_v55, %v16082_v40  ;;  %v16089_v53 = vld [vmem:[#allocation125_spill] sm:$0xff]  ;;  %v16092_v40 = vld [vmem:[#allocation131_spill] sm:$0xff] }
 0x20c   : > { %v9738_v25 = vpop.f32.mrf.mxu1  ;;  %v3360_v2 = vpop.f32.mrf.mxu0 }
 0x20d   : > { %16081 = vst [vmem:[#allocation176_spill] sm:$0xff] %v12951_v3  ;;  %v12954_v1 = vadd.f32 %v3357_v58, %v2359_v56  ;;  %v2370_v54 = vadd.f32 %v9738_v25, %v16084_v41  ;;  %v16091_v41 = vld [vmem:[#allocation128_spill] sm:$0xff] }
 0x20e   : > { %v2361_v29 = vpop.f32.mrf.mxu1  ;;  %v9871_v57 = vpop.f32.mrf.mxu0  ;;  %10098 = vmatmul.mubr.msk.bf16.gmra.mxu0 %vm1131_vm2, %v16085_v43 }
 0x20f   : > { %16083 = vst [vmem:[#allocation178_spill] sm:$0xff] %v12954_v1  ;;  %v12959_v11 = vadd.f32 %v9868_v47, %v2370_v54  ;;  %v2362_v26 = vadd.f32 %v2361_v29, %v16087_v14  ;;  %10101 = vmatprep.mubr.msk.bf16.mxu0 %vm1131_vm2, %v16088_v36  ;;  %v16094_v29 = vld [vmem:[#allocation186_spill] sm:$0xff]  ;;  %v16096_v1 = vld [vmem:[#allocation188_spill] sm:$0xff] }
 0x210   : > { %v9741_v18 = vpop.f32.mrf.mxu1  ;;  %9968 = vmatmul.mubr.msk.bf16.gmra.mxu1 %vm1131_vm2, %v16089_v53  ;;  %v3373_v58 = vpop.f32.mrf.mxu0 }
 0x211   : > { %16086 = vst [vmem:[#allocation180_spill] sm:$0xff] %v12959_v11  ;;  %v12966_v55 = vadd.f32 %v3360_v2, %v2362_v26  ;;  %v2383_v25 = vadd.f32 %v9741_v18, %v16091_v41  ;;  %9971 = vmatprep.mubr.msk.bf16.mxu1 %vm1131_vm2, %v16092_v40  ;;  %v16097_v26 = vld [vmem:[#allocation140_spill] sm:$0xff]  ;;  %v16099_v41 = vld [vmem:[#allocation190_spill] sm:$0xff] }
 0x212   : > { %v2374_v56 = vpop.f32.mrf.mxu1  ;;  %v9872_v54 = vpop.f32.mrf.mxu0  ;;  %v16100_v40 = vld [vmem:[#allocation8_spill] sm:$0xff] }
 0x213   : > { %16090 = vst [vmem:[#allocation119_spill] sm:$0xff] %v12966_v55  ;;  %v12971_v47 = vadd.f32 %v9871_v57, %v2383_v25  ;;  %v2375_v14 = vadd.f32 %v2374_v56, %v16094_v29  ;;  %v16101_v25 = vld [vmem:[#allocation134_spill] sm:$0xff]  ;;  %v16104_v29 = vld [vmem:[#allocation5_spill] sm:$0xff] }
 0x214   : > { %v9742_v43 = vpop.f32.mrf.mxu1  ;;  %v3376_v36 = vpop.f32.mrf.mxu0 }
 0x215   : > { %16093 = vst [vmem:[#allocation181_spill] sm:$0xff] %v12971_v47  ;;  %v12974_v11 = vadd.f32 %v3373_v58, %v2375_v14  ;;  %v2386_v3 = vadd.f32 %v9742_v43, %v16096_v1  ;;  %v16103_v1 = vld [vmem:[#allocation191_spill] sm:$0xff] }
 0x216   : > { %v2377_v53 = vpop.f32.mrf.mxu1  ;;  %v9875_v2 = vpop.f32.mrf.mxu0  ;;  %10102 = vmatmul.mubr.msk.bf16.gmra.mxu0 %vm1131_vm2, %v16097_v26 }
 0x217   : > { %16095 = vst [vmem:[#allocation183_spill] sm:$0xff] %v12974_v11  ;;  %v12979_v18 = vadd.f32 %v9872_v54, %v2386_v3  ;;  %v2378_v55 = vadd.f32 %v2377_v53, %v16099_v41  ;;  %10105 = vmatprep.mubr.msk.bf16.mxu0 %vm1131_vm2, %v16100_v40  ;;  %v16106_v53 = vld [vmem:[#allocation192_spill] sm:$0xff]  ;;  %v16108_v11 = vld [vmem:[#allocation194_spill] sm:$0xff] }
 0x218   : > { %v9745_v57 = vpop.f32.mrf.mxu1  ;;  %9972 = vmatmul.mubr.msk.bf16.gmra.mxu1 %vm1131_vm2, %v16101_v25  ;;  %v3389_v58 = vpop.f32.mrf.mxu0 }
 0x219   : > { %16098 = vst [vmem:[#allocation185_spill] sm:$0xff] %v12979_v18  ;;  %v12986_v56 = vadd.f32 %v3376_v36, %v2378_v55  ;;  %v2399_v43 = vadd.f32 %v9745_v57, %v16103_v1  ;;  %9975 = vmatprep.mubr.msk.bf16.mxu1 %vm1131_vm2, %v16104_v29  ;;  %v16109_v55 = vld [vmem:[#allocation11_spill] sm:$0xff]  ;;  %v16111_v1 = vld [vmem:[#allocation196_spill] sm:$0xff]  ;;  %v16112_v29 = vld [vmem:[#allocation18_spill] sm:$0xff] }
 0x21a   : > { %v2390_v14 = vpop.f32.mrf.mxu1  ;;  %v9876_v3 = vpop.f32.mrf.mxu0 }
 0x21b   : > { %16102 = vst [vmem:[#allocation128_spill] sm:$0xff] %v12986_v56  ;;  %v12991_v54 = vadd.f32 %v9875_v2, %v2399_v43  ;;  %v2391_v41 = vadd.f32 %v2390_v14, %v16106_v53  ;;  %v16113_v43 = vld [vmem:[#allocation6_spill] sm:$0xff]  ;;  %v16116_v53 = vld [vmem:[#allocation9_spill] sm:$0xff] }
 0x21c   : > { %v9746_v26 = vpop.f32.mrf.mxu1  ;;  %v3392_v40 = vpop.f32.mrf.mxu0 }
 0x21d   : > { %16105 = vst [vmem:[#allocation186_spill] sm:$0xff] %v12991_v54  ;;  %v12994_v18 = vadd.f32 %v3389_v58, %v2391_v41  ;;  %v2402_v47 = vadd.f32 %v9746_v26, %v16108_v11  ;;  %v16115_v11 = vld [vmem:[#allocation7_spill] sm:$0xff] }
 0x21e   : > { %v2393_v25 = vpop.f32.mrf.mxu1  ;;  %v9879_v36 = vpop.f32.mrf.mxu0  ;;  %10106 = vmatmul.mubr.msk.bf16.gmra.mxu0 %vm1131_vm2, %v16109_v55 }
 0x21f   : > { %16107 = vst [vmem:[#allocation188_spill] sm:$0xff] %v12994_v18  ;;  %v12999_v57 = vadd.f32 %v9876_v3, %v2402_v47  ;;  %v2394_v56 = vadd.f32 %v2393_v25, %v16111_v1  ;;  %10109 = vmatprep.mubr.msk.bf16.mxu0 %vm1131_vm2, %v16112_v29  ;;  %v16118_v25 = vld [vmem:[#allocation197_spill] sm:$0xff]  ;;  %v16120_v18 = vld [vmem:[#allocation199_spill] sm:$0xff] }
 0x220   : > { %v9749_v2 = vpop.f32.mrf.mxu1  ;;  %9976 = vmatmul.mubr.msk.bf16.gmra.mxu1 %vm1131_vm2, %v16113_v43  ;;  %v3405_v58 = vpop.f32.mrf.mxu0 }
 0x221   : > { %16110 = vst [vmem:[#allocation190_spill] sm:$0xff] %v12999_v57  ;;  %v13006_v14 = vadd.f32 %v3392_v40, %v2394_v56  ;;  %v2415_v26 = vadd.f32 %v9749_v2, %v16115_v11  ;;  %9979 = vmatprep.mubr.msk.bf16.mxu1 %vm1131_vm2, %v16116_v53  ;;  %v16121_v56 = vld [vmem:[#allocation19_spill] sm:$0xff]  ;;  %v16123_v11 = vld [vmem:[#allocation201_spill] sm:$0xff]  ;;  %v16124_v53 = vld [vmem:[#allocation24_spill] sm:$0xff] }
 0x222   : > { %v2406_v41 = vpop.f32.mrf.mxu1  ;;  %v9880_v47 = vpop.f32.mrf.mxu0 }
 0x223   : > { %16114 = vst [vmem:[#allocation191_spill] sm:$0xff] %v13006_v14  ;;  %v13011_v3 = vadd.f32 %v9879_v36, %v2415_v26  ;;  %v2407_v1 = vadd.f32 %v2406_v41, %v16118_v25  ;;  %v16125_v26 = vld [vmem:[#allocation10_spill] sm:$0xff]  ;;  %v16128_v25 = vld [vmem:[#allocation15_spill] sm:$0xff] }
 0x224   : > { %v9750_v55 = vpop.f32.mrf.mxu1  ;;  %v3408_v29 = vpop.f32.mrf.mxu0 }
 0x225   : > { %16117 = vst [vmem:[#allocation192_spill] sm:$0xff] %v13011_v3  ;;  %v13014_v57 = vadd.f32 %v3405_v58, %v2407_v1  ;;  %v2418_v54 = vadd.f32 %v9750_v55, %v16120_v18  ;;  %v16127_v18 = vld [vmem:[#allocation12_spill] sm:$0xff] }
 0x226   : > { %v2409_v43 = vpop.f32.mrf.mxu1  ;;  %v9883_v40 = vpop.f32.mrf.mxu0  ;;  %10110 = vmatmul.mubr.msk.bf16.gmra.mxu0 %vm1131_vm2, %v16121_v56  ;;  %v16132_v56 = vld [vmem:[#allocation205_spill] sm:$0xff] }
 0x227   : > { %16119 = vst [vmem:[#allocation194_spill] sm:$0xff] %v13014_v57  ;;  %v13019_v2 = vadd.f32 %v9880_v47, %v2418_v54  ;;  %v2410_v14 = vadd.f32 %v2409_v43, %v16123_v11  ;;  %10113 = vmatprep.mubr.msk.bf16.mxu0 %vm1131_vm2, %v16124_v53  ;;  %v13034_v54 = vld [vmem:[%s15170_s1 + $0x1c] sm:$0x7]  ;;  %v16130_v11 = vld [vmem:[#allocation202_spill] sm:$0xff] }
 0x228   : > { %v9753_v36 = vpop.f32.mrf.mxu1  ;;  %9980 = vmatmul.mubr.msk.bf16.gmra.mxu1 %vm1131_vm2, %v16125_v26  ;;  %v3421_v58 = vpop.f32.mrf.mxu0  ;;  %10703 = vmatprep.subr.msk.bf16.mxu1 %vm1324_vm0, %v13034_v54 }
 0x229   : > { %16122 = vst [vmem:[#allocation196_spill] sm:$0xff] %v13019_v2  ;;  %v13026_v41 = vadd.f32 %v3408_v29, %v2410_v14  ;;  %v2431_v55 = vadd.f32 %v9753_v36, %v16127_v18  ;;  %9983 = vmatprep.mubr.msk.bf16.mxu1 %vm1131_vm2, %v16128_v25  ;;  %v13044_v14 = vld [vmem:[%s15170_s1 + $0x20] sm:$0x7] }
 0x22a   : > { %v2422_v43 = vpop.f32.mrf.mxu1  ;;  %v9884_v47 = vpop.f32.mrf.mxu0  ;;  %10704 = vmatprep.subr.msk.bf16.mxu0 %vm1324_vm0, %v13044_v14  ;;  %v16137_v25 = vld [vmem:[#allocation17_spill] sm:$0xff] }
 0x22b   : > { %16126 = vst [vmem:[#allocation7_spill] sm:$0xff] %v13026_v41  ;;  %v13038_v1 = vadd.f32 %v9883_v40, %v2431_v55  ;;  %v2423_v29 = vadd.f32 %v2422_v43, %v16130_v11  ;;  %v16133_v40 = vld [vmem:[#allocation28_spill] sm:$0xff] }
 0x22c   : > { %v9754_v36 = vpop.f32.mrf.mxu1  ;;  %v3424_v18 = vpop.f32.mrf.mxu0  ;;  %v16135_v43 = vld [vmem:[#allocation208_spill] sm:$0xff] }
 0x22d   : > { %16129 = vst [vmem:[#allocation197_spill] sm:$0xff] %v13038_v1  ;;  %v13048_v53 = vadd.f32 %v3421_v58, %v2423_v29  ;;  %v2434_v41 = vadd.f32 %v9754_v36, %v16132_v56  ;;  %v16136_v1 = vld [vmem:[#allocation35_spill] sm:$0xff]  ;;  %v16139_v56 = vld [vmem:[#allocation20_spill] sm:$0xff] }
 0x22e   : > { %v2425_v2 = vpop.f32.mrf.mxu1  ;;  %v9887_v57 = vpop.f32.mrf.mxu0  ;;  %10114 = vmatmul.mubr.msk.bf16.gmra.mxu0 %vm1131_vm2, %v16133_v40 }
 0x22f   : > { %16131 = vst [vmem:[#allocation199_spill] sm:$0xff] %v13048_v53  ;;  %v13053_v55 = vadd.f32 %v9884_v47, %v2434_v41  ;;  %v2426_v11 = vadd.f32 %v2425_v2, %v16135_v43  ;;  %10117 = vmatprep.mubr.msk.bf16.mxu0 %vm1131_vm2, %v16136_v1  ;;  %v16140_v53 = vld [vmem:[#allocation25_spill] sm:$0xff]  ;;  %v16142_v2 = vld [vmem:[#allocation211_spill] sm:$0xff] }
 0x230   : > { %v9757_v3 = vpop.f32.mrf.mxu1  ;;  %9984 = vmatmul.mubr.msk.bf16.gmra.mxu1 %vm1131_vm2, %v16137_v25  ;;  %v3437_v58 = vpop.f32.mrf.mxu0 }
 0x231   : > { %16134 = vst [vmem:[#allocation201_spill] sm:$0xff] %v13053_v55  ;;  %v13060_v29 = vadd.f32 %v3424_v18, %v2426_v11  ;;  %v2447_v36 = vadd.f32 %v9757_v3, %v16139_v56  ;;  %9987 = vmatprep.mubr.msk.bf16.mxu1 %vm1131_vm2, %v16140_v53  ;;  %v16145_v11 = vld [vmem:[#allocation37_spill] sm:$0xff]  ;;  %v16148_v53 = vld [vmem:[#allocation42_spill] sm:$0xff] }
 0x232   : > { %v2438_v40 = vpop.f32.mrf.mxu1  ;;  %v9888_v41 = vpop.f32.mrf.mxu0  ;;  %v16147_v56 = vld [vmem:[#allocation217_spill] sm:$0xff] }
 0x233   : > { %16138 = vst [vmem:[#allocation12_spill] sm:$0xff] %v13060_v29  ;;  %v13065_v47 = vadd.f32 %v9887_v57, %v2447_v36  ;;  %v2439_v43 = vadd.f32 %v2438_v40, %v16142_v2  ;;  %v16149_v40 = vld [vmem:[#allocation27_spill] sm:$0xff]  ;;  %v16152_v2 = vld [vmem:[#allocation34_spill] sm:$0xff] }
 0x234   : > { %v9758_v55 = vpop.f32.mrf.mxu1  ;;  %v3440_v1 = vpop.f32.mrf.mxu0 }
 0x235   : > { %16141 = vst [vmem:[#allocation202_spill] sm:$0xff] %v13065_v47  ;;  %v13068_v26 = vadd.f32 %v3437_v58, %v2439_v43  ;;  %v2450_v25 = vadd.f32 %v9758_v55, %v16144_v12  ;;  %v16151_v12 = vld [vmem:[#allocation29_spill] sm:$0xff] }
 0x236   : > { %v2441_v8 = vpop.f32.mrf.mxu1  ;;  %v9891_v18 = vpop.f32.mrf.mxu0  ;;  %10118 = vmatmul.mubr.msk.bf16.gmra.mxu0 %vm1131_vm2, %v16145_v11 }
 0x237   : > { %16143 = vst [vmem:[#allocation205_spill] sm:$0xff] %v13068_v26  ;;  %v13073_v3 = vadd.f32 %v9888_v41, %v2450_v25  ;;  %v2442_v29 = vadd.f32 %v2441_v8, %v16147_v56  ;;  %10121 = vmatprep.mubr.msk.bf16.mxu0 %vm1131_vm2, %v16148_v53  ;;  %v16154_v8 = vld [vmem:[#allocation220_spill] sm:$0xff]  ;;  %v16156_v26 = vld [vmem:[#allocation223_spill] sm:$0xff] }
 0x238   : > { %v9761_v57 = vpop.f32.mrf.mxu1  ;;  %9988 = vmatmul.mubr.msk.bf16.gmra.mxu1 %vm1131_vm2, %v16149_v40  ;;  %v3453_v58 = vpop.f32.mrf.mxu0 }
 0x239   : > { %16146 = vst [vmem:[#allocation208_spill] sm:$0xff] %v13073_v3  ;;  %v13080_v36 = vadd.f32 %v3440_v1, %v2442_v29  ;;  %v2463_v55 = vadd.f32 %v9761_v57, %v16151_v12  ;;  %9991 = vmatprep.mubr.msk.bf16.mxu1 %vm1131_vm2, %v16152_v2  ;;  %v16157_v29 = vld [vmem:[#allocation46_spill] sm:$0xff]  ;;  %v16160_v2 = vld [vmem:[#allocation53_spill] sm:$0xff] }
 0x23a   : > { %v2454_v43 = vpop.f32.mrf.mxu1  ;;  %v9892_v25 = vpop.f32.mrf.mxu0  ;;  %v16159_v12 = vld [vmem:[#allocation226_spill] sm:$0xff] }
 0x23b   : > { %16150 = vst [vmem:[#allocation20_spill] sm:$0xff] %v13080_v36  ;;  %v13085_v41 = vadd.f32 %v9891_v18, %v2463_v55  ;;  %v2455_v56 = vadd.f32 %v2454_v43, %v16154_v8  ;;  %v16161_v55 = vld [vmem:[#allocation36_spill] sm:$0xff] }
 0x23c   : > { %v9762_v11 = vpop.f32.mrf.mxu1  ;;  %v3456_v53 = vpop.f32.mrf.mxu0  ;;  %v16164_v8 = vld [vmem:[#allocation44_spill] sm:$0xff] }
 0x23d   : > { %16153 = vst [vmem:[#allocation211_spill] sm:$0xff] %v13085_v41  ;;  %v13088_v3 = vadd.f32 %v3453_v58, %v2455_v56  ;;  %v2466_v47 = vadd.f32 %v9762_v11, %v16156_v26  ;;  %v16163_v26 = vld [vmem:[#allocation38_spill] sm:$0xff] }
 0x23e   : > { %v2457_v40 = vpop.f32.mrf.mxu1  ;;  %v9895_v1 = vpop.f32.mrf.mxu0  ;;  %10122 = vmatmul.mubr.msk.bf16.gmra.mxu0 %vm1131_vm2, %v16157_v29 }
 0x23f   : > { %16155 = vst [vmem:[#allocation214_spill] sm:$0xff] %v13088_v3  ;;  %v13093_v57 = vadd.f32 %v9892_v25, %v2466_v47  ;;  %v2458_v36 = vadd.f32 %v2457_v40, %v16159_v12  ;;  %10125 = vmatprep.mubr.msk.bf16.mxu0 %vm1131_vm2, %v16160_v2  ;;  %v16166_v40 = vld [vmem:[#allocation229_spill] sm:$0xff]  ;;  %v16168_v3 = vld [vmem:[#allocation232_spill] sm:$0xff] }
 0x240   : > { %v9765_v18 = vpop.f32.mrf.mxu1  ;;  %9992 = vmatmul.mubr.msk.bf16.gmra.mxu1 %vm1131_vm2, %v16161_v55  ;;  %v3469_v58 = vpop.f32.mrf.mxu0 }
 0x241   : > { %16158 = vst [vmem:[#allocation217_spill] sm:$0xff] %v13093_v57  ;;  %v13100_v43 = vadd.f32 %v3456_v53, %v2458_v36  ;;  %v2479_v11 = vadd.f32 %v9765_v18, %v16163_v26  ;;  %9995 = vmatprep.mubr.msk.bf16.mxu1 %vm1131_vm2, %v16164_v8  ;;  %v16169_v36 = vld [vmem:[#allocation55_spill] sm:$0xff]  ;;  %v16172_v8 = vld [vmem:[#allocation60_spill] sm:$0xff] }
 0x242   : > { %v2470_v56 = vpop.f32.mrf.mxu1  ;;  %v9896_v47 = vpop.f32.mrf.mxu0  ;;  %v16171_v26 = vld [vmem:[#allocation235_spill] sm:$0xff] }
 0x243   : > { %16162 = vst [vmem:[#allocation29_spill] sm:$0xff] %v13100_v43  ;;  %v13105_v25 = vadd.f32 %v9895_v1, %v2479_v11  ;;  %v2471_v12 = vadd.f32 %v2470_v56, %v16166_v40  ;;  %v16173_v11 = vld [vmem:[#allocation45_spill] sm:$0xff]  ;;  %v16176_v40 = vld [vmem:[#allocation52_spill] sm:$0xff] }
 0x244   : > { %v9766_v29 = vpop.f32.mrf.mxu1  ;;  %v3472_v2 = vpop.f32.mrf.mxu0 }
 0x245   : > { %16165 = vst [vmem:[#allocation220_spill] sm:$0xff] %v13105_v25  ;;  %v13108_v57 = vadd.f32 %v3469_v58, %v2471_v12  ;;  %v2482_v41 = vadd.f32 %v9766_v29, %v16168_v3  ;;  %v16175_v3 = vld [vmem:[#allocation47_spill] sm:$0xff] }
 0x246   : > { %v2473_v55 = vpop.f32.mrf.mxu1  ;;  %v9899_v53 = vpop.f32.mrf.mxu0  ;;  %10126 = vmatmul.mubr.msk.bf16.gmra.mxu0 %vm1131_vm2, %v16169_v36 }
 0x247   : > { %16167 = vst [vmem:[#allocation223_spill] sm:$0xff] %v13108_v57  ;;  %v13113_v18 = vadd.f32 %v9896_v47, %v2482_v41  ;;  %v2474_v43 = vadd.f32 %v2473_v55, %v16171_v26  ;;  %10129 = vmatprep.mubr.msk.bf16.mxu0 %vm1131_vm2, %v16172_v8  ;;  %v16178_v55 = vld [vmem:[#allocation238_spill] sm:$0xff]  ;;  %v16180_v57 = vld [vmem:[#allocation241_spill] sm:$0xff] }
 0x248   : > { %v9769_v1 = vpop.f32.mrf.mxu1  ;;  %9996 = vmatmul.mubr.msk.bf16.gmra.mxu1 %vm1131_vm2, %v16173_v11  ;;  %v3485_v58 = vpop.f32.mrf.mxu0 }
 0x249   : > { %16170 = vst [vmem:[#allocation226_spill] sm:$0xff] %v13113_v18  ;;  %v13120_v56 = vadd.f32 %v3472_v2, %v2474_v43  ;;  %v2495_v29 = vadd.f32 %v9769_v1, %v16175_v3  ;;  %9999 = vmatprep.mubr.msk.bf16.mxu1 %vm1131_vm2, %v16176_v40  ;;  %v16181_v43 = vld [vmem:[#allocation64_spill] sm:$0xff]  ;;  %v16184_v40 = vld [vmem:[#allocation71_spill] sm:$0xff] }
 0x24a   : > { %v2486_v12 = vpop.f32.mrf.mxu1  ;;  %v9900_v41 = vpop.f32.mrf.mxu0  ;;  %v16183_v3 = vld [vmem:[#allocation244_spill] sm:$0xff] }
 0x24b   : > { %16174 = vst [vmem:[#allocation38_spill] sm:$0xff] %v13120_v56  ;;  %v13125_v47 = vadd.f32 %v9899_v53, %v2495_v29  ;;  %v2487_v26 = vadd.f32 %v2486_v12, %v16178_v55  ;;  %v16185_v29 = vld [vmem:[#allocation54_spill] sm:$0xff] }
 0x24c   : > { %v9770_v36 = vpop.f32.mrf.mxu1  ;;  %v3488_v8 = vpop.f32.mrf.mxu0  ;;  %v16188_v55 = vld [vmem:[#allocation62_spill] sm:$0xff] }
 0x24d   : > { %16177 = vst [vmem:[#allocation229_spill] sm:$0xff] %v13125_v47  ;;  %v13128_v18 = vadd.f32 %v3485_v58, %v2487_v26  ;;  %v2498_v25 = vadd.f32 %v9770_v36, %v16180_v57  ;;  %v16187_v57 = vld [vmem:[#allocation56_spill] sm:$0xff] }
 0x24e   : > { %v2489_v11 = vpop.f32.mrf.mxu1  ;;  %v9903_v2 = vpop.f32.mrf.mxu0  ;;  %10130 = vmatmul.mubr.msk.bf16.gmra.mxu0 %vm1131_vm2, %v16181_v43 }
 0x24f   : > { %16179 = vst [vmem:[#allocation232_spill] sm:$0xff] %v13128_v18  ;;  %v13133_v1 = vadd.f32 %v9900_v41, %v2498_v25  ;;  %v2490_v56 = vadd.f32 %v2489_v11, %v16183_v3  ;;  %10133 = vmatprep.mubr.msk.bf16.mxu0 %vm1131_vm2, %v16184_v40  ;;  %v16190_v11 = vld [vmem:[#allocation247_spill] sm:$0xff]  ;;  %v16192_v18 = vld [vmem:[#allocation250_spill] sm:$0xff] }
 0x250   : > { %v9773_v53 = vpop.f32.mrf.mxu1  ;;  %10000 = vmatmul.mubr.msk.bf16.gmra.mxu1 %vm1131_vm2, %v16185_v29  ;;  %v3501_v58 = vpop.f32.mrf.mxu0 }
 0x251   : > { %16182 = vst [vmem:[#allocation235_spill] sm:$0xff] %v13133_v1  ;;  %v13140_v12 = vadd.f32 %v3488_v8, %v2490_v56  ;;  %v2511_v36 = vadd.f32 %v9773_v53, %v16187_v57  ;;  %10003 = vmatprep.mubr.msk.bf16.mxu1 %vm1131_vm2, %v16188_v55  ;;  %v16193_v56 = vld [vmem:[#allocation73_spill] sm:$0xff]  ;;  %v16196_v55 = vld [vmem:[#allocation78_spill] sm:$0xff] }
 0x252   : > { %v2502_v26 = vpop.f32.mrf.mxu1  ;;  %v9904_v25 = vpop.f32.mrf.mxu0  ;;  %v16195_v57 = vld [vmem:[#allocation253_spill] sm:$0xff] }
 0x253   : > { %16186 = vst [vmem:[#allocation47_spill] sm:$0xff] %v13140_v12  ;;  %v13145_v41 = vadd.f32 %v9903_v2, %v2511_v36  ;;  %v2503_v3 = vadd.f32 %v2502_v26, %v16190_v11  ;;  %v16197_v36 = vld [vmem:[#allocation63_spill] sm:$0xff]  ;;  %v16200_v11 = vld [vmem:[#allocation70_spill] sm:$0xff] }
 0x254   : > { %v9774_v43 = vpop.f32.mrf.mxu1  ;;  %v3504_v40 = vpop.f32.mrf.mxu0 }
 0x255   : > { %16189 = vst [vmem:[#allocation238_spill] sm:$0xff] %v13145_v41  ;;  %v13148_v1 = vadd.f32 %v3501_v58, %v2503_v3  ;;  %v2514_v47 = vadd.f32 %v9774_v43, %v16192_v18  ;;  %v16199_v18 = vld [vmem:[#allocation65_spill] sm:$0xff] }
 0x256   : > { %v2505_v29 = vpop.f32.mrf.mxu1  ;;  %v9907_v8 = vpop.f32.mrf.mxu0  ;;  %10134 = vmatmul.mubr.msk.bf16.gmra.mxu0 %vm1131_vm2, %v16193_v56 }
 0x257   : > { %16191 = vst [vmem:[#allocation241_spill] sm:$0xff] %v13148_v1  ;;  %v13153_v53 = vadd.f32 %v9904_v25, %v2514_v47  ;;  %v2506_v12 = vadd.f32 %v2505_v29, %v16195_v57  ;;  %10137 = vmatprep.mubr.msk.bf16.mxu0 %vm1131_vm2, %v16196_v55  ;;  %v16202_v29 = vld [vmem:[#allocation256_spill] sm:$0xff]  ;;  %v16204_v1 = vld [vmem:[#allocation259_spill] sm:$0xff] }
 0x258   : > { %v9777_v2 = vpop.f32.mrf.mxu1  ;;  %10004 = vmatmul.mubr.msk.bf16.gmra.mxu1 %vm1131_vm2, %v16197_v36  ;;  %v3517_v58 = vpop.f32.mrf.mxu0 }
 0x259   : > { %16194 = vst [vmem:[#allocation244_spill] sm:$0xff] %v13153_v53  ;;  %v13160_v26 = vadd.f32 %v3504_v40, %v2506_v12  ;;  %v2527_v43 = vadd.f32 %v9777_v2, %v16199_v18  ;;  %10007 = vmatprep.mubr.msk.bf16.mxu1 %vm1131_vm2, %v16200_v11  ;;  %v16205_v12 = vld [vmem:[#allocation82_spill] sm:$0xff]  ;;  %v16208_v11 = vld [vmem:[#allocation89_spill] sm:$0xff] }
 0x25a   : > { %v2518_v3 = vpop.f32.mrf.mxu1  ;;  %v9908_v47 = vpop.f32.mrf.mxu0  ;;  %v16207_v18 = vld [vmem:[#allocation262_spill] sm:$0xff] }
 0x25b   : > { %16198 = vst [vmem:[#allocation56_spill] sm:$0xff] %v13160_v26  ;;  %v13165_v25 = vadd.f32 %v9907_v8, %v2527_v43  ;;  %v2519_v57 = vadd.f32 %v2518_v3, %v16202_v29  ;;  %v16209_v43 = vld [vmem:[#allocation72_spill] sm:$0xff] }
 0x25c   : > { %v9778_v56 = vpop.f32.mrf.mxu1  ;;  %v3520_v55 = vpop.f32.mrf.mxu0  ;;  %v16212_v29 = vld [vmem:[#allocation80_spill] sm:$0xff] }
 0x25d   : > { %16201 = vst [vmem:[#allocation247_spill] sm:$0xff] %v13165_v25  ;;  %v13168_v53 = vadd.f32 %v3517_v58, %v2519_v57  ;;  %v2530_v41 = vadd.f32 %v9778_v56, %v16204_v1  ;;  %v16211_v1 = vld [vmem:[#allocation74_spill] sm:$0xff] }
 0x25e   : > { %v2521_v36 = vpop.f32.mrf.mxu1  ;;  %v9911_v40 = vpop.f32.mrf.mxu0  ;;  %10138 = vmatmul.mubr.msk.bf16.gmra.mxu0 %vm1131_vm2, %v16205_v12 }
 0x25f   : > { %16203 = vst [vmem:[#allocation250_spill] sm:$0xff] %v13168_v53  ;;  %v13173_v2 = vadd.f32 %v9908_v47, %v2530_v41  ;;  %v2522_v26 = vadd.f32 %v2521_v36, %v16207_v18  ;;  %10141 = vmatprep.mubr.msk.bf16.mxu0 %vm1131_vm2, %v16208_v11  ;;  %v16213_v36 = vld [vmem:[#allocation81_spill] sm:$0xff]  ;;  %v16214_v53 = vld [vmem:[#allocation267_spill] sm:$0xff] }
 0x260   : > { %v9781_v8 = vpop.f32.mrf.mxu1  ;;  %10008 = vmatmul.mubr.msk.bf16.gmra.mxu1 %vm1131_vm2, %v16209_v43  ;;  %v3533_v58 = vpop.f32.mrf.mxu0 }
 0x261   : > { %16206 = vst [vmem:[#allocation253_spill] sm:$0xff] %v13173_v2  ;;  %v13180_v3 = vadd.f32 %v3520_v55, %v2522_v26  ;;  %v2543_v56 = vadd.f32 %v9781_v8, %v16211_v1  ;;  %10011 = vmatprep.mubr.msk.bf16.mxu1 %vm1131_vm2, %v16212_v29  ;;  %v16215_v26 = vld [vmem:[#allocation91_spill] sm:$0xff]  ;;  %v16217_v1 = vld [vmem:[#allocation270_spill] sm:$0xff]  ;;  %v16218_v29 = vld [vmem:[#allocation96_spill] sm:$0xff] }
 0x262   : > { %v2534_v57 = vpop.f32.mrf.mxu1  ;;  %v9912_v41 = vpop.f32.mrf.mxu0 }
 0x263   : > { %16210 = vst [vmem:[#allocation65_spill] sm:$0xff] %v13180_v3  ;;  %v13185_v47 = vadd.f32 %v9911_v40, %v2543_v56  ;;  %v2535_v18 = vadd.f32 %v2534_v57, %v16213_v36 }
 0x264   : > { %v9782_v12 = vpop.f32.mrf.mxu1  ;;  %v3536_v11 = vpop.f32.mrf.mxu0 }
 0x265   : > { %v13188_v2 = vadd.f32 %v3533_v58, %v2535_v18  ;;  %v2546_v25 = vadd.f32 %v9782_v12, %v16214_v53 }
 0x266   : > { %v2537_v43 = vpop.f32.mrf.mxu1  ;;  %v10047_v55 = vpop.f32.mrf.mxu0  ;;  %10142 = vmatmul.mubr.msk.bf16.gmra.mxu0 %vm1131_vm2, %v16215_v26 }
 0x267   : > { %v13193_v8 = vadd.f32 %v9912_v41, %v2546_v25  ;;  %v2538_v3 = vadd.f32 %v2537_v43, %v16217_v1  ;;  %10145 = vmatprep.mubr.msk.bf16.mxu0 %vm1131_vm2, %v16218_v29  ;;  %v16220_v43 = vld [vmem:[#allocation90_spill] sm:$0xff]  ;;  %v16221_v29 = vld [vmem:[#allocation271_spill] sm:$0xff] }
 0x268   : > { %v9917_v40 = vpop.f32.mrf.mxu1  ;;  %10012 = vmatmul.mubr.msk.bf16.gmra.mxu1 %vm1131_vm2, %v15893_v17  ;;  %v4423_v58 = vpop.f32.mrf.mxu0 }
 0x269   : > { %16216 = vst [vmem:[#allocation256_spill] sm:$0xff] %v13193_v8  ;;  %v13200_v56 = vadd.f32 %v3536_v11, %v2538_v3  ;;  %v4234_v53 = vadd.f32 %v9917_v40, %v12492_v0  ;;  %10015 = vmatprep.mubr.msk.bf16.mxu1 %vm1131_vm2, %v15902_v10  ;;  %v16222_v3 = vld [vmem:[#allocation101_spill] sm:$0xff] }
 0x26a   : > { %v3721_v12 = vpop.f32.mrf.mxu1  ;;  %v10048_v25 = vpop.f32.mrf.mxu0 }
 0x26b   : > { %16219 = vst [vmem:[#allocation259_spill] sm:$0xff] %v13200_v56  ;;  %v13205_v57 = vadd.f32 %v10047_v55, %v4234_v53  ;;  %v4232_v41 = vadd.f32 %v3721_v12, %v16220_v43  ;;  %v16224_v56 = vld [vmem:[#allocation108_spill] sm:$0xff] }
 0x26c   : > { %v9918_v36 = vpop.f32.mrf.mxu1  ;;  %v4426_v18 = vpop.f32.mrf.mxu0 }
 0x26d   : > { %v13208_v1 = vadd.f32 %v4423_v58, %v4232_v41  ;;  %v4235_v26 = vadd.f32 %v9918_v36, %v16221_v29 }
 0x26e   : > { %v3724_v8 = vpop.f32.mrf.mxu1  ;;  %v10051_v11 = vpop.f32.mrf.mxu0  ;;  %10146 = vmatmul.mubr.msk.bf16.gmra.mxu0 %vm1131_vm2, %v16222_v3 }
 0x26f   : > { %v13213_v0 = vadd.f32 %v10048_v25, %v4235_v26  ;;  %v4233_v40 = vadd.f32 %v3724_v8, %v12516_v50  ;;  %10149 = vmatprep.mubr.msk.bf16.mxu0 %vm1131_vm2, %v16224_v56  ;;  %v16226_v50 = vld [vmem:[#allocation99_spill] sm:$0xff]  ;;  %v16227_v56 = vld [vmem:[#allocation272_spill] sm:$0xff] }
 0x270   : > { %v9921_v55 = vpop.f32.mrf.mxu1  ;;  %10016 = vmatmul.mubr.msk.bf16.gmra.mxu1 %vm1131_vm2, %v15903_v49  ;;  %v4439_v58 = vpop.f32.mrf.mxu0 }
 0x271   : > { %16223 = vst [vmem:[#allocation262_spill] sm:$0xff] %v13213_v0  ;;  %v13220_v53 = vadd.f32 %v4426_v18, %v4233_v40  ;;  %v4238_v29 = vadd.f32 %v9921_v55, %v12521_v42  ;;  %10019 = vmatprep.mubr.msk.bf16.mxu1 %vm1131_vm2, %v15909_v37  ;;  %v16228_v40 = vld [vmem:[#allocation111_spill] sm:$0xff] }
 0x272   : > { %v3737_v12 = vpop.f32.mrf.mxu1  ;;  %v10052_v26 = vpop.f32.mrf.mxu0 }
 0x273   : > { %16225 = vst [vmem:[#allocation74_spill] sm:$0xff] %v13220_v53  ;;  %v13225_v25 = vadd.f32 %v10051_v11, %v4238_v29  ;;  %v4236_v8 = vadd.f32 %v3737_v12, %v16226_v50  ;;  %v16229_v53 = vld [vmem:[#allocation116_spill] sm:$0xff] }
 0x274   : > { %v9922_v43 = vpop.f32.mrf.mxu1  ;;  %v4442_v41 = vpop.f32.mrf.mxu0 }
 0x275   : > { %v13228_v36 = vadd.f32 %v4439_v58, %v4236_v8  ;;  %v4239_v3 = vadd.f32 %v9922_v43, %v16227_v56 }
 0x276   : > { %v3740_v0 = vpop.f32.mrf.mxu1  ;;  %v10055_v18 = vpop.f32.mrf.mxu0  ;;  %10150 = vmatmul.mubr.msk.bf16.gmra.mxu0 %vm1131_vm2, %v16228_v40 }
 0x277   : > { %v13233_v42 = vadd.f32 %v10052_v26, %v4239_v3  ;;  %v4237_v55 = vadd.f32 %v3740_v0, %v12545_v15  ;;  %10153 = vmatprep.mubr.msk.bf16.mxu0 %vm1131_vm2, %v16229_v53  ;;  %v16232_v15 = vld [vmem:[#allocation109_spill] sm:$0xff] }
 0x278   : > { %v9925_v11 = vpop.f32.mrf.mxu1  ;;  %10020 = vmatmul.mubr.msk.bf16.gmra.mxu1 %vm1131_vm2, %v15910_v48  ;;  %v4455_v58 = vpop.f32.mrf.mxu0  ;;  %v16234_v53 = vld [vmem:[#allocation273_spill] sm:$0xff] }
 0x279   : > { %v13240_v29 = vadd.f32 %v4442_v41, %v4237_v55  ;;  %v4242_v56 = vadd.f32 %v9925_v11, %v12550_v6  ;;  %10023 = vmatprep.mubr.msk.bf16.mxu1 %vm1131_vm2, %v15916_v30  ;;  %v16235_v6 = vld [vmem:[#allocation123_spill] sm:$0xff] }
 0x27a   : > { %v3753_v12 = vpop.f32.mrf.mxu1  ;;  %v10056_v3 = vpop.f32.mrf.mxu0 }
 0x27b   : > { %16230 = vst [vmem:[#allocation81_spill] sm:$0xff] %v13240_v29  ;;  %v13245_v26 = vadd.f32 %v10055_v18, %v4242_v56  ;;  %v4240_v0 = vadd.f32 %v3753_v12, %v16232_v15  ;;  %v16237_v56 = vld [vmem:[#allocation127_spill] sm:$0xff] }
 0x27c   : > { %v9926_v50 = vpop.f32.mrf.mxu1  ;;  %v4458_v8 = vpop.f32.mrf.mxu0 }
 0x27d   : > { %16231 = vst [vmem:[#allocation267_spill] sm:$0xff] %v13245_v26  ;;  %v13248_v43 = vadd.f32 %v4455_v58, %v4240_v0  ;;  %v4243_v41 = vadd.f32 %v9926_v50, %v16234_v53  ;;  %v376_v0 = vld [vmem:[%s10939_s9 + $0x508] sm:$0xff] }
 0x27e   : > { %v3756_v55 = vpop.f32.mrf.mxu1  ;;  %v10059_v40 = vpop.f32.mrf.mxu0  ;;  %10154 = vmatmul.mubr.msk.bf16.gmra.mxu0 %vm1131_vm2, %v16235_v6 }
 0x27f   : > { %16233 = vst [vmem:[#allocation270_spill] sm:$0xff] %v13248_v43  ;;  %v13253_v11 = vadd.f32 %v10056_v3, %v4243_v41  ;;  %v4241_v18 = vadd.f32 %v3756_v55, %v12574_v5  ;;  %10157 = vmatprep.mubr.msk.bf16.mxu0 %vm1131_vm2, %v16237_v56  ;;  %v375_v3 = vld [vmem:[%s10939_s9 + $0x500] sm:$0xff] }
 0x280   : > { %v9929_v12 = vpop.f32.mrf.mxu1  ;;  %10024 = vmatmul.mubr.msk.bf16.gmra.mxu1 %vm1131_vm2, %v15917_v7  ;;  %v4471_v58 = vpop.f32.mrf.mxu0 }
 0x281   : > { %16236 = vst [vmem:[#allocation90_spill] sm:$0xff] %v13253_v11  ;;  %v13260_v53 = vadd.f32 %v4458_v8, %v4241_v18  ;;  %v4246_v15 = vadd.f32 %v9929_v12, %v12579_v59  ;;  %10027 = vmatprep.mubr.msk.bf16.mxu1 %vm1131_vm2, %v15923_v39  ;;  %v13270_v11 = vpack.c.bf16 %v376_v0, %v375_v3  ;;  %v16239_v8 = vld [vmem:[#allocation274_spill] sm:$0xff]  ;;  %v377_v59 = vld [vmem:[%s10939_s9 + $0x510] sm:$0xff]  ;;  %v378_v12 = vld [vmem:[%s10939_s9 + $0x518] sm:$0xff] }
 0x282   : > { %v3769_v5 = vpop.f32.mrf.mxu1  ;;  %v10060_v50 = vpop.f32.mrf.mxu0  ;;  %v16240_v39 = vld [vmem:[#allocation132_spill] sm:$0xff] }
 0x283   : > { %16238 = vst [vmem:[#allocation271_spill] sm:$0xff] %v13260_v53  ;;  %v13267_v41 = vadd.f32 %v10059_v40, %v4246_v15  ;;  %v4244_v55 = vadd.f32 %v3769_v5, %v12588_v60  ;;  %v16241_v60 = vld [vmem:[#allocation135_spill] sm:$0xff]  ;;  %v4362_v3 = vshll.u32 %v13270_v11, 16 }
 0x284   : > { %v9930_v56 = vpop.f32.mrf.mxu1  ;;  %v4474_v6 = vpop.f32.mrf.mxu0 }
 0x285   : > { %v13272_v43 = vadd.f32 %v4471_v58, %v4244_v55  ;;  %v4247_v18 = vadd.f32 %v9930_v56, %v16239_v8  ;;  %v13286_v58 = vpack.c.bf16 %v378_v12, %v377_v59  ;;  %v4360_v59 = vshrl.u32 %v13270_v11, 16 }
 0x286   : > { %v3772_v53 = vpop.f32.mrf.mxu1  ;;  %v10063_v26 = vpop.f32.mrf.mxu0  ;;  %10158 = vmatmul.mubr.msk.bf16.gmra.mxu0 %vm1131_vm2, %v16240_v39  ;;  %v4364_v12 = vrot.slane %v4362_v3, 1 }
 0x287   : > { %v13279_v29 = vadd.f32 %v10060_v50, %v4247_v18  ;;  %v4245_v40 = vadd.f32 %v3772_v53, %v12603_v62  ;;  %10161 = vmatprep.mubr.msk.bf16.mxu0 %vm1131_vm2, %v16241_v60  ;;  %v4366_v60 = vshll.u32 %v13286_v58, 16 }
 0x288   : > { %v9933_v15 = vpop.f32.mrf.mxu1  ;;  %10028 = vmatmul.mubr.msk.bf16.gmra.mxu1 %vm1131_vm2, %v15924_v20  ;;  %v4487_v56 = vpop.f32.mrf.mxu0 }
 0x289   : > { %v13289_v0 = vadd.f32 %v4474_v6, %v4245_v40  ;;  %v4250_v5 = vadd.f32 %v9933_v15, %v12608_v32  ;;  %10031 = vmatprep.mubr.msk.bf16.mxu1 %vm1131_vm2, %v15929_v16  ;;  %v379_v6 = vld [vmem:[%s10939_s9 + $0x520] sm:$0x3] }
 0x28a   : > { %v3785_v62 = vpop.f32.mrf.mxu1  ;;  %v10064_v53 = vpop.f32.mrf.mxu0  ;;  %v13310_v3 = vpack.c.bf16 %v379_v6, %v379_v6 }
 0x28b   : > { %16242 = vst [vmem:[#allocation99_spill] sm:$0xff] %v13289_v0  ;;  %v13294_v50 = vadd.f32 %v10063_v26, %v4250_v5  ;;  %v4248_v55 = vadd.f32 %v3785_v62, %v12617_v61  ;;  %v16243_v0 = vld [vmem:[#allocation138_spill] sm:$0xff]  ;;  %v16245_v5 = vld [vmem:[#allocation139_spill] sm:$0xff] }
 0x28c   : > { %v9934_v8 = vpop.f32.mrf.mxu1  ;;  %v4490_v18 = vpop.f32.mrf.mxu0 }
 0x28d   : > { %v13300_v40 = vadd.f32 %v4487_v56, %v4248_v55  ;;  %v4251_v32 = vadd.f32 %v9934_v8, %v12622_v4  ;;  %v4365_v4 = vor.u32 %v4364_v12, %v4360_v59  ;;  %v4368_v55 = vrot.slane %v4366_v60, 1 }
 0x28e   : > { %v3788_v15 = vpop.f32.mrf.mxu1  ;;  %v10067_v39 = vpop.f32.mrf.mxu0  ;;  %10162 = vmatmul.mubr.msk.bf16.gmra.mxu0 %vm1131_vm2, %v16243_v0 }
 0x28f   : > { %v13305_v26 = vadd.f32 %v10064_v53, %v4251_v32  ;;  %v4249_v61 = vadd.f32 %v3788_v15, %v12632_v35  ;;  %10165 = vmatprep.mubr.msk.bf16.mxu0 %vm1131_vm2, %v16245_v5  ;;  %v4370_v15 = vshrl.u32 %v13286_v58, 16  ;;  %v4374_v5 = vshll.u32 %v13310_v3, 16 }
 0x290   : > { %v9937_v62 = vpop.f32.mrf.mxu1  ;;  %10032 = vmatmul.mubr.msk.bf16.gmra.mxu1 %vm1131_vm2, %v11686_v9  ;;  %v4503_v56 = vpop.f32.mrf.mxu0  ;;  %v13325_v60 = vsel %vm488_vm1, %v4365_v4, %v4368_v55 }
 0x291   : > { %16244 = vst [vmem:[#allocation272_spill] sm:$0xff] %v13305_v26  ;;  %v13314_v8 = vadd.f32 %v4490_v18, %v4249_v61  ;;  %v4254_v0 = vadd.f32 %v9937_v62, %v12637_v34  ;;  %10035 = vmatprep.mubr.msk.bf16.mxu1 %vm1131_vm2, %v11733_v45  ;;  %16246 = vst [vmem:[#allocation109_spill] sm:$0xff] %v13325_v60  ;;  %v16247_v62 = vld [vmem:[#allocation141_spill] sm:$0xff] }
 0x292   : > { %v3801_v35 = vpop.f32.mrf.mxu1  ;;  %v10068_v53 = vpop.f32.mrf.mxu0 }
 0x293   : > { %v13319_v32 = vadd.f32 %v10067_v39, %v4254_v0  ;;  %v4252_v6 = vadd.f32 %v3801_v35, %v12646_v31  ;;  %v4372_v0 = vor.u32 %v4370_v15, %v4368_v55  ;;  %v4376_v35 = vrot.slane %v4374_v5, 1 }
 0x294   : > { %v9938_v26 = vpop.f32.mrf.mxu1  ;;  %v4506_v59 = vpop.f32.mrf.mxu0 }
 0x295   : > { %v13327_v18 = vadd.f32 %v4503_v56, %v4252_v6  ;;  %v4255_v34 = vadd.f32 %v9938_v26, %v12651_v44  ;;  %v13348_v5 = vsel %vm488_vm1, %v4372_v0, %v4376_v35 }
 0x296   : > { %v3804_v12 = vpop.f32.mrf.mxu1  ;;  %v10071_v61 = vpop.f32.mrf.mxu0  ;;  %10166 = vmatmul.mubr.msk.bf16.gmra.mxu0 %vm1131_vm2, %v16247_v62  ;;  %16248 = vst [vmem:[#allocation273_spill] sm:$0xff] %v13348_v5 }
 0x297   : > { %v13332_v39 = vadd.f32 %v10068_v53, %v4255_v34  ;;  %v4253_v31 = vadd.f32 %v3804_v12, %v12659_v21  ;;  %10169 = vmatprep.mubr.msk.bf16.mxu0 %vm1131_vm2, %v13325_v60  ;;  %v16266_v60 = vld [vmem:[#allocation209_spill] sm:$0xff] }
 0x298   : > { %v9941_v4 = vpop.f32.mrf.mxu1  ;;  %10036 = vmatmul.mubr.msk.bf16.gmra.mxu1 %vm1131_vm2, %v11738_v33  ;;  %v4519_v56 = vpop.f32.mrf.mxu0 }
 0x299   : > { %v13339_v44 = vadd.f32 %v4506_v59, %v4253_v31  ;;  %v4258_v26 = vadd.f32 %v9941_v4, %v12664_v51  ;;  %10039 = vmatprep.mubr.msk.bf16.mxu1 %vm1131_vm2, %v13270_v11 }
 0x29a   : > { %v3817_v53 = vpop.f32.mrf.mxu1  ;;  %v10072_v6 = vpop.f32.mrf.mxu0 }
 0x29b   : > { %v13344_v21 = vadd.f32 %v10071_v61, %v4258_v26  ;;  %v4256_v55 = vadd.f32 %v3817_v53, %v12670_v24 }
 0x29c   : > { %v9942_v15 = vpop.f32.mrf.mxu1  ;;  %v4522_v34 = vpop.f32.mrf.mxu0 }
 0x29d   : > { %v13350_v12 = vadd.f32 %v4519_v56, %v4256_v55  ;;  %v4259_v59 = vadd.f32 %v9942_v15, %v12675_v63  ;;  %v16249_v56 = vld [vmem:[#allocation142_spill] sm:$0xff]  ;;  %v7157_v15 = vsel %vm1324_vm0, %v13044_v14, 0 }
 0x29e   : > { %v3820_v31 = vpop.f32.mrf.mxu1  ;;  %v10075_v51 = vpop.f32.mrf.mxu0  ;;  %10170 = vmatmul.mubr.msk.bf16.gmra.mxu0 %vm1131_vm2, %v13348_v5 }
 0x29f   : > { %v13355_v4 = vadd.f32 %v10072_v6, %v4259_v59  ;;  %v4257_v61 = vadd.f32 %v3820_v31, %v12682_v38  ;;  %10305 = vmatprep.mubr.msk.bf16.mxu0 %vm1131_vm2, %v11033_v27 }
 0x2a0   : > { %v9945_v24 = vpop.f32.mrf.mxu1  ;;  %10040 = vmatmul.mubr.msk.bf16.gmra.mxu1 %vm1131_vm2, %v13286_v58  ;;  %v4535_v0 = vpop.f32.mrf.mxu0 }
 0x2a1   : > { %v13362_v35 = vadd.f32 %v4522_v34, %v4257_v61  ;;  %v4262_v63 = vadd.f32 %v9945_v24, %v12687_v13  ;;  %10175 = vmatprep.mubr.msk.bf16.mxu1 %vm1131_vm2, %v16249_v56  ;;  %v16250_v24 = vld [vmem:[#allocation143_spill] sm:$0xff] }
 0x2a2   : > { %v3833_v26 = vpop.f32.mrf.mxu1  ;;  %v10076_v53 = vpop.f32.mrf.mxu0 }
 0x2a3   : > { %v13367_v6 = vadd.f32 %v10075_v51, %v4262_v63  ;;  %v4260_v38 = vadd.f32 %v3833_v26, %v12692_v22  ;;  %v6465_v51 = vsel %vm1324_vm0, %v13034_v54, 0  ;;  %v16251_v63 = vld [vmem:[#allocation144_spill] sm:$0xff]  ;;  %v16252_v26 = vld [vmem:[#allocation13_spill] sm:$0xff] }
 0x2a4   : > { %v9946_v55 = vpop.f32.mrf.mxu1  ;;  %v4538_v27 = vpop.f32.mrf.mxu0 }
 0x2a5   : > { %v13372_v59 = vadd.f32 %v4535_v0, %v4260_v38  ;;  %v4263_v34 = vadd.f32 %v9946_v55, %v12699_v28 }
 0x2a6   : > { %v3836_v31 = vpop.f32.mrf.mxu1  ;;  %v10079_v13 = vpop.f32.mrf.mxu0  ;;  %10306 = vmatmul.mubr.msk.bf16.vlgmr.msra.gmra.mxu0 %vm1131_vm2, %v15945_v46 }
 0x2a7   : > { %v13379_v61 = vadd.f32 %v10076_v53, %v4263_v34  ;;  %v4261_v22 = vadd.f32 %v3836_v31, %v12706_v19  ;;  %10564 = vmatpush3.bf16.msra.mxu0 %v7157_v15  ;;  %10309 = vmatprep.mubr.msk.bf16.mxu0 %vm1131_vm2, %v15948_v23  ;;  %v16254_v15 = vld [vmem:[#allocation16_spill] sm:$0xff] }
 0x2a8   : > { %v9949_v14 = vpop.f32.mrf.mxu1  ;;  %10176 = vmatmul.mubr.msk.bf16.vlgmr.msra.gmra.mxu1 %vm1131_vm2, %v16250_v24  ;;  %v4551_v28 = vpop.f32.mrf.mxu0  ;;  %v16258_v24 = vld [vmem:[#allocation30_spill] sm:$0xff] }
 0x2a9   : > { %v13386_v0 = vadd.f32 %v4538_v27, %v4261_v22  ;;  %v4266_v46 = vadd.f32 %v9949_v14, %v12711_v52  ;;  %10434 = vmatpush3.bf16.msra.mxu1 %v6465_v51  ;;  %10179 = vmatprep.mubr.msk.bf16.mxu1 %vm1131_vm2, %v16251_v63  ;;  %v16255_v22 = vld [vmem:[#allocation23_spill] sm:$0xff] }
 0x2aa   : > { %v3849_v54 = vpop.f32.mrf.mxu1  ;;  %v10080_v56 = vpop.f32.mrf.mxu0  ;;  %v16257_v51 = vld [vmem:[#allocation203_spill] sm:$0xff] }
 0x2ab   : > { %v13391_v19 = vadd.f32 %v10079_v13, %v4266_v46  ;;  %v4264_v53 = vadd.f32 %v3849_v54, %v16252_v26  ;;  %v16259_v46 = vld [vmem:[#allocation145_spill] sm:$0xff]  ;;  %v16261_v26 = vld [vmem:[#allocation206_spill] sm:$0xff] }
 0x2ac   : > { %v9950_v23 = vpop.f32.mrf.mxu1  ;;  %v4554_v38 = vpop.f32.mrf.mxu0 }
 0x2ad   : > { %v13394_v55 = vadd.f32 %v4551_v28, %v4264_v53  ;;  %v4267_v34 = vadd.f32 %v9950_v23, %v16254_v15  ;;  %v16262_v23 = vld [vmem:[#allocation146_spill] sm:$0xff] }
 0x2ae   : > { %v3852_v27 = vpop.f32.mrf.mxu1  ;;  %v10083_v31 = vpop.f32.mrf.mxu0  ;;  %10310 = vmatmul.mubr.msk.bf16.gmra.mxu0 %vm1131_vm2, %v16255_v22 }
 0x2af   : > { %16253 = vst [vmem:[#allocation274_spill] sm:$0xff] %v13394_v55  ;;  %v13399_v52 = vadd.f32 %v10080_v56, %v4267_v34  ;;  %v4265_v14 = vadd.f32 %v3852_v27, %v16257_v51  ;;  %10313 = vmatprep.mubr.msk.bf16.mxu0 %vm1131_vm2, %v16258_v24  ;;  %v16264_v27 = vld [vmem:[#allocation14_spill] sm:$0xff]  ;;  %v16270_v55 = vld [vmem:[#allocation39_spill] sm:$0xff] }
 0x2b0   : > { %v9953_v13 = vpop.f32.mrf.mxu1  ;;  %10180 = vmatmul.mubr.msk.bf16.gmra.mxu1 %vm1131_vm2, %v16259_v46  ;;  %v4567_v28 = vpop.f32.mrf.mxu0 }
 0x2b1   : > { %16256 = vst [vmem:[#allocation142_spill] sm:$0xff] %v13399_v52  ;;  %v13406_v54 = vadd.f32 %v4554_v38, %v4265_v14  ;;  %v4270_v53 = vadd.f32 %v9953_v13, %v16261_v26  ;;  %10183 = vmatprep.mubr.msk.bf16.mxu1 %vm1131_vm2, %v16262_v23  ;;  %v16267_v14 = vld [vmem:[#allocation32_spill] sm:$0xff]  ;;  %v16269_v26 = vld [vmem:[#allocation21_spill] sm:$0xff] }
 0x2b2   : > { %v3865_v15 = vpop.f32.mrf.mxu1  ;;  %v10084_v56 = vpop.f32.mrf.mxu0 }
 0x2b3   : > { %16260 = vst [vmem:[#allocation143_spill] sm:$0xff] %v13406_v54  ;;  %v13411_v34 = vadd.f32 %v10083_v31, %v4270_v53  ;;  %v4268_v22 = vadd.f32 %v3865_v15, %v16264_v27  ;;  %v16271_v53 = vld [vmem:[#allocation147_spill] sm:$0xff] }
 0x2b4   : > { %v9954_v51 = vpop.f32.mrf.mxu1  ;;  %v4570_v24 = vpop.f32.mrf.mxu0 }
 0x2b5   : > { %16263 = vst [vmem:[#allocation144_spill] sm:$0xff] %v13411_v34  ;;  %v13414_v5 = vadd.f32 %v4567_v28, %v4268_v22  ;;  %v4271_v62 = vadd.f32 %v9954_v51, %v16266_v60  ;;  %v16273_v60 = vld [vmem:[#allocation210_spill] sm:$0xff]  ;;  %v16274_v22 = vld [vmem:[#allocation148_spill] sm:$0xff] }
 0x2b6   : > { %v3868_v52 = vpop.f32.mrf.mxu1  ;;  %v10087_v38 = vpop.f32.mrf.mxu0  ;;  %10314 = vmatmul.mubr.msk.bf16.gmra.mxu0 %vm1131_vm2, %v16267_v14 }
 0x2b7   : > { %16265 = vst [vmem:[#allocation13_spill] sm:$0xff] %v13414_v5  ;;  %v13419_v13 = vadd.f32 %v10084_v56, %v4271_v62  ;;  %v4269_v54 = vadd.f32 %v3868_v52, %v16269_v26  ;;  %10317 = vmatprep.mubr.msk.bf16.mxu0 %vm1131_vm2, %v16270_v55  ;;  %v16276_v52 = vld [vmem:[#allocation212_spill] sm:$0xff]  ;;  %v16278_v5 = vld [vmem:[#allocation215_spill] sm:$0xff] }
 0x2b8   : > { %v9957_v31 = vpop.f32.mrf.mxu1  ;;  %10184 = vmatmul.mubr.msk.bf16.gmra.mxu1 %vm1131_vm2, %v16271_v53  ;;  %v4583_v28 = vpop.f32.mrf.mxu0 }
 0x2b9   : > { %16268 = vst [vmem:[#allocation16_spill] sm:$0xff] %v13419_v13  ;;  %v13426_v15 = vadd.f32 %v4570_v24, %v4269_v54  ;;  %v4274_v27 = vadd.f32 %v9957_v31, %v16273_v60  ;;  %10187 = vmatprep.mubr.msk.bf16.mxu1 %vm1131_vm2, %v16274_v22  ;;  %v16279_v24 = vld [vmem:[#allocation41_spill] sm:$0xff]  ;;  %v16281_v60 = vld [vmem:[#allocation218_spill] sm:$0xff]  ;;  %v16282_v22 = vld [vmem:[#allocation48_spill] sm:$0xff] }
 0x2ba   : > { %v3881_v51 = vpop.f32.mrf.mxu1  ;;  %v10088_v62 = vpop.f32.mrf.mxu0 }
 0x2bb   : > { %16272 = vst [vmem:[#allocation23_spill] sm:$0xff] %v13426_v15  ;;  %v13431_v56 = vadd.f32 %v10087_v38, %v4274_v27  ;;  %v4272_v14 = vadd.f32 %v3881_v51, %v16276_v52  ;;  %v16283_v27 = vld [vmem:[#allocation149_spill] sm:$0xff] }
 0x2bc   : > { %v9958_v26 = vpop.f32.mrf.mxu1  ;;  %v4586_v55 = vpop.f32.mrf.mxu0 }
 0x2bd   : > { %16275 = vst [vmem:[#allocation203_spill] sm:$0xff] %v13431_v56  ;;  %v13434_v13 = vadd.f32 %v4583_v28, %v4272_v14  ;;  %v4275_v34 = vadd.f32 %v9958_v26, %v16278_v5  ;;  %v16285_v5 = vld [vmem:[#allocation219_spill] sm:$0xff]  ;;  %v16286_v14 = vld [vmem:[#allocation150_spill] sm:$0xff] }
 0x2be   : > { %v3884_v53 = vpop.f32.mrf.mxu1  ;;  %v10091_v54 = vpop.f32.mrf.mxu0  ;;  %10318 = vmatmul.mubr.msk.bf16.gmra.mxu0 %vm1131_vm2, %v16279_v24 }
 0x2bf   : > { %16277 = vst [vmem:[#allocation30_spill] sm:$0xff] %v13434_v13  ;;  %v13439_v31 = vadd.f32 %v10088_v62, %v4275_v34  ;;  %v4273_v15 = vadd.f32 %v3884_v53, %v16281_v60  ;;  %10321 = vmatprep.mubr.msk.bf16.mxu0 %vm1131_vm2, %v16282_v22  ;;  %v16288_v53 = vld [vmem:[#allocation221_spill] sm:$0xff]  ;;  %v16290_v13 = vld [vmem:[#allocation224_spill] sm:$0xff] }
 0x2c0   : > { %v9961_v38 = vpop.f32.mrf.mxu1  ;;  %10188 = vmatmul.mubr.msk.bf16.gmra.mxu1 %vm1131_vm2, %v16283_v27  ;;  %v4599_v28 = vpop.f32.mrf.mxu0 }
 0x2c1   : > { %16280 = vst [vmem:[#allocation145_spill] sm:$0xff] %v13439_v31  ;;  %v13446_v51 = vadd.f32 %v4586_v55, %v4273_v15  ;;  %v4278_v52 = vadd.f32 %v9961_v38, %v16285_v5  ;;  %10191 = vmatprep.mubr.msk.bf16.mxu1 %vm1131_vm2, %v16286_v14  ;;  %v16291_v55 = vld [vmem:[#allocation50_spill] sm:$0xff]  ;;  %v16293_v5 = vld [vmem:[#allocation227_spill] sm:$0xff]  ;;  %v16294_v14 = vld [vmem:[#allocation57_spill] sm:$0xff] }
 0x2c2   : > { %v3897_v26 = vpop.f32.mrf.mxu1  ;;  %v10092_v34 = vpop.f32.mrf.mxu0 }
 0x2c3   : > { %16284 = vst [vmem:[#allocation206_spill] sm:$0xff] %v13446_v51  ;;  %v13451_v62 = vadd.f32 %v10091_v54, %v4278_v52  ;;  %v4276_v24 = vadd.f32 %v3897_v26, %v16288_v53  ;;  %v16295_v52 = vld [vmem:[#allocation151_spill] sm:$0xff] }
 0x2c4   : > { %v9962_v60 = vpop.f32.mrf.mxu1  ;;  %v4602_v22 = vpop.f32.mrf.mxu0 }
 0x2c5   : > { %16287 = vst [vmem:[#allocation146_spill] sm:$0xff] %v13451_v62  ;;  %v13454_v31 = vadd.f32 %v4599_v28, %v4276_v24  ;;  %v4279_v56 = vadd.f32 %v9962_v60, %v16290_v13  ;;  %v16297_v13 = vld [vmem:[#allocation228_spill] sm:$0xff] }
 0x2c6   : > { %v3900_v27 = vpop.f32.mrf.mxu1  ;;  %v10095_v15 = vpop.f32.mrf.mxu0  ;;  %10322 = vmatmul.mubr.msk.bf16.gmra.mxu0 %vm1131_vm2, %v16291_v55  ;;  %v16298_v24 = vld [vmem:[#allocation152_spill] sm:$0xff] }
 0x2c7   : > { %16289 = vst [vmem:[#allocation14_spill] sm:$0xff] %v13454_v31  ;;  %v13459_v38 = vadd.f32 %v10092_v34, %v4279_v56  ;;  %v4277_v51 = vadd.f32 %v3900_v27, %v16293_v5  ;;  %10325 = vmatprep.mubr.msk.bf16.mxu0 %vm1131_vm2, %v16294_v14  ;;  %v16300_v27 = vld [vmem:[#allocation230_spill] sm:$0xff]  ;;  %v16302_v31 = vld [vmem:[#allocation233_spill] sm:$0xff] }
 0x2c8   : > { %v9965_v54 = vpop.f32.mrf.mxu1  ;;  %10192 = vmatmul.mubr.msk.bf16.gmra.mxu1 %vm1131_vm2, %v16295_v52  ;;  %v4615_v28 = vpop.f32.mrf.mxu0 }
 0x2c9   : > { %16292 = vst [vmem:[#allocation209_spill] sm:$0xff] %v13459_v38  ;;  %v13466_v26 = vadd.f32 %v4602_v22, %v4277_v51  ;;  %v4282_v53 = vadd.f32 %v9965_v54, %v16297_v13  ;;  %10195 = vmatprep.mubr.msk.bf16.mxu1 %vm1131_vm2, %v16298_v24  ;;  %v16303_v22 = vld [vmem:[#allocation59_spill] sm:$0xff]  ;;  %v16305_v13 = vld [vmem:[#allocation236_spill] sm:$0xff]  ;;  %v16306_v24 = vld [vmem:[#allocation66_spill] sm:$0xff] }
 0x2ca   : > { %v3913_v60 = vpop.f32.mrf.mxu1  ;;  %v10096_v56 = vpop.f32.mrf.mxu0 }
 0x2cb   : > { %16296 = vst [vmem:[#allocation32_spill] sm:$0xff] %v13466_v26  ;;  %v13471_v34 = vadd.f32 %v10095_v15, %v4282_v53  ;;  %v4280_v55 = vadd.f32 %v3913_v60, %v16300_v27  ;;  %v16307_v53 = vld [vmem:[#allocation153_spill] sm:$0xff] }
 0x2cc   : > { %v9966_v5 = vpop.f32.mrf.mxu1  ;;  %v4618_v14 = vpop.f32.mrf.mxu0 }
 0x2cd   : > { %16299 = vst [vmem:[#allocation21_spill] sm:$0xff] %v13471_v34  ;;  %v13474_v38 = vadd.f32 %v4615_v28, %v4280_v55  ;;  %v4283_v62 = vadd.f32 %v9966_v5, %v16302_v31  ;;  %v16309_v31 = vld [vmem:[#allocation237_spill] sm:$0xff]  ;;  %v16310_v55 = vld [vmem:[#allocation154_spill] sm:$0xff] }
 0x2ce   : > { %v3916_v52 = vpop.f32.mrf.mxu1  ;;  %v10099_v51 = vpop.f32.mrf.mxu0  ;;  %10326 = vmatmul.mubr.msk.bf16.gmra.mxu0 %vm1131_vm2, %v16303_v22 }
 0x2cf   : > { %16301 = vst [vmem:[#allocation39_spill] sm:$0xff] %v13474_v38  ;;  %v13479_v54 = vadd.f32 %v10096_v56, %v4283_v62  ;;  %v4281_v26 = vadd.f32 %v3916_v52, %v16305_v13  ;;  %10329 = vmatprep.mubr.msk.bf16.mxu0 %vm1131_vm2, %v16306_v24  ;;  %v16312_v52 = vld [vmem:[#allocation239_spill] sm:$0xff]  ;;  %v16314_v38 = vld [vmem:[#allocation242_spill] sm:$0xff] }
 0x2d0   : > { %v9969_v15 = vpop.f32.mrf.mxu1  ;;  %10196 = vmatmul.mubr.msk.bf16.gmra.mxu1 %vm1131_vm2, %v16307_v53  ;;  %v4631_v28 = vpop.f32.mrf.mxu0 }
 0x2d1   : > { %16304 = vst [vmem:[#allocation210_spill] sm:$0xff] %v13479_v54  ;;  %v13486_v60 = vadd.f32 %v4618_v14, %v4281_v26  ;;  %v4286_v27 = vadd.f32 %v9969_v15, %v16309_v31  ;;  %10199 = vmatprep.mubr.msk.bf16.mxu1 %vm1131_vm2, %v16310_v55  ;;  %v16315_v14 = vld [vmem:[#allocation68_spill] sm:$0xff]  ;;  %v16317_v31 = vld [vmem:[#allocation245_spill] sm:$0xff]  ;;  %v16318_v55 = vld [vmem:[#allocation75_spill] sm:$0xff] }
 0x2d2   : > { %v3929_v5 = vpop.f32.mrf.mxu1  ;;  %v10100_v62 = vpop.f32.mrf.mxu0 }
 0x2d3   : > { %16308 = vst [vmem:[#allocation212_spill] sm:$0xff] %v13486_v60  ;;  %v13491_v56 = vadd.f32 %v10099_v51, %v4286_v27  ;;  %v4284_v22 = vadd.f32 %v3929_v5, %v16312_v52  ;;  %v16319_v27 = vld [vmem:[#allocation155_spill] sm:$0xff] }
 0x2d4   : > { %v9970_v13 = vpop.f32.mrf.mxu1  ;;  %v4634_v24 = vpop.f32.mrf.mxu0 }
 0x2d5   : > { %16311 = vst [vmem:[#allocation215_spill] sm:$0xff] %v13491_v56  ;;  %v13494_v54 = vadd.f32 %v4631_v28, %v4284_v22  ;;  %v4287_v34 = vadd.f32 %v9970_v13, %v16314_v38  ;;  %v16321_v38 = vld [vmem:[#allocation246_spill] sm:$0xff]  ;;  %v16322_v22 = vld [vmem:[#allocation156_spill] sm:$0xff] }
 0x2d6   : > { %v3932_v53 = vpop.f32.mrf.mxu1  ;;  %v10103_v26 = vpop.f32.mrf.mxu0  ;;  %10330 = vmatmul.mubr.msk.bf16.gmra.mxu0 %vm1131_vm2, %v16315_v14 }
 0x2d7   : > { %16313 = vst [vmem:[#allocation41_spill] sm:$0xff] %v13494_v54  ;;  %v13499_v15 = vadd.f32 %v10100_v62, %v4287_v34  ;;  %v4285_v60 = vadd.f32 %v3932_v53, %v16317_v31  ;;  %10333 = vmatprep.mubr.msk.bf16.mxu0 %vm1131_vm2, %v16318_v55  ;;  %v16324_v53 = vld [vmem:[#allocation248_spill] sm:$0xff]  ;;  %v16326_v54 = vld [vmem:[#allocation251_spill] sm:$0xff] }
 0x2d8   : > { %v9973_v51 = vpop.f32.mrf.mxu1  ;;  %10200 = vmatmul.mubr.msk.bf16.gmra.mxu1 %vm1131_vm2, %v16319_v27  ;;  %v4647_v28 = vpop.f32.mrf.mxu0 }
 0x2d9   : > { %16316 = vst [vmem:[#allocation218_spill] sm:$0xff] %v13499_v15  ;;  %v13506_v5 = vadd.f32 %v4634_v24, %v4285_v60  ;;  %v4290_v52 = vadd.f32 %v9973_v51, %v16321_v38  ;;  %10203 = vmatprep.mubr.msk.bf16.mxu1 %vm1131_vm2, %v16322_v22  ;;  %v16327_v24 = vld [vmem:[#allocation77_spill] sm:$0xff]  ;;  %v16329_v38 = vld [vmem:[#allocation254_spill] sm:$0xff]  ;;  %v16330_v22 = vld [vmem:[#allocation84_spill] sm:$0xff] }
 0x2da   : > { %v3945_v13 = vpop.f32.mrf.mxu1  ;;  %v10104_v34 = vpop.f32.mrf.mxu0 }
 0x2db   : > { %16320 = vst [vmem:[#allocation48_spill] sm:$0xff] %v13506_v5  ;;  %v13511_v62 = vadd.f32 %v10103_v26, %v4290_v52  ;;  %v4288_v14 = vadd.f32 %v3945_v13, %v16324_v53  ;;  %v16331_v52 = vld [vmem:[#allocation157_spill] sm:$0xff] }
 0x2dc   : > { %v9974_v31 = vpop.f32.mrf.mxu1  ;;  %v4650_v55 = vpop.f32.mrf.mxu0 }
 0x2dd   : > { %16323 = vst [vmem:[#allocation219_spill] sm:$0xff] %v13511_v62  ;;  %v13514_v15 = vadd.f32 %v4647_v28, %v4288_v14  ;;  %v4291_v56 = vadd.f32 %v9974_v31, %v16326_v54  ;;  %v16333_v54 = vld [vmem:[#allocation255_spill] sm:$0xff]  ;;  %v16334_v14 = vld [vmem:[#allocation158_spill] sm:$0xff] }
 0x2de   : > { %v3948_v27 = vpop.f32.mrf.mxu1  ;;  %v10107_v60 = vpop.f32.mrf.mxu0  ;;  %10334 = vmatmul.mubr.msk.bf16.gmra.mxu0 %vm1131_vm2, %v16327_v24 }
 0x2df   : > { %16325 = vst [vmem:[#allocation221_spill] sm:$0xff] %v13514_v15  ;;  %v13519_v51 = vadd.f32 %v10104_v34, %v4291_v56  ;;  %v4289_v5 = vadd.f32 %v3948_v27, %v16329_v38  ;;  %10337 = vmatprep.mubr.msk.bf16.mxu0 %vm1131_vm2, %v16330_v22  ;;  %v16336_v27 = vld [vmem:[#allocation257_spill] sm:$0xff]  ;;  %v16338_v15 = vld [vmem:[#allocation260_spill] sm:$0xff] }
 0x2e0   : > { %v9977_v26 = vpop.f32.mrf.mxu1  ;;  %10204 = vmatmul.mubr.msk.bf16.gmra.mxu1 %vm1131_vm2, %v16331_v52  ;;  %v4663_v28 = vpop.f32.mrf.mxu0 }
 0x2e1   : > { %16328 = vst [vmem:[#allocation224_spill] sm:$0xff] %v13519_v51  ;;  %v13526_v13 = vadd.f32 %v4650_v55, %v4289_v5  ;;  %v4294_v53 = vadd.f32 %v9977_v26, %v16333_v54  ;;  %10207 = vmatprep.mubr.msk.bf16.mxu1 %vm1131_vm2, %v16334_v14  ;;  %v16339_v55 = vld [vmem:[#allocation86_spill] sm:$0xff]  ;;  %v16341_v54 = vld [vmem:[#allocation263_spill] sm:$0xff]  ;;  %v16342_v14 = vld [vmem:[#allocation93_spill] sm:$0xff] }
 0x2e2   : > { %v3961_v31 = vpop.f32.mrf.mxu1  ;;  %v10108_v56 = vpop.f32.mrf.mxu0 }
 0x2e3   : > { %16332 = vst [vmem:[#allocation50_spill] sm:$0xff] %v13526_v13  ;;  %v13531_v34 = vadd.f32 %v10107_v60, %v4294_v53  ;;  %v4292_v24 = vadd.f32 %v3961_v31, %v16336_v27  ;;  %v16343_v53 = vld [vmem:[#allocation161_spill] sm:$0xff] }
 0x2e4   : > { %v9978_v38 = vpop.f32.mrf.mxu1  ;;  %v4666_v22 = vpop.f32.mrf.mxu0 }
 0x2e5   : > { %16335 = vst [vmem:[#allocation227_spill] sm:$0xff] %v13531_v34  ;;  %v13534_v51 = vadd.f32 %v4663_v28, %v4292_v24  ;;  %v4295_v62 = vadd.f32 %v9978_v38, %v16338_v15  ;;  %v16345_v15 = vld [vmem:[#allocation264_spill] sm:$0xff]  ;;  %v16346_v24 = vld [vmem:[#allocation163_spill] sm:$0xff] }
 0x2e6   : > { %v3964_v52 = vpop.f32.mrf.mxu1  ;;  %v10111_v5 = vpop.f32.mrf.mxu0  ;;  %10338 = vmatmul.mubr.msk.bf16.gmra.mxu0 %vm1131_vm2, %v16339_v55 }
 0x2e7   : > { %16337 = vst [vmem:[#allocation57_spill] sm:$0xff] %v13534_v51  ;;  %v13539_v26 = vadd.f32 %v10108_v56, %v4295_v62  ;;  %v4293_v13 = vadd.f32 %v3964_v52, %v16341_v54  ;;  %10341 = vmatprep.mubr.msk.bf16.mxu0 %vm1131_vm2, %v16342_v14  ;;  %v16348_v52 = vld [vmem:[#allocation265_spill] sm:$0xff]  ;;  %v16350_v51 = vld [vmem:[#allocation268_spill] sm:$0xff] }
 0x2e8   : > { %v9981_v60 = vpop.f32.mrf.mxu1  ;;  %10208 = vmatmul.mubr.msk.bf16.gmra.mxu1 %vm1131_vm2, %v16343_v53  ;;  %v4679_v28 = vpop.f32.mrf.mxu0 }
 0x2e9   : > { %16340 = vst [vmem:[#allocation228_spill] sm:$0xff] %v13539_v26  ;;  %v13546_v31 = vadd.f32 %v4666_v22, %v4293_v13  ;;  %v4298_v27 = vadd.f32 %v9981_v60, %v16345_v15  ;;  %10211 = vmatprep.mubr.msk.bf16.mxu1 %vm1131_vm2, %v16346_v24  ;;  %v16351_v22 = vld [vmem:[#allocation95_spill] sm:$0xff] }
 0x2ea   : > { %v3977_v38 = vpop.f32.mrf.mxu1  ;;  %v10112_v62 = vpop.f32.mrf.mxu0  ;;  %v16353_v15 = vld [vmem:[#allocation159_spill] sm:$0xff] }
 0x2eb   : > { %16344 = vst [vmem:[#allocation230_spill] sm:$0xff] %v13546_v31  ;;  %v13551_v56 = vadd.f32 %v10111_v5, %v4298_v27  ;;  %v4296_v55 = vadd.f32 %v3977_v38, %v16348_v52  ;;  %v16354_v24 = vld [vmem:[#allocation103_spill] sm:$0xff] }
 0x2ec   : > { %v9982_v54 = vpop.f32.mrf.mxu1  ;;  %v4682_v14 = vpop.f32.mrf.mxu0  ;;  %v16355_v27 = vld [vmem:[#allocation167_spill] sm:$0xff] }
 0x2ed   : > { %16347 = vst [vmem:[#allocation233_spill] sm:$0xff] %v13551_v56  ;;  %v13554_v26 = vadd.f32 %v4679_v28, %v4296_v55  ;;  %v4299_v34 = vadd.f32 %v9982_v54, %v16350_v51  ;;  %v16357_v51 = vld [vmem:[#allocation160_spill] sm:$0xff]  ;;  %v16358_v55 = vld [vmem:[#allocation169_spill] sm:$0xff] }
 0x2ee   : > { %v3980_v53 = vpop.f32.mrf.mxu1  ;;  %v10115_v13 = vpop.f32.mrf.mxu0  ;;  %10342 = vmatmul.mubr.msk.bf16.gmra.mxu0 %vm1131_vm2, %v16351_v22 }
 0x2ef   : > { %16349 = vst [vmem:[#allocation59_spill] sm:$0xff] %v13554_v26  ;;  %v13559_v60 = vadd.f32 %v10112_v62, %v4299_v34  ;;  %v4297_v31 = vadd.f32 %v3980_v53, %v16353_v15  ;;  %10345 = vmatprep.mubr.msk.bf16.mxu0 %vm1131_vm2, %v16354_v24  ;;  %v16360_v53 = vld [vmem:[#allocation162_spill] sm:$0xff]  ;;  %v16362_v26 = vld [vmem:[#allocation164_spill] sm:$0xff] }
 0x2f0   : > { %v9985_v5 = vpop.f32.mrf.mxu1  ;;  %10212 = vmatmul.mubr.msk.bf16.gmra.mxu1 %vm1131_vm2, %v16355_v27  ;;  %v4695_v28 = vpop.f32.mrf.mxu0 }
 0x2f1   : > { %16352 = vst [vmem:[#allocation236_spill] sm:$0xff] %v13559_v60  ;;  %v13566_v38 = vadd.f32 %v4682_v14, %v4297_v31  ;;  %v4302_v52 = vadd.f32 %v9985_v5, %v16357_v51  ;;  %10215 = vmatprep.mubr.msk.bf16.mxu1 %vm1131_vm2, %v16358_v55  ;;  %v16363_v14 = vld [vmem:[#allocation105_spill] sm:$0xff] }
 0x2f2   : > { %v3993_v54 = vpop.f32.mrf.mxu1  ;;  %v10116_v34 = vpop.f32.mrf.mxu0  ;;  %v16365_v51 = vld [vmem:[#allocation165_spill] sm:$0xff] }
 0x2f3   : > { %16356 = vst [vmem:[#allocation66_spill] sm:$0xff] %v13566_v38  ;;  %v13571_v62 = vadd.f32 %v10115_v13, %v4302_v52  ;;  %v4300_v22 = vadd.f32 %v3993_v54, %v16360_v53  ;;  %v16366_v55 = vld [vmem:[#allocation113_spill] sm:$0xff]  ;;  %v16367_v52 = vld [vmem:[#allocation172_spill] sm:$0xff] }
 0x2f4   : > { %v9986_v15 = vpop.f32.mrf.mxu1  ;;  %v4698_v24 = vpop.f32.mrf.mxu0 }
 0x2f5   : > { %16359 = vst [vmem:[#allocation237_spill] sm:$0xff] %v13571_v62  ;;  %v13574_v60 = vadd.f32 %v4695_v28, %v4300_v22  ;;  %v4303_v56 = vadd.f32 %v9986_v15, %v16362_v26  ;;  %v16369_v26 = vld [vmem:[#allocation166_spill] sm:$0xff] }
 0x2f6   : > { %v3996_v27 = vpop.f32.mrf.mxu1  ;;  %v10119_v31 = vpop.f32.mrf.mxu0  ;;  %10346 = vmatmul.mubr.msk.bf16.gmra.mxu0 %vm1131_vm2, %v16363_v14  ;;  %v16370_v22 = vld [vmem:[#allocation174_spill] sm:$0xff] }
 0x2f7   : > { %16361 = vst [vmem:[#allocation239_spill] sm:$0xff] %v13574_v60  ;;  %v13579_v5 = vadd.f32 %v10116_v34, %v4303_v56  ;;  %v4301_v38 = vadd.f32 %v3996_v27, %v16365_v51  ;;  %10349 = vmatprep.mubr.msk.bf16.mxu0 %vm1131_vm2, %v16366_v55  ;;  %v16372_v27 = vld [vmem:[#allocation168_spill] sm:$0xff]  ;;  %v16374_v60 = vld [vmem:[#allocation170_spill] sm:$0xff] }
 0x2f8   : > { %v9989_v13 = vpop.f32.mrf.mxu1  ;;  %10216 = vmatmul.mubr.msk.bf16.gmra.mxu1 %vm1131_vm2, %v16367_v52  ;;  %v4711_v28 = vpop.f32.mrf.mxu0 }
 0x2f9   : > { %16364 = vst [vmem:[#allocation242_spill] sm:$0xff] %v13579_v5  ;;  %v13586_v54 = vadd.f32 %v4698_v24, %v4301_v38  ;;  %v4306_v53 = vadd.f32 %v9989_v13, %v16369_v26  ;;  %10219 = vmatprep.mubr.msk.bf16.mxu1 %vm1131_vm2, %v16370_v22  ;;  %v16375_v24 = vld [vmem:[#allocation115_spill] sm:$0xff]  ;;  %v16377_v26 = vld [vmem:[#allocation100_spill] sm:$0xff]  ;;  %v16378_v22 = vld [vmem:[#allocation122_spill] sm:$0xff] }
 0x2fa   : > { %v4009_v15 = vpop.f32.mrf.mxu1  ;;  %v10120_v56 = vpop.f32.mrf.mxu0 }
 0x2fb   : > { %16368 = vst [vmem:[#allocation68_spill] sm:$0xff] %v13586_v54  ;;  %v13591_v34 = vadd.f32 %v10119_v31, %v4306_v53  ;;  %v4304_v14 = vadd.f32 %v4009_v15, %v16372_v27  ;;  %v16379_v53 = vld [vmem:[#allocation177_spill] sm:$0xff] }
 0x2fc   : > { %v9990_v51 = vpop.f32.mrf.mxu1  ;;  %v4714_v55 = vpop.f32.mrf.mxu0 }
 0x2fd   : > { %16371 = vst [vmem:[#allocation245_spill] sm:$0xff] %v13591_v34  ;;  %v13594_v5 = vadd.f32 %v4711_v28, %v4304_v14  ;;  %v4307_v62 = vadd.f32 %v9990_v51, %v16374_v60  ;;  %v16381_v60 = vld [vmem:[#allocation171_spill] sm:$0xff] }
 0x2fe   : > { %v4012_v52 = vpop.f32.mrf.mxu1  ;;  %v10123_v38 = vpop.f32.mrf.mxu0  ;;  %10350 = vmatmul.mubr.msk.bf16.gmra.mxu0 %vm1131_vm2, %v16375_v24  ;;  %v16382_v14 = vld [vmem:[#allocation179_spill] sm:$0xff] }
 0x2ff   : > { %16373 = vst [vmem:[#allocation75_spill] sm:$0xff] %v13594_v5  ;;  %v13599_v13 = vadd.f32 %v10120_v56, %v4307_v62  ;;  %v4305_v54 = vadd.f32 %v4012_v52, %v16377_v26  ;;  %10353 = vmatprep.mubr.msk.bf16.mxu0 %vm1131_vm2, %v16378_v22  ;;  %v16384_v52 = vld [vmem:[#allocation173_spill] sm:$0xff]  ;;  %v16386_v5 = vld [vmem:[#allocation175_spill] sm:$0xff] }
 0x300   : > { %v9993_v31 = vpop.f32.mrf.mxu1  ;;  %10220 = vmatmul.mubr.msk.bf16.gmra.mxu1 %vm1131_vm2, %v16379_v53  ;;  %v4727_v28 = vpop.f32.mrf.mxu0 }
 0x301   : > { %16376 = vst [vmem:[#allocation246_spill] sm:$0xff] %v13599_v13  ;;  %v13606_v15 = vadd.f32 %v4714_v55, %v4305_v54  ;;  %v4310_v27 = vadd.f32 %v9993_v31, %v16381_v60  ;;  %10223 = vmatprep.mubr.msk.bf16.mxu1 %vm1131_vm2, %v16382_v14  ;;  %v16387_v55 = vld [vmem:[#allocation125_spill] sm:$0xff]  ;;  %v16389_v60 = vld [vmem:[#allocation110_spill] sm:$0xff]  ;;  %v16390_v14 = vld [vmem:[#allocation131_spill] sm:$0xff] }
 0x302   : > { %v4025_v51 = vpop.f32.mrf.mxu1  ;;  %v10124_v62 = vpop.f32.mrf.mxu0 }
 0x303   : > { %16380 = vst [vmem:[#allocation248_spill] sm:$0xff] %v13606_v15  ;;  %v13611_v56 = vadd.f32 %v10123_v38, %v4310_v27  ;;  %v4308_v24 = vadd.f32 %v4025_v51, %v16384_v52  ;;  %v16391_v27 = vld [vmem:[#allocation182_spill] sm:$0xff] }
 0x304   : > { %v9994_v26 = vpop.f32.mrf.mxu1  ;;  %v4730_v22 = vpop.f32.mrf.mxu0 }
 0x305   : > { %16383 = vst [vmem:[#allocation251_spill] sm:$0xff] %v13611_v56  ;;  %v13614_v13 = vadd.f32 %v4727_v28, %v4308_v24  ;;  %v4311_v34 = vadd.f32 %v9994_v26, %v16386_v5  ;;  %v16393_v5 = vld [vmem:[#allocation176_spill] sm:$0xff] }
 0x306   : > { %v4028_v53 = vpop.f32.mrf.mxu1  ;;  %v10127_v54 = vpop.f32.mrf.mxu0  ;;  %10354 = vmatmul.mubr.msk.bf16.gmra.mxu0 %vm1131_vm2, %v16387_v55  ;;  %v16394_v24 = vld [vmem:[#allocation184_spill] sm:$0xff] }
 0x307   : > { %16385 = vst [vmem:[#allocation77_spill] sm:$0xff] %v13614_v13  ;;  %v13619_v31 = vadd.f32 %v10124_v62, %v4311_v34  ;;  %v4309_v15 = vadd.f32 %v4028_v53, %v16389_v60  ;;  %10357 = vmatprep.mubr.msk.bf16.mxu0 %vm1131_vm2, %v16390_v14  ;;  %v16396_v53 = vld [vmem:[#allocation178_spill] sm:$0xff]  ;;  %v16398_v13 = vld [vmem:[#allocation180_spill] sm:$0xff] }
 0x308   : > { %v9997_v38 = vpop.f32.mrf.mxu1  ;;  %10224 = vmatmul.mubr.msk.bf16.gmra.mxu1 %vm1131_vm2, %v16391_v27  ;;  %v4743_v28 = vpop.f32.mrf.mxu0 }
 0x309   : > { %16388 = vst [vmem:[#allocation254_spill] sm:$0xff] %v13619_v31  ;;  %v13626_v51 = vadd.f32 %v4730_v22, %v4309_v15  ;;  %v4314_v52 = vadd.f32 %v9997_v38, %v16393_v5  ;;  %10227 = vmatprep.mubr.msk.bf16.mxu1 %vm1131_vm2, %v16394_v24  ;;  %v16399_v22 = vld [vmem:[#allocation134_spill] sm:$0xff]  ;;  %v16401_v5 = vld [vmem:[#allocation119_spill] sm:$0xff]  ;;  %v16402_v24 = vld [vmem:[#allocation5_spill] sm:$0xff] }
 0x30a   : > { %v4041_v26 = vpop.f32.mrf.mxu1  ;;  %v10128_v34 = vpop.f32.mrf.mxu0 }
 0x30b   : > { %16392 = vst [vmem:[#allocation84_spill] sm:$0xff] %v13626_v51  ;;  %v13631_v62 = vadd.f32 %v10127_v54, %v4314_v52  ;;  %v4312_v55 = vadd.f32 %v4041_v26, %v16396_v53  ;;  %v16403_v52 = vld [vmem:[#allocation187_spill] sm:$0xff] }
 0x30c   : > { %v9998_v60 = vpop.f32.mrf.mxu1  ;;  %v4746_v14 = vpop.f32.mrf.mxu0 }
 0x30d   : > { %16395 = vst [vmem:[#allocation255_spill] sm:$0xff] %v13631_v62  ;;  %v13634_v31 = vadd.f32 %v4743_v28, %v4312_v55  ;;  %v4315_v56 = vadd.f32 %v9998_v60, %v16398_v13  ;;  %v16405_v13 = vld [vmem:[#allocation181_spill] sm:$0xff] }
 0x30e   : > { %v4044_v27 = vpop.f32.mrf.mxu1  ;;  %v10131_v15 = vpop.f32.mrf.mxu0  ;;  %10358 = vmatmul.mubr.msk.bf16.gmra.mxu0 %vm1131_vm2, %v16399_v22  ;;  %v16406_v55 = vld [vmem:[#allocation189_spill] sm:$0xff] }
 0x30f   : > { %16397 = vst [vmem:[#allocation257_spill] sm:$0xff] %v13634_v31  ;;  %v13639_v38 = vadd.f32 %v10128_v34, %v4315_v56  ;;  %v4313_v51 = vadd.f32 %v4044_v27, %v16401_v5  ;;  %10361 = vmatprep.mubr.msk.bf16.mxu0 %vm1131_vm2, %v16402_v24  ;;  %v16408_v27 = vld [vmem:[#allocation183_spill] sm:$0xff]  ;;  %v16410_v31 = vld [vmem:[#allocation185_spill] sm:$0xff] }
 0x310   : > { %v10001_v54 = vpop.f32.mrf.mxu1  ;;  %10228 = vmatmul.mubr.msk.bf16.gmra.mxu1 %vm1131_vm2, %v16403_v52  ;;  %v4759_v28 = vpop.f32.mrf.mxu0 }
 0x311   : > { %16400 = vst [vmem:[#allocation260_spill] sm:$0xff] %v13639_v38  ;;  %v13646_v26 = vadd.f32 %v4746_v14, %v4313_v51  ;;  %v4318_v53 = vadd.f32 %v10001_v54, %v16405_v13  ;;  %10231 = vmatprep.mubr.msk.bf16.mxu1 %vm1131_vm2, %v16406_v55  ;;  %v16411_v14 = vld [vmem:[#allocation6_spill] sm:$0xff]  ;;  %v16413_v13 = vld [vmem:[#allocation128_spill] sm:$0xff]  ;;  %v16414_v55 = vld [vmem:[#allocation9_spill] sm:$0xff] }
 0x312   : > { %v4057_v60 = vpop.f32.mrf.mxu1  ;;  %v10132_v56 = vpop.f32.mrf.mxu0 }
 0x313   : > { %16404 = vst [vmem:[#allocation86_spill] sm:$0xff] %v13646_v26  ;;  %v13651_v34 = vadd.f32 %v10131_v15, %v4318_v53  ;;  %v4316_v22 = vadd.f32 %v4057_v60, %v16408_v27  ;;  %v16415_v53 = vld [vmem:[#allocation193_spill] sm:$0xff] }
 0x314   : > { %v10002_v5 = vpop.f32.mrf.mxu1  ;;  %v4762_v24 = vpop.f32.mrf.mxu0 }
 0x315   : > { %16407 = vst [vmem:[#allocation263_spill] sm:$0xff] %v13651_v34  ;;  %v13654_v38 = vadd.f32 %v4759_v28, %v4316_v22  ;;  %v4319_v62 = vadd.f32 %v10002_v5, %v16410_v31  ;;  %v16417_v31 = vld [vmem:[#allocation186_spill] sm:$0xff]  ;;  %v16418_v22 = vld [vmem:[#allocation195_spill] sm:$0xff] }
 0x316   : > { %v4060_v52 = vpop.f32.mrf.mxu1  ;;  %v10135_v51 = vpop.f32.mrf.mxu0  ;;  %10362 = vmatmul.mubr.msk.bf16.gmra.mxu0 %vm1131_vm2, %v16411_v14 }
 0x317   : > { %16409 = vst [vmem:[#allocation93_spill] sm:$0xff] %v13654_v38  ;;  %v13659_v54 = vadd.f32 %v10132_v56, %v4319_v62  ;;  %v4317_v26 = vadd.f32 %v4060_v52, %v16413_v13  ;;  %10365 = vmatprep.mubr.msk.bf16.mxu0 %vm1131_vm2, %v16414_v55  ;;  %v16420_v52 = vld [vmem:[#allocation188_spill] sm:$0xff]  ;;  %v16422_v38 = vld [vmem:[#allocation190_spill] sm:$0xff] }
 0x318   : > { %v10005_v15 = vpop.f32.mrf.mxu1  ;;  %10232 = vmatmul.mubr.msk.bf16.gmra.mxu1 %vm1131_vm2, %v16415_v53  ;;  %v4775_v28 = vpop.f32.mrf.mxu0 }
 0x319   : > { %16412 = vst [vmem:[#allocation264_spill] sm:$0xff] %v13659_v54  ;;  %v13666_v60 = vadd.f32 %v4762_v24, %v4317_v26  ;;  %v4322_v27 = vadd.f32 %v10005_v15, %v16417_v31  ;;  %10235 = vmatprep.mubr.msk.bf16.mxu1 %vm1131_vm2, %v16418_v22  ;;  %v16423_v24 = vld [vmem:[#allocation10_spill] sm:$0xff]  ;;  %v16425_v31 = vld [vmem:[#allocation191_spill] sm:$0xff] }
 0x31a   : > { %v4073_v5 = vpop.f32.mrf.mxu1  ;;  %v10136_v62 = vpop.f32.mrf.mxu0  ;;  %v16426_v22 = vld [vmem:[#allocation15_spill] sm:$0xff] }
 0x31b   : > { %16416 = vst [vmem:[#allocation265_spill] sm:$0xff] %v13666_v60  ;;  %v13671_v56 = vadd.f32 %v10135_v51, %v4322_v27  ;;  %v4320_v14 = vadd.f32 %v4073_v5, %v16420_v52  ;;  %v16427_v27 = vld [vmem:[#allocation198_spill] sm:$0xff] }
 0x31c   : > { %v10006_v13 = vpop.f32.mrf.mxu1  ;;  %v4778_v55 = vpop.f32.mrf.mxu0 }
 0x31d   : > { %16419 = vst [vmem:[#allocation268_spill] sm:$0xff] %v13671_v56  ;;  %v13674_v54 = vadd.f32 %v4775_v28, %v4320_v14  ;;  %v4323_v34 = vadd.f32 %v10006_v13, %v16422_v38  ;;  %v16429_v38 = vld [vmem:[#allocation192_spill] sm:$0xff] }
 0x31e   : > { %v4076_v53 = vpop.f32.mrf.mxu1  ;;  %v10139_v26 = vpop.f32.mrf.mxu0  ;;  %10366 = vmatmul.mubr.msk.bf16.gmra.mxu0 %vm1131_vm2, %v16423_v24  ;;  %v16430_v14 = vld [vmem:[#allocation200_spill] sm:$0xff] }
 0x31f   : > { %16421 = vst [vmem:[#allocation95_spill] sm:$0xff] %v13674_v54  ;;  %v13679_v15 = vadd.f32 %v10136_v62, %v4323_v34  ;;  %v4321_v60 = vadd.f32 %v4076_v53, %v16425_v31  ;;  %10369 = vmatprep.mubr.msk.bf16.mxu0 %vm1131_vm2, %v16426_v22  ;;  %v16432_v53 = vld [vmem:[#allocation194_spill] sm:$0xff]  ;;  %v16434_v54 = vld [vmem:[#allocation196_spill] sm:$0xff] }
 0x320   : > { %v10009_v51 = vpop.f32.mrf.mxu1  ;;  %10236 = vmatmul.mubr.msk.bf16.gmra.mxu1 %vm1131_vm2, %v16427_v27  ;;  %v4791_v28 = vpop.f32.mrf.mxu0 }
 0x321   : > { %16424 = vst [vmem:[#allocation159_spill] sm:$0xff] %v13679_v15  ;;  %v13686_v5 = vadd.f32 %v4778_v55, %v4321_v60  ;;  %v4326_v52 = vadd.f32 %v10009_v51, %v16429_v38  ;;  %10239 = vmatprep.mubr.msk.bf16.mxu1 %vm1131_vm2, %v16430_v14  ;;  %v16435_v55 = vld [vmem:[#allocation17_spill] sm:$0xff]  ;;  %v16437_v38 = vld [vmem:[#allocation7_spill] sm:$0xff] }
 0x322   : > { %v4089_v13 = vpop.f32.mrf.mxu1  ;;  %v10140_v34 = vpop.f32.mrf.mxu0  ;;  %v16438_v14 = vld [vmem:[#allocation25_spill] sm:$0xff] }
 0x323   : > { %16428 = vst [vmem:[#allocation103_spill] sm:$0xff] %v13686_v5  ;;  %v13691_v62 = vadd.f32 %v10139_v26, %v4326_v52  ;;  %v4324_v24 = vadd.f32 %v4089_v13, %v16432_v53  ;;  %v16439_v52 = vld [vmem:[#allocation204_spill] sm:$0xff] }
 0x324   : > { %v10010_v31 = vpop.f32.mrf.mxu1  ;;  %v4794_v22 = vpop.f32.mrf.mxu0 }
 0x325   : > { %16431 = vst [vmem:[#allocation160_spill] sm:$0xff] %v13691_v62  ;;  %v13694_v15 = vadd.f32 %v4791_v28, %v4324_v24  ;;  %v4327_v56 = vadd.f32 %v10010_v31, %v16434_v54  ;;  %v16441_v54 = vld [vmem:[#allocation197_spill] sm:$0xff]  ;;  %v16442_v24 = vld [vmem:[#allocation207_spill] sm:$0xff] }
 0x326   : > { %v4092_v27 = vpop.f32.mrf.mxu1  ;;  %v10143_v60 = vpop.f32.mrf.mxu0  ;;  %10370 = vmatmul.mubr.msk.bf16.gmra.mxu0 %vm1131_vm2, %v16435_v55 }
 0x327   : > { %16433 = vst [vmem:[#allocation162_spill] sm:$0xff] %v13694_v15  ;;  %v13699_v51 = vadd.f32 %v10140_v34, %v4327_v56  ;;  %v4325_v5 = vadd.f32 %v4092_v27, %v16437_v38  ;;  %10373 = vmatprep.mubr.msk.bf16.mxu0 %vm1131_vm2, %v16438_v14  ;;  %v16444_v27 = vld [vmem:[#allocation199_spill] sm:$0xff]  ;;  %v16446_v15 = vld [vmem:[#allocation201_spill] sm:$0xff] }
 0x328   : > { %v10013_v26 = vpop.f32.mrf.mxu1  ;;  %10240 = vmatmul.mubr.msk.bf16.gmra.mxu1 %vm1131_vm2, %v16439_v52  ;;  %v4807_v28 = vpop.f32.mrf.mxu0 }
 0x329   : > { %16436 = vst [vmem:[#allocation164_spill] sm:$0xff] %v13699_v51  ;;  %v13706_v13 = vadd.f32 %v4794_v22, %v4325_v5  ;;  %v4330_v53 = vadd.f32 %v10013_v26, %v16441_v54  ;;  %10243 = vmatprep.mubr.msk.bf16.mxu1 %vm1131_vm2, %v16442_v24  ;;  %v16447_v22 = vld [vmem:[#allocation27_spill] sm:$0xff]  ;;  %v16449_v54 = vld [vmem:[#allocation12_spill] sm:$0xff]  ;;  %v16450_v24 = vld [vmem:[#allocation34_spill] sm:$0xff] }
 0x32a   : > { %v4105_v31 = vpop.f32.mrf.mxu1  ;;  %v10144_v56 = vpop.f32.mrf.mxu0 }
 0x32b   : > { %16440 = vst [vmem:[#allocation105_spill] sm:$0xff] %v13706_v13  ;;  %v13711_v34 = vadd.f32 %v10143_v60, %v4330_v53  ;;  %v4328_v55 = vadd.f32 %v4105_v31, %v16444_v27  ;;  %v16451_v53 = vld [vmem:[#allocation213_spill] sm:$0xff] }
 0x32c   : > { %v10014_v38 = vpop.f32.mrf.mxu1  ;;  %v4810_v14 = vpop.f32.mrf.mxu0 }
 0x32d   : > { %16443 = vst [vmem:[#allocation165_spill] sm:$0xff] %v13711_v34  ;;  %v13714_v51 = vadd.f32 %v4807_v28, %v4328_v55  ;;  %v4331_v62 = vadd.f32 %v10014_v38, %v16446_v15  ;;  %v16453_v15 = vld [vmem:[#allocation202_spill] sm:$0xff]  ;;  %v16454_v55 = vld [vmem:[#allocation216_spill] sm:$0xff] }
 0x32e   : > { %v4108_v52 = vpop.f32.mrf.mxu1  ;;  %v10147_v5 = vpop.f32.mrf.mxu0  ;;  %10374 = vmatmul.mubr.msk.bf16.gmra.mxu0 %vm1131_vm2, %v16447_v22 }
 0x32f   : > { %16445 = vst [vmem:[#allocation113_spill] sm:$0xff] %v13714_v51  ;;  %v13719_v26 = vadd.f32 %v10144_v56, %v4331_v62  ;;  %v4329_v13 = vadd.f32 %v4108_v52, %v16449_v54  ;;  %10377 = vmatprep.mubr.msk.bf16.mxu0 %vm1131_vm2, %v16450_v24  ;;  %v16456_v52 = vld [vmem:[#allocation205_spill] sm:$0xff]  ;;  %v16458_v51 = vld [vmem:[#allocation208_spill] sm:$0xff] }
 0x330   : > { %v10017_v60 = vpop.f32.mrf.mxu1  ;;  %10244 = vmatmul.mubr.msk.bf16.gmra.mxu1 %vm1131_vm2, %v16451_v53  ;;  %v4823_v28 = vpop.f32.mrf.mxu0 }
 0x331   : > { %16448 = vst [vmem:[#allocation166_spill] sm:$0xff] %v13719_v26  ;;  %v13726_v31 = vadd.f32 %v4810_v14, %v4329_v13  ;;  %v4334_v27 = vadd.f32 %v10017_v60, %v16453_v15  ;;  %10247 = vmatprep.mubr.msk.bf16.mxu1 %vm1131_vm2, %v16454_v55  ;;  %v16459_v14 = vld [vmem:[#allocation36_spill] sm:$0xff] }
 0x332   : > { %v4121_v38 = vpop.f32.mrf.mxu1  ;;  %v10148_v62 = vpop.f32.mrf.mxu0  ;;  %v16461_v15 = vld [vmem:[#allocation20_spill] sm:$0xff] }
 0x333   : > { %16452 = vst [vmem:[#allocation168_spill] sm:$0xff] %v13726_v31  ;;  %v13731_v56 = vadd.f32 %v10147_v5, %v4334_v27  ;;  %v4332_v22 = vadd.f32 %v4121_v38, %v16456_v52  ;;  %v16462_v55 = vld [vmem:[#allocation44_spill] sm:$0xff]  ;;  %v16463_v27 = vld [vmem:[#allocation222_spill] sm:$0xff] }
 0x334   : > { %v10018_v54 = vpop.f32.mrf.mxu1  ;;  %v4826_v24 = vpop.f32.mrf.mxu0 }
 0x335   : > { %16455 = vst [vmem:[#allocation170_spill] sm:$0xff] %v13731_v56  ;;  %v13734_v26 = vadd.f32 %v4823_v28, %v4332_v22  ;;  %v4335_v34 = vadd.f32 %v10018_v54, %v16458_v51  ;;  %v16465_v51 = vld [vmem:[#allocation211_spill] sm:$0xff]  ;;  %v16466_v22 = vld [vmem:[#allocation225_spill] sm:$0xff] }
 0x336   : > { %v4124_v53 = vpop.f32.mrf.mxu1  ;;  %v10151_v13 = vpop.f32.mrf.mxu0  ;;  %10378 = vmatmul.mubr.msk.bf16.gmra.mxu0 %vm1131_vm2, %v16459_v14 }
 0x337   : > { %16457 = vst [vmem:[#allocation115_spill] sm:$0xff] %v13734_v26  ;;  %v13739_v60 = vadd.f32 %v10148_v62, %v4335_v34  ;;  %v4333_v31 = vadd.f32 %v4124_v53, %v16461_v15  ;;  %10381 = vmatprep.mubr.msk.bf16.mxu0 %vm1131_vm2, %v16462_v55  ;;  %v16468_v53 = vld [vmem:[#allocation214_spill] sm:$0xff]  ;;  %v16470_v26 = vld [vmem:[#allocation217_spill] sm:$0xff] }
 0x338   : > { %v10021_v5 = vpop.f32.mrf.mxu1  ;;  %10248 = vmatmul.mubr.msk.bf16.gmra.mxu1 %vm1131_vm2, %v16463_v27  ;;  %v4839_v28 = vpop.f32.mrf.mxu0 }
 0x339   : > { %16460 = vst [vmem:[#allocation100_spill] sm:$0xff] %v13739_v60  ;;  %v13746_v38 = vadd.f32 %v4826_v24, %v4333_v31  ;;  %v4338_v52 = vadd.f32 %v10021_v5, %v16465_v51  ;;  %10251 = vmatprep.mubr.msk.bf16.mxu1 %vm1131_vm2, %v16466_v22  ;;  %v16471_v24 = vld [vmem:[#allocation45_spill] sm:$0xff]  ;;  %v16474_v22 = vld [vmem:[#allocation52_spill] sm:$0xff] }
 0x33a   : > { %v4137_v54 = vpop.f32.mrf.mxu1  ;;  %v10152_v34 = vpop.f32.mrf.mxu0  ;;  %v16473_v51 = vld [vmem:[#allocation29_spill] sm:$0xff] }
 0x33b   : > { %16464 = vst [vmem:[#allocation122_spill] sm:$0xff] %v13746_v38  ;;  %v13751_v62 = vadd.f32 %v10151_v13, %v4338_v52  ;;  %v4336_v14 = vadd.f32 %v4137_v54, %v16468_v53  ;;  %v16475_v52 = vld [vmem:[#allocation231_spill] sm:$0xff] }
 0x33c   : > { %v10022_v15 = vpop.f32.mrf.mxu1  ;;  %v4842_v55 = vpop.f32.mrf.mxu0 }
 0x33d   : > { %16467 = vst [vmem:[#allocation171_spill] sm:$0xff] %v13751_v62  ;;  %v13754_v60 = vadd.f32 %v4839_v28, %v4336_v14  ;;  %v4339_v56 = vadd.f32 %v10022_v15, %v16470_v26  ;;  %v16477_v26 = vld [vmem:[#allocation220_spill] sm:$0xff]  ;;  %v16478_v14 = vld [vmem:[#allocation234_spill] sm:$0xff] }
 0x33e   : > { %v4140_v27 = vpop.f32.mrf.mxu1  ;;  %v10155_v31 = vpop.f32.mrf.mxu0  ;;  %10382 = vmatmul.mubr.msk.bf16.gmra.mxu0 %vm1131_vm2, %v16471_v24 }
 0x33f   : > { %16469 = vst [vmem:[#allocation173_spill] sm:$0xff] %v13754_v60  ;;  %v13759_v5 = vadd.f32 %v10152_v34, %v4339_v56  ;;  %v4337_v38 = vadd.f32 %v4140_v27, %v16473_v51  ;;  %10385 = vmatprep.mubr.msk.bf16.mxu0 %vm1131_vm2, %v16474_v22  ;;  %v16480_v27 = vld [vmem:[#allocation223_spill] sm:$0xff]  ;;  %v16482_v60 = vld [vmem:[#allocation226_spill] sm:$0xff] }
 0x340   : > { %v10025_v13 = vpop.f32.mrf.mxu1  ;;  %10252 = vmatmul.mubr.msk.bf16.gmra.mxu1 %vm1131_vm2, %v16475_v52  ;;  %v4855_v28 = vpop.f32.mrf.mxu0 }
 0x341   : > { %16472 = vst [vmem:[#allocation175_spill] sm:$0xff] %v13759_v5  ;;  %v13766_v54 = vadd.f32 %v4842_v55, %v4337_v38  ;;  %v4342_v53 = vadd.f32 %v10025_v13, %v16477_v26  ;;  %10255 = vmatprep.mubr.msk.bf16.mxu1 %vm1131_vm2, %v16478_v14  ;;  %v16483_v55 = vld [vmem:[#allocation54_spill] sm:$0xff] }
 0x342   : > { %v4153_v15 = vpop.f32.mrf.mxu1  ;;  %v10156_v56 = vpop.f32.mrf.mxu0  ;;  %v16485_v26 = vld [vmem:[#allocation38_spill] sm:$0xff] }
 0x343   : > { %16476 = vst [vmem:[#allocation125_spill] sm:$0xff] %v13766_v54  ;;  %v13771_v34 = vadd.f32 %v10155_v31, %v4342_v53  ;;  %v4340_v24 = vadd.f32 %v4153_v15, %v16480_v27  ;;  %v16486_v14 = vld [vmem:[#allocation62_spill] sm:$0xff]  ;;  %v16487_v53 = vld [vmem:[#allocation240_spill] sm:$0xff] }
 0x344   : > { %v10026_v51 = vpop.f32.mrf.mxu1  ;;  %v4858_v22 = vpop.f32.mrf.mxu0 }
 0x345   : > { %16479 = vst [vmem:[#allocation110_spill] sm:$0xff] %v13771_v34  ;;  %v13774_v5 = vadd.f32 %v4855_v28, %v4340_v24  ;;  %v4343_v62 = vadd.f32 %v10026_v51, %v16482_v60  ;;  %v16489_v60 = vld [vmem:[#allocation229_spill] sm:$0xff]  ;;  %v16490_v24 = vld [vmem:[#allocation243_spill] sm:$0xff] }
 0x346   : > { %v4156_v52 = vpop.f32.mrf.mxu1  ;;  %v10159_v38 = vpop.f32.mrf.mxu0  ;;  %10386 = vmatmul.mubr.msk.bf16.gmra.mxu0 %vm1131_vm2, %v16483_v55 }
 0x347   : > { %16481 = vst [vmem:[#allocation131_spill] sm:$0xff] %v13774_v5  ;;  %v13779_v13 = vadd.f32 %v10156_v56, %v4343_v62  ;;  %v4341_v54 = vadd.f32 %v4156_v52, %v16485_v26  ;;  %10389 = vmatprep.mubr.msk.bf16.mxu0 %vm1131_vm2, %v16486_v14  ;;  %v16492_v52 = vld [vmem:[#allocation232_spill] sm:$0xff]  ;;  %v16494_v5 = vld [vmem:[#allocation235_spill] sm:$0xff] }
 0x348   : > { %v10029_v31 = vpop.f32.mrf.mxu1  ;;  %10256 = vmatmul.mubr.msk.bf16.gmra.mxu1 %vm1131_vm2, %v16487_v53  ;;  %v4871_v28 = vpop.f32.mrf.mxu0 }
 0x349   : > { %16484 = vst [vmem:[#allocation176_spill] sm:$0xff] %v13779_v13  ;;  %v13786_v15 = vadd.f32 %v4858_v22, %v4341_v54  ;;  %v4346_v27 = vadd.f32 %v10029_v31, %v16489_v60  ;;  %10259 = vmatprep.mubr.msk.bf16.mxu1 %vm1131_vm2, %v16490_v24  ;;  %v16495_v22 = vld [vmem:[#allocation63_spill] sm:$0xff]  ;;  %v16498_v24 = vld [vmem:[#allocation70_spill] sm:$0xff] }
 0x34a   : > { %v4169_v51 = vpop.f32.mrf.mxu1  ;;  %v10160_v62 = vpop.f32.mrf.mxu0  ;;  %v16497_v60 = vld [vmem:[#allocation47_spill] sm:$0xff] }
 0x34b   : > { %16488 = vst [vmem:[#allocation178_spill] sm:$0xff] %v13786_v15  ;;  %v13791_v56 = vadd.f32 %v10159_v38, %v4346_v27  ;;  %v4344_v55 = vadd.f32 %v4169_v51, %v16492_v52  ;;  %v16499_v27 = vld [vmem:[#allocation249_spill] sm:$0xff] }
 0x34c   : > { %v10030_v26 = vpop.f32.mrf.mxu1  ;;  %v4874_v14 = vpop.f32.mrf.mxu0 }
 0x34d   : > { %16491 = vst [vmem:[#allocation180_spill] sm:$0xff] %v13791_v56  ;;  %v13794_v13 = vadd.f32 %v4871_v28, %v4344_v55  ;;  %v4347_v34 = vadd.f32 %v10030_v26, %v16494_v5  ;;  %v16501_v5 = vld [vmem:[#allocation238_spill] sm:$0xff]  ;;  %v16502_v55 = vld [vmem:[#allocation252_spill] sm:$0xff] }
 0x34e   : > { %v4172_v53 = vpop.f32.mrf.mxu1  ;;  %v10163_v54 = vpop.f32.mrf.mxu0  ;;  %10390 = vmatmul.mubr.msk.bf16.gmra.mxu0 %vm1131_vm2, %v16495_v22 }
 0x34f   : > { %16493 = vst [vmem:[#allocation134_spill] sm:$0xff] %v13794_v13  ;;  %v13799_v31 = vadd.f32 %v10160_v62, %v4347_v34  ;;  %v4345_v15 = vadd.f32 %v4172_v53, %v16497_v60  ;;  %10393 = vmatprep.mubr.msk.bf16.mxu0 %vm1131_vm2, %v16498_v24  ;;  %v16504_v53 = vld [vmem:[#allocation241_spill] sm:$0xff]  ;;  %v16506_v13 = vld [vmem:[#allocation244_spill] sm:$0xff] }
 0x350   : > { %v10033_v38 = vpop.f32.mrf.mxu1  ;;  %10260 = vmatmul.mubr.msk.bf16.gmra.mxu1 %vm1131_vm2, %v16499_v27  ;;  %v4887_v28 = vpop.f32.mrf.mxu0 }
 0x351   : > { %16496 = vst [vmem:[#allocation119_spill] sm:$0xff] %v13799_v31  ;;  %v13806_v51 = vadd.f32 %v4874_v14, %v4345_v15  ;;  %v4350_v52 = vadd.f32 %v10033_v38, %v16501_v5  ;;  %10263 = vmatprep.mubr.msk.bf16.mxu1 %vm1131_vm2, %v16502_v55  ;;  %v16507_v14 = vld [vmem:[#allocation72_spill] sm:$0xff] }
 0x352   : > { %v4185_v26 = vpop.f32.mrf.mxu1  ;;  %v10164_v34 = vpop.f32.mrf.mxu0  ;;  %v16509_v5 = vld [vmem:[#allocation56_spill] sm:$0xff] }
 0x353   : > { %16500 = vst [vmem:[#allocation5_spill] sm:$0xff] %v13806_v51  ;;  %v13811_v62 = vadd.f32 %v10163_v54, %v4350_v52  ;;  %v4348_v22 = vadd.f32 %v4185_v26, %v16504_v53  ;;  %v16510_v55 = vld [vmem:[#allocation80_spill] sm:$0xff]  ;;  %v16511_v52 = vld [vmem:[#allocation258_spill] sm:$0xff] }
 0x354   : > { %v10034_v60 = vpop.f32.mrf.mxu1  ;;  %v4890_v24 = vpop.f32.mrf.mxu0 }
 0x355   : > { %16503 = vst [vmem:[#allocation181_spill] sm:$0xff] %v13811_v62  ;;  %v13814_v31 = vadd.f32 %v4887_v28, %v4348_v22  ;;  %v4351_v56 = vadd.f32 %v10034_v60, %v16506_v13  ;;  %v16512_v13 = vld [vmem:[#allocation247_spill] sm:$0xff]  ;;  %v16513_v22 = vld [vmem:[#allocation261_spill] sm:$0xff] }
 0x356   : > { %v4188_v27 = vpop.f32.mrf.mxu1  ;;  %v10167_v15 = vpop.f32.mrf.mxu0  ;;  %10394 = vmatmul.mubr.msk.bf16.gmra.mxu0 %vm1131_vm2, %v16507_v14 }
 0x357   : > { %16505 = vst [vmem:[#allocation183_spill] sm:$0xff] %v13814_v31  ;;  %v13819_v38 = vadd.f32 %v10164_v34, %v4351_v56  ;;  %v4349_v51 = vadd.f32 %v4188_v27, %v16509_v5  ;;  %10397 = vmatprep.mubr.msk.bf16.mxu0 %vm1131_vm2, %v16510_v55  ;;  %v16514_v27 = vld [vmem:[#allocation250_spill] sm:$0xff]  ;;  %v16516_v31 = vld [vmem:[#allocation253_spill] sm:$0xff] }
 0x358   : > { %v10037_v54 = vpop.f32.mrf.mxu1  ;;  %10264 = vmatmul.mubr.msk.bf16.gmra.mxu1 %vm1131_vm2, %v16511_v52  ;;  %v4903_v28 = vpop.f32.mrf.mxu0 }
 0x359   : > { %16508 = vst [vmem:[#allocation185_spill] sm:$0xff] %v13819_v38  ;;  %v13826_v26 = vadd.f32 %v4890_v24, %v4349_v51  ;;  %v4354_v53 = vadd.f32 %v10037_v54, %v16512_v13  ;;  %10267 = vmatprep.mubr.msk.bf16.mxu1 %vm1131_vm2, %v16513_v22  ;;  %v16518_v54 = vld [vmem:[#allocation65_spill] sm:$0xff] }
 0x35a   : > { %v4201_v60 = vpop.f32.mrf.mxu1  ;;  %v10168_v56 = vpop.f32.mrf.mxu0 }
 0x35b   : > { %v13831_v34 = vadd.f32 %v10167_v15, %v4354_v53  ;;  %v4352_v14 = vadd.f32 %v4201_v60, %v16514_v27  ;;  %v16519_v53 = vld [vmem:[#allocation266_spill] sm:$0xff]  ;;  %v16520_v27 = vld [vmem:[#allocation269_spill] sm:$0xff] }
 0x35c   : > { %v10038_v5 = vpop.f32.mrf.mxu1  ;;  %v4906_v55 = vpop.f32.mrf.mxu0 }
 0x35d   : > { %v13834_v38 = vadd.f32 %v4903_v28, %v4352_v14  ;;  %v4355_v62 = vadd.f32 %v10038_v5, %v16516_v31 }
 0x35e   : > { %v4204_v52 = vpop.f32.mrf.mxu1  ;;  %v10171_v51 = vpop.f32.mrf.mxu0  ;;  %10398 = vmatmul.mubr.msk.bf16.gmra.mxu0 %vm1131_vm2, %v15893_v17 }
 0x35f   : > { %16515 = vst [vmem:[#allocation6_spill] sm:$0xff] %v13834_v38  ;;  %v13839_v24 = vadd.f32 %v10168_v56, %v4355_v62  ;;  %v4353_v13 = vadd.f32 %v4204_v52, %v16518_v54  ;;  %10401 = vmatprep.mubr.msk.bf16.mxu0 %vm1131_vm2, %v15902_v10  ;;  %v16522_v54 = vld [vmem:[#allocation256_spill] sm:$0xff] }
 0x360   : > { %v10041_v15 = vpop.f32.mrf.mxu1  ;;  %10268 = vmatmul.mubr.msk.bf16.gmra.mxu1 %vm1131_vm2, %v16519_v53  ;;  %v4919_v28 = vpop.f32.mrf.mxu0 }
 0x361   : > { %16517 = vst [vmem:[#allocation128_spill] sm:$0xff] %v13839_v24  ;;  %v13846_v60 = vadd.f32 %v4906_v55, %v4353_v13  ;;  %v4358_v31 = vadd.f32 %v10041_v15, %v13185_v47  ;;  %10271 = vmatprep.mubr.msk.bf16.mxu1 %vm1131_vm2, %v16520_v27  ;;  %v16524_v13 = vld [vmem:[#allocation259_spill] sm:$0xff] }
 0x362   : > { %v4217_v17 = vpop.f32.mrf.mxu1  ;;  %v10172_v62 = vpop.f32.mrf.mxu0 }
 0x363   : > { %v13851_v56 = vadd.f32 %v10171_v51, %v4358_v31  ;;  %v4356_v52 = vadd.f32 %v4217_v17, %v13188_v2  ;;  %v16525_v2 = vld [vmem:[#allocation83_spill] sm:$0xff] }
 0x364   : > { %v10042_v14 = vpop.f32.mrf.mxu1  ;;  %v4922_v10 = vpop.f32.mrf.mxu0 }
 0x365   : > { %v13854_v5 = vadd.f32 %v4919_v28, %v4356_v52  ;;  %v4359_v24 = vadd.f32 %v10042_v14, %v16522_v54  ;;  %v16526_v52 = vld [vmem:[#allocation88_spill] sm:$0xff] }
 0x366   : > { %v4220_v38 = vpop.f32.mrf.mxu1  ;;  %v10307_v55 = vpop.f32.mrf.mxu0  ;;  %10402 = vmatmul.mubr.msk.bf16.gmra.mxu0 %vm1131_vm2, %v15903_v49 }
 0x367   : > { %16521 = vst [vmem:[#allocation9_spill] sm:$0xff] %v13854_v5  ;;  %v13859_v47 = vadd.f32 %v10172_v62, %v4359_v24  ;;  %v4357_v15 = vadd.f32 %v4220_v38, %v16524_v13  ;;  %10405 = vmatprep.mubr.msk.bf16.mxu0 %vm1131_vm2, %v15909_v37  ;;  %v16527_v13 = vld [vmem:[#allocation262_spill] sm:$0xff] }
 0x368   : > { %v10177_v51 = vpop.f32.mrf.mxu1  ;;  %10272 = vmatmul.mubr.msk.bf16.gmra.mxu1 %vm1131_vm2, %v16525_v2  ;;  %v5799_v28 = vpop.f32.mrf.mxu0 }
 0x369   : > { %16523 = vst [vmem:[#allocation186_spill] sm:$0xff] %v13859_v47  ;;  %v13866_v31 = vadd.f32 %v4922_v10, %v4357_v15  ;;  %v5628_v17 = vadd.f32 %v10177_v51, %v13205_v57  ;;  %10275 = vmatprep.mubr.msk.bf16.mxu1 %vm1131_vm2, %v16526_v52  ;;  %v16529_v15 = vld [vmem:[#allocation74_spill] sm:$0xff] }
 0x36a   : > { %v5115_v49 = vpop.f32.mrf.mxu1  ;;  %v10308_v24 = vpop.f32.mrf.mxu0 }
 0x36b   : > { %v13871_v62 = vadd.f32 %v10307_v55, %v5628_v17  ;;  %v5626_v38 = vadd.f32 %v5115_v49, %v13208_v1  ;;  %v16530_v1 = vld [vmem:[#allocation92_spill] sm:$0xff] }
 0x36c   : > { %v10178_v14 = vpop.f32.mrf.mxu1  ;;  %v5802_v37 = vpop.f32.mrf.mxu0 }
 0x36d   : > { %v13874_v54 = vadd.f32 %v5799_v28, %v5626_v38  ;;  %v5629_v47 = vadd.f32 %v10178_v14, %v16527_v13  ;;  %v16532_v38 = vld [vmem:[#allocation98_spill] sm:$0xff] }
 0x36e   : > { %v5118_v5 = vpop.f32.mrf.mxu1  ;;  %v10311_v10 = vpop.f32.mrf.mxu0  ;;  %10406 = vmatmul.mubr.msk.bf16.gmra.mxu0 %vm1131_vm2, %v15910_v48 }
 0x36f   : > { %v13879_v57 = vadd.f32 %v10308_v24, %v5629_v47  ;;  %v5627_v51 = vadd.f32 %v5118_v5, %v16529_v15  ;;  %10409 = vmatprep.mubr.msk.bf16.mxu0 %vm1131_vm2, %v15916_v30 }
 0x370   : > { %v10181_v55 = vpop.f32.mrf.mxu1  ;;  %10276 = vmatmul.mubr.msk.bf16.gmra.mxu1 %vm1131_vm2, %v16530_v1  ;;  %v5815_v28 = vpop.f32.mrf.mxu0 }
 0x371   : > { %16528 = vst [vmem:[#allocation188_spill] sm:$0xff] %v13879_v57  ;;  %v13886_v17 = vadd.f32 %v5802_v37, %v5627_v51  ;;  %v5632_v49 = vadd.f32 %v10181_v55, %v13225_v25  ;;  %10279 = vmatprep.mubr.msk.bf16.mxu1 %vm1131_vm2, %v16532_v38  ;;  %v16536_v51 = vld [vmem:[#allocation81_spill] sm:$0xff] }
 0x372   : > { %v5131_v48 = vpop.f32.mrf.mxu1  ;;  %v10312_v47 = vpop.f32.mrf.mxu0 }
 0x373   : > { %16531 = vst [vmem:[#allocation190_spill] sm:$0xff] %v13886_v17  ;;  %v13891_v24 = vadd.f32 %v10311_v10, %v5632_v49  ;;  %v5630_v5 = vadd.f32 %v5131_v48, %v13228_v36  ;;  %v16537_v17 = vld [vmem:[#allocation117_spill] sm:$0xff]  ;;  %v16538_v36 = vld [vmem:[#allocation102_spill] sm:$0xff] }
 0x374   : > { %v10182_v14 = vpop.f32.mrf.mxu1  ;;  %v5818_v30 = vpop.f32.mrf.mxu0 }
 0x375   : > { %16533 = vst [vmem:[#allocation10_spill] sm:$0xff] %v13891_v24  ;;  %v13894_v13 = vadd.f32 %v5815_v28, %v5630_v5  ;;  %v5633_v15 = vadd.f32 %v10182_v14, %v13233_v42  ;;  %v16539_v42 = vld [vmem:[#allocation267_spill] sm:$0xff] }
 0x376   : > { %v5134_v57 = vpop.f32.mrf.mxu1  ;;  %v10315_v37 = vpop.f32.mrf.mxu0  ;;  %10410 = vmatmul.mubr.msk.bf16.gmra.mxu0 %vm1131_vm2, %v15917_v7  ;;  %v16540_v5 = vld [vmem:[#allocation107_spill] sm:$0xff] }
 0x377   : > { %16534 = vst [vmem:[#allocation191_spill] sm:$0xff] %v13894_v13  ;;  %v13899_v25 = vadd.f32 %v10312_v47, %v5633_v15  ;;  %v5631_v55 = vadd.f32 %v5134_v57, %v16536_v51  ;;  %10413 = vmatprep.mubr.msk.bf16.mxu0 %vm1131_vm2, %v16537_v17  ;;  %v16541_v57 = vld [vmem:[#allocation270_spill] sm:$0xff] }
 0x378   : > { %v10185_v10 = vpop.f32.mrf.mxu1  ;;  %10280 = vmatmul.mubr.msk.bf16.gmra.mxu1 %vm1131_vm2, %v16538_v36  ;;  %v5831_v28 = vpop.f32.mrf.mxu0  ;;  %v16542_v13 = vld [vmem:[#allocation90_spill] sm:$0xff] }
 0x379   : > { %16535 = vst [vmem:[#allocation15_spill] sm:$0xff] %v13899_v25  ;;  %v13906_v49 = vadd.f32 %v5818_v30, %v5631_v55  ;;  %v5636_v48 = vadd.f32 %v10185_v10, %v16539_v42  ;;  %10283 = vmatprep.mubr.msk.bf16.mxu1 %vm1131_vm2, %v16540_v5  ;;  %v16544_v10 = vld [vmem:[#allocation271_spill] sm:$0xff] }
 0x37a   : > { %v5147_v7 = vpop.f32.mrf.mxu1  ;;  %v10316_v47 = vpop.f32.mrf.mxu0 }
 0x37b   : > { %v13911_v14 = vadd.f32 %v10315_v37, %v5636_v48  ;;  %v5634_v15 = vadd.f32 %v5147_v7, %v16541_v57  ;;  %v16545_v48 = vld [vmem:[#allocation112_spill] sm:$0xff]  ;;  %v16546_v57 = vld [vmem:[#allocation118_spill] sm:$0xff] }
 0x37c   : > { %v10186_v51 = vpop.f32.mrf.mxu1  ;;  %v5834_v17 = vpop.f32.mrf.mxu0 }
 0x37d   : > { %v13914_v25 = vadd.f32 %v5831_v28, %v5634_v15  ;;  %v5637_v24 = vadd.f32 %v10186_v51, %v16542_v13 }
 0x37e   : > { %v5150_v36 = vpop.f32.mrf.mxu1  ;;  %v10319_v30 = vpop.f32.mrf.mxu0  ;;  %10414 = vmatmul.mubr.msk.bf16.gmra.mxu0 %vm1131_vm2, %v15924_v20 }
 0x37f   : > { %v13919_v55 = vadd.f32 %v10316_v47, %v5637_v24  ;;  %v5635_v42 = vadd.f32 %v5150_v36, %v16544_v10  ;;  %10417 = vmatprep.mubr.msk.bf16.mxu0 %vm1131_vm2, %v15929_v16 }
 0x380   : > { %v10189_v37 = vpop.f32.mrf.mxu1  ;;  %10284 = vmatmul.mubr.msk.bf16.gmra.mxu1 %vm1131_vm2, %v16545_v48  ;;  %v5847_v28 = vpop.f32.mrf.mxu0 }
 0x381   : > { %16543 = vst [vmem:[#allocation192_spill] sm:$0xff] %v13919_v55  ;;  %v13926_v7 = vadd.f32 %v5834_v17, %v5635_v42  ;;  %v5640_v13 = vadd.f32 %v10189_v37, %v13267_v41  ;;  %10287 = vmatprep.mubr.msk.bf16.mxu1 %vm1131_vm2, %v16546_v57  ;;  %v16547_v42 = vld [vmem:[#allocation99_spill] sm:$0xff] }
 0x382   : > { %v5163_v20 = vpop.f32.mrf.mxu1  ;;  %v10320_v24 = vpop.f32.mrf.mxu0 }
 0x383   : > { %v13931_v47 = vadd.f32 %v10319_v30, %v5640_v13  ;;  %v5638_v36 = vadd.f32 %v5163_v20, %v13272_v43  ;;  %v16548_v43 = vld [vmem:[#allocation121_spill] sm:$0xff]  ;;  %v16550_v20 = vld [vmem:[#allocation126_spill] sm:$0xff] }
 0x384   : > { %v10190_v15 = vpop.f32.mrf.mxu1  ;;  %v5850_v16 = vpop.f32.mrf.mxu0 }
 0x385   : > { %v13934_v51 = vadd.f32 %v5847_v28, %v5638_v36  ;;  %v5641_v10 = vadd.f32 %v10190_v15, %v13279_v29 }
 0x386   : > { %v5166_v55 = vpop.f32.mrf.mxu1  ;;  %v10323_v17 = vpop.f32.mrf.mxu0  ;;  %10418 = vmatmul.mubr.msk.bf16.gmra.mxu0 %vm1131_vm2, %v11686_v9 }
 0x387   : > { %v13939_v41 = vadd.f32 %v10320_v24, %v5641_v10  ;;  %v5639_v37 = vadd.f32 %v5166_v55, %v16547_v42  ;;  %10421 = vmatprep.mubr.msk.bf16.mxu0 %vm1131_vm2, %v11733_v45  ;;  %v16553_v42 = vld [vmem:[#allocation272_spill] sm:$0xff] }
 0x388   : > { %v10193_v30 = vpop.f32.mrf.mxu1  ;;  %10288 = vmatmul.mubr.msk.bf16.gmra.mxu1 %vm1131_vm2, %v16548_v43  ;;  %v5863_v28 = vpop.f32.mrf.mxu0 }
 0x389   : > { %v13946_v13 = vadd.f32 %v5850_v16, %v5639_v37  ;;  %v5644_v29 = vadd.f32 %v10193_v30, %v13294_v50  ;;  %10291 = vmatprep.mubr.msk.bf16.mxu1 %vm1131_vm2, %v16550_v20 }
 0x38a   : > { %v5179_v9 = vpop.f32.mrf.mxu1  ;;  %v10324_v24 = vpop.f32.mrf.mxu0 }
 0x38b   : > { %16549 = vst [vmem:[#allocation194_spill] sm:$0xff] %v13946_v13  ;;  %v13951_v36 = vadd.f32 %v10323_v17, %v5644_v29  ;;  %v5642_v45 = vadd.f32 %v5179_v9, %v13300_v40  ;;  %v16555_v40 = vld [vmem:[#allocation129_spill] sm:$0xff]  ;;  %v380_v29 = vld [vmem:[%s10939_s9 + $0x528] sm:$0xff]  ;;  %v381_v9 = vld [vmem:[%s10939_s9 + $0x530] sm:$0xff] }
 0x38c   : > { %v10194_v55 = vpop.f32.mrf.mxu1  ;;  %v5866_v15 = vpop.f32.mrf.mxu0 }
 0x38d   : > { %16551 = vst [vmem:[#allocation196_spill] sm:$0xff] %v13951_v36  ;;  %v13954_v10 = vadd.f32 %v5863_v28, %v5642_v45  ;;  %v5645_v16 = vadd.f32 %v10194_v55, %v16553_v42  ;;  %v16557_v42 = vld [vmem:[#allocation275_spill] sm:$0xff] }
 0x38e   : > { %v5182_v37 = vpop.f32.mrf.mxu1  ;;  %v10327_v13 = vpop.f32.mrf.mxu0  ;;  %10422 = vmatmul.mubr.msk.bf16.gmra.mxu0 %vm1131_vm2, %v11738_v33 }
 0x38f   : > { %16552 = vst [vmem:[#allocation17_spill] sm:$0xff] %v13954_v10  ;;  %v13959_v50 = vadd.f32 %v10324_v24, %v5645_v16  ;;  %v5643_v30 = vadd.f32 %v5182_v37, %v13314_v8  ;;  %10425 = vmatprep.mubr.msk.bf16.mxu0 %vm1131_vm2, %v13270_v11  ;;  %v5065_v8 = vrot.slane %v13270_v11, 1  ;;  %v5066_v16 = vrot.slane %v13286_v58, 1 }
 0x390   : > { %v10197_v17 = vpop.f32.mrf.mxu1  ;;  %10292 = vmatmul.mubr.msk.bf16.gmra.mxu1 %vm1131_vm2, %v16555_v40  ;;  %v5879_v28 = vpop.f32.mrf.mxu0  ;;  %v13978_v10 = vpack.c.bf16 %v381_v9, %v380_v29  ;;  %v382_v29 = vld [vmem:[%s10939_s9 + $0x538] sm:$0xff] }
 0x391   : > { %16554 = vst [vmem:[#allocation7_spill] sm:$0xff] %v13959_v50  ;;  %v13968_v45 = vadd.f32 %v5866_v15, %v5643_v30  ;;  %v5648_v55 = vadd.f32 %v10197_v17, %v13319_v32  ;;  %10295 = vmatprep.mubr.msk.bf16.mxu1 %vm1131_vm2, %v16557_v42  ;;  %v13986_v11 = vsel %vm2645_vm3, %v5065_v8, %v5066_v16  ;;  %v16560_v9 = vld [vmem:[#allocation276_spill] sm:$0xff] }
 0x392   : > { %v5195_v33 = vpop.f32.mrf.mxu1  ;;  %v10328_v24 = vpop.f32.mrf.mxu0 }
 0x393   : > { %16556 = vst [vmem:[#allocation25_spill] sm:$0xff] %v13968_v45  ;;  %v13975_v37 = vadd.f32 %v10327_v13, %v5648_v55  ;;  %v5646_v50 = vadd.f32 %v5195_v33, %v13327_v18  ;;  %v5068_v33 = vrot.slane %v13310_v3, 1 }
 0x394   : > { %v10198_v15 = vpop.f32.mrf.mxu1  ;;  %v5882_v30 = vpop.f32.mrf.mxu0 }
 0x395   : > { %v13980_v32 = vadd.f32 %v5879_v28, %v5646_v50  ;;  %v5649_v17 = vadd.f32 %v10198_v15, %v13332_v39  ;;  %v383_v50 = vld [vmem:[%s10939_s9 + $0x540] sm:$0xff] }
 0x396   : > { %v5198_v45 = vpop.f32.mrf.mxu1  ;;  %v10331_v36 = vpop.f32.mrf.mxu0  ;;  %10426 = vmatmul.mubr.msk.bf16.gmra.mxu0 %vm1131_vm2, %v13286_v58 }
 0x397   : > { %16558 = vst [vmem:[#allocation197_spill] sm:$0xff] %v13980_v32  ;;  %v13988_v13 = vadd.f32 %v10328_v24, %v5649_v17  ;;  %v5647_v18 = vadd.f32 %v5198_v45, %v13339_v44  ;;  %10429 = vmatprep.mubr.msk.bf16.mxu0 %vm1131_vm2, %v13978_v10  ;;  %v14003_v24 = vpack.c.bf16 %v383_v50, %v382_v29  ;;  %v16561_v50 = vld [vmem:[#allocation22_spill] sm:$0xff] }
 0x398   : > { %v10201_v28 = vpop.f32.mrf.mxu1  ;;  %10296 = vmatmul.mubr.msk.bf16.gmra.mxu1 %vm1131_vm2, %v16560_v9  ;;  %v5895_v39 = vpop.f32.mrf.mxu0 }
 0x399   : > { %16559 = vst [vmem:[#allocation199_spill] sm:$0xff] %v13988_v13  ;;  %v13997_v55 = vadd.f32 %v5882_v30, %v5647_v18  ;;  %v5652_v58 = vadd.f32 %v10201_v28, %v13344_v21  ;;  %10299 = vmatprep.mubr.msk.bf16.mxu1 %vm1131_vm2, %v13986_v11  ;;  %v14012_v21 = vsel %vm2645_vm3, %v5066_v16, %v5068_v33 }
 0x39a   : > { %v5211_v44 = vpop.f32.mrf.mxu1  ;;  %v10332_v45 = vpop.f32.mrf.mxu0 }
 0x39b   : > { %v14005_v8 = vadd.f32 %v10331_v36, %v5652_v58  ;;  %v5650_v15 = vadd.f32 %v5211_v44, %v13350_v12 }
 0x39c   : > { %v10202_v17 = vpop.f32.mrf.mxu1  ;;  %v5898_v13 = vpop.f32.mrf.mxu0 }
 0x39d   : > { %v14008_v32 = vadd.f32 %v5895_v39, %v5650_v15  ;;  %v5653_v30 = vadd.f32 %v10202_v17, %v13355_v4 }
 0x39e   : > { %v5214_v18 = vpop.f32.mrf.mxu1  ;;  %v10335_v28 = vpop.f32.mrf.mxu0  ;;  %10430 = vmatmul.mubr.msk.bf16.gmra.mxu0 %vm1131_vm2, %v14003_v24 }
 0x39f   : > { %v14016_v3 = vadd.f32 %v10332_v45, %v5653_v30  ;;  %v5651_v36 = vadd.f32 %v5214_v18, %v13362_v35  ;;  %10565 = vmatprep.mubr.msk.bf16.mxu0 %vm1131_vm2, %v16251_v63 }
 0x3a0   : > { %v10205_v12 = vpop.f32.mrf.mxu1  ;;  %10300 = vmatmul.mubr.msk.bf16.gmra.mxu1 %vm1131_vm2, %v14012_v21  ;;  %v5911_v4 = vpop.f32.mrf.mxu0 }
 0x3a1   : > { %v14023_v29 = vadd.f32 %v5898_v13, %v5651_v36  ;;  %v5656_v16 = vadd.f32 %v10205_v12, %v13367_v6  ;;  %10435 = vmatprep.mubr.msk.bf16.mxu1 %vm1131_vm2, %v16561_v50  ;;  %v16563_v12 = vld [vmem:[#allocation31_spill] sm:$0xff] }
 0x3a2   : > { %v5227_v39 = vpop.f32.mrf.mxu1  ;;  %v10336_v58 = vpop.f32.mrf.mxu0 }
 0x3a3   : > { %v14028_v33 = vadd.f32 %v10335_v28, %v5656_v16  ;;  %v5654_v35 = vadd.f32 %v5227_v39, %v13372_v59  ;;  %v16562_v59 = vld [vmem:[#allocation26_spill] sm:$0xff] }
 0x3a4   : > { %v10206_v44 = vpop.f32.mrf.mxu1  ;;  %v5914_v63 = vpop.f32.mrf.mxu0 }
 0x3a5   : > { %v14031_v45 = vadd.f32 %v5911_v4, %v5654_v35  ;;  %v5657_v15 = vadd.f32 %v10206_v44, %v13379_v61  ;;  %v16566_v35 = vld [vmem:[#allocation142_spill] sm:$0xff] }
 0x3a6   : > { %v5230_v17 = vpop.f32.mrf.mxu1  ;;  %v10339_v13 = vpop.f32.mrf.mxu0  ;;  %10566 = vmatmul.mubr.msk.bf16.vlgmr.msra.gmra.mxu0 %vm1131_vm2, %v16259_v46 }
 0x3a7   : > { %v14036_v6 = vadd.f32 %v10336_v58, %v5657_v15  ;;  %v5655_v30 = vadd.f32 %v5230_v17, %v13386_v0  ;;  %10569 = vmatprep.mubr.msk.bf16.mxu0 %vm1131_vm2, %v16262_v23  ;;  %v16564_v0 = vld [vmem:[#allocation274_spill] sm:$0xff]  ;;  %v16567_v17 = vld [vmem:[#allocation147_spill] sm:$0xff] }
 0x3a8   : > { %v10209_v18 = vpop.f32.mrf.mxu1  ;;  %10436 = vmatmul.mubr.msk.bf16.vlgmr.msra.gmra.mxu1 %vm1131_vm2, %v16562_v59  ;;  %v5927_v28 = vpop.f32.mrf.mxu0  ;;  %v16570_v59 = vld [vmem:[#allocation148_spill] sm:$0xff] }
 0x3a9   : > { %v14043_v36 = vadd.f32 %v5914_v63, %v5655_v30  ;;  %v5660_v61 = vadd.f32 %v10209_v18, %v13391_v19  ;;  %10439 = vmatprep.mubr.msk.bf16.mxu1 %vm1131_vm2, %v16563_v12  ;;  %v16569_v30 = vld [vmem:[#allocation143_spill] sm:$0xff] }
 0x3aa   : > { %v5243_v46 = vpop.f32.mrf.mxu1  ;;  %v10340_v4 = vpop.f32.mrf.mxu0 }
 0x3ab   : > { %v14048_v16 = vadd.f32 %v10339_v13, %v5660_v61  ;;  %v5658_v50 = vadd.f32 %v5243_v46, %v16564_v0  ;;  %v16571_v61 = vld [vmem:[#allocation33_spill] sm:$0xff]  ;;  %v16573_v46 = vld [vmem:[#allocation144_spill] sm:$0xff] }
 0x3ac   : > { %v10210_v39 = vpop.f32.mrf.mxu1  ;;  %v5930_v23 = vpop.f32.mrf.mxu0 }
 0x3ad   : > { %v14051_v58 = vadd.f32 %v5927_v28, %v5658_v50  ;;  %v5661_v44 = vadd.f32 %v10210_v39, %v16566_v35  ;;  %v16574_v50 = vld [vmem:[#allocation40_spill] sm:$0xff] }
 0x3ae   : > { %v5246_v15 = vpop.f32.mrf.mxu1  ;;  %v10343_v63 = vpop.f32.mrf.mxu0  ;;  %10570 = vmatmul.mubr.msk.bf16.gmra.mxu0 %vm1131_vm2, %v16567_v17 }
 0x3af   : > { %16565 = vst [vmem:[#allocation201_spill] sm:$0xff] %v14051_v58  ;;  %v14056_v19 = vadd.f32 %v10340_v4, %v5661_v44  ;;  %v5659_v18 = vadd.f32 %v5246_v15, %v16569_v30  ;;  %10573 = vmatprep.mubr.msk.bf16.mxu0 %vm1131_vm2, %v16570_v59  ;;  %v16576_v44 = vld [vmem:[#allocation13_spill] sm:$0xff] }
 0x3b0   : > { %v10213_v13 = vpop.f32.mrf.mxu1  ;;  %10440 = vmatmul.mubr.msk.bf16.gmra.mxu1 %vm1131_vm2, %v16571_v61  ;;  %v5943_v28 = vpop.f32.mrf.mxu0 }
 0x3b1   : > { %16568 = vst [vmem:[#allocation27_spill] sm:$0xff] %v14056_v19  ;;  %v14063_v12 = vadd.f32 %v5930_v23, %v5659_v18  ;;  %v5664_v0 = vadd.f32 %v10213_v13, %v16573_v46  ;;  %10443 = vmatprep.mubr.msk.bf16.mxu1 %vm1131_vm2, %v16574_v50  ;;  %v16578_v19 = vld [vmem:[#allocation16_spill] sm:$0xff]  ;;  %v16579_v18 = vld [vmem:[#allocation149_spill] sm:$0xff]  ;;  %v16581_v46 = vld [vmem:[#allocation23_spill] sm:$0xff] }
 0x3b2   : > { %v5259_v39 = vpop.f32.mrf.mxu1  ;;  %v10344_v4 = vpop.f32.mrf.mxu0 }
 0x3b3   : > { %16572 = vst [vmem:[#allocation12_spill] sm:$0xff] %v14063_v12  ;;  %v14068_v35 = vadd.f32 %v10343_v63, %v5664_v0  ;;  %v5662_v15 = vadd.f32 %v5259_v39, %v16576_v44  ;;  %v16582_v12 = vld [vmem:[#allocation150_spill] sm:$0xff]  ;;  %v16583_v0 = vld [vmem:[#allocation43_spill] sm:$0xff] }
 0x3b4   : > { %v10214_v17 = vpop.f32.mrf.mxu1  ;;  %v5946_v30 = vpop.f32.mrf.mxu0 }
 0x3b5   : > { %16575 = vst [vmem:[#allocation34_spill] sm:$0xff] %v14068_v35  ;;  %v14071_v59 = vadd.f32 %v5943_v28, %v5662_v15  ;;  %v5665_v61 = vadd.f32 %v10214_v17, %v16578_v19  ;;  %v16585_v19 = vld [vmem:[#allocation203_spill] sm:$0xff]  ;;  %v16586_v15 = vld [vmem:[#allocation49_spill] sm:$0xff] }
 0x3b6   : > { %v5262_v58 = vpop.f32.mrf.mxu1  ;;  %v10347_v23 = vpop.f32.mrf.mxu0  ;;  %10574 = vmatmul.mubr.msk.bf16.gmra.mxu0 %vm1131_vm2, %v16579_v18 }
 0x3b7   : > { %16577 = vst [vmem:[#allocation202_spill] sm:$0xff] %v14071_v59  ;;  %v14076_v13 = vadd.f32 %v10344_v4, %v5665_v61  ;;  %v5663_v50 = vadd.f32 %v5262_v58, %v16581_v46  ;;  %10577 = vmatprep.mubr.msk.bf16.mxu0 %vm1131_vm2, %v16582_v12  ;;  %v16588_v58 = vld [vmem:[#allocation30_spill] sm:$0xff]  ;;  %v16590_v59 = vld [vmem:[#allocation145_spill] sm:$0xff] }
 0x3b8   : > { %v10217_v63 = vpop.f32.mrf.mxu1  ;;  %10444 = vmatmul.mubr.msk.bf16.gmra.mxu1 %vm1131_vm2, %v16583_v0  ;;  %v5959_v28 = vpop.f32.mrf.mxu0 }
 0x3b9   : > { %16580 = vst [vmem:[#allocation205_spill] sm:$0xff] %v14076_v13  ;;  %v14083_v39 = vadd.f32 %v5946_v30, %v5663_v50  ;;  %v5668_v44 = vadd.f32 %v10217_v63, %v16585_v19  ;;  %10447 = vmatprep.mubr.msk.bf16.mxu1 %vm1131_vm2, %v16586_v15  ;;  %v16591_v50 = vld [vmem:[#allocation151_spill] sm:$0xff]  ;;  %v16593_v19 = vld [vmem:[#allocation206_spill] sm:$0xff] }
 0x3ba   : > { %v5275_v17 = vpop.f32.mrf.mxu1  ;;  %v10348_v4 = vpop.f32.mrf.mxu0 }
 0x3bb   : > { %16584 = vst [vmem:[#allocation208_spill] sm:$0xff] %v14083_v39  ;;  %v14088_v61 = vadd.f32 %v10347_v23, %v5668_v44  ;;  %v5666_v18 = vadd.f32 %v5275_v17, %v16588_v58  ;;  %v16594_v39 = vld [vmem:[#allocation152_spill] sm:$0xff]  ;;  %v16595_v44 = vld [vmem:[#allocation51_spill] sm:$0xff] }
 0x3bc   : > { %v10218_v46 = vpop.f32.mrf.mxu1  ;;  %v5962_v12 = vpop.f32.mrf.mxu0 }
 0x3bd   : > { %16587 = vst [vmem:[#allocation36_spill] sm:$0xff] %v14088_v61  ;;  %v14091_v13 = vadd.f32 %v5959_v28, %v5666_v18  ;;  %v5669_v0 = vadd.f32 %v10218_v46, %v16590_v59  ;;  %v16597_v59 = vld [vmem:[#allocation146_spill] sm:$0xff] }
 0x3be   : > { %v5278_v35 = vpop.f32.mrf.mxu1  ;;  %v10351_v30 = vpop.f32.mrf.mxu0  ;;  %10578 = vmatmul.mubr.msk.bf16.gmra.mxu0 %vm1131_vm2, %v16591_v50  ;;  %v16598_v18 = vld [vmem:[#allocation58_spill] sm:$0xff] }
 0x3bf   : > { %16589 = vst [vmem:[#allocation20_spill] sm:$0xff] %v14091_v13  ;;  %v14096_v63 = vadd.f32 %v10348_v4, %v5669_v0  ;;  %v5667_v15 = vadd.f32 %v5278_v35, %v16593_v19  ;;  %10581 = vmatprep.mubr.msk.bf16.mxu0 %vm1131_vm2, %v16594_v39  ;;  %v16600_v35 = vld [vmem:[#allocation14_spill] sm:$0xff]  ;;  %v16602_v13 = vld [vmem:[#allocation209_spill] sm:$0xff] }
 0x3c0   : > { %v10221_v23 = vpop.f32.mrf.mxu1  ;;  %10448 = vmatmul.mubr.msk.bf16.gmra.mxu1 %vm1131_vm2, %v16595_v44  ;;  %v5975_v28 = vpop.f32.mrf.mxu0 }
 0x3c1   : > { %16592 = vst [vmem:[#allocation44_spill] sm:$0xff] %v14096_v63  ;;  %v14103_v17 = vadd.f32 %v5962_v12, %v5667_v15  ;;  %v5672_v58 = vadd.f32 %v10221_v23, %v16597_v59  ;;  %10451 = vmatprep.mubr.msk.bf16.mxu1 %vm1131_vm2, %v16598_v18  ;;  %v16603_v15 = vld [vmem:[#allocation153_spill] sm:$0xff]  ;;  %v16605_v59 = vld [vmem:[#allocation32_spill] sm:$0xff] }
 0x3c2   : > { %v5291_v46 = vpop.f32.mrf.mxu1  ;;  %v10352_v4 = vpop.f32.mrf.mxu0 }
 0x3c3   : > { %16596 = vst [vmem:[#allocation211_spill] sm:$0xff] %v14103_v17  ;;  %v14108_v0 = vadd.f32 %v10351_v30, %v5672_v58  ;;  %v5670_v50 = vadd.f32 %v5291_v46, %v16600_v35  ;;  %v16606_v17 = vld [vmem:[#allocation154_spill] sm:$0xff]  ;;  %v16607_v58 = vld [vmem:[#allocation61_spill] sm:$0xff] }
 0x3c4   : > { %v10222_v19 = vpop.f32.mrf.mxu1  ;;  %v5978_v39 = vpop.f32.mrf.mxu0 }
 0x3c5   : > { %16599 = vst [vmem:[#allocation214_spill] sm:$0xff] %v14108_v0  ;;  %v14111_v63 = vadd.f32 %v5975_v28, %v5670_v50  ;;  %v5673_v44 = vadd.f32 %v10222_v19, %v16602_v13  ;;  %v16609_v13 = vld [vmem:[#allocation21_spill] sm:$0xff]  ;;  %v16610_v50 = vld [vmem:[#allocation67_spill] sm:$0xff] }
 0x3c6   : > { %v5294_v61 = vpop.f32.mrf.mxu1  ;;  %v10355_v12 = vpop.f32.mrf.mxu0  ;;  %10582 = vmatmul.mubr.msk.bf16.gmra.mxu0 %vm1131_vm2, %v16603_v15 }
 0x3c7   : > { %16601 = vst [vmem:[#allocation217_spill] sm:$0xff] %v14111_v63  ;;  %v14116_v23 = vadd.f32 %v10352_v4, %v5673_v44  ;;  %v5671_v18 = vadd.f32 %v5294_v61, %v16605_v59  ;;  %10585 = vmatprep.mubr.msk.bf16.mxu0 %vm1131_vm2, %v16606_v17  ;;  %v16612_v61 = vld [vmem:[#allocation39_spill] sm:$0xff]  ;;  %v16614_v63 = vld [vmem:[#allocation210_spill] sm:$0xff] }
 0x3c8   : > { %v10225_v30 = vpop.f32.mrf.mxu1  ;;  %10452 = vmatmul.mubr.msk.bf16.gmra.mxu1 %vm1131_vm2, %v16607_v58  ;;  %v5991_v28 = vpop.f32.mrf.mxu0 }
 0x3c9   : > { %16604 = vst [vmem:[#allocation45_spill] sm:$0xff] %v14116_v23  ;;  %v14123_v46 = vadd.f32 %v5978_v39, %v5671_v18  ;;  %v5676_v35 = vadd.f32 %v10225_v30, %v16609_v13  ;;  %10455 = vmatprep.mubr.msk.bf16.mxu1 %vm1131_vm2, %v16610_v50  ;;  %v16615_v18 = vld [vmem:[#allocation155_spill] sm:$0xff]  ;;  %v16617_v13 = vld [vmem:[#allocation212_spill] sm:$0xff] }
 0x3ca   : > { %v5307_v19 = vpop.f32.mrf.mxu1  ;;  %v10356_v4 = vpop.f32.mrf.mxu0 }
 0x3cb   : > { %16608 = vst [vmem:[#allocation29_spill] sm:$0xff] %v14123_v46  ;;  %v14128_v44 = vadd.f32 %v10355_v12, %v5676_v35  ;;  %v5674_v15 = vadd.f32 %v5307_v19, %v16612_v61  ;;  %v16618_v46 = vld [vmem:[#allocation156_spill] sm:$0xff]  ;;  %v16619_v35 = vld [vmem:[#allocation69_spill] sm:$0xff] }
 0x3cc   : > { %v10226_v59 = vpop.f32.mrf.mxu1  ;;  %v5994_v17 = vpop.f32.mrf.mxu0 }
 0x3cd   : > { %16611 = vst [vmem:[#allocation52_spill] sm:$0xff] %v14128_v44  ;;  %v14131_v23 = vadd.f32 %v5991_v28, %v5674_v15  ;;  %v5677_v58 = vadd.f32 %v10226_v59, %v16614_v63  ;;  %v16621_v63 = vld [vmem:[#allocation215_spill] sm:$0xff]  ;;  %v16622_v15 = vld [vmem:[#allocation76_spill] sm:$0xff] }
 0x3ce   : > { %v5310_v0 = vpop.f32.mrf.mxu1  ;;  %v10359_v39 = vpop.f32.mrf.mxu0  ;;  %10586 = vmatmul.mubr.msk.bf16.gmra.mxu0 %vm1131_vm2, %v16615_v18 }
 0x3cf   : > { %16613 = vst [vmem:[#allocation220_spill] sm:$0xff] %v14131_v23  ;;  %v14136_v30 = vadd.f32 %v10356_v4, %v5677_v58  ;;  %v5675_v50 = vadd.f32 %v5310_v0, %v16617_v13  ;;  %10589 = vmatprep.mubr.msk.bf16.mxu0 %vm1131_vm2, %v16618_v46  ;;  %v16624_v0 = vld [vmem:[#allocation41_spill] sm:$0xff]  ;;  %v16626_v23 = vld [vmem:[#allocation218_spill] sm:$0xff] }
 0x3d0   : > { %v10229_v12 = vpop.f32.mrf.mxu1  ;;  %10456 = vmatmul.mubr.msk.bf16.gmra.mxu1 %vm1131_vm2, %v16619_v35  ;;  %v6007_v28 = vpop.f32.mrf.mxu0 }
 0x3d1   : > { %16616 = vst [vmem:[#allocation223_spill] sm:$0xff] %v14136_v30  ;;  %v14143_v19 = vadd.f32 %v5994_v17, %v5675_v50  ;;  %v5680_v61 = vadd.f32 %v10229_v12, %v16621_v63  ;;  %10459 = vmatprep.mubr.msk.bf16.mxu1 %vm1131_vm2, %v16622_v15  ;;  %v16627_v50 = vld [vmem:[#allocation157_spill] sm:$0xff]  ;;  %v16629_v63 = vld [vmem:[#allocation48_spill] sm:$0xff] }
 0x3d2   : > { %v5323_v59 = vpop.f32.mrf.mxu1  ;;  %v10360_v4 = vpop.f32.mrf.mxu0 }
 0x3d3   : > { %16620 = vst [vmem:[#allocation226_spill] sm:$0xff] %v14143_v19  ;;  %v14148_v58 = vadd.f32 %v10359_v39, %v5680_v61  ;;  %v5678_v18 = vadd.f32 %v5323_v59, %v16624_v0  ;;  %v16630_v19 = vld [vmem:[#allocation158_spill] sm:$0xff]  ;;  %v16631_v61 = vld [vmem:[#allocation79_spill] sm:$0xff] }
 0x3d4   : > { %v10230_v13 = vpop.f32.mrf.mxu1  ;;  %v6010_v46 = vpop.f32.mrf.mxu0 }
 0x3d5   : > { %16623 = vst [vmem:[#allocation54_spill] sm:$0xff] %v14148_v58  ;;  %v14151_v30 = vadd.f32 %v6007_v28, %v5678_v18  ;;  %v5681_v35 = vadd.f32 %v10230_v13, %v16626_v23  ;;  %v16633_v23 = vld [vmem:[#allocation219_spill] sm:$0xff]  ;;  %v16634_v18 = vld [vmem:[#allocation85_spill] sm:$0xff] }
 0x3d6   : > { %v5326_v44 = vpop.f32.mrf.mxu1  ;;  %v10363_v17 = vpop.f32.mrf.mxu0  ;;  %10590 = vmatmul.mubr.msk.bf16.gmra.mxu0 %vm1131_vm2, %v16627_v50 }
 0x3d7   : > { %16625 = vst [vmem:[#allocation38_spill] sm:$0xff] %v14151_v30  ;;  %v14156_v12 = vadd.f32 %v10360_v4, %v5681_v35  ;;  %v5679_v15 = vadd.f32 %v5326_v44, %v16629_v63  ;;  %10593 = vmatprep.mubr.msk.bf16.mxu0 %vm1131_vm2, %v16630_v19  ;;  %v16636_v44 = vld [vmem:[#allocation221_spill] sm:$0xff]  ;;  %v16638_v30 = vld [vmem:[#allocation224_spill] sm:$0xff] }
 0x3d8   : > { %v10233_v39 = vpop.f32.mrf.mxu1  ;;  %10460 = vmatmul.mubr.msk.bf16.gmra.mxu1 %vm1131_vm2, %v16631_v61  ;;  %v6023_v28 = vpop.f32.mrf.mxu0 }
 0x3d9   : > { %16628 = vst [vmem:[#allocation62_spill] sm:$0xff] %v14156_v12  ;;  %v14163_v59 = vadd.f32 %v6010_v46, %v5679_v15  ;;  %v5684_v0 = vadd.f32 %v10233_v39, %v16633_v23  ;;  %10463 = vmatprep.mubr.msk.bf16.mxu1 %vm1131_vm2, %v16634_v18  ;;  %v16639_v15 = vld [vmem:[#allocation161_spill] sm:$0xff]  ;;  %v16641_v23 = vld [vmem:[#allocation50_spill] sm:$0xff] }
 0x3da   : > { %v5339_v13 = vpop.f32.mrf.mxu1  ;;  %v10364_v4 = vpop.f32.mrf.mxu0 }
 0x3db   : > { %16632 = vst [vmem:[#allocation229_spill] sm:$0xff] %v14163_v59  ;;  %v14168_v35 = vadd.f32 %v10363_v17, %v5684_v0  ;;  %v5682_v50 = vadd.f32 %v5339_v13, %v16636_v44  ;;  %v16642_v59 = vld [vmem:[#allocation163_spill] sm:$0xff] }
 0x3dc   : > { %v10234_v63 = vpop.f32.mrf.mxu1  ;;  %v6026_v19 = vpop.f32.mrf.mxu0  ;;  %v16643_v0 = vld [vmem:[#allocation87_spill] sm:$0xff] }
 0x3dd   : > { %16635 = vst [vmem:[#allocation232_spill] sm:$0xff] %v14168_v35  ;;  %v14171_v12 = vadd.f32 %v6023_v28, %v5682_v50  ;;  %v5685_v61 = vadd.f32 %v10234_v63, %v16638_v30  ;;  %v16645_v30 = vld [vmem:[#allocation227_spill] sm:$0xff]  ;;  %v16646_v50 = vld [vmem:[#allocation94_spill] sm:$0xff] }
 0x3de   : > { %v5342_v58 = vpop.f32.mrf.mxu1  ;;  %v10367_v46 = vpop.f32.mrf.mxu0  ;;  %10594 = vmatmul.mubr.msk.bf16.gmra.mxu0 %vm1131_vm2, %v16639_v15 }
 0x3df   : > { %16637 = vst [vmem:[#allocation235_spill] sm:$0xff] %v14171_v12  ;;  %v14176_v39 = vadd.f32 %v10364_v4, %v5685_v61  ;;  %v5683_v18 = vadd.f32 %v5342_v58, %v16641_v23  ;;  %10597 = vmatprep.mubr.msk.bf16.mxu0 %vm1131_vm2, %v16642_v59  ;;  %v16648_v58 = vld [vmem:[#allocation57_spill] sm:$0xff]  ;;  %v16650_v12 = vld [vmem:[#allocation228_spill] sm:$0xff] }
 0x3e0   : > { %v10237_v17 = vpop.f32.mrf.mxu1  ;;  %10464 = vmatmul.mubr.msk.bf16.gmra.mxu1 %vm1131_vm2, %v16643_v0  ;;  %v6039_v28 = vpop.f32.mrf.mxu0 }
 0x3e1   : > { %16640 = vst [vmem:[#allocation63_spill] sm:$0xff] %v14176_v39  ;;  %v14183_v13 = vadd.f32 %v6026_v19, %v5683_v18  ;;  %v5688_v44 = vadd.f32 %v10237_v17, %v16645_v30  ;;  %10467 = vmatprep.mubr.msk.bf16.mxu1 %vm1131_vm2, %v16646_v50  ;;  %v16651_v18 = vld [vmem:[#allocation167_spill] sm:$0xff]  ;;  %v16653_v30 = vld [vmem:[#allocation230_spill] sm:$0xff] }
 0x3e2   : > { %v5355_v63 = vpop.f32.mrf.mxu1  ;;  %v10368_v4 = vpop.f32.mrf.mxu0 }
 0x3e3   : > { %16644 = vst [vmem:[#allocation47_spill] sm:$0xff] %v14183_v13  ;;  %v14188_v61 = vadd.f32 %v10367_v46, %v5688_v44  ;;  %v5686_v15 = vadd.f32 %v5355_v63, %v16648_v58  ;;  %v16654_v13 = vld [vmem:[#allocation169_spill] sm:$0xff] }
 0x3e4   : > { %v10238_v23 = vpop.f32.mrf.mxu1  ;;  %v6042_v59 = vpop.f32.mrf.mxu0  ;;  %v16655_v44 = vld [vmem:[#allocation97_spill] sm:$0xff] }
 0x3e5   : > { %16647 = vst [vmem:[#allocation70_spill] sm:$0xff] %v14188_v61  ;;  %v14191_v39 = vadd.f32 %v6039_v28, %v5686_v15  ;;  %v5689_v0 = vadd.f32 %v10238_v23, %v16650_v12  ;;  %v16657_v12 = vld [vmem:[#allocation233_spill] sm:$0xff]  ;;  %v16658_v15 = vld [vmem:[#allocation104_spill] sm:$0xff] }
 0x3e6   : > { %v5358_v35 = vpop.f32.mrf.mxu1  ;;  %v10371_v19 = vpop.f32.mrf.mxu0  ;;  %10598 = vmatmul.mubr.msk.bf16.gmra.mxu0 %vm1131_vm2, %v16651_v18 }
 0x3e7   : > { %16649 = vst [vmem:[#allocation238_spill] sm:$0xff] %v14191_v39  ;;  %v14196_v17 = vadd.f32 %v10368_v4, %v5689_v0  ;;  %v5687_v50 = vadd.f32 %v5358_v35, %v16653_v30  ;;  %10601 = vmatprep.mubr.msk.bf16.mxu0 %vm1131_vm2, %v16654_v13  ;;  %v16660_v35 = vld [vmem:[#allocation59_spill] sm:$0xff]  ;;  %v16662_v39 = vld [vmem:[#allocation236_spill] sm:$0xff] }
 0x3e8   : > { %v10241_v46 = vpop.f32.mrf.mxu1  ;;  %10468 = vmatmul.mubr.msk.bf16.gmra.mxu1 %vm1131_vm2, %v16655_v44  ;;  %v6055_v28 = vpop.f32.mrf.mxu0 }
 0x3e9   : > { %16652 = vst [vmem:[#allocation241_spill] sm:$0xff] %v14196_v17  ;;  %v14203_v63 = vadd.f32 %v6042_v59, %v5687_v50  ;;  %v5692_v58 = vadd.f32 %v10241_v46, %v16657_v12  ;;  %10471 = vmatprep.mubr.msk.bf16.mxu1 %vm1131_vm2, %v16658_v15  ;;  %v16663_v50 = vld [vmem:[#allocation172_spill] sm:$0xff]  ;;  %v16665_v12 = vld [vmem:[#allocation66_spill] sm:$0xff] }
 0x3ea   : > { %v5371_v23 = vpop.f32.mrf.mxu1  ;;  %v10372_v4 = vpop.f32.mrf.mxu0 }
 0x3eb   : > { %16656 = vst [vmem:[#allocation244_spill] sm:$0xff] %v14203_v63  ;;  %v14208_v0 = vadd.f32 %v10371_v19, %v5692_v58  ;;  %v5690_v18 = vadd.f32 %v5371_v23, %v16660_v35  ;;  %v16666_v63 = vld [vmem:[#allocation174_spill] sm:$0xff] }
 0x3ec   : > { %v10242_v30 = vpop.f32.mrf.mxu1  ;;  %v6058_v13 = vpop.f32.mrf.mxu0  ;;  %v16667_v58 = vld [vmem:[#allocation106_spill] sm:$0xff] }
 0x3ed   : > { %16659 = vst [vmem:[#allocation72_spill] sm:$0xff] %v14208_v0  ;;  %v14211_v17 = vadd.f32 %v6055_v28, %v5690_v18  ;;  %v5693_v44 = vadd.f32 %v10242_v30, %v16662_v39  ;;  %v16669_v39 = vld [vmem:[#allocation237_spill] sm:$0xff]  ;;  %v16670_v18 = vld [vmem:[#allocation114_spill] sm:$0xff] }
 0x3ee   : > { %v5374_v61 = vpop.f32.mrf.mxu1  ;;  %v10375_v59 = vpop.f32.mrf.mxu0  ;;  %10602 = vmatmul.mubr.msk.bf16.gmra.mxu0 %vm1131_vm2, %v16663_v50 }
 0x3ef   : > { %16661 = vst [vmem:[#allocation56_spill] sm:$0xff] %v14211_v17  ;;  %v14216_v46 = vadd.f32 %v10372_v4, %v5693_v44  ;;  %v5691_v15 = vadd.f32 %v5374_v61, %v16665_v12  ;;  %10605 = vmatprep.mubr.msk.bf16.mxu0 %vm1131_vm2, %v16666_v63  ;;  %v16672_v61 = vld [vmem:[#allocation239_spill] sm:$0xff]  ;;  %v16674_v17 = vld [vmem:[#allocation242_spill] sm:$0xff] }
 0x3f0   : > { %v10245_v19 = vpop.f32.mrf.mxu1  ;;  %10472 = vmatmul.mubr.msk.bf16.gmra.mxu1 %vm1131_vm2, %v16667_v58  ;;  %v6071_v28 = vpop.f32.mrf.mxu0 }
 0x3f1   : > { %16664 = vst [vmem:[#allocation80_spill] sm:$0xff] %v14216_v46  ;;  %v14223_v23 = vadd.f32 %v6058_v13, %v5691_v15  ;;  %v5696_v35 = vadd.f32 %v10245_v19, %v16669_v39  ;;  %10475 = vmatprep.mubr.msk.bf16.mxu1 %vm1131_vm2, %v16670_v18  ;;  %v16675_v15 = vld [vmem:[#allocation177_spill] sm:$0xff]  ;;  %v16677_v39 = vld [vmem:[#allocation68_spill] sm:$0xff] }
 0x3f2   : > { %v5387_v30 = vpop.f32.mrf.mxu1  ;;  %v10376_v4 = vpop.f32.mrf.mxu0 }
 0x3f3   : > { %16668 = vst [vmem:[#allocation247_spill] sm:$0xff] %v14223_v23  ;;  %v14228_v44 = vadd.f32 %v10375_v59, %v5696_v35  ;;  %v5694_v50 = vadd.f32 %v5387_v30, %v16672_v61  ;;  %v16678_v23 = vld [vmem:[#allocation179_spill] sm:$0xff]  ;;  %v16679_v35 = vld [vmem:[#allocation120_spill] sm:$0xff] }
 0x3f4   : > { %v10246_v12 = vpop.f32.mrf.mxu1  ;;  %v6074_v63 = vpop.f32.mrf.mxu0 }
 0x3f5   : > { %16671 = vst [vmem:[#allocation261_spill] sm:$0xff] %v14228_v44  ;;  %v14231_v46 = vadd.f32 %v6071_v28, %v5694_v50  ;;  %v5697_v58 = vadd.f32 %v10246_v12, %v16674_v17  ;;  %v16681_v17 = vld [vmem:[#allocation245_spill] sm:$0xff]  ;;  %v16682_v50 = vld [vmem:[#allocation124_spill] sm:$0xff] }
 0x3f6   : > { %v5390_v0 = vpop.f32.mrf.mxu1  ;;  %v10379_v13 = vpop.f32.mrf.mxu0  ;;  %10606 = vmatmul.mubr.msk.bf16.gmra.mxu0 %vm1131_vm2, %v16675_v15 }
 0x3f7   : > { %16673 = vst [vmem:[#allocation250_spill] sm:$0xff] %v14231_v46  ;;  %v14236_v19 = vadd.f32 %v10376_v4, %v5697_v58  ;;  %v5695_v18 = vadd.f32 %v5390_v0, %v16677_v39  ;;  %10609 = vmatprep.mubr.msk.bf16.mxu0 %vm1131_vm2, %v16678_v23  ;;  %v16684_v0 = vld [vmem:[#allocation75_spill] sm:$0xff]  ;;  %v16686_v46 = vld [vmem:[#allocation246_spill] sm:$0xff] }
 0x3f8   : > { %v10249_v59 = vpop.f32.mrf.mxu1  ;;  %10476 = vmatmul.mubr.msk.bf16.gmra.mxu1 %vm1131_vm2, %v16679_v35  ;;  %v6087_v28 = vpop.f32.mrf.mxu0 }
 0x3f9   : > { %16676 = vst [vmem:[#allocation253_spill] sm:$0xff] %v14236_v19  ;;  %v14243_v30 = vadd.f32 %v6074_v63, %v5695_v18  ;;  %v5700_v61 = vadd.f32 %v10249_v59, %v16681_v17  ;;  %10479 = vmatprep.mubr.msk.bf16.mxu1 %vm1131_vm2, %v16682_v50  ;;  %v16687_v18 = vld [vmem:[#allocation182_spill] sm:$0xff]  ;;  %v16689_v17 = vld [vmem:[#allocation248_spill] sm:$0xff] }
 0x3fa   : > { %v5403_v12 = vpop.f32.mrf.mxu1  ;;  %v10380_v4 = vpop.f32.mrf.mxu0 }
 0x3fb   : > { %16680 = vst [vmem:[#allocation65_spill] sm:$0xff] %v14243_v30  ;;  %v14248_v58 = vadd.f32 %v10379_v13, %v5700_v61  ;;  %v5698_v15 = vadd.f32 %v5403_v12, %v16684_v0  ;;  %v16690_v30 = vld [vmem:[#allocation184_spill] sm:$0xff]  ;;  %v16691_v61 = vld [vmem:[#allocation130_spill] sm:$0xff] }
 0x3fc   : > { %v10250_v39 = vpop.f32.mrf.mxu1  ;;  %v6090_v23 = vpop.f32.mrf.mxu0 }
 0x3fd   : > { %16683 = vst [vmem:[#allocation266_spill] sm:$0xff] %v14248_v58  ;;  %v14251_v19 = vadd.f32 %v6087_v28, %v5698_v15  ;;  %v5701_v35 = vadd.f32 %v10250_v39, %v16686_v46  ;;  %v16693_v46 = vld [vmem:[#allocation251_spill] sm:$0xff]  ;;  %v16694_v15 = vld [vmem:[#allocation133_spill] sm:$0xff] }
 0x3fe   : > { %v5406_v44 = vpop.f32.mrf.mxu1  ;;  %v10383_v63 = vpop.f32.mrf.mxu0  ;;  %10610 = vmatmul.mubr.msk.bf16.gmra.mxu0 %vm1131_vm2, %v16687_v18 }
 0x3ff   : > { %16685 = vst [vmem:[#allocation269_spill] sm:$0xff] %v14251_v19  ;;  %v14256_v59 = vadd.f32 %v10380_v4, %v5701_v35  ;;  %v5699_v50 = vadd.f32 %v5406_v44, %v16689_v17  ;;  %10613 = vmatprep.mubr.msk.bf16.mxu0 %vm1131_vm2, %v16690_v30  ;;  %v16696_v44 = vld [vmem:[#allocation77_spill] sm:$0xff]  ;;  %v16698_v19 = vld [vmem:[#allocation254_spill] sm:$0xff] }
 0x400   : > { %v10253_v13 = vpop.f32.mrf.mxu1  ;;  %10480 = vmatmul.mubr.msk.bf16.gmra.mxu1 %vm1131_vm2, %v16691_v61  ;;  %v6103_v28 = vpop.f32.mrf.mxu0 }
 0x401   : > { %16688 = vst [vmem:[#allocation256_spill] sm:$0xff] %v14256_v59  ;;  %v14263_v12 = vadd.f32 %v6090_v23, %v5699_v50  ;;  %v5704_v0 = vadd.f32 %v10253_v13, %v16693_v46  ;;  %10483 = vmatprep.mubr.msk.bf16.mxu1 %vm1131_vm2, %v16694_v15  ;;  %v16699_v50 = vld [vmem:[#allocation187_spill] sm:$0xff]  ;;  %v16701_v46 = vld [vmem:[#allocation84_spill] sm:$0xff] }
 0x402   : > { %v5419_v39 = vpop.f32.mrf.mxu1  ;;  %v10384_v4 = vpop.f32.mrf.mxu0 }
 0x403   : > { %16692 = vst [vmem:[#allocation259_spill] sm:$0xff] %v14263_v12  ;;  %v14268_v35 = vadd.f32 %v10383_v63, %v5704_v0  ;;  %v5702_v18 = vadd.f32 %v5419_v39, %v16696_v44  ;;  %v16702_v12 = vld [vmem:[#allocation189_spill] sm:$0xff]  ;;  %v16703_v0 = vld [vmem:[#allocation136_spill] sm:$0xff] }
 0x404   : > { %v10254_v17 = vpop.f32.mrf.mxu1  ;;  %v6106_v30 = vpop.f32.mrf.mxu0 }
 0x405   : > { %16695 = vst [vmem:[#allocation83_spill] sm:$0xff] %v14268_v35  ;;  %v14271_v59 = vadd.f32 %v6103_v28, %v5702_v18  ;;  %v5705_v61 = vadd.f32 %v10254_v17, %v16698_v19  ;;  %v16705_v19 = vld [vmem:[#allocation255_spill] sm:$0xff]  ;;  %v16706_v18 = vld [vmem:[#allocation137_spill] sm:$0xff] }
 0x406   : > { %v5422_v58 = vpop.f32.mrf.mxu1  ;;  %v10387_v23 = vpop.f32.mrf.mxu0  ;;  %10614 = vmatmul.mubr.msk.bf16.gmra.mxu0 %vm1131_vm2, %v16699_v50 }
 0x407   : > { %16697 = vst [vmem:[#allocation88_spill] sm:$0xff] %v14271_v59  ;;  %v14276_v13 = vadd.f32 %v10384_v4, %v5705_v61  ;;  %v5703_v15 = vadd.f32 %v5422_v58, %v16701_v46  ;;  %10617 = vmatprep.mubr.msk.bf16.mxu0 %vm1131_vm2, %v16702_v12  ;;  %v16708_v58 = vld [vmem:[#allocation257_spill] sm:$0xff]  ;;  %v16710_v59 = vld [vmem:[#allocation260_spill] sm:$0xff] }
 0x408   : > { %v10257_v63 = vpop.f32.mrf.mxu1  ;;  %10484 = vmatmul.mubr.msk.bf16.gmra.mxu1 %vm1131_vm2, %v16703_v0  ;;  %v6119_v28 = vpop.f32.mrf.mxu0 }
 0x409   : > { %16700 = vst [vmem:[#allocation262_spill] sm:$0xff] %v14276_v13  ;;  %v14283_v39 = vadd.f32 %v6106_v30, %v5703_v15  ;;  %v5708_v44 = vadd.f32 %v10257_v63, %v16705_v19  ;;  %10487 = vmatprep.mubr.msk.bf16.mxu1 %vm1131_vm2, %v16706_v18  ;;  %v16711_v15 = vld [vmem:[#allocation193_spill] sm:$0xff]  ;;  %v16713_v19 = vld [vmem:[#allocation86_spill] sm:$0xff] }
 0x40a   : > { %v5435_v17 = vpop.f32.mrf.mxu1  ;;  %v10388_v4 = vpop.f32.mrf.mxu0 }
 0x40b   : > { %16704 = vst [vmem:[#allocation74_spill] sm:$0xff] %v14283_v39  ;;  %v14288_v61 = vadd.f32 %v10387_v23, %v5708_v44  ;;  %v5706_v50 = vadd.f32 %v5435_v17, %v16708_v58  ;;  %v16714_v39 = vld [vmem:[#allocation195_spill] sm:$0xff]  ;;  %v16715_v44 = vld [vmem:[#allocation140_spill] sm:$0xff] }
 0x40c   : > { %v10258_v46 = vpop.f32.mrf.mxu1  ;;  %v6122_v12 = vpop.f32.mrf.mxu0 }
 0x40d   : > { %16707 = vst [vmem:[#allocation92_spill] sm:$0xff] %v14288_v61  ;;  %v14291_v13 = vadd.f32 %v6119_v28, %v5706_v50  ;;  %v5709_v0 = vadd.f32 %v10258_v46, %v16710_v59  ;;  %v16717_v59 = vld [vmem:[#allocation263_spill] sm:$0xff]  ;;  %v16718_v50 = vld [vmem:[#allocation8_spill] sm:$0xff] }
 0x40e   : > { %v5438_v35 = vpop.f32.mrf.mxu1  ;;  %v10391_v30 = vpop.f32.mrf.mxu0  ;;  %10618 = vmatmul.mubr.msk.bf16.gmra.mxu0 %vm1131_vm2, %v16711_v15 }
 0x40f   : > { %16709 = vst [vmem:[#allocation98_spill] sm:$0xff] %v14291_v13  ;;  %v14296_v63 = vadd.f32 %v10388_v4, %v5709_v0  ;;  %v5707_v18 = vadd.f32 %v5438_v35, %v16713_v19  ;;  %10621 = vmatprep.mubr.msk.bf16.mxu0 %vm1131_vm2, %v16714_v39  ;;  %v16720_v35 = vld [vmem:[#allocation93_spill] sm:$0xff]  ;;  %v16722_v13 = vld [vmem:[#allocation264_spill] sm:$0xff] }
 0x410   : > { %v10261_v23 = vpop.f32.mrf.mxu1  ;;  %10488 = vmatmul.mubr.msk.bf16.gmra.mxu1 %vm1131_vm2, %v16715_v44  ;;  %v6135_v28 = vpop.f32.mrf.mxu0 }
 0x411   : > { %16712 = vst [vmem:[#allocation81_spill] sm:$0xff] %v14296_v63  ;;  %v14303_v17 = vadd.f32 %v6122_v12, %v5707_v18  ;;  %v5712_v58 = vadd.f32 %v10261_v23, %v16717_v59  ;;  %10491 = vmatprep.mubr.msk.bf16.mxu1 %vm1131_vm2, %v16718_v50  ;;  %v16723_v18 = vld [vmem:[#allocation198_spill] sm:$0xff]  ;;  %v16725_v59 = vld [vmem:[#allocation265_spill] sm:$0xff] }
 0x412   : > { %v5451_v46 = vpop.f32.mrf.mxu1  ;;  %v10392_v4 = vpop.f32.mrf.mxu0 }
 0x413   : > { %16716 = vst [vmem:[#allocation117_spill] sm:$0xff] %v14303_v17  ;;  %v14308_v0 = vadd.f32 %v10391_v30, %v5712_v58  ;;  %v5710_v15 = vadd.f32 %v5451_v46, %v16720_v35  ;;  %v16726_v17 = vld [vmem:[#allocation200_spill] sm:$0xff]  ;;  %v16727_v58 = vld [vmem:[#allocation11_spill] sm:$0xff] }
 0x414   : > { %v10262_v19 = vpop.f32.mrf.mxu1  ;;  %v6138_v39 = vpop.f32.mrf.mxu0 }
 0x415   : > { %16719 = vst [vmem:[#allocation267_spill] sm:$0xff] %v14308_v0  ;;  %v14311_v63 = vadd.f32 %v6135_v28, %v5710_v15  ;;  %v5713_v44 = vadd.f32 %v10262_v19, %v16722_v13  ;;  %v16729_v13 = vld [vmem:[#allocation268_spill] sm:$0xff]  ;;  %v16730_v15 = vld [vmem:[#allocation18_spill] sm:$0xff] }
 0x416   : > { %v5454_v61 = vpop.f32.mrf.mxu1  ;;  %v10395_v12 = vpop.f32.mrf.mxu0  ;;  %10622 = vmatmul.mubr.msk.bf16.gmra.mxu0 %vm1131_vm2, %v16723_v18 }
 0x417   : > { %16721 = vst [vmem:[#allocation107_spill] sm:$0xff] %v14311_v63  ;;  %v14316_v23 = vadd.f32 %v10392_v4, %v5713_v44  ;;  %v5711_v50 = vadd.f32 %v5454_v61, %v16725_v59  ;;  %10625 = vmatprep.mubr.msk.bf16.mxu0 %vm1131_vm2, %v16726_v17  ;;  %v16732_v61 = vld [vmem:[#allocation95_spill] sm:$0xff] }
 0x418   : > { %v10265_v30 = vpop.f32.mrf.mxu1  ;;  %10492 = vmatmul.mubr.msk.bf16.gmra.mxu1 %vm1131_vm2, %v16727_v58  ;;  %v6151_v28 = vpop.f32.mrf.mxu0  ;;  %v16734_v63 = vld [vmem:[#allocation159_spill] sm:$0xff] }
 0x419   : > { %16724 = vst [vmem:[#allocation270_spill] sm:$0xff] %v14316_v23  ;;  %v14323_v46 = vadd.f32 %v6138_v39, %v5711_v50  ;;  %v5716_v35 = vadd.f32 %v10265_v30, %v16729_v13  ;;  %10495 = vmatprep.mubr.msk.bf16.mxu1 %vm1131_vm2, %v16730_v15  ;;  %v16735_v50 = vld [vmem:[#allocation204_spill] sm:$0xff]  ;;  %v16737_v13 = vld [vmem:[#allocation103_spill] sm:$0xff] }
 0x41a   : > { %v5467_v19 = vpop.f32.mrf.mxu1  ;;  %v10396_v4 = vpop.f32.mrf.mxu0 }
 0x41b   : > { %16728 = vst [vmem:[#allocation90_spill] sm:$0xff] %v14323_v46  ;;  %v14328_v44 = vadd.f32 %v10395_v12, %v5716_v35  ;;  %v5714_v18 = vadd.f32 %v5467_v19, %v16732_v61  ;;  %v16738_v46 = vld [vmem:[#allocation207_spill] sm:$0xff] }
 0x41c   : > { %v10266_v59 = vpop.f32.mrf.mxu1  ;;  %v6154_v17 = vpop.f32.mrf.mxu0  ;;  %v16739_v35 = vld [vmem:[#allocation19_spill] sm:$0xff] }
 0x41d   : > { %16731 = vst [vmem:[#allocation271_spill] sm:$0xff] %v14328_v44  ;;  %v14331_v23 = vadd.f32 %v6151_v28, %v5714_v18  ;;  %v5717_v58 = vadd.f32 %v10266_v59, %v16734_v63  ;;  %v16741_v63 = vld [vmem:[#allocation160_spill] sm:$0xff] }
 0x41e   : > { %v5470_v0 = vpop.f32.mrf.mxu1  ;;  %v10399_v39 = vpop.f32.mrf.mxu0  ;;  %10626 = vmatmul.mubr.msk.bf16.gmra.mxu0 %vm1131_vm2, %v16735_v50  ;;  %v16742_v18 = vld [vmem:[#allocation24_spill] sm:$0xff] }
 0x41f   : > { %16733 = vst [vmem:[#allocation112_spill] sm:$0xff] %v14331_v23  ;;  %v14336_v30 = vadd.f32 %v10396_v4, %v5717_v58  ;;  %v5715_v15 = vadd.f32 %v5470_v0, %v16737_v13  ;;  %10629 = vmatprep.mubr.msk.bf16.mxu0 %vm1131_vm2, %v16738_v46  ;;  %v16744_v0 = vld [vmem:[#allocation162_spill] sm:$0xff]  ;;  %v16746_v23 = vld [vmem:[#allocation164_spill] sm:$0xff] }
 0x420   : > { %v10269_v12 = vpop.f32.mrf.mxu1  ;;  %10496 = vmatmul.mubr.msk.bf16.gmra.mxu1 %vm1131_vm2, %v16739_v35  ;;  %v6167_v28 = vpop.f32.mrf.mxu0 }
 0x421   : > { %16736 = vst [vmem:[#allocation118_spill] sm:$0xff] %v14336_v30  ;;  %v14343_v19 = vadd.f32 %v6154_v17, %v5715_v15  ;;  %v5720_v61 = vadd.f32 %v10269_v12, %v16741_v63  ;;  %10499 = vmatprep.mubr.msk.bf16.mxu1 %vm1131_vm2, %v16742_v18  ;;  %v16747_v15 = vld [vmem:[#allocation213_spill] sm:$0xff] }
 0x422   : > { %v5483_v59 = vpop.f32.mrf.mxu1  ;;  %v10400_v4 = vpop.f32.mrf.mxu0  ;;  %v16749_v63 = vld [vmem:[#allocation105_spill] sm:$0xff] }
 0x423   : > { %16740 = vst [vmem:[#allocation99_spill] sm:$0xff] %v14343_v19  ;;  %v14348_v58 = vadd.f32 %v10399_v39, %v5720_v61  ;;  %v5718_v50 = vadd.f32 %v5483_v59, %v16744_v0  ;;  %v16750_v19 = vld [vmem:[#allocation216_spill] sm:$0xff] }
 0x424   : > { %v10270_v13 = vpop.f32.mrf.mxu1  ;;  %v6170_v46 = vpop.f32.mrf.mxu0  ;;  %v16751_v61 = vld [vmem:[#allocation28_spill] sm:$0xff] }
 0x425   : > { %16743 = vst [vmem:[#allocation121_spill] sm:$0xff] %v14348_v58  ;;  %v14351_v30 = vadd.f32 %v6167_v28, %v5718_v50  ;;  %v5721_v35 = vadd.f32 %v10270_v13, %v16746_v23  ;;  %v16753_v23 = vld [vmem:[#allocation165_spill] sm:$0xff]  ;;  %v16754_v50 = vld [vmem:[#allocation35_spill] sm:$0xff] }
 0x426   : > { %v5486_v44 = vpop.f32.mrf.mxu1  ;;  %v10403_v17 = vpop.f32.mrf.mxu0  ;;  %10630 = vmatmul.mubr.msk.bf16.gmra.mxu0 %vm1131_vm2, %v16747_v15 }
 0x427   : > { %16745 = vst [vmem:[#allocation126_spill] sm:$0xff] %v14351_v30  ;;  %v14356_v12 = vadd.f32 %v10400_v4, %v5721_v35  ;;  %v5719_v18 = vadd.f32 %v5486_v44, %v16749_v63  ;;  %10633 = vmatprep.mubr.msk.bf16.mxu0 %vm1131_vm2, %v16750_v19  ;;  %v16756_v44 = vld [vmem:[#allocation113_spill] sm:$0xff]  ;;  %v16758_v30 = vld [vmem:[#allocation166_spill] sm:$0xff] }
 0x428   : > { %v10273_v39 = vpop.f32.mrf.mxu1  ;;  %10500 = vmatmul.mubr.msk.bf16.gmra.mxu1 %vm1131_vm2, %v16751_v61  ;;  %v6183_v28 = vpop.f32.mrf.mxu0 }
 0x429   : > { %16748 = vst [vmem:[#allocation272_spill] sm:$0xff] %v14356_v12  ;;  %v14363_v59 = vadd.f32 %v6170_v46, %v5719_v18  ;;  %v5724_v0 = vadd.f32 %v10273_v39, %v16753_v23  ;;  %10503 = vmatprep.mubr.msk.bf16.mxu1 %vm1131_vm2, %v16754_v50  ;;  %v16759_v18 = vld [vmem:[#allocation222_spill] sm:$0xff]  ;;  %v16761_v23 = vld [vmem:[#allocation168_spill] sm:$0xff] }
 0x42a   : > { %v5499_v13 = vpop.f32.mrf.mxu1  ;;  %v10404_v4 = vpop.f32.mrf.mxu0 }
 0x42b   : > { %16752 = vst [vmem:[#allocation129_spill] sm:$0xff] %v14363_v59  ;;  %v14368_v35 = vadd.f32 %v10403_v17, %v5724_v0  ;;  %v5722_v15 = vadd.f32 %v5499_v13, %v16756_v44  ;;  %v16762_v59 = vld [vmem:[#allocation225_spill] sm:$0xff] }
 0x42c   : > { %v10274_v63 = vpop.f32.mrf.mxu1  ;;  %v6186_v19 = vpop.f32.mrf.mxu0  ;;  %v16763_v0 = vld [vmem:[#allocation37_spill] sm:$0xff] }
 0x42d   : > { %16755 = vst [vmem:[#allocation275_spill] sm:$0xff] %v14368_v35  ;;  %v14371_v12 = vadd.f32 %v6183_v28, %v5722_v15  ;;  %v5725_v61 = vadd.f32 %v10274_v63, %v16758_v30  ;;  %v16765_v30 = vld [vmem:[#allocation170_spill] sm:$0xff] }
 0x42e   : > { %v5502_v58 = vpop.f32.mrf.mxu1  ;;  %v10407_v46 = vpop.f32.mrf.mxu0  ;;  %10634 = vmatmul.mubr.msk.bf16.gmra.mxu0 %vm1131_vm2, %v16759_v18  ;;  %v16766_v15 = vld [vmem:[#allocation42_spill] sm:$0xff] }
 0x42f   : > { %16757 = vst [vmem:[#allocation276_spill] sm:$0xff] %v14371_v12  ;;  %v14376_v39 = vadd.f32 %v10404_v4, %v5725_v61  ;;  %v5723_v50 = vadd.f32 %v5502_v58, %v16761_v23  ;;  %10637 = vmatprep.mubr.msk.bf16.mxu0 %vm1131_vm2, %v16762_v59  ;;  %v16768_v58 = vld [vmem:[#allocation115_spill] sm:$0xff]  ;;  %v16770_v12 = vld [vmem:[#allocation100_spill] sm:$0xff] }
 0x430   : > { %v10277_v17 = vpop.f32.mrf.mxu1  ;;  %10504 = vmatmul.mubr.msk.bf16.gmra.mxu1 %vm1131_vm2, %v16763_v0  ;;  %v6199_v28 = vpop.f32.mrf.mxu0 }
 0x431   : > { %16760 = vst [vmem:[#allocation22_spill] sm:$0xff] %v14376_v39  ;;  %v14383_v13 = vadd.f32 %v6186_v19, %v5723_v50  ;;  %v5728_v44 = vadd.f32 %v10277_v17, %v16765_v30  ;;  %10507 = vmatprep.mubr.msk.bf16.mxu1 %vm1131_vm2, %v16766_v15  ;;  %v16771_v50 = vld [vmem:[#allocation231_spill] sm:$0xff]  ;;  %v16773_v30 = vld [vmem:[#allocation122_spill] sm:$0xff] }
 0x432   : > { %v5515_v63 = vpop.f32.mrf.mxu1  ;;  %v10408_v4 = vpop.f32.mrf.mxu0 }
 0x433   : > { %16764 = vst [vmem:[#allocation26_spill] sm:$0xff] %v14383_v13  ;;  %v14388_v61 = vadd.f32 %v10407_v46, %v5728_v44  ;;  %v5726_v18 = vadd.f32 %v5515_v63, %v16768_v58  ;;  %v16774_v13 = vld [vmem:[#allocation234_spill] sm:$0xff] }
 0x434   : > { %v10278_v23 = vpop.f32.mrf.mxu1  ;;  %v6202_v59 = vpop.f32.mrf.mxu0  ;;  %v16775_v44 = vld [vmem:[#allocation46_spill] sm:$0xff] }
 0x435   : > { %16767 = vst [vmem:[#allocation31_spill] sm:$0xff] %v14388_v61  ;;  %v14391_v39 = vadd.f32 %v6199_v28, %v5726_v18  ;;  %v5729_v0 = vadd.f32 %v10278_v23, %v16770_v12  ;;  %v16777_v12 = vld [vmem:[#allocation171_spill] sm:$0xff]  ;;  %v16778_v18 = vld [vmem:[#allocation53_spill] sm:$0xff] }
 0x436   : > { %v5518_v35 = vpop.f32.mrf.mxu1  ;;  %v10411_v19 = vpop.f32.mrf.mxu0  ;;  %10638 = vmatmul.mubr.msk.bf16.gmra.mxu0 %vm1131_vm2, %v16771_v50 }
 0x437   : > { %16769 = vst [vmem:[#allocation274_spill] sm:$0xff] %v14391_v39  ;;  %v14396_v17 = vadd.f32 %v10408_v4, %v5729_v0  ;;  %v5727_v15 = vadd.f32 %v5518_v35, %v16773_v30  ;;  %10641 = vmatprep.mubr.msk.bf16.mxu0 %vm1131_vm2, %v16774_v13  ;;  %v16780_v35 = vld [vmem:[#allocation173_spill] sm:$0xff]  ;;  %v16782_v39 = vld [vmem:[#allocation175_spill] sm:$0xff] }
 0x438   : > { %v10281_v46 = vpop.f32.mrf.mxu1  ;;  %10508 = vmatmul.mubr.msk.bf16.gmra.mxu1 %vm1131_vm2, %v16775_v44  ;;  %v6215_v28 = vpop.f32.mrf.mxu0 }
 0x439   : > { %16772 = vst [vmem:[#allocation142_spill] sm:$0xff] %v14396_v17  ;;  %v14403_v63 = vadd.f32 %v6202_v59, %v5727_v15  ;;  %v5732_v58 = vadd.f32 %v10281_v46, %v16777_v12  ;;  %10511 = vmatprep.mubr.msk.bf16.mxu1 %vm1131_vm2, %v16778_v18  ;;  %v16783_v15 = vld [vmem:[#allocation240_spill] sm:$0xff]  ;;  %v16785_v12 = vld [vmem:[#allocation125_spill] sm:$0xff] }
 0x43a   : > { %v5531_v23 = vpop.f32.mrf.mxu1  ;;  %v10412_v4 = vpop.f32.mrf.mxu0 }
 0x43b   : > { %16776 = vst [vmem:[#allocation147_spill] sm:$0xff] %v14403_v63  ;;  %v14408_v0 = vadd.f32 %v10411_v19, %v5732_v58  ;;  %v5730_v50 = vadd.f32 %v5531_v23, %v16780_v35  ;;  %v16786_v63 = vld [vmem:[#allocation243_spill] sm:$0xff] }
 0x43c   : > { %v10282_v30 = vpop.f32.mrf.mxu1  ;;  %v6218_v13 = vpop.f32.mrf.mxu0  ;;  %v16787_v58 = vld [vmem:[#allocation55_spill] sm:$0xff] }
 0x43d   : > { %16779 = vst [vmem:[#allocation143_spill] sm:$0xff] %v14408_v0  ;;  %v14411_v17 = vadd.f32 %v6215_v28, %v5730_v50  ;;  %v5733_v44 = vadd.f32 %v10282_v30, %v16782_v39  ;;  %v16789_v39 = vld [vmem:[#allocation110_spill] sm:$0xff]  ;;  %v16790_v50 = vld [vmem:[#allocation60_spill] sm:$0xff] }
 0x43e   : > { %v5534_v61 = vpop.f32.mrf.mxu1  ;;  %v10415_v59 = vpop.f32.mrf.mxu0  ;;  %10642 = vmatmul.mubr.msk.bf16.gmra.mxu0 %vm1131_vm2, %v16783_v15 }
 0x43f   : > { %16781 = vst [vmem:[#allocation148_spill] sm:$0xff] %v14411_v17  ;;  %v14416_v46 = vadd.f32 %v10412_v4, %v5733_v44  ;;  %v5731_v18 = vadd.f32 %v5534_v61, %v16785_v12  ;;  %10645 = vmatprep.mubr.msk.bf16.mxu0 %vm1131_vm2, %v16786_v63  ;;  %v16792_v61 = vld [vmem:[#allocation131_spill] sm:$0xff]  ;;  %v16794_v17 = vld [vmem:[#allocation176_spill] sm:$0xff] }
 0x440   : > { %v10285_v19 = vpop.f32.mrf.mxu1  ;;  %10512 = vmatmul.mubr.msk.bf16.gmra.mxu1 %vm1131_vm2, %v16787_v58  ;;  %v6231_v28 = vpop.f32.mrf.mxu0 }
 0x441   : > { %16784 = vst [vmem:[#allocation33_spill] sm:$0xff] %v14416_v46  ;;  %v14423_v23 = vadd.f32 %v6218_v13, %v5731_v18  ;;  %v5736_v35 = vadd.f32 %v10285_v19, %v16789_v39  ;;  %10515 = vmatprep.mubr.msk.bf16.mxu1 %vm1131_vm2, %v16790_v50  ;;  %v16795_v18 = vld [vmem:[#allocation249_spill] sm:$0xff]  ;;  %v16797_v39 = vld [vmem:[#allocation178_spill] sm:$0xff] }
 0x442   : > { %v5547_v30 = vpop.f32.mrf.mxu1  ;;  %v10416_v4 = vpop.f32.mrf.mxu0 }
 0x443   : > { %16788 = vst [vmem:[#allocation144_spill] sm:$0xff] %v14423_v23  ;;  %v14428_v44 = vadd.f32 %v10415_v59, %v5736_v35  ;;  %v5734_v15 = vadd.f32 %v5547_v30, %v16792_v61  ;;  %v16798_v23 = vld [vmem:[#allocation252_spill] sm:$0xff] }
 0x444   : > { %v10286_v12 = vpop.f32.mrf.mxu1  ;;  %v6234_v63 = vpop.f32.mrf.mxu0  ;;  %v16799_v35 = vld [vmem:[#allocation64_spill] sm:$0xff] }
 0x445   : > { %16791 = vst [vmem:[#allocation40_spill] sm:$0xff] %v14428_v44  ;;  %v14431_v46 = vadd.f32 %v6231_v28, %v5734_v15  ;;  %v5737_v58 = vadd.f32 %v10286_v12, %v16794_v17  ;;  %v16800_v17 = vld [vmem:[#allocation180_spill] sm:$0xff]  ;;  %v16801_v15 = vld [vmem:[#allocation71_spill] sm:$0xff] }
 0x446   : > { %v5550_v0 = vpop.f32.mrf.mxu1  ;;  %v10419_v13 = vpop.f32.mrf.mxu0  ;;  %10646 = vmatmul.mubr.msk.bf16.gmra.mxu0 %vm1131_vm2, %v16795_v18 }
 0x447   : > { %16793 = vst [vmem:[#allocation13_spill] sm:$0xff] %v14431_v46  ;;  %v14436_v19 = vadd.f32 %v10416_v4, %v5737_v58  ;;  %v5735_v50 = vadd.f32 %v5550_v0, %v16797_v39  ;;  %10649 = vmatprep.mubr.msk.bf16.mxu0 %vm1131_vm2, %v16798_v23  ;;  %v16803_v0 = vld [vmem:[#allocation134_spill] sm:$0xff]  ;;  %v16805_v46 = vld [vmem:[#allocation119_spill] sm:$0xff] }
 0x448   : > { %v10289_v59 = vpop.f32.mrf.mxu1  ;;  %10516 = vmatmul.mubr.msk.bf16.gmra.mxu1 %vm1131_vm2, %v16799_v35  ;;  %v6247_v28 = vpop.f32.mrf.mxu0 }
 0x449   : > { %16796 = vst [vmem:[#allocation16_spill] sm:$0xff] %v14436_v19  ;;  %v14443_v30 = vadd.f32 %v6234_v63, %v5735_v50  ;;  %v5740_v61 = vadd.f32 %v10289_v59, %v16800_v17  ;;  %10519 = vmatprep.mubr.msk.bf16.mxu1 %vm1131_vm2, %v16801_v15  ;;  %v16806_v50 = vld [vmem:[#allocation258_spill] sm:$0xff]  ;;  %v16808_v17 = vld [vmem:[#allocation5_spill] sm:$0xff] }
 0x44a   : > { %v5563_v12 = vpop.f32.mrf.mxu1  ;;  %v10420_v4 = vpop.f32.mrf.mxu0 }
 0x44b   : > { %v14448_v58 = vadd.f32 %v10419_v13, %v5740_v61  ;;  %v5738_v18 = vadd.f32 %v5563_v12, %v16803_v0  ;;  %v16809_v61 = vld [vmem:[#allocation73_spill] sm:$0xff] }
 0x44c   : > { %v10290_v39 = vpop.f32.mrf.mxu1  ;;  %v6250_v23 = vpop.f32.mrf.mxu0 }
 0x44d   : > { %16802 = vst [vmem:[#allocation149_spill] sm:$0xff] %v14448_v58  ;;  %v14451_v19 = vadd.f32 %v6247_v28, %v5738_v18  ;;  %v5741_v35 = vadd.f32 %v10290_v39, %v16805_v46  ;;  %v16810_v46 = vld [vmem:[#allocation181_spill] sm:$0xff]  ;;  %v16811_v18 = vld [vmem:[#allocation78_spill] sm:$0xff] }
 0x44e   : > { %v5566_v44 = vpop.f32.mrf.mxu1  ;;  %v10423_v63 = vpop.f32.mrf.mxu0  ;;  %10650 = vmatmul.mubr.msk.bf16.gmra.mxu0 %vm1131_vm2, %v16806_v50 }
 0x44f   : > { %16804 = vst [vmem:[#allocation23_spill] sm:$0xff] %v14451_v19  ;;  %v14456_v59 = vadd.f32 %v10420_v4, %v5741_v35  ;;  %v5739_v15 = vadd.f32 %v5566_v44, %v16808_v17  ;;  %10653 = vmatprep.mubr.msk.bf16.mxu0 %vm1131_vm2, %v16513_v22  ;;  %v16812_v44 = vld [vmem:[#allocation183_spill] sm:$0xff]  ;;  %v16813_v19 = vld [vmem:[#allocation185_spill] sm:$0xff] }
 0x450   : > { %v10293_v13 = vpop.f32.mrf.mxu1  ;;  %10520 = vmatmul.mubr.msk.bf16.gmra.mxu1 %vm1131_vm2, %v16809_v61  ;;  %v6263_v28 = vpop.f32.mrf.mxu0 }
 0x451   : > { %16807 = vst [vmem:[#allocation150_spill] sm:$0xff] %v14456_v59  ;;  %v14463_v12 = vadd.f32 %v6250_v23, %v5739_v15  ;;  %v5744_v0 = vadd.f32 %v10293_v13, %v16810_v46  ;;  %10523 = vmatprep.mubr.msk.bf16.mxu1 %vm1131_vm2, %v16811_v18  ;;  %v16814_v46 = vld [vmem:[#allocation82_spill] sm:$0xff]  ;;  %v16815_v18 = vld [vmem:[#allocation89_spill] sm:$0xff] }
 0x452   : > { %v5579_v39 = vpop.f32.mrf.mxu1  ;;  %v10424_v4 = vpop.f32.mrf.mxu0 }
 0x453   : > { %v14468_v35 = vadd.f32 %v10423_v63, %v5744_v0  ;;  %v5742_v50 = vadd.f32 %v5579_v39, %v16812_v44 }
 0x454   : > { %v10294_v17 = vpop.f32.mrf.mxu1  ;;  %v6266_v22 = vpop.f32.mrf.mxu0 }
 0x455   : > { %v14471_v59 = vadd.f32 %v6263_v28, %v5742_v50  ;;  %v5745_v61 = vadd.f32 %v10294_v17, %v16813_v19  ;;  %v16817_v17 = vld [vmem:[#allocation128_spill] sm:$0xff] }
 0x456   : > { %v5582_v58 = vpop.f32.mrf.mxu1  ;;  %v10427_v23 = vpop.f32.mrf.mxu0  ;;  %10654 = vmatmul.mubr.msk.bf16.gmra.mxu0 %vm1131_vm2, %v16519_v53 }
 0x457   : > { %v14476_v15 = vadd.f32 %v10424_v4, %v5745_v61  ;;  %v5743_v13 = vadd.f32 %v5582_v58, %v13826_v26  ;;  %10657 = vmatprep.mubr.msk.bf16.mxu0 %vm1131_vm2, %v16520_v27  ;;  %v16816_v26 = vld [vmem:[#allocation6_spill] sm:$0xff] }
 0x458   : > { %v10297_v63 = vpop.f32.mrf.mxu1  ;;  %10524 = vmatmul.mubr.msk.bf16.gmra.mxu1 %vm1131_vm2, %v16814_v46  ;;  %v6279_v28 = vpop.f32.mrf.mxu0 }
 0x459   : > { %v14483_v0 = vadd.f32 %v6266_v22, %v5743_v13  ;;  %v5748_v19 = vadd.f32 %v10297_v63, %v13831_v34  ;;  %10527 = vmatprep.mubr.msk.bf16.mxu1 %vm1131_vm2, %v16815_v18  ;;  %v16818_v63 = vld [vmem:[#allocation91_spill] sm:$0xff] }
 0x45a   : > { %v5595_v53 = vpop.f32.mrf.mxu1  ;;  %v10428_v39 = vpop.f32.mrf.mxu0 }
 0x45b   : > { %v14488_v4 = vadd.f32 %v10427_v23, %v5748_v19  ;;  %v5746_v58 = vadd.f32 %v5595_v53, %v16816_v26  ;;  %v16819_v53 = vld [vmem:[#allocation96_spill] sm:$0xff] }
 0x45c   : > { %v10298_v44 = vpop.f32.mrf.mxu1  ;;  %v6282_v27 = vpop.f32.mrf.mxu0 }
 0x45d   : > { %v14491_v50 = vadd.f32 %v6279_v28, %v5746_v58  ;;  %v5749_v61 = vadd.f32 %v10298_v44, %v16817_v17 }
 0x45e   : > { %v5598_v46 = vpop.f32.mrf.mxu1  ;;  %v10431_v22 = vpop.f32.mrf.mxu0  ;;  %10658 = vmatmul.mubr.msk.bf16.gmra.mxu0 %vm1131_vm2, %v16525_v2 }
 0x45f   : > { %v14496_v34 = vadd.f32 %v10428_v39, %v5749_v61  ;;  %v5747_v13 = vadd.f32 %v5598_v46, %v13846_v60  ;;  %10661 = vmatprep.mubr.msk.bf16.mxu0 %vm1131_vm2, %v16526_v52  ;;  %v16820_v60 = vld [vmem:[#allocation9_spill] sm:$0xff]  ;;  %v16821_v61 = vld [vmem:[#allocation186_spill] sm:$0xff] }
 0x460   : > { %v10301_v23 = vpop.f32.mrf.mxu1  ;;  %10528 = vmatmul.mubr.msk.bf16.gmra.mxu1 %vm1131_vm2, %v16818_v63  ;;  %v6295_v28 = vpop.f32.mrf.mxu0  ;;  %v16823_v63 = vld [vmem:[#allocation101_spill] sm:$0xff] }
 0x461   : > { %v14503_v19 = vadd.f32 %v6282_v27, %v5747_v13  ;;  %v5752_v18 = vadd.f32 %v10301_v23, %v13851_v56  ;;  %10531 = vmatprep.mubr.msk.bf16.mxu1 %vm1131_vm2, %v16819_v53 }
 0x462   : > { %v5611_v2 = vpop.f32.mrf.mxu1  ;;  %v10432_v39 = vpop.f32.mrf.mxu0 }
 0x463   : > { %v14508_v26 = vadd.f32 %v10431_v22, %v5752_v18  ;;  %v5750_v58 = vadd.f32 %v5611_v2, %v16820_v60  ;;  %v16825_v2 = vld [vmem:[#allocation108_spill] sm:$0xff] }
 0x464   : > { %v10302_v52 = vpop.f32.mrf.mxu1  ;;  %v6298_v44 = vpop.f32.mrf.mxu0 }
 0x465   : > { %v14511_v17 = vadd.f32 %v6295_v28, %v5750_v58  ;;  %v5753_v46 = vadd.f32 %v10302_v52, %v16821_v61  ;;  %v16826_v61 = vld [vmem:[#allocation188_spill] sm:$0xff] }
 0x466   : > { %v5614_v27 = vpop.f32.mrf.mxu1  ;;  %v10567_v13 = vpop.f32.mrf.mxu0  ;;  %10662 = vmatmul.mubr.msk.bf16.gmra.mxu0 %vm1131_vm2, %v16530_v1 }
 0x467   : > { %v14516_v56 = vadd.f32 %v10432_v39, %v5753_v46  ;;  %v5751_v23 = vadd.f32 %v5614_v27, %v13866_v31  ;;  %10665 = vmatprep.mubr.msk.bf16.mxu0 %vm1131_vm2, %v16532_v38  ;;  %v14532_v31 = vld [vmem:[%s15171_s2] ss:$0 sm:$0xff] }
 0x468   : > { %v10437_v22 = vpop.f32.mrf.mxu1  ;;  %10532 = vmatmul.mubr.msk.bf16.gmra.mxu1 %vm1131_vm2, %v16823_v63  ;;  %v7193_v28 = vpop.f32.mrf.mxu0 }
 0x469   : > { %16822 = vst [vmem:[#allocation43_spill] sm:$0xff] %v14516_v56  ;;  %v14524_v18 = vadd.f32 %v6298_v44, %v5751_v23  ;;  %v7014_v53 = vadd.f32 %v10437_v22, %v13871_v62  ;;  %10535 = vmatprep.mubr.msk.bf16.mxu1 %vm1131_vm2, %v16825_v2  ;;  %v16827_v22 = vld [vmem:[#allocation102_spill] sm:$0xff] }
 0x46a   : > { %v6501_v1 = vpop.f32.mrf.mxu1  ;;  %v10568_v38 = vpop.f32.mrf.mxu0 }
 0x46b   : > { %16824 = vst [vmem:[#allocation203_spill] sm:$0xff] %v14524_v18  ;;  %v7706_v39 = vadd.f32 %v10567_v13, %v7014_v53  ;;  %v7012_v60 = vadd.f32 %v6501_v1, %v13874_v54  ;;  %v16828_v13 = vld [vmem:[#allocation190_spill] sm:$0xff]  ;;  %v16829_v1 = vld [vmem:[#allocation111_spill] sm:$0xff] }
 0x46c   : > { %v10438_v58 = vpop.f32.mrf.mxu1  ;;  %v7196_v52 = vpop.f32.mrf.mxu0 }
 0x46d   : > { %v7841_v44 = vadd.f32 %v14532_v31, %v7706_v39  ;;  %v7704_v62 = vadd.f32 %v7193_v28, %v7012_v60  ;;  %v7015_v46 = vadd.f32 %v10438_v58, %v16826_v61  ;;  %v16830_v58 = vld [vmem:[#allocation10_spill] sm:$0xff] }
 0x46e   : > { %v6504_v27 = vpop.f32.mrf.mxu1  ;;  %v10571_v23 = vpop.f32.mrf.mxu0  ;;  %10666 = vmatmul.mubr.msk.bf16.gmra.mxu0 %vm1131_vm2, %v16827_v22 }
 0x46f   : > { %v7969_v63 = vmax.f32 %v7841_v44, 0.0  ;;  %v7839_v2 = vadd.f32 %v14532_v31, %v7704_v62  ;;  %v7707_v18 = vadd.f32 %v10568_v38, %v7015_v46  ;;  %v7013_v53 = vadd.f32 %v6504_v27, %v16828_v13  ;;  %10669 = vmatprep.mubr.msk.bf16.mxu0 %vm1131_vm2, %v16540_v5  ;;  %v16831_v62 = vld [vmem:[#allocation116_spill] sm:$0xff]  ;;  %v16832_v13 = vld [vmem:[#allocation191_spill] sm:$0xff] }
 0x470   : > { %v10441_v54 = vpop.f32.mrf.mxu1  ;;  %10536 = vmatmul.mubr.msk.bf16.gmra.mxu1 %vm1131_vm2, %v16829_v1  ;;  %v7209_v28 = vpop.f32.mrf.mxu0 }
 0x471   : > { %8098 = vst.msk [vmem:[%s14547_s10 + $0x10] sm:$0xff] %vm8095_vm4, %v7969_v63  ;;  %v7967_v39 = vmax.f32 %v7839_v2, 0.0  ;;  %v7842_v38 = vadd.f32 %v14532_v31, %v7707_v18  ;;  %v7705_v60 = vadd.f32 %v7196_v52, %v7013_v53  ;;  %v7018_v44 = vadd.f32 %v10441_v54, %v16830_v58  ;;  %10539 = vmatprep.mubr.msk.bf16.mxu1 %vm1131_vm2, %v16831_v62  ;;  %v16833_v54 = vld [vmem:[#allocation15_spill] sm:$0xff] }
 0x472   : > { %v6517_v5 = vpop.f32.mrf.mxu1  ;;  %v10572_v61 = vpop.f32.mrf.mxu0 }
 0x473   : > { %8096 = vst.msk [vmem:[%s14547_s10] sm:$0xff] %vm8095_vm4, %v7967_v39  ;;  %v7970_v46 = vmax.f32 %v7842_v38, 0.0  ;;  %v7840_v27 = vadd.f32 %v14532_v31, %v7705_v60  ;;  %v7710_v22 = vadd.f32 %v10571_v23, %v7018_v44  ;;  %v7016_v63 = vadd.f32 %v6517_v5, %v16832_v13  ;;  %v16834_v44 = vld [vmem:[#allocation123_spill] sm:$0xff] }
 0x474   : > { %v10442_v2 = vpop.f32.mrf.mxu1  ;;  %v7212_v1 = vpop.f32.mrf.mxu0 }
 0x475   : > { %8099 = vst.msk [vmem:[%s14547_s10 + $0x18] sm:$0xff] %vm8095_vm4, %v7970_v46  ;;  %v7968_v18 = vmax.f32 %v7840_v27, 0.0  ;;  %v7845_v52 = vadd.f32 %v14532_v31, %v7710_v22  ;;  %v7708_v53 = vadd.f32 %v7209_v28, %v7016_v63  ;;  %v7019_v58 = vadd.f32 %v10442_v2, %v16833_v54 }
 0x476   : > { %v6520_v62 = vpop.f32.mrf.mxu1  ;;  %v10575_v56 = vpop.f32.mrf.mxu0  ;;  %10670 = vmatmul.mubr.msk.bf16.gmra.mxu0 %vm1131_vm2, %v16545_v48 }
 0x477   : > { %8097 = vst.msk [vmem:[%s14547_s10 + $0x8] sm:$0xff] %vm8095_vm4, %v7968_v18  ;;  %v7973_v23 = vmax.f32 %v7845_v52, 0.0  ;;  %v7843_v39 = vadd.f32 %v14532_v31, %v7708_v53  ;;  %v7711_v38 = vadd.f32 %v10572_v61, %v7019_v58  ;;  %v7017_v60 = vadd.f32 %v6520_v62, %v13906_v49  ;;  %10673 = vmatprep.mubr.msk.bf16.mxu0 %vm1131_vm2, %v16546_v57  ;;  %v16835_v61 = vld [vmem:[#allocation127_spill] sm:$0xff]  ;;  %v16836_v58 = vld [vmem:[#allocation192_spill] sm:$0xff] }
 0x478   : > { %v10445_v28 = vpop.f32.mrf.mxu1  ;;  %10540 = vmatmul.mubr.msk.bf16.gmra.mxu1 %vm1131_vm2, %v16834_v44  ;;  %v7225_v5 = vpop.f32.mrf.mxu0  ;;  %v16837_v44 = vld [vmem:[#allocation132_spill] sm:$0xff] }
 0x479   : > { %8102 = vst.msk [vmem:[%s14547_s10 + $0x30] sm:$0xff] %vm8095_vm4, %v7973_v23  ;;  %v7971_v48 = vmax.f32 %v7843_v39, 0.0  ;;  %v7846_v46 = vadd.f32 %v14532_v31, %v7711_v38  ;;  %v7709_v27 = vadd.f32 %v7212_v1, %v7017_v60  ;;  %v7022_v22 = vadd.f32 %v10445_v28, %v13911_v14  ;;  %10543 = vmatprep.mubr.msk.bf16.mxu1 %vm1131_vm2, %v16835_v61 }
 0x47a   : > { %v6533_v49 = vpop.f32.mrf.mxu1  ;;  %v10576_v13 = vpop.f32.mrf.mxu0 }
 0x47b   : > { %8100 = vst.msk [vmem:[%s14547_s10 + $0x20] sm:$0xff] %vm8095_vm4, %v7971_v48  ;;  %v7974_v57 = vmax.f32 %v7846_v46, 0.0  ;;  %v7844_v63 = vadd.f32 %v14532_v31, %v7709_v27  ;;  %v7714_v2 = vadd.f32 %v10575_v56, %v7022_v22  ;;  %v7020_v18 = vadd.f32 %v6533_v49, %v13914_v25  ;;  %v16838_v22 = vld [vmem:[#allocation135_spill] sm:$0xff] }
 0x47c   : > { %v10446_v52 = vpop.f32.mrf.mxu1  ;;  %v7228_v53 = vpop.f32.mrf.mxu0 }
 0x47d   : > { %8103 = vst.msk [vmem:[%s14547_s10 + $0x38] sm:$0xff] %vm8095_vm4, %v7974_v57  ;;  %v7972_v1 = vmax.f32 %v7844_v63, 0.0  ;;  %v7849_v14 = vadd.f32 %v14532_v31, %v7714_v2  ;;  %v7712_v54 = vadd.f32 %v7225_v5, %v7020_v18  ;;  %v7023_v62 = vadd.f32 %v10446_v52, %v16836_v58 }
 0x47e   : > { %v6536_v23 = vpop.f32.mrf.mxu1  ;;  %v10579_v39 = vpop.f32.mrf.mxu0  ;;  %10674 = vmatmul.mubr.msk.bf16.gmra.mxu0 %vm1131_vm2, %v16548_v43 }
 0x47f   : > { %8101 = vst.msk [vmem:[%s14547_s10 + $0x28] sm:$0xff] %vm8095_vm4, %v7972_v1  ;;  %v7977_v56 = vmax.f32 %v7849_v14, 0.0  ;;  %v7847_v25 = vadd.f32 %v14532_v31, %v7712_v54  ;;  %v7715_v38 = vadd.f32 %v10576_v13, %v7023_v62  ;;  %v7021_v60 = vadd.f32 %v6536_v23, %v13926_v7  ;;  %10677 = vmatprep.mubr.msk.bf16.mxu0 %vm1131_vm2, %v16550_v20  ;;  %v16839_v62 = vld [vmem:[#allocation194_spill] sm:$0xff] }
 0x480   : > { %v10449_v28 = vpop.f32.mrf.mxu1  ;;  %10544 = vmatmul.mubr.msk.bf16.gmra.mxu1 %vm1131_vm2, %v16837_v44  ;;  %v7241_v5 = vpop.f32.mrf.mxu0  ;;  %v16842_v44 = vld [vmem:[#allocation139_spill] sm:$0xff] }
 0x481   : > { %8106 = vst.msk [vmem:[%s14547_s10 + $0x50] sm:$0xff] %vm8095_vm4, %v7977_v56  ;;  %v7975_v43 = vmax.f32 %v7847_v25, 0.0  ;;  %v7850_v48 = vadd.f32 %v14532_v31, %v7715_v38  ;;  %v7713_v46 = vadd.f32 %v7228_v53, %v7021_v60  ;;  %v7026_v27 = vadd.f32 %v10449_v28, %v13931_v47  ;;  %10547 = vmatprep.mubr.msk.bf16.mxu1 %vm1131_vm2, %v16838_v22  ;;  %v16840_v56 = vld [vmem:[#allocation138_spill] sm:$0xff]  ;;  %v16841_v60 = vld [vmem:[#allocation196_spill] sm:$0xff]  ;;  %v16843_v22 = vld [vmem:[#allocation17_spill] sm:$0xff] }
 0x482   : > { %v6549_v7 = vpop.f32.mrf.mxu1  ;;  %v10580_v61 = vpop.f32.mrf.mxu0 }
 0x483   : > { %8104 = vst.msk [vmem:[%s14547_s10 + $0x40] sm:$0xff] %vm8095_vm4, %v7975_v43  ;;  %v7978_v20 = vmax.f32 %v7850_v48, 0.0  ;;  %v7848_v49 = vadd.f32 %v14532_v31, %v7713_v46  ;;  %v7718_v13 = vadd.f32 %v10579_v39, %v7026_v27  ;;  %v7024_v57 = vadd.f32 %v6549_v7, %v13934_v51 }
 0x484   : > { %v10450_v63 = vpop.f32.mrf.mxu1  ;;  %v7244_v2 = vpop.f32.mrf.mxu0  ;;  %v6440_v43 = vshll.u32 %v13978_v10, 16 }
 0x485   : > { %8107 = vst.msk [vmem:[%s14547_s10 + $0x58] sm:$0xff] %vm8095_vm4, %v7978_v20  ;;  %v7976_v18 = vmax.f32 %v7848_v49, 0.0  ;;  %v7853_v47 = vadd.f32 %v14532_v31, %v7718_v13  ;;  %v7716_v52 = vadd.f32 %v7241_v5, %v7024_v57  ;;  %v7027_v53 = vadd.f32 %v10450_v63, %v13939_v41  ;;  %v16844_v63 = vld [vmem:[#allocation7_spill] sm:$0xff] }
 0x486   : > { %v6552_v1 = vpop.f32.mrf.mxu1  ;;  %v10583_v14 = vpop.f32.mrf.mxu0  ;;  %10678 = vmatmul.mubr.msk.bf16.gmra.mxu0 %vm1131_vm2, %v16555_v40 }
 0x487   : > { %8105 = vst.msk [vmem:[%s14547_s10 + $0x48] sm:$0xff] %vm8095_vm4, %v7976_v18  ;;  %v7981_v54 = vmax.f32 %v7853_v47, 0.0  ;;  %v7851_v51 = vadd.f32 %v14532_v31, %v7716_v52  ;;  %v7719_v58 = vadd.f32 %v10580_v61, %v7027_v53  ;;  %v7025_v23 = vadd.f32 %v6552_v1, %v16839_v62  ;;  %10681 = vmatprep.mubr.msk.bf16.mxu0 %vm1131_vm2, %v16557_v42  ;;  %v384_v18 = vld [vmem:[%s10939_s9 + $0x548] sm:$0x3]  ;;  %v16845_v62 = vld [vmem:[#allocation25_spill] sm:$0xff] }
 0x488   : > { %v10453_v39 = vpop.f32.mrf.mxu1  ;;  %10548 = vmatmul.mubr.msk.bf16.gmra.mxu1 %vm1131_vm2, %v16840_v56  ;;  %v7257_v41 = vpop.f32.mrf.mxu0  ;;  %v6438_v53 = vshrl.u32 %v13978_v10, 16  ;;  %v6442_v1 = vrot.slane %v6440_v43, 1  ;;  %v16846_v56 = vld [vmem:[#allocation141_spill] sm:$0xff] }
 0x489   : > { %8110 = vst.msk [vmem:[%s14547_s10 + $0x70] sm:$0xff] %vm8095_vm4, %v7981_v54  ;;  %v7979_v40 = vmax.f32 %v7851_v51, 0.0  ;;  %v7854_v25 = vadd.f32 %v14532_v31, %v7719_v58  ;;  %v7717_v38 = vadd.f32 %v7244_v2, %v7025_v23  ;;  %v7030_v28 = vadd.f32 %v10453_v39, %v16841_v60  ;;  %10551 = vmatprep.mubr.msk.bf16.mxu1 %vm1131_vm2, %v16842_v44 }
 0x48a   : > { %v6565_v5 = vpop.f32.mrf.mxu1  ;;  %v10584_v42 = vpop.f32.mrf.mxu0  ;;  %v6443_v43 = vor.u32 %v6442_v1, %v6438_v53 }
 0x48b   : > { %8108 = vst.msk [vmem:[%s14547_s10 + $0x60] sm:$0xff] %vm8095_vm4, %v7979_v40  ;;  %v7982_v48 = vmax.f32 %v7854_v25, 0.0  ;;  %v7852_v46 = vadd.f32 %v14532_v31, %v7717_v38  ;;  %v7722_v27 = vadd.f32 %v10583_v14, %v7030_v28  ;;  %v7028_v7 = vadd.f32 %v6565_v5, %v16843_v22  ;;  %v16848_v22 = vld [vmem:[#allocation197_spill] sm:$0xff] }
 0x48c   : > { %v10454_v61 = vpop.f32.mrf.mxu1  ;;  %v7260_v20 = vpop.f32.mrf.mxu0  ;;  %v6444_v14 = vshll.u32 %v14003_v24, 16  ;;  %v7144_v40 = vrot.slane %v14003_v24, 1  ;;  %v486_v25 = vpack.c.bf16 %v384_v18, %v384_v18  ;;  %v16849_v18 = vld [vmem:[#allocation199_spill] sm:$0xff] }
 0x48d   : > { %8111 = vst.msk [vmem:[%s14547_s10 + $0x78] sm:$0xff] %vm8095_vm4, %v7982_v48  ;;  %v7980_v49 = vmax.f32 %v7852_v46, 0.0  ;;  %v7857_v13 = vadd.f32 %v14532_v31, %v7722_v27  ;;  %v7720_v57 = vadd.f32 %v7257_v41, %v7028_v7  ;;  %v7031_v2 = vadd.f32 %v10454_v61, %v16844_v63 }
 0x48e   : > { %v6568_v47 = vpop.f32.mrf.mxu1  ;;  %v10587_v52 = vpop.f32.mrf.mxu0  ;;  %10682 = vmatmul.mubr.msk.bf16.gmra.mxu0 %vm1131_vm2, %v16560_v9  ;;  %v7143_v41 = vrot.slane %v13978_v10, 1  ;;  %v6446_v48 = vrot.slane %v6444_v14, 1 }
 0x48f   : > { %8109 = vst.msk [vmem:[%s14547_s10 + $0x68] sm:$0xff] %vm8095_vm4, %v7980_v49  ;;  %v7985_v54 = vmax.f32 %v7857_v13, 0.0  ;;  %v7855_v51 = vadd.f32 %v14532_v31, %v7720_v57  ;;  %v7723_v58 = vadd.f32 %v10584_v42, %v7031_v2  ;;  %v7029_v23 = vadd.f32 %v6568_v47, %v16845_v62  ;;  %10685 = vmatprep.mubr.msk.bf16.mxu0 %vm1131_vm2, %v13986_v11  ;;  %v16847_v11 = vld [vmem:[#allocation109_spill] sm:$0xff] }
 0x490   : > { %v10457_v39 = vpop.f32.mrf.mxu1  ;;  %10552 = vmatmul.mubr.msk.bf16.gmra.mxu1 %vm1131_vm2, %v16846_v56  ;;  %v7273_v9 = vpop.f32.mrf.mxu0  ;;  %v7145_v49 = vsel %vm2645_vm3, %v7143_v41, %v7144_v40  ;;  %v6452_v13 = vshll.u32 %v486_v25, 16  ;;  %v6447_v1 = vsel %vm488_vm1, %v6443_v43, %v6446_v48 }
 0x491   : > { %8114 = vst.msk [vmem:[%s14547_s10 + $0x90] sm:$0xff] %vm8095_vm4, %v7985_v54  ;;  %v7983_v38 = vmax.f32 %v7855_v51, 0.0  ;;  %v7858_v60 = vadd.f32 %v14532_v31, %v7723_v58  ;;  %v7721_v28 = vadd.f32 %v7260_v20, %v7029_v23  ;;  %v7034_v44 = vadd.f32 %v10457_v39, %v13975_v37  ;;  %10555 = vmatprep.mubr.msk.bf16.mxu1 %vm1131_vm2, %v16847_v11  ;;  %v16850_v23 = vld [vmem:[#allocation273_spill] sm:$0xff] }
 0x492   : > { %v6581_v5 = vpop.f32.mrf.mxu1  ;;  %v10588_v42 = vpop.f32.mrf.mxu0  ;;  %v6448_v37 = vshrl.u32 %v14003_v24, 16  ;;  %v7146_v24 = vrot.slane %v486_v25, 1  ;;  %v6454_v56 = vrot.slane %v6452_v13, 1 }
 0x493   : > { %8112 = vst.msk [vmem:[%s14547_s10 + $0x80] sm:$0xff] %vm8095_vm4, %v7983_v38  ;;  %v7986_v10 = vmax.f32 %v7858_v60, 0.0  ;;  %v7856_v46 = vadd.f32 %v14532_v31, %v7721_v28  ;;  %v7726_v27 = vadd.f32 %v10587_v52, %v7034_v44  ;;  %v7032_v7 = vadd.f32 %v6581_v5, %v16848_v22 }
 0x494   : > { %v10458_v61 = vpop.f32.mrf.mxu1  ;;  %v7276_v20 = vpop.f32.mrf.mxu0  ;;  %v7147_v28 = vsel %vm2645_vm3, %v7144_v40, %v7146_v24 }
 0x495   : > { %8115 = vst.msk [vmem:[%s14547_s10 + $0x98] sm:$0xff] %vm8095_vm4, %v7986_v10  ;;  %v7984_v57 = vmax.f32 %v7856_v46, 0.0  ;;  %v7861_v63 = vadd.f32 %v14532_v31, %v7726_v27  ;;  %v7724_v2 = vadd.f32 %v7273_v9, %v7032_v7  ;;  %v7035_v47 = vadd.f32 %v10458_v61, %v16849_v18 }
 0x496   : > { %v6584_v53 = vpop.f32.mrf.mxu1  ;;  %v10591_v52 = vpop.f32.mrf.mxu0  ;;  %10686 = vmatmul.mubr.msk.bf16.gmra.mxu0 %vm1131_vm2, %v14012_v21  ;;  %v6450_v21 = vor.u32 %v6448_v37, %v6446_v48 }
 0x497   : > { %8113 = vst.msk [vmem:[%s14547_s10 + $0x88] sm:$0xff] %vm8095_vm4, %v7984_v57  ;;  %v7989_v14 = vmax.f32 %v7861_v63, 0.0  ;;  %v7859_v54 = vadd.f32 %v14532_v31, %v7724_v2  ;;  %v7727_v51 = vadd.f32 %v10588_v42, %v7035_v47  ;;  %v7033_v58 = vadd.f32 %v6584_v53, %v13997_v55  ;;  %10689 = vmatprep.mubr.msk.bf16.mxu0 %vm1131_vm2, %v7145_v49 }
 0x498   : > { %v10461_v62 = vpop.f32.mrf.mxu1  ;;  %10556 = vmatmul.mubr.msk.bf16.gmra.mxu1 %vm1131_vm2, %v16850_v23  ;;  %v7289_v39 = vpop.f32.mrf.mxu0  ;;  %v6455_v10 = vsel %vm488_vm1, %v6450_v21, %v6454_v56 }
 0x499   : > { %8118 = vst.msk [vmem:[%s14547_s10 + $0xb0] sm:$0xff] %vm8095_vm4, %v7989_v14  ;;  %v7987_v9 = vmax.f32 %v7859_v54, 0.0  ;;  %v7862_v41 = vadd.f32 %v14532_v31, %v7727_v51  ;;  %v7725_v25 = vadd.f32 %v7276_v20, %v7033_v58  ;;  %v7038_v38 = vadd.f32 %v10461_v62, %v14005_v8  ;;  %10559 = vmatprep.mubr.msk.bf16.mxu1 %vm1131_vm2, %v6447_v1 }
 0x49a   : > { %v6597_v55 = vpop.f32.mrf.mxu1  ;;  %v10592_v60 = vpop.f32.mrf.mxu0 }
 0x49b   : > { %8116 = vst.msk [vmem:[%s14547_s10 + $0xa0] sm:$0xff] %vm8095_vm4, %v7987_v9  ;;  %v7990_v44 = vmax.f32 %v7862_v41, 0.0  ;;  %v7860_v11 = vadd.f32 %v14532_v31, %v7725_v25  ;;  %v7730_v5 = vadd.f32 %v10591_v52, %v7038_v38  ;;  %v7036_v42 = vadd.f32 %v6597_v55, %v14008_v32 }
 0x49c   : > { %v10462_v43 = vpop.f32.mrf.mxu1  ;;  %v7292_v48 = vpop.f32.mrf.mxu0 }
 0x49d   : > { %8119 = vst.msk [vmem:[%s14547_s10 + $0xb8] sm:$0xff] %vm8095_vm4, %v7990_v44  ;;  %v7988_v8 = vmax.f32 %v7860_v11, 0.0  ;;  %v7865_v46 = vadd.f32 %v14532_v31, %v7730_v5  ;;  %v7728_v40 = vadd.f32 %v7289_v39, %v7036_v42  ;;  %v7039_v27 = vadd.f32 %v10462_v43, %v14016_v3  ;;  %v16851_v5 = vld [vmem:[#allocation201_spill] sm:$0xff] }
 0x49e   : > { %v6600_v22 = vpop.f32.mrf.mxu1  ;;  %v10595_v7 = vpop.f32.mrf.mxu0  ;;  %10690 = vmatmul.mubr.msk.bf16.gmra.mxu0 %vm1131_vm2, %v7147_v28 }
 0x49f   : > { %8117 = vst.msk [vmem:[%s14547_s10 + $0xa8] sm:$0xff] %vm8095_vm4, %v7988_v8  ;;  %v7993_v32 = vmax.f32 %v7865_v46, 0.0  ;;  %v7863_v61 = vadd.f32 %v14532_v31, %v7728_v40  ;;  %v7731_v20 = vadd.f32 %v10592_v60, %v7039_v27  ;;  %v7037_v37 = vadd.f32 %v6600_v22, %v14023_v29  ;;  %v16852_v46 = vld [vmem:[#allocation27_spill] sm:$0xff] }
 0x4a0   : > { %v10465_v49 = vpop.f32.mrf.mxu1  ;;  %10560 = vmatmul.mubr.msk.bf16.gmra.mxu1 %vm1131_vm2, %v6455_v10  ;;  %v7305_v13 = vpop.f32.mrf.mxu0 }
 0x4a1   : > { %8122 = vst.msk [vmem:[%s14547_s10 + $0xd0] sm:$0xff] %vm8095_vm4, %v7993_v32  ;;  %v7991_v3 = vmax.f32 %v7863_v61, 0.0  ;;  %v7866_v57 = vadd.f32 %v14532_v31, %v7731_v20  ;;  %v7729_v63 = vadd.f32 %v7292_v48, %v7037_v37  ;;  %v7042_v2 = vadd.f32 %v10465_v49, %v14028_v33  ;;  %v16853_v20 = vld [vmem:[#allocation12_spill] sm:$0xff] }
 0x4a2   : > { %v6613_v18 = vpop.f32.mrf.mxu1  ;;  %v10596_v47 = vpop.f32.mrf.mxu0 }
 0x4a3   : > { %8120 = vst.msk [vmem:[%s14547_s10 + $0xc0] sm:$0xff] %vm8095_vm4, %v7991_v3  ;;  %v7994_v53 = vmax.f32 %v7866_v57, 0.0  ;;  %v7864_v29 = vadd.f32 %v14532_v31, %v7729_v63  ;;  %v7734_v52 = vadd.f32 %v10595_v7, %v7042_v2  ;;  %v7040_v1 = vadd.f32 %v6613_v18, %v14031_v45  ;;  %v16854_v2 = vld [vmem:[#allocation34_spill] sm:$0xff] }
 0x4a4   : > { %v10466_v24 = vpop.f32.mrf.mxu1  ;;  %v7308_v14 = vpop.f32.mrf.mxu0 }
 0x4a5   : > { %8123 = vst.msk [vmem:[%s14547_s10 + $0xd8] sm:$0xff] %vm8095_vm4, %v7994_v53  ;;  %v7992_v54 = vmax.f32 %v7864_v29, 0.0  ;;  %v7869_v51 = vadd.f32 %v14532_v31, %v7734_v52  ;;  %v7732_v33 = vadd.f32 %v7305_v13, %v7040_v1  ;;  %v7043_v58 = vadd.f32 %v10466_v24, %v14036_v6  ;;  %v16855_v24 = vld [vmem:[#allocation202_spill] sm:$0xff] }
 0x4a6   : > { %v6616_v62 = vpop.f32.mrf.mxu1  ;;  %v10599_v23 = vpop.f32.mrf.mxu0 }
 0x4a7   : > { %8121 = vst.msk [vmem:[%s14547_s10 + $0xc8] sm:$0xff] %vm8095_vm4, %v7992_v54  ;;  %v7997_v39 = vmax.f32 %v7869_v51, 0.0  ;;  %v7867_v21 = vadd.f32 %v14532_v31, %v7732_v33  ;;  %v7735_v45 = vadd.f32 %v10596_v47, %v7043_v58  ;;  %v7041_v56 = vadd.f32 %v6616_v62, %v14043_v36 }
 0x4a8   : > { %v10469_v9 = vpop.f32.mrf.mxu1  ;;  %v7321_v41 = vpop.f32.mrf.mxu0 }
 0x4a9   : > { %8126 = vst.msk [vmem:[%s14547_s10 + $0xf0] sm:$0xff] %vm8095_vm4, %v7997_v39  ;;  %v7995_v25 = vmax.f32 %v7867_v21, 0.0  ;;  %v7870_v38 = vadd.f32 %v14532_v31, %v7735_v45  ;;  %v7733_v6 = vadd.f32 %v7308_v14, %v7041_v56  ;;  %v7046_v55 = vadd.f32 %v10469_v9, %v14048_v16 }
 0x4aa   : > { %v6629_v60 = vpop.f32.mrf.mxu1  ;;  %v10600_v28 = vpop.f32.mrf.mxu0 }
 0x4ab   : > { %8124 = vst.msk [vmem:[%s14547_s10 + $0xe0] sm:$0xff] %vm8095_vm4, %v7995_v25  ;;  %v7998_v44 = vmax.f32 %v7870_v38, 0.0  ;;  %v7868_v11 = vadd.f32 %v14532_v31, %v7733_v6  ;;  %v7738_v36 = vadd.f32 %v10599_v23, %v7046_v55  ;;  %v7044_v42 = vadd.f32 %v6629_v60, %v16851_v5  ;;  %v16856_v23 = vld [vmem:[#allocation205_spill] sm:$0xff]  ;;  %v16857_v25 = vld [vmem:[#allocation208_spill] sm:$0xff] }
 0x4ac   : > { %v10470_v43 = vpop.f32.mrf.mxu1  ;;  %v7324_v48 = vpop.f32.mrf.mxu0 }
 0x4ad   : > { %8127 = vst.msk [vmem:[%s14547_s10 + $0xf8] sm:$0xff] %vm8095_vm4, %v7998_v44  ;;  %v7996_v10 = vmax.f32 %v7868_v11, 0.0  ;;  %v7873_v8 = vadd.f32 %v14532_v31, %v7738_v36  ;;  %v7736_v16 = vadd.f32 %v7321_v41, %v7044_v42  ;;  %v7047_v40 = vadd.f32 %v10470_v43, %v16852_v46  ;;  %v16858_v11 = vld [vmem:[#allocation36_spill] sm:$0xff] }
 0x4ae   : > { %v6632_v27 = vpop.f32.mrf.mxu1  ;;  %v10603_v22 = vpop.f32.mrf.mxu0 }
 0x4af   : > { %8125 = vst.msk [vmem:[%s14547_s10 + $0xe8] sm:$0xff] %vm8095_vm4, %v7996_v10  ;;  %v8001_v7 = vmax.f32 %v7873_v8, 0.0  ;;  %v7871_v32 = vadd.f32 %v14532_v31, %v7736_v16  ;;  %v7739_v61 = vadd.f32 %v10600_v28, %v7047_v40  ;;  %v7045_v37 = vadd.f32 %v6632_v27, %v16853_v20  ;;  %v16859_v8 = vld [vmem:[#allocation20_spill] sm:$0xff] }
 0x4b0   : > { %v10473_v49 = vpop.f32.mrf.mxu1  ;;  %v7337_v13 = vpop.f32.mrf.mxu0 }
 0x4b1   : > { %8130 = vst.msk [vmem:[%s14547_s10 + $0x110] sm:$0xff] %vm8095_vm4, %v8001_v7  ;;  %v7999_v3 = vmax.f32 %v7871_v32, 0.0  ;;  %v7874_v57 = vadd.f32 %v14532_v31, %v7739_v61  ;;  %v7737_v63 = vadd.f32 %v7324_v48, %v7045_v37  ;;  %v7050_v18 = vadd.f32 %v10473_v49, %v16854_v2  ;;  %v16860_v32 = vld [vmem:[#allocation44_spill] sm:$0xff] }
 0x4b2   : > { %v6645_v47 = vpop.f32.mrf.mxu1  ;;  %v10604_v53 = vpop.f32.mrf.mxu0 }
 0x4b3   : > { %8128 = vst.msk [vmem:[%s14547_s10 + $0x100] sm:$0xff] %vm8095_vm4, %v7999_v3  ;;  %v8002_v29 = vmax.f32 %v7874_v57, 0.0  ;;  %v7872_v52 = vadd.f32 %v14532_v31, %v7737_v63  ;;  %v7742_v1 = vadd.f32 %v10603_v22, %v7050_v18  ;;  %v7048_v14 = vadd.f32 %v6645_v47, %v16855_v24  ;;  %v16861_v57 = vld [vmem:[#allocation211_spill] sm:$0xff] }
 0x4b4   : > { %v10474_v54 = vpop.f32.mrf.mxu1  ;;  %v7340_v51 = vpop.f32.mrf.mxu0 }
 0x4b5   : > { %8131 = vst.msk [vmem:[%s14547_s10 + $0x118] sm:$0xff] %vm8095_vm4, %v8002_v29  ;;  %v8000_v33 = vmax.f32 %v7872_v52, 0.0  ;;  %v7877_v58 = vadd.f32 %v14532_v31, %v7742_v1  ;;  %v7740_v62 = vadd.f32 %v7337_v13, %v7048_v14  ;;  %v7051_v39 = vadd.f32 %v10474_v54, %v16856_v23  ;;  %v16862_v52 = vld [vmem:[#allocation214_spill] sm:$0xff] }
 0x4b6   : > { %v6648_v21 = vpop.f32.mrf.mxu1  ;;  %v10607_v45 = vpop.f32.mrf.mxu0 }
 0x4b7   : > { %8129 = vst.msk [vmem:[%s14547_s10 + $0x108] sm:$0xff] %vm8095_vm4, %v8000_v33  ;;  %v8005_v56 = vmax.f32 %v7877_v58, 0.0  ;;  %v7875_v9 = vadd.f32 %v14532_v31, %v7740_v62  ;;  %v7743_v41 = vadd.f32 %v10604_v53, %v7051_v39  ;;  %v7049_v38 = vadd.f32 %v6648_v21, %v16857_v25  ;;  %v16863_v58 = vld [vmem:[#allocation217_spill] sm:$0xff] }
 0x4b8   : > { %v10477_v6 = vpop.f32.mrf.mxu1  ;;  %v7353_v55 = vpop.f32.mrf.mxu0 }
 0x4b9   : > { %8134 = vst.msk [vmem:[%s14547_s10 + $0x130] sm:$0xff] %vm8095_vm4, %v8005_v56  ;;  %v8003_v60 = vmax.f32 %v7875_v9, 0.0  ;;  %v7878_v28 = vadd.f32 %v14532_v31, %v7743_v41  ;;  %v7741_v44 = vadd.f32 %v7340_v51, %v7049_v38  ;;  %v7054_v36 = vadd.f32 %v10477_v6, %v16858_v11  ;;  %v16864_v9 = vld [vmem:[#allocation45_spill] sm:$0xff] }
 0x4ba   : > { %v6661_v5 = vpop.f32.mrf.mxu1  ;;  %v10608_v42 = vpop.f32.mrf.mxu0 }
 0x4bb   : > { %8132 = vst.msk [vmem:[%s14547_s10 + $0x120] sm:$0xff] %vm8095_vm4, %v8003_v60  ;;  %v8006_v43 = vmax.f32 %v7878_v28, 0.0  ;;  %v7876_v48 = vadd.f32 %v14532_v31, %v7741_v44  ;;  %v7746_v10 = vadd.f32 %v10607_v45, %v7054_v36  ;;  %v7052_v16 = vadd.f32 %v6661_v5, %v16859_v8  ;;  %v16865_v28 = vld [vmem:[#allocation29_spill] sm:$0xff] }
 0x4bc   : > { %v10478_v46 = vpop.f32.mrf.mxu1  ;;  %v7356_v40 = vpop.f32.mrf.mxu0 }
 0x4bd   : > { %8135 = vst.msk [vmem:[%s14547_s10 + $0x138] sm:$0xff] %vm8095_vm4, %v8006_v43  ;;  %v8004_v27 = vmax.f32 %v7876_v48, 0.0  ;;  %v7881_v22 = vadd.f32 %v14532_v31, %v7746_v10  ;;  %v7744_v7 = vadd.f32 %v7353_v55, %v7052_v16  ;;  %v7055_v61 = vadd.f32 %v10478_v46, %v16860_v32  ;;  %v16866_v48 = vld [vmem:[#allocation52_spill] sm:$0xff] }
 0x4be   : > { %v6664_v20 = vpop.f32.mrf.mxu1  ;;  %v10611_v37 = vpop.f32.mrf.mxu0 }
 0x4bf   : > { %8133 = vst.msk [vmem:[%s14547_s10 + $0x128] sm:$0xff] %vm8095_vm4, %v8004_v27  ;;  %v8009_v49 = vmax.f32 %v7881_v22, 0.0  ;;  %v7879_v13 = vadd.f32 %v14532_v31, %v7744_v7  ;;  %v7747_v3 = vadd.f32 %v10608_v42, %v7055_v61  ;;  %v7053_v63 = vadd.f32 %v6664_v20, %v16861_v57  ;;  %v16867_v22 = vld [vmem:[#allocation220_spill] sm:$0xff] }
 0x4c0   : > { %v10481_v2 = vpop.f32.mrf.mxu1  ;;  %v7369_v18 = vpop.f32.mrf.mxu0 }
 0x4c1   : > { %8138 = vst.msk [vmem:[%s14547_s10 + $0x150] sm:$0xff] %vm8095_vm4, %v8009_v49  ;;  %v8007_v47 = vmax.f32 %v7879_v13, 0.0  ;;  %v7882_v53 = vadd.f32 %v14532_v31, %v7747_v3  ;;  %v7745_v29 = vadd.f32 %v7356_v40, %v7053_v63  ;;  %v7058_v1 = vadd.f32 %v10481_v2, %v16862_v52  ;;  %v16868_v13 = vld [vmem:[#allocation223_spill] sm:$0xff] }
 0x4c2   : > { %v6677_v24 = vpop.f32.mrf.mxu1  ;;  %v10612_v14 = vpop.f32.mrf.mxu0 }
 0x4c3   : > { %8136 = vst.msk [vmem:[%s14547_s10 + $0x140] sm:$0xff] %vm8095_vm4, %v8007_v47  ;;  %v8010_v54 = vmax.f32 %v7882_v53, 0.0  ;;  %v7880_v51 = vadd.f32 %v14532_v31, %v7745_v29  ;;  %v7750_v33 = vadd.f32 %v10611_v37, %v7058_v1  ;;  %v7056_v62 = vadd.f32 %v6677_v24, %v16863_v58  ;;  %v16869_v53 = vld [vmem:[#allocation226_spill] sm:$0xff] }
 0x4c4   : > { %v10482_v23 = vpop.f32.mrf.mxu1  ;;  %v7372_v39 = vpop.f32.mrf.mxu0 }
 0x4c5   : > { %8139 = vst.msk [vmem:[%s14547_s10 + $0x158] sm:$0xff] %vm8095_vm4, %v8010_v54  ;;  %v8008_v21 = vmax.f32 %v7880_v51, 0.0  ;;  %v7885_v45 = vadd.f32 %v14532_v31, %v7750_v33  ;;  %v7748_v56 = vadd.f32 %v7369_v18, %v7056_v62  ;;  %v7059_v41 = vadd.f32 %v10482_v23, %v16864_v9  ;;  %v16870_v51 = vld [vmem:[#allocation54_spill] sm:$0xff] }
 0x4c6   : > { %v6680_v25 = vpop.f32.mrf.mxu1  ;;  %v10615_v38 = vpop.f32.mrf.mxu0 }
 0x4c7   : > { %8137 = vst.msk [vmem:[%s14547_s10 + $0x148] sm:$0xff] %vm8095_vm4, %v8008_v21  ;;  %v8013_v6 = vmax.f32 %v7885_v45, 0.0  ;;  %v7883_v55 = vadd.f32 %v14532_v31, %v7748_v56  ;;  %v7751_v60 = vadd.f32 %v10612_v14, %v7059_v41  ;;  %v7057_v44 = vadd.f32 %v6680_v25, %v16865_v28  ;;  %v16871_v45 = vld [vmem:[#allocation38_spill] sm:$0xff] }
 0x4c8   : > { %v10485_v11 = vpop.f32.mrf.mxu1  ;;  %v7385_v36 = vpop.f32.mrf.mxu0 }
 0x4c9   : > { %8142 = vst.msk [vmem:[%s14547_s10 + $0x170] sm:$0xff] %vm8095_vm4, %v8013_v6  ;;  %v8011_v5 = vmax.f32 %v7883_v55, 0.0  ;;  %v7886_v42 = vadd.f32 %v14532_v31, %v7751_v60  ;;  %v7749_v43 = vadd.f32 %v7372_v39, %v7057_v44  ;;  %v7062_v10 = vadd.f32 %v10485_v11, %v16866_v48  ;;  %v16872_v55 = vld [vmem:[#allocation62_spill] sm:$0xff] }
 0x4ca   : > { %v6693_v8 = vpop.f32.mrf.mxu1  ;;  %v10616_v16 = vpop.f32.mrf.mxu0 }
 0x4cb   : > { %8140 = vst.msk [vmem:[%s14547_s10 + $0x160] sm:$0xff] %vm8095_vm4, %v8011_v5  ;;  %v8014_v46 = vmax.f32 %v7886_v42, 0.0  ;;  %v7884_v40 = vadd.f32 %v14532_v31, %v7749_v43  ;;  %v7754_v27 = vadd.f32 %v10615_v38, %v7062_v10  ;;  %v7060_v7 = vadd.f32 %v6693_v8, %v16867_v22  ;;  %v16873_v42 = vld [vmem:[#allocation229_spill] sm:$0xff] }
 0x4cc   : > { %v10486_v32 = vpop.f32.mrf.mxu1  ;;  %v7388_v61 = vpop.f32.mrf.mxu0 }
 0x4cd   : > { %8143 = vst.msk [vmem:[%s14547_s10 + $0x178] sm:$0xff] %vm8095_vm4, %v8014_v46  ;;  %v8012_v20 = vmax.f32 %v7884_v40, 0.0  ;;  %v7889_v37 = vadd.f32 %v14532_v31, %v7754_v27  ;;  %v7752_v49 = vadd.f32 %v7385_v36, %v7060_v7  ;;  %v7063_v3 = vadd.f32 %v10486_v32, %v16868_v13  ;;  %v16874_v40 = vld [vmem:[#allocation232_spill] sm:$0xff] }
 0x4ce   : > { %v6696_v57 = vpop.f32.mrf.mxu1  ;;  %v10619_v63 = vpop.f32.mrf.mxu0 }
 0x4cf   : > { %8141 = vst.msk [vmem:[%s14547_s10 + $0x168] sm:$0xff] %vm8095_vm4, %v8012_v20  ;;  %v8017_v2 = vmax.f32 %v7889_v37, 0.0  ;;  %v7887_v18 = vadd.f32 %v14532_v31, %v7752_v49  ;;  %v7755_v47 = vadd.f32 %v10616_v16, %v7063_v3  ;;  %v7061_v29 = vadd.f32 %v6696_v57, %v16869_v53  ;;  %v16875_v37 = vld [vmem:[#allocation235_spill] sm:$0xff] }
 0x4d0   : > { %v10489_v52 = vpop.f32.mrf.mxu1  ;;  %v7401_v1 = vpop.f32.mrf.mxu0 }
 0x4d1   : > { %8146 = vst.msk [vmem:[%s14547_s10 + $0x190] sm:$0xff] %vm8095_vm4, %v8017_v2  ;;  %v8015_v24 = vmax.f32 %v7887_v18, 0.0  ;;  %v7890_v14 = vadd.f32 %v14532_v31, %v7755_v47  ;;  %v7753_v54 = vadd.f32 %v7388_v61, %v7061_v29  ;;  %v7066_v33 = vadd.f32 %v10489_v52, %v16870_v51  ;;  %v16876_v18 = vld [vmem:[#allocation63_spill] sm:$0xff] }
 0x4d2   : > { %v6709_v58 = vpop.f32.mrf.mxu1  ;;  %v10620_v62 = vpop.f32.mrf.mxu0 }
 0x4d3   : > { %8144 = vst.msk [vmem:[%s14547_s10 + $0x180] sm:$0xff] %vm8095_vm4, %v8015_v24  ;;  %v8018_v23 = vmax.f32 %v7890_v14, 0.0  ;;  %v7888_v39 = vadd.f32 %v14532_v31, %v7753_v54  ;;  %v7758_v21 = vadd.f32 %v10619_v63, %v7066_v33  ;;  %v7064_v56 = vadd.f32 %v6709_v58, %v16871_v45  ;;  %v16877_v14 = vld [vmem:[#allocation47_spill] sm:$0xff] }
 0x4d4   : > { %v10490_v9 = vpop.f32.mrf.mxu1  ;;  %v7404_v41 = vpop.f32.mrf.mxu0 }
 0x4d5   : > { %8147 = vst.msk [vmem:[%s14547_s10 + $0x198] sm:$0xff] %vm8095_vm4, %v8018_v23  ;;  %v8016_v25 = vmax.f32 %v7888_v39, 0.0  ;;  %v7893_v38 = vadd.f32 %v14532_v31, %v7758_v21  ;;  %v7756_v6 = vadd.f32 %v7401_v1, %v7064_v56  ;;  %v7067_v60 = vadd.f32 %v10490_v9, %v16872_v55  ;;  %v16878_v39 = vld [vmem:[#allocation70_spill] sm:$0xff] }
 0x4d6   : > { %v6712_v28 = vpop.f32.mrf.mxu1  ;;  %v10623_v44 = vpop.f32.mrf.mxu0 }
 0x4d7   : > { %8145 = vst.msk [vmem:[%s14547_s10 + $0x188] sm:$0xff] %vm8095_vm4, %v8016_v25  ;;  %v8021_v11 = vmax.f32 %v7893_v38, 0.0  ;;  %v7891_v36 = vadd.f32 %v14532_v31, %v7756_v6  ;;  %v7759_v5 = vadd.f32 %v10620_v62, %v7067_v60  ;;  %v7065_v43 = vadd.f32 %v6712_v28, %v16873_v42  ;;  %v16879_v38 = vld [vmem:[#allocation238_spill] sm:$0xff] }
 0x4d8   : > { %v10493_v48 = vpop.f32.mrf.mxu1  ;;  %v7417_v10 = vpop.f32.mrf.mxu0 }
 0x4d9   : > { %8150 = vst.msk [vmem:[%s14547_s10 + $0x1b0] sm:$0xff] %vm8095_vm4, %v8021_v11  ;;  %v8019_v8 = vmax.f32 %v7891_v36, 0.0  ;;  %v7894_v16 = vadd.f32 %v14532_v31, %v7759_v5  ;;  %v7757_v46 = vadd.f32 %v7404_v41, %v7065_v43  ;;  %v7070_v27 = vadd.f32 %v10493_v48, %v16874_v40  ;;  %v16880_v36 = vld [vmem:[#allocation241_spill] sm:$0xff] }
 0x4da   : > { %v6725_v22 = vpop.f32.mrf.mxu1  ;;  %v10624_v7 = vpop.f32.mrf.mxu0 }
 0x4db   : > { %8148 = vst.msk [vmem:[%s14547_s10 + $0x1a0] sm:$0xff] %vm8095_vm4, %v8019_v8  ;;  %v8022_v32 = vmax.f32 %v7894_v16, 0.0  ;;  %v7892_v61 = vadd.f32 %v14532_v31, %v7757_v46  ;;  %v7762_v20 = vadd.f32 %v10623_v44, %v7070_v27  ;;  %v7068_v49 = vadd.f32 %v6725_v22, %v16875_v37  ;;  %v16881_v16 = vld [vmem:[#allocation244_spill] sm:$0xff] }
 0x4dc   : > { %v10494_v13 = vpop.f32.mrf.mxu1  ;;  %v7420_v3 = vpop.f32.mrf.mxu0 }
 0x4dd   : > { %8151 = vst.msk [vmem:[%s14547_s10 + $0x1b8] sm:$0xff] %vm8095_vm4, %v8022_v32  ;;  %v8020_v57 = vmax.f32 %v7892_v61, 0.0  ;;  %v7897_v63 = vadd.f32 %v14532_v31, %v7762_v20  ;;  %v7760_v2 = vadd.f32 %v7417_v10, %v7068_v49  ;;  %v7071_v47 = vadd.f32 %v10494_v13, %v16876_v18  ;;  %v16882_v61 = vld [vmem:[#allocation72_spill] sm:$0xff] }
 0x4de   : > { %v6728_v53 = vpop.f32.mrf.mxu1  ;;  %v10627_v29 = vpop.f32.mrf.mxu0 }
 0x4df   : > { %8149 = vst.msk [vmem:[%s14547_s10 + $0x1a8] sm:$0xff] %vm8095_vm4, %v8020_v57  ;;  %v8025_v52 = vmax.f32 %v7897_v63, 0.0  ;;  %v7895_v1 = vadd.f32 %v14532_v31, %v7760_v2  ;;  %v7763_v24 = vadd.f32 %v10624_v7, %v7071_v47  ;;  %v7069_v54 = vadd.f32 %v6728_v53, %v16877_v14  ;;  %v16883_v63 = vld [vmem:[#allocation56_spill] sm:$0xff] }
 0x4e0   : > { %v10497_v51 = vpop.f32.mrf.mxu1  ;;  %v7433_v33 = vpop.f32.mrf.mxu0 }
 0x4e1   : > { %8154 = vst.msk [vmem:[%s14547_s10 + $0x1d0] sm:$0xff] %vm8095_vm4, %v8025_v52  ;;  %v8023_v58 = vmax.f32 %v7895_v1, 0.0  ;;  %v7898_v62 = vadd.f32 %v14532_v31, %v7763_v24  ;;  %v7761_v23 = vadd.f32 %v7420_v3, %v7069_v54  ;;  %v7074_v21 = vadd.f32 %v10497_v51, %v16878_v39  ;;  %v16884_v1 = vld [vmem:[#allocation80_spill] sm:$0xff] }
 0x4e2   : > { %v6741_v45 = vpop.f32.mrf.mxu1  ;;  %v10628_v56 = vpop.f32.mrf.mxu0 }
 0x4e3   : > { %8152 = vst.msk [vmem:[%s14547_s10 + $0x1c0] sm:$0xff] %vm8095_vm4, %v8023_v58  ;;  %v8026_v9 = vmax.f32 %v7898_v62, 0.0  ;;  %v7896_v41 = vadd.f32 %v14532_v31, %v7761_v23  ;;  %v7766_v25 = vadd.f32 %v10627_v29, %v7074_v21  ;;  %v7072_v6 = vadd.f32 %v6741_v45, %v16879_v38  ;;  %v16885_v62 = vld [vmem:[#allocation247_spill] sm:$0xff] }
 0x4e4   : > { %v10498_v55 = vpop.f32.mrf.mxu1  ;;  %v7436_v60 = vpop.f32.mrf.mxu0 }
 0x4e5   : > { %8155 = vst.msk [vmem:[%s14547_s10 + $0x1d8] sm:$0xff] %vm8095_vm4, %v8026_v9  ;;  %v8024_v28 = vmax.f32 %v7896_v41, 0.0  ;;  %v7901_v44 = vadd.f32 %v14532_v31, %v7766_v25  ;;  %v7764_v11 = vadd.f32 %v7433_v33, %v7072_v6  ;;  %v7075_v5 = vadd.f32 %v10498_v55, %v16880_v36  ;;  %v16886_v25 = vld [vmem:[#allocation261_spill] sm:$0xff] }
 0x4e6   : > { %v6744_v42 = vpop.f32.mrf.mxu1  ;;  %v10631_v43 = vpop.f32.mrf.mxu0 }
 0x4e7   : > { %8153 = vst.msk [vmem:[%s14547_s10 + $0x1c8] sm:$0xff] %vm8095_vm4, %v8024_v28  ;;  %v8029_v48 = vmax.f32 %v7901_v44, 0.0  ;;  %v7899_v10 = vadd.f32 %v14532_v31, %v7764_v11  ;;  %v7767_v8 = vadd.f32 %v10628_v56, %v7075_v5  ;;  %v7073_v46 = vadd.f32 %v6744_v42, %v16881_v16  ;;  %v14863_v56 = vld [vmem:[%s15171_s2] ss:$0 sm:$0xff]  ;;  %v16887_v44 = vld [vmem:[#allocation250_spill] sm:$0xff] }
 0x4e8   : > { %v10501_v40 = vpop.f32.mrf.mxu1  ;;  %v7449_v27 = vpop.f32.mrf.mxu0 }
 0x4e9   : > { %8158 = vst.msk [vmem:[%s14547_s10 + $0x1f0] sm:$0xff] %vm8095_vm4, %v8029_v48  ;;  %v8027_v22 = vmax.f32 %v7899_v10, 0.0  ;;  %v7902_v7 = vadd.f32 %v14532_v31, %v7767_v8  ;;  %v7765_v32 = vadd.f32 %v7436_v60, %v7073_v46  ;;  %v7078_v20 = vadd.f32 %v10501_v40, %v16882_v61  ;;  %v16888_v10 = vld [vmem:[#allocation253_spill] sm:$0xff] }
 0x4ea   : > { %v6757_v37 = vpop.f32.mrf.mxu1  ;;  %v10632_v49 = vpop.f32.mrf.mxu0 }
 0x4eb   : > { %8156 = vst.msk [vmem:[%s14547_s10 + $0x1e0] sm:$0xff] %vm8095_vm4, %v8027_v22  ;;  %v8030_v13 = vmax.f32 %v7902_v7, 0.0  ;;  %v7900_v3 = vadd.f32 %v14532_v31, %v7765_v32  ;;  %v7770_v57 = vadd.f32 %v10631_v43, %v7078_v20  ;;  %v7076_v2 = vadd.f32 %v6757_v37, %v16883_v63  ;;  %v16889_v7 = vld [vmem:[#allocation65_spill] sm:$0xff] }
 0x4ec   : > { %v10502_v18 = vpop.f32.mrf.mxu1  ;;  %v7452_v47 = vpop.f32.mrf.mxu0 }
 0x4ed   : > { %8159 = vst.msk [vmem:[%s14547_s10 + $0x1f8] sm:$0xff] %vm8095_vm4, %v8030_v13  ;;  %v8028_v53 = vmax.f32 %v7900_v3, 0.0  ;;  %v7905_v29 = vadd.f32 %v14532_v31, %v7770_v57  ;;  %v7768_v52 = vadd.f32 %v7449_v27, %v7076_v2  ;;  %v7079_v24 = vadd.f32 %v10502_v18, %v16884_v1  ;;  %v16890_v3 = vld [vmem:[#allocation266_spill] sm:$0xff] }
 0x4ee   : > { %v6760_v14 = vpop.f32.mrf.mxu1  ;;  %v10635_v54 = vpop.f32.mrf.mxu0 }
 0x4ef   : > { %8157 = vst.msk [vmem:[%s14547_s10 + $0x1e8] sm:$0xff] %vm8095_vm4, %v8028_v53  ;;  %v8033_v51 = vmax.f32 %v7905_v29, 0.0  ;;  %v7903_v33 = vadd.f32 %v14532_v31, %v7768_v52  ;;  %v7771_v58 = vadd.f32 %v10632_v49, %v7079_v24  ;;  %v7077_v23 = vadd.f32 %v6760_v14, %v16885_v62  ;;  %v16891_v29 = vld [vmem:[#allocation269_spill] sm:$0xff] }
 0x4f0   : > { %v10505_v39 = vpop.f32.mrf.mxu1  ;;  %v7465_v21 = vpop.f32.mrf.mxu0 }
 0x4f1   : > { %8162 = vst.msk [vmem:[%s14547_s10 + $0x210] sm:$0xff] %vm8095_vm4, %v8033_v51  ;;  %v8031_v45 = vmax.f32 %v7903_v33, 0.0  ;;  %v7906_v9 = vadd.f32 %v14863_v56, %v7771_v58  ;;  %v7769_v41 = vadd.f32 %v7452_v47, %v7077_v23  ;;  %v7082_v38 = vadd.f32 %v10505_v39, %v16886_v25  ;;  %v16892_v33 = vld [vmem:[#allocation256_spill] sm:$0xff] }
 0x4f2   : > { %v6773_v31 = vpop.f32.mrf.mxu1  ;;  %v10636_v6 = vpop.f32.mrf.mxu0 }
 0x4f3   : > { %8160 = vst.msk [vmem:[%s14547_s10 + $0x200] sm:$0xff] %vm8095_vm4, %v8031_v45  ;;  %v8034_v55 = vmax.f32 %v7906_v9, 0.0  ;;  %v7904_v60 = vadd.f32 %v14863_v56, %v7769_v41  ;;  %v7774_v28 = vadd.f32 %v10635_v54, %v7082_v38  ;;  %v7080_v11 = vadd.f32 %v6773_v31, %v16887_v44  ;;  %v16893_v9 = vld [vmem:[#allocation259_spill] sm:$0xff] }
 0x4f4   : > { %v10506_v36 = vpop.f32.mrf.mxu1  ;;  %v7468_v5 = vpop.f32.mrf.mxu0 }
 0x4f5   : > { %8163 = vst.msk [vmem:[%s14547_s10 + $0x218] sm:$0xff] %vm8095_vm4, %v8034_v55  ;;  %v8032_v42 = vmax.f32 %v7904_v60, 0.0  ;;  %v7909_v43 = vadd.f32 %v14863_v56, %v7774_v28  ;;  %v7772_v48 = vadd.f32 %v7465_v21, %v7080_v11  ;;  %v7083_v8 = vadd.f32 %v10506_v36, %v16888_v10  ;;  %v16894_v60 = vld [vmem:[#allocation83_spill] sm:$0xff] }
 0x4f6   : > { %v6776_v16 = vpop.f32.mrf.mxu1  ;;  %v10639_v46 = vpop.f32.mrf.mxu0 }
 0x4f7   : > { %8161 = vst.msk [vmem:[%s14547_s10 + $0x208] sm:$0xff] %vm8095_vm4, %v8032_v42  ;;  %v8037_v40 = vmax.f32 %v7909_v43, 0.0  ;;  %v7907_v27 = vadd.f32 %v14863_v56, %v7772_v48  ;;  %v7775_v22 = vadd.f32 %v10636_v6, %v7083_v8  ;;  %v7081_v32 = vadd.f32 %v6776_v16, %v16889_v7  ;;  %v16895_v43 = vld [vmem:[#allocation88_spill] sm:$0xff] }
 0x4f8   : > { %v10509_v61 = vpop.f32.mrf.mxu1  ;;  %v7481_v20 = vpop.f32.mrf.mxu0 }
 0x4f9   : > { %8166 = vst.msk [vmem:[%s14547_s10 + $0x230] sm:$0xff] %vm8095_vm4, %v8037_v40  ;;  %v8035_v37 = vmax.f32 %v7907_v27, 0.0  ;;  %v7910_v49 = vadd.f32 %v14863_v56, %v7775_v22  ;;  %v7773_v13 = vadd.f32 %v7468_v5, %v7081_v32  ;;  %v7086_v57 = vadd.f32 %v10509_v61, %v16890_v3  ;;  %v16896_v27 = vld [vmem:[#allocation262_spill] sm:$0xff] }
 0x4fa   : > { %v6789_v63 = vpop.f32.mrf.mxu1  ;;  %v10640_v2 = vpop.f32.mrf.mxu0 }
 0x4fb   : > { %8164 = vst.msk [vmem:[%s14547_s10 + $0x220] sm:$0xff] %vm8095_vm4, %v8035_v37  ;;  %v8038_v18 = vmax.f32 %v7910_v49, 0.0  ;;  %v7908_v47 = vadd.f32 %v14863_v56, %v7773_v13  ;;  %v7778_v53 = vadd.f32 %v10639_v46, %v7086_v57  ;;  %v7084_v52 = vadd.f32 %v6789_v63, %v16891_v29  ;;  %v16897_v49 = vld [vmem:[#allocation74_spill] sm:$0xff] }
 0x4fc   : > { %v10510_v1 = vpop.f32.mrf.mxu1  ;;  %v7484_v24 = vpop.f32.mrf.mxu0 }
 0x4fd   : > { %8167 = vst.msk [vmem:[%s14547_s10 + $0x238] sm:$0xff] %vm8095_vm4, %v8038_v18  ;;  %v8036_v14 = vmax.f32 %v7908_v47, 0.0  ;;  %v7913_v54 = vadd.f32 %v14863_v56, %v7778_v53  ;;  %v7776_v51 = vadd.f32 %v7481_v20, %v7084_v52  ;;  %v7087_v58 = vadd.f32 %v10510_v1, %v16892_v33  ;;  %v16898_v47 = vld [vmem:[#allocation92_spill] sm:$0xff] }
 0x4fe   : > { %v6792_v62 = vpop.f32.mrf.mxu1  ;;  %v10643_v23 = vpop.f32.mrf.mxu0 }
 0x4ff   : > { %8165 = vst.msk [vmem:[%s14547_s10 + $0x228] sm:$0xff] %vm8095_vm4, %v8036_v14  ;;  %v8041_v39 = vmax.f32 %v7913_v54, 0.0  ;;  %v7911_v21 = vadd.f32 %v14863_v56, %v7776_v51  ;;  %v7779_v45 = vadd.f32 %v10640_v2, %v7087_v58  ;;  %v7085_v41 = vadd.f32 %v6792_v62, %v16893_v9  ;;  %v16899_v54 = vld [vmem:[#allocation98_spill] sm:$0xff] }
 0x500   : > { %v10513_v25 = vpop.f32.mrf.mxu1  ;;  %v7497_v38 = vpop.f32.mrf.mxu0 }
 0x501   : > { %8170 = vst.msk [vmem:[%s14547_s10 + $0x250] sm:$0xff] %vm8095_vm4, %v8041_v39  ;;  %v8039_v31 = vmax.f32 %v7911_v21, 0.0  ;;  %v7914_v6 = vadd.f32 %v14863_v56, %v7779_v45  ;;  %v7777_v55 = vadd.f32 %v7484_v24, %v7085_v41  ;;  %v7090_v28 = vadd.f32 %v10513_v25, %v16894_v60  ;;  %v16900_v21 = vld [vmem:[#allocation81_spill] sm:$0xff] }
 0x502   : > { %v6805_v44 = vpop.f32.mrf.mxu1  ;;  %v10644_v11 = vpop.f32.mrf.mxu0 }
 0x503   : > { %8168 = vst.msk [vmem:[%s14547_s10 + $0x240] sm:$0xff] %vm8095_vm4, %v8039_v31  ;;  %v8042_v36 = vmax.f32 %v7914_v6, 0.0  ;;  %v7912_v5 = vadd.f32 %v14863_v56, %v7777_v55  ;;  %v7782_v42 = vadd.f32 %v10643_v23, %v7090_v28  ;;  %v7088_v48 = vadd.f32 %v6805_v44, %v16895_v43  ;;  %v16901_v6 = vld [vmem:[#allocation117_spill] sm:$0xff] }
 0x504   : > { %v10514_v10 = vpop.f32.mrf.mxu1  ;;  %v7500_v8 = vpop.f32.mrf.mxu0 }
 0x505   : > { %8171 = vst.msk [vmem:[%s14547_s10 + $0x258] sm:$0xff] %vm8095_vm4, %v8042_v36  ;;  %v8040_v16 = vmax.f32 %v7912_v5, 0.0  ;;  %v7917_v46 = vadd.f32 %v14863_v56, %v7782_v42  ;;  %v7780_v40 = vadd.f32 %v7497_v38, %v7088_v48  ;;  %v7091_v22 = vadd.f32 %v10514_v10, %v16896_v27  ;;  %v16902_v5 = vld [vmem:[#allocation267_spill] sm:$0xff] }
 0x506   : > { %v6808_v7 = vpop.f32.mrf.mxu1  ;;  %v10647_v32 = vpop.f32.mrf.mxu0 }
 0x507   : > { %8169 = vst.msk [vmem:[%s14547_s10 + $0x248] sm:$0xff] %vm8095_vm4, %v8040_v16  ;;  %v8045_v61 = vmax.f32 %v7917_v46, 0.0  ;;  %v7915_v20 = vadd.f32 %v14863_v56, %v7780_v40  ;;  %v7783_v37 = vadd.f32 %v10644_v11, %v7091_v22  ;;  %v7089_v13 = vadd.f32 %v6808_v7, %v16897_v49  ;;  %v16903_v46 = vld [vmem:[#allocation107_spill] sm:$0xff] }
 0x508   : > { %v10517_v3 = vpop.f32.mrf.mxu1  ;;  %v7513_v57 = vpop.f32.mrf.mxu0 }
 0x509   : > { %8174 = vst.msk [vmem:[%s14547_s10 + $0x270] sm:$0xff] %vm8095_vm4, %v8045_v61  ;;  %v8043_v63 = vmax.f32 %v7915_v20, 0.0  ;;  %v7918_v2 = vadd.f32 %v14863_v56, %v7783_v37  ;;  %v7781_v18 = vadd.f32 %v7500_v8, %v7089_v13  ;;  %v7094_v53 = vadd.f32 %v10517_v3, %v16898_v47  ;;  %v16904_v20 = vld [vmem:[#allocation270_spill] sm:$0xff] }
 0x50a   : > { %v6821_v29 = vpop.f32.mrf.mxu1  ;;  %v10648_v52 = vpop.f32.mrf.mxu0 }
 0x50b   : > { %8172 = vst.msk [vmem:[%s14547_s10 + $0x260] sm:$0xff] %vm8095_vm4, %v8043_v63  ;;  %v8046_v1 = vmax.f32 %v7918_v2, 0.0  ;;  %v7916_v24 = vadd.f32 %v14863_v56, %v7781_v18  ;;  %v7786_v14 = vadd.f32 %v10647_v32, %v7094_v53  ;;  %v7092_v51 = vadd.f32 %v6821_v29, %v16899_v54  ;;  %v16905_v2 = vld [vmem:[#allocation90_spill] sm:$0xff] }
 0x50c   : > { %v10518_v33 = vpop.f32.mrf.mxu1  ;;  %v7516_v58 = vpop.f32.mrf.mxu0 }
 0x50d   : > { %8175 = vst.msk [vmem:[%s14547_s10 + $0x278] sm:$0xff] %vm8095_vm4, %v8046_v1  ;;  %v8044_v62 = vmax.f32 %v7916_v24, 0.0  ;;  %v7921_v23 = vadd.f32 %v14863_v56, %v7786_v14  ;;  %v7784_v39 = vadd.f32 %v7513_v57, %v7092_v51  ;;  %v7095_v45 = vadd.f32 %v10518_v33, %v16900_v21  ;;  %v16906_v24 = vld [vmem:[#allocation271_spill] sm:$0xff] }
 0x50e   : > { %v6824_v9 = vpop.f32.mrf.mxu1  ;;  %v10651_v41 = vpop.f32.mrf.mxu0 }
 0x50f   : > { %8173 = vst.msk [vmem:[%s14547_s10 + $0x268] sm:$0xff] %vm8095_vm4, %v8044_v62  ;;  %v8049_v25 = vmax.f32 %v7921_v23, 0.0  ;;  %v7919_v38 = vadd.f32 %v14863_v56, %v7784_v39  ;;  %v7787_v31 = vadd.f32 %v10648_v52, %v7095_v45  ;;  %v7093_v55 = vadd.f32 %v6824_v9, %v16901_v6  ;;  %v16907_v23 = vld [vmem:[#allocation112_spill] sm:$0xff] }
 0x510   : > { %v10521_v60 = vpop.f32.mrf.mxu1  ;;  %v7529_v28 = vpop.f32.mrf.mxu0 }
 0x511   : > { %8178 = vst.msk [vmem:[%s14547_s10 + $0x290] sm:$0xff] %vm8095_vm4, %v8049_v25  ;;  %v8047_v44 = vmax.f32 %v7919_v38, 0.0  ;;  %v7922_v11 = vadd.f32 %v14863_v56, %v7787_v31  ;;  %v7785_v36 = vadd.f32 %v7516_v58, %v7093_v55  ;;  %v7098_v42 = vadd.f32 %v10521_v60, %v16902_v5  ;;  %v16908_v38 = vld [vmem:[#allocation118_spill] sm:$0xff] }
 0x512   : > { %v6837_v43 = vpop.f32.mrf.mxu1  ;;  %v10652_v48 = vpop.f32.mrf.mxu0 }
 0x513   : > { %8176 = vst.msk [vmem:[%s14547_s10 + $0x280] sm:$0xff] %vm8095_vm4, %v8047_v44  ;;  %v8050_v10 = vmax.f32 %v7922_v11, 0.0  ;;  %v7920_v8 = vadd.f32 %v14863_v56, %v7785_v36  ;;  %v7790_v16 = vadd.f32 %v10651_v41, %v7098_v42  ;;  %v7096_v40 = vadd.f32 %v6837_v43, %v16903_v46  ;;  %v16909_v11 = vld [vmem:[#allocation99_spill] sm:$0xff] }
 0x514   : > { %v10522_v27 = vpop.f32.mrf.mxu1  ;;  %v7532_v22 = vpop.f32.mrf.mxu0 }
 0x515   : > { %8179 = vst.msk [vmem:[%s14547_s10 + $0x298] sm:$0xff] %vm8095_vm4, %v8050_v10  ;;  %v8048_v7 = vmax.f32 %v7920_v8, 0.0  ;;  %v7925_v32 = vadd.f32 %v14863_v56, %v7790_v16  ;;  %v7788_v61 = vadd.f32 %v7529_v28, %v7096_v40  ;;  %v7099_v37 = vadd.f32 %v10522_v27, %v16904_v20  ;;  %v16910_v8 = vld [vmem:[#allocation121_spill] sm:$0xff] }
 0x516   : > { %v6840_v49 = vpop.f32.mrf.mxu1  ;;  %v10655_v13 = vpop.f32.mrf.mxu0 }
 0x517   : > { %8177 = vst.msk [vmem:[%s14547_s10 + $0x288] sm:$0xff] %vm8095_vm4, %v8048_v7  ;;  %v8053_v3 = vmax.f32 %v7925_v32, 0.0  ;;  %v7923_v57 = vadd.f32 %v14863_v56, %v7788_v61  ;;  %v7791_v63 = vadd.f32 %v10652_v48, %v7099_v37  ;;  %v7097_v18 = vadd.f32 %v6840_v49, %v16905_v2  ;;  %v16911_v32 = vld [vmem:[#allocation126_spill] sm:$0xff] }
 0x518   : > { %v10525_v47 = vpop.f32.mrf.mxu1  ;;  %v7545_v53 = vpop.f32.mrf.mxu0 }
 0x519   : > { %8182 = vst.msk [vmem:[%s14547_s10 + $0x2b0] sm:$0xff] %vm8095_vm4, %v8053_v3  ;;  %v8051_v29 = vmax.f32 %v7923_v57, 0.0  ;;  %v7926_v52 = vadd.f32 %v14863_v56, %v7791_v63  ;;  %v7789_v1 = vadd.f32 %v7532_v22, %v7097_v18  ;;  %v7102_v14 = vadd.f32 %v10525_v47, %v16906_v24  ;;  %v16912_v57 = vld [vmem:[#allocation272_spill] sm:$0xff] }
 0x51a   : > { %v6853_v54 = vpop.f32.mrf.mxu1  ;;  %v10656_v51 = vpop.f32.mrf.mxu0 }
 0x51b   : > { %8180 = vst.msk [vmem:[%s14547_s10 + $0x2a0] sm:$0xff] %vm8095_vm4, %v8051_v29  ;;  %v8054_v33 = vmax.f32 %v7926_v52, 0.0  ;;  %v7924_v58 = vadd.f32 %v14863_v56, %v7789_v1  ;;  %v7794_v62 = vadd.f32 %v10655_v13, %v7102_v14  ;;  %v7100_v39 = vadd.f32 %v6853_v54, %v16907_v23  ;;  %v16913_v52 = vld [vmem:[#allocation129_spill] sm:$0xff] }
 0x51c   : > { %v10526_v21 = vpop.f32.mrf.mxu1  ;;  %v7548_v45 = vpop.f32.mrf.mxu0 }
 0x51d   : > { %8183 = vst.msk [vmem:[%s14547_s10 + $0x2b8] sm:$0xff] %vm8095_vm4, %v8054_v33  ;;  %v8052_v9 = vmax.f32 %v7924_v58, 0.0  ;;  %v7929_v41 = vadd.f32 %v14863_v56, %v7794_v62  ;;  %v7792_v25 = vadd.f32 %v7545_v53, %v7100_v39  ;;  %v7103_v31 = vadd.f32 %v10526_v21, %v16908_v38  ;;  %v16914_v58 = vld [vmem:[#allocation275_spill] sm:$0xff] }
 0x51e   : > { %v6856_v6 = vpop.f32.mrf.mxu1  ;;  %v10659_v55 = vpop.f32.mrf.mxu0 }
 0x51f   : > { %8181 = vst.msk [vmem:[%s14547_s10 + $0x2a8] sm:$0xff] %vm8095_vm4, %v8052_v9  ;;  %v8057_v60 = vmax.f32 %v7929_v41, 0.0  ;;  %v7927_v28 = vadd.f32 %v14863_v56, %v7792_v25  ;;  %v7795_v44 = vadd.f32 %v10656_v51, %v7103_v31  ;;  %v7101_v36 = vadd.f32 %v6856_v6, %v16909_v11  ;;  %v16915_v41 = vld [vmem:[#allocation276_spill] sm:$0xff] }
 0x520   : > { %v10529_v5 = vpop.f32.mrf.mxu1  ;;  %v7561_v42 = vpop.f32.mrf.mxu0 }
 0x521   : > { %8186 = vst.msk [vmem:[%s14547_s10 + $0x2d0] sm:$0xff] %vm8095_vm4, %v8057_v60  ;;  %v8055_v43 = vmax.f32 %v7927_v28, 0.0  ;;  %v7930_v48 = vadd.f32 %v14863_v56, %v7795_v44  ;;  %v7793_v10 = vadd.f32 %v7548_v45, %v7101_v36  ;;  %v7106_v16 = vadd.f32 %v10529_v5, %v16910_v8  ;;  %v16916_v28 = vld [vmem:[#allocation22_spill] sm:$0xff] }
 0x522   : > { %v6869_v46 = vpop.f32.mrf.mxu1  ;;  %v10660_v40 = vpop.f32.mrf.mxu0 }
 0x523   : > { %8184 = vst.msk [vmem:[%s14547_s10 + $0x2c0] sm:$0xff] %vm8095_vm4, %v8055_v43  ;;  %v8058_v27 = vmax.f32 %v7930_v48, 0.0  ;;  %v7928_v22 = vadd.f32 %v14863_v56, %v7793_v10  ;;  %v7798_v7 = vadd.f32 %v10659_v55, %v7106_v16  ;;  %v7104_v61 = vadd.f32 %v6869_v46, %v16911_v32  ;;  %v16917_v48 = vld [vmem:[#allocation26_spill] sm:$0xff] }
 0x524   : > { %v10530_v20 = vpop.f32.mrf.mxu1  ;;  %v7564_v37 = vpop.f32.mrf.mxu0 }
 0x525   : > { %8187 = vst.msk [vmem:[%s14547_s10 + $0x2d8] sm:$0xff] %vm8095_vm4, %v8058_v27  ;;  %v8056_v49 = vmax.f32 %v7928_v22, 0.0  ;;  %v7933_v13 = vadd.f32 %v14863_v56, %v7798_v7  ;;  %v7796_v3 = vadd.f32 %v7561_v42, %v7104_v61  ;;  %v7107_v63 = vadd.f32 %v10530_v20, %v16912_v57  ;;  %v16918_v22 = vld [vmem:[#allocation31_spill] sm:$0xff] }
 0x526   : > { %v6872_v2 = vpop.f32.mrf.mxu1  ;;  %v10663_v18 = vpop.f32.mrf.mxu0 }
 0x527   : > { %8185 = vst.msk [vmem:[%s14547_s10 + $0x2c8] sm:$0xff] %vm8095_vm4, %v8056_v49  ;;  %v8061_v47 = vmax.f32 %v7933_v13, 0.0  ;;  %v7931_v53 = vadd.f32 %v14863_v56, %v7796_v3  ;;  %v7799_v29 = vadd.f32 %v10660_v40, %v7107_v63  ;;  %v7105_v1 = vadd.f32 %v6872_v2, %v16913_v52  ;;  %v16919_v13 = vld [vmem:[#allocation274_spill] sm:$0xff] }
 0x528   : > { %v10533_v24 = vpop.f32.mrf.mxu1  ;;  %v7577_v14 = vpop.f32.mrf.mxu0 }
 0x529   : > { %8190 = vst.msk [vmem:[%s14547_s10 + $0x2f0] sm:$0xff] %vm8095_vm4, %v8061_v47  ;;  %v8059_v54 = vmax.f32 %v7931_v53, 0.0  ;;  %v7934_v51 = vadd.f32 %v14863_v56, %v7799_v29  ;;  %v7797_v33 = vadd.f32 %v7564_v37, %v7105_v1  ;;  %v7110_v62 = vadd.f32 %v10533_v24, %v16914_v58  ;;  %v16920_v53 = vld [vmem:[#allocation142_spill] sm:$0xff] }
 0x52a   : > { %v6885_v23 = vpop.f32.mrf.mxu1  ;;  %v10664_v39 = vpop.f32.mrf.mxu0 }
 0x52b   : > { %8188 = vst.msk [vmem:[%s14547_s10 + $0x2e0] sm:$0xff] %vm8095_vm4, %v8059_v54  ;;  %v8062_v21 = vmax.f32 %v7934_v51, 0.0  ;;  %v7932_v45 = vadd.f32 %v14863_v56, %v7797_v33  ;;  %v7802_v9 = vadd.f32 %v10663_v18, %v7110_v62  ;;  %v7108_v25 = vadd.f32 %v6885_v23, %v16915_v41  ;;  %v16921_v51 = vld [vmem:[#allocation147_spill] sm:$0xff] }
 0x52c   : > { %v10534_v38 = vpop.f32.mrf.mxu1  ;;  %v7580_v31 = vpop.f32.mrf.mxu0 }
 0x52d   : > { %8191 = vst.msk [vmem:[%s14547_s10 + $0x2f8] sm:$0xff] %vm8095_vm4, %v8062_v21  ;;  %v8060_v6 = vmax.f32 %v7932_v45, 0.0  ;;  %v7937_v55 = vadd.f32 %v14863_v56, %v7802_v9  ;;  %v7800_v60 = vadd.f32 %v7577_v14, %v7108_v25  ;;  %v7111_v44 = vadd.f32 %v10534_v38, %v16916_v28  ;;  %v16922_v45 = vld [vmem:[#allocation143_spill] sm:$0xff] }
 0x52e   : > { %v6888_v11 = vpop.f32.mrf.mxu1  ;;  %v10667_v36 = vpop.f32.mrf.mxu0 }
 0x52f   : > { %8189 = vst.msk [vmem:[%s14547_s10 + $0x2e8] sm:$0xff] %vm8095_vm4, %v8060_v6  ;;  %v8065_v5 = vmax.f32 %v7937_v55, 0.0  ;;  %v7935_v42 = vadd.f32 %v14863_v56, %v7800_v60  ;;  %v7803_v43 = vadd.f32 %v10664_v39, %v7111_v44  ;;  %v7109_v10 = vadd.f32 %v6888_v11, %v16917_v48  ;;  %v16923_v55 = vld [vmem:[#allocation148_spill] sm:$0xff] }
 0x530   : > { %v10537_v8 = vpop.f32.mrf.mxu1  ;;  %v7593_v16 = vpop.f32.mrf.mxu0 }
 0x531   : > { %8194 = vst.msk [vmem:[%s14547_s10 + $0x310] sm:$0xff] %vm8095_vm4, %v8065_v5  ;;  %v8063_v46 = vmax.f32 %v7935_v42, 0.0  ;;  %v7938_v40 = vadd.f32 %v14863_v56, %v7803_v43  ;;  %v7801_v27 = vadd.f32 %v7580_v31, %v7109_v10  ;;  %v7114_v7 = vadd.f32 %v10537_v8, %v16918_v22  ;;  %v16924_v42 = vld [vmem:[#allocation33_spill] sm:$0xff] }
 0x532   : > { %v6901_v32 = vpop.f32.mrf.mxu1  ;;  %v10668_v61 = vpop.f32.mrf.mxu0 }
 0x533   : > { %8192 = vst.msk [vmem:[%s14547_s10 + $0x300] sm:$0xff] %vm8095_vm4, %v8063_v46  ;;  %v8066_v20 = vmax.f32 %v7938_v40, 0.0  ;;  %v7936_v37 = vadd.f32 %v14863_v56, %v7801_v27  ;;  %v7806_v49 = vadd.f32 %v10667_v36, %v7114_v7  ;;  %v7112_v3 = vadd.f32 %v6901_v32, %v16919_v13  ;;  %v16925_v40 = vld [vmem:[#allocation144_spill] sm:$0xff] }
 0x534   : > { %v10538_v57 = vpop.f32.mrf.mxu1  ;;  %v7596_v63 = vpop.f32.mrf.mxu0 }
 0x535   : > { %8195 = vst.msk [vmem:[%s14547_s10 + $0x318] sm:$0xff] %vm8095_vm4, %v8066_v20  ;;  %v8064_v2 = vmax.f32 %v7936_v37, 0.0  ;;  %v7941_v18 = vadd.f32 %v14863_v56, %v7806_v49  ;;  %v7804_v47 = vadd.f32 %v7593_v16, %v7112_v3  ;;  %v7115_v29 = vadd.f32 %v10538_v57, %v16920_v53  ;;  %v16926_v37 = vld [vmem:[#allocation40_spill] sm:$0xff] }
 0x536   : > { %v6904_v52 = vpop.f32.mrf.mxu1  ;;  %v10671_v1 = vpop.f32.mrf.mxu0 }
 0x537   : > { %8193 = vst.msk [vmem:[%s14547_s10 + $0x308] sm:$0xff] %vm8095_vm4, %v8064_v2  ;;  %v8069_v24 = vmax.f32 %v7941_v18, 0.0  ;;  %v7939_v14 = vadd.f32 %v14863_v56, %v7804_v47  ;;  %v7807_v54 = vadd.f32 %v10668_v61, %v7115_v29  ;;  %v7113_v33 = vadd.f32 %v6904_v52, %v16921_v51  ;;  %v16927_v18 = vld [vmem:[#allocation13_spill] sm:$0xff] }
 0x538   : > { %v10541_v58 = vpop.f32.mrf.mxu1  ;;  %v7609_v62 = vpop.f32.mrf.mxu0 }
 0x539   : > { %8198 = vst.msk [vmem:[%s14547_s10 + $0x330] sm:$0xff] %vm8095_vm4, %v8069_v24  ;;  %v8067_v23 = vmax.f32 %v7939_v14, 0.0  ;;  %v7942_v39 = vadd.f32 %v14863_v56, %v7807_v54  ;;  %v7805_v21 = vadd.f32 %v7596_v63, %v7113_v33  ;;  %v7118_v9 = vadd.f32 %v10541_v58, %v16922_v45  ;;  %v16928_v14 = vld [vmem:[#allocation16_spill] sm:$0xff] }
 0x53a   : > { %v6917_v41 = vpop.f32.mrf.mxu1  ;;  %v10672_v25 = vpop.f32.mrf.mxu0 }
 0x53b   : > { %8196 = vst.msk [vmem:[%s14547_s10 + $0x320] sm:$0xff] %vm8095_vm4, %v8067_v23  ;;  %v8070_v38 = vmax.f32 %v7942_v39, 0.0  ;;  %v7940_v31 = vadd.f32 %v14863_v56, %v7805_v21  ;;  %v7810_v6 = vadd.f32 %v10671_v1, %v7118_v9  ;;  %v7116_v60 = vadd.f32 %v6917_v41, %v16923_v55 }
 0x53c   : > { %v10542_v28 = vpop.f32.mrf.mxu1  ;;  %v7612_v44 = vpop.f32.mrf.mxu0 }
 0x53d   : > { %8199 = vst.msk [vmem:[%s14547_s10 + $0x338] sm:$0xff] %vm8095_vm4, %v8070_v38  ;;  %v8068_v11 = vmax.f32 %v7940_v31, 0.0  ;;  %v7945_v36 = vadd.f32 %v14863_v56, %v7810_v6  ;;  %v7808_v5 = vadd.f32 %v7609_v62, %v7116_v60  ;;  %v7119_v43 = vadd.f32 %v10542_v28, %v16924_v42  ;;  %v16929_v38 = vld [vmem:[#allocation149_spill] sm:$0xff] }
 0x53e   : > { %v6920_v48 = vpop.f32.mrf.mxu1  ;;  %v10675_v10 = vpop.f32.mrf.mxu0 }
 0x53f   : > { %8197 = vst.msk [vmem:[%s14547_s10 + $0x328] sm:$0xff] %vm8095_vm4, %v8068_v11  ;;  %v8073_v8 = vmax.f32 %v7945_v36, 0.0  ;;  %v7943_v16 = vadd.f32 %v14863_v56, %v7808_v5  ;;  %v7811_v46 = vadd.f32 %v10672_v25, %v7119_v43  ;;  %v7117_v27 = vadd.f32 %v6920_v48, %v16925_v40 }
 0x540   : > { %v10545_v22 = vpop.f32.mrf.mxu1  ;;  %v7625_v7 = vpop.f32.mrf.mxu0 }
 0x541   : > { %8202 = vst.msk [vmem:[%s14547_s10 + $0x350] sm:$0xff] %vm8095_vm4, %v8073_v8  ;;  %v8071_v32 = vmax.f32 %v7943_v16, 0.0  ;;  %v7946_v61 = vadd.f32 %v14863_v56, %v7811_v46  ;;  %v7809_v20 = vadd.f32 %v7612_v44, %v7117_v27  ;;  %v7122_v49 = vadd.f32 %v10545_v22, %v16926_v37  ;;  %v16930_v44 = vld [vmem:[#allocation23_spill] sm:$0xff] }
 0x542   : > { %v6933_v13 = vpop.f32.mrf.mxu1  ;;  %v10676_v3 = vpop.f32.mrf.mxu0 }
 0x543   : > { %8200 = vst.msk [vmem:[%s14547_s10 + $0x340] sm:$0xff] %vm8095_vm4, %v8071_v32  ;;  %v8074_v57 = vmax.f32 %v7946_v61, 0.0  ;;  %v7944_v63 = vadd.f32 %v14863_v56, %v7809_v20  ;;  %v7814_v2 = vadd.f32 %v10675_v10, %v7122_v49  ;;  %v7120_v47 = vadd.f32 %v6933_v13, %v16927_v18  ;;  %v16931_v10 = vld [vmem:[#allocation150_spill] sm:$0xff] }
 0x544   : > { %v10546_v53 = vpop.f32.mrf.mxu1  ;;  %v7628_v29 = vpop.f32.mrf.mxu0 }
 0x545   : > { %8203 = vst.msk [vmem:[%s14547_s10 + $0x358] sm:$0xff] %vm8095_vm4, %v8074_v57  ;;  %v8072_v52 = vmax.f32 %v7944_v63, 0.0  ;;  %v7949_v1 = vadd.f32 %v14863_v56, %v7814_v2  ;;  %v7812_v24 = vadd.f32 %v7625_v7, %v7120_v47  ;;  %v7123_v54 = vadd.f32 %v10546_v53, %v16928_v14 }
 0x546   : > { %v6936_v51 = vpop.f32.mrf.mxu1  ;;  %v10679_v33 = vpop.f32.mrf.mxu0 }
 0x547   : > { %8201 = vst.msk [vmem:[%s14547_s10 + $0x348] sm:$0xff] %vm8095_vm4, %v8072_v52  ;;  %v8077_v58 = vmax.f32 %v7949_v1, 0.0  ;;  %v7947_v62 = vadd.f32 %v14863_v56, %v7812_v24  ;;  %v7815_v23 = vadd.f32 %v10676_v3, %v7123_v54  ;;  %v7121_v39 = vadd.f32 %v6936_v51, %v14443_v30 }
 0x548   : > { %v10549_v21 = vpop.f32.mrf.mxu1  ;;  %v7641_v45 = vpop.f32.mrf.mxu0 }
 0x549   : > { %8206 = vst.msk [vmem:[%s14547_s10 + $0x370] sm:$0xff] %vm8095_vm4, %v8077_v58  ;;  %v8075_v9 = vmax.f32 %v7947_v62, 0.0  ;;  %v7950_v41 = vadd.f32 %v14863_v56, %v7815_v23  ;;  %v7813_v25 = vadd.f32 %v7628_v29, %v7121_v39  ;;  %v7126_v31 = vadd.f32 %v10549_v21, %v16929_v38 }
 0x54a   : > { %v6949_v6 = vpop.f32.mrf.mxu1  ;;  %v10680_v55 = vpop.f32.mrf.mxu0 }
 0x54b   : > { %8204 = vst.msk [vmem:[%s14547_s10 + $0x360] sm:$0xff] %vm8095_vm4, %v8075_v9  ;;  %v8078_v60 = vmax.f32 %v7950_v41, 0.0  ;;  %v7948_v28 = vadd.f32 %v14863_v56, %v7813_v25  ;;  %v7818_v30 = vadd.f32 %v10679_v33, %v7126_v31  ;;  %v7124_v11 = vadd.f32 %v6949_v6, %v16930_v44 }
 0x54c   : > { %v10550_v36 = vpop.f32.mrf.mxu1  ;;  %v7644_v5 = vpop.f32.mrf.mxu0 }
 0x54d   : > { %8207 = vst.msk [vmem:[%s14547_s10 + $0x378] sm:$0xff] %vm8095_vm4, %v8078_v60  ;;  %v8076_v42 = vmax.f32 %v7948_v28, 0.0  ;;  %v7953_v43 = vadd.f32 %v14863_v56, %v7818_v30  ;;  %v7816_v48 = vadd.f32 %v7641_v45, %v7124_v11  ;;  %v7127_v8 = vadd.f32 %v10550_v36, %v16931_v10 }
 0x54e   : > { %v6952_v16 = vpop.f32.mrf.mxu1  ;;  %v10683_v46 = vpop.f32.mrf.mxu0 }
 0x54f   : > { %8205 = vst.msk [vmem:[%s14547_s10 + $0x368] sm:$0xff] %vm8095_vm4, %v8076_v42  ;;  %v8081_v40 = vmax.f32 %v7953_v43, 0.0  ;;  %v7951_v27 = vadd.f32 %v14863_v56, %v7816_v48  ;;  %v7819_v22 = vadd.f32 %v10680_v55, %v7127_v8  ;;  %v7125_v7 = vadd.f32 %v6952_v16, %v14463_v12 }
 0x550   : > { %v10553_v32 = vpop.f32.mrf.mxu1  ;;  %v7657_v61 = vpop.f32.mrf.mxu0 }
 0x551   : > { %8210 = vst.msk [vmem:[%s14547_s10 + $0x390] sm:$0xff] %vm8095_vm4, %v8081_v40  ;;  %v8079_v20 = vmax.f32 %v7951_v27, 0.0  ;;  %v7954_v37 = vadd.f32 %v14863_v56, %v7819_v22  ;;  %v7817_v49 = vadd.f32 %v7644_v5, %v7125_v7  ;;  %v7130_v13 = vadd.f32 %v10553_v32, %v14468_v35 }
 0x552   : > { %v6965_v3 = vpop.f32.mrf.mxu1  ;;  %v10684_v57 = vpop.f32.mrf.mxu0 }
 0x553   : > { %8208 = vst.msk [vmem:[%s14547_s10 + $0x380] sm:$0xff] %vm8095_vm4, %v8079_v20  ;;  %v8082_v63 = vmax.f32 %v7954_v37, 0.0  ;;  %v7952_v2 = vadd.f32 %v14863_v56, %v7817_v49  ;;  %v7822_v12 = vadd.f32 %v10683_v46, %v7130_v13  ;;  %v7128_v18 = vadd.f32 %v6965_v3, %v14471_v59  ;;  %v16932_v20 = vld [vmem:[#allocation43_spill] sm:$0xff] }
 0x554   : > { %v10554_v47 = vpop.f32.mrf.mxu1  ;;  %v7660_v53 = vpop.f32.mrf.mxu0 }
 0x555   : > { %8211 = vst.msk [vmem:[%s14547_s10 + $0x398] sm:$0xff] %vm8095_vm4, %v8082_v63  ;;  %v8080_v29 = vmax.f32 %v7952_v2, 0.0  ;;  %v7957_v52 = vadd.f32 %v14863_v56, %v7822_v12  ;;  %v7820_v35 = vadd.f32 %v7657_v61, %v7128_v18  ;;  %v7131_v1 = vadd.f32 %v10554_v47, %v14476_v15 }
 0x556   : > { %v6968_v24 = vpop.f32.mrf.mxu1  ;;  %v10687_v14 = vpop.f32.mrf.mxu0 }
 0x557   : > { %8209 = vst.msk [vmem:[%s14547_s10 + $0x388] sm:$0xff] %vm8095_vm4, %v8080_v29  ;;  %v8085_v54 = vmax.f32 %v7957_v52, 0.0  ;;  %v7955_v51 = vadd.f32 %v14863_v56, %v7820_v35  ;;  %v7823_v59 = vadd.f32 %v10684_v57, %v7131_v1  ;;  %v7129_v33 = vadd.f32 %v6968_v24, %v14483_v0  ;;  %v16933_v57 = vld [vmem:[#allocation203_spill] sm:$0xff] }
 0x558   : > { %v10557_v58 = vpop.f32.mrf.mxu1  ;;  %v7673_v62 = vpop.f32.mrf.mxu0 }
 0x559   : > { %8214 = vst.msk [vmem:[%s14547_s10 + $0x3b0] sm:$0xff] %vm8095_vm4, %v8085_v54  ;;  %v8083_v23 = vmax.f32 %v7955_v51, 0.0  ;;  %v7958_v39 = vadd.f32 %v14863_v56, %v7823_v59  ;;  %v7821_v15 = vadd.f32 %v7660_v53, %v7129_v33  ;;  %v7134_v21 = vadd.f32 %v10557_v58, %v14488_v4 }
 0x55a   : > { %v6981_v45 = vpop.f32.mrf.mxu1  ;;  %v10688_v9 = vpop.f32.mrf.mxu0 }
 0x55b   : > { %8212 = vst.msk [vmem:[%s14547_s10 + $0x3a0] sm:$0xff] %vm8095_vm4, %v8083_v23  ;;  %v8086_v41 = vmax.f32 %v7958_v39, 0.0  ;;  %v7956_v25 = vadd.f32 %v14863_v56, %v7821_v15  ;;  %v7826_v0 = vadd.f32 %v10687_v14, %v7134_v21  ;;  %v7132_v38 = vadd.f32 %v6981_v45, %v14491_v50 }
 0x55c   : > { %v10558_v31 = vpop.f32.mrf.mxu1  ;;  %v7676_v6 = vpop.f32.mrf.mxu0 }
 0x55d   : > { %8215 = vst.msk [vmem:[%s14547_s10 + $0x3b8] sm:$0xff] %vm8095_vm4, %v8086_v41  ;;  %v8084_v55 = vmax.f32 %v7956_v25, 0.0  ;;  %v7961_v60 = vadd.f32 %v14863_v56, %v7826_v0  ;;  %v7824_v4 = vadd.f32 %v7673_v62, %v7132_v38  ;;  %v7135_v28 = vadd.f32 %v10558_v31, %v14496_v34 }
 0x55e   : > { %v6984_v30 = vpop.f32.mrf.mxu1  ;;  %v10691_v44 = vpop.f32.mrf.mxu0 }
 0x55f   : > { %8213 = vst.msk [vmem:[%s14547_s10 + $0x3a8] sm:$0xff] %vm8095_vm4, %v8084_v55  ;;  %v8089_v11 = vmax.f32 %v7961_v60, 0.0  ;;  %v7959_v36 = vadd.f32 %v14863_v56, %v7824_v4  ;;  %v7827_v50 = vadd.f32 %v10688_v9, %v7135_v28  ;;  %v7133_v5 = vadd.f32 %v6984_v30, %v14503_v19 }
 0x560   : > { %v10561_v42 = vpop.f32.mrf.mxu1  ;;  %v7689_v43 = vpop.f32.mrf.mxu0 }
 0x561   : > { %8218 = vst.msk [vmem:[%s14547_s10 + $0x3d0] sm:$0xff] %vm8095_vm4, %v8089_v11  ;;  %v8087_v48 = vmax.f32 %v7959_v36, 0.0  ;;  %v7962_v10 = vadd.f32 %v14863_v56, %v7827_v50  ;;  %v7825_v34 = vadd.f32 %v7676_v6, %v7133_v5  ;;  %v7138_v8 = vadd.f32 %v10561_v42, %v14508_v26 }
 0x562   : > { %v6997_v16 = vpop.f32.mrf.mxu1  ;;  %v10692_v7 = vpop.f32.mrf.mxu0 }
 0x563   : > { %8216 = vst.msk [vmem:[%s14547_s10 + $0x3c0] sm:$0xff] %vm8095_vm4, %v8087_v48  ;;  %v8090_v46 = vmax.f32 %v7962_v10, 0.0  ;;  %v7960_v40 = vadd.f32 %v14863_v56, %v7825_v34  ;;  %v7830_v27 = vadd.f32 %v10691_v44, %v7138_v8  ;;  %v7136_v19 = vadd.f32 %v6997_v16, %v14511_v17 }
 0x564   : > { %v10562_v22 = vpop.f32.mrf.mxu1  ;;  %v7692_v2 = vpop.f32.mrf.mxu0 }
 0x565   : > { %8219 = vst.msk [vmem:[%s14547_s10 + $0x3d8] sm:$0xff] %vm8095_vm4, %v8090_v46  ;;  %v8088_v32 = vmax.f32 %v7960_v40, 0.0  ;;  %v7965_v61 = vadd.f32 %v14863_v56, %v7830_v27  ;;  %v7828_v26 = vadd.f32 %v7689_v43, %v7136_v19  ;;  %v7139_v37 = vadd.f32 %v10562_v22, %v16932_v20 }
 0x566   : > { %v7000_v49 = vpop.f32.mrf.mxu1 }
 0x567   : > { %8217 = vst.msk [vmem:[%s14547_s10 + $0x3c8] sm:$0xff] %vm8095_vm4, %v8088_v32  ;;  %v8093_v13 = vmax.f32 %v7965_v61, 0.0  ;;  %v7963_v17 = vadd.f32 %v14863_v56, %v7828_v26  ;;  %v7831_v3 = vadd.f32 %v10692_v7, %v7139_v37  ;;  %v7137_v63 = vadd.f32 %v7000_v49, %v16933_v57 }
 0x569   : > { %8222 = vst.msk [vmem:[%s14547_s10 + $0x3f0] sm:$0xff] %vm8095_vm4, %v8093_v13  ;;  %v8091_v12 = vmax.f32 %v7963_v17, 0.0  ;;  %v7966_v18 = vadd.f32 %v14863_v56, %v7831_v3  ;;  %v7829_v47 = vadd.f32 %v7692_v2, %v7137_v63 }
 0x56b   : > { %8220 = vst.msk [vmem:[%s14547_s10 + $0x3e0] sm:$0xff] %vm8095_vm4, %v8091_v12  ;;  %v8094_v53 = vmax.f32 %v7966_v18, 0.0  ;;  %v7964_v29 = vadd.f32 %v14863_v56, %v7829_v47 }
 0x56d   : > { %8223 = vst.msk [vmem:[%s14547_s10 + $0x3f8] sm:$0xff] %vm8095_vm4, %v8094_v53  ;;  %v8092_v52 = vmax.f32 %v7964_v29, 0.0 }
 0x56f   : > { %8221 = vst.msk [vmem:[%s14547_s10 + $0x3e8] sm:$0xff] %vm8095_vm4, %v8092_v52 }
 0x570   : > { %10777 = shalt.err (!%p10774_p5)
}
 0x571   : > { %s10778_s4 = scalar_lea.hbm %s15114_s26, 16384  ;;  %s10782_s7 = scalar_lea.hbm %s15172_s3, 32768 }
 0x572   : > { %p10779_p6 = scmp.ne.s32.totalorder %s15114_s26, %s10778_s4  ;;  %p10783_p10 = scmp.lt.s32.totalorder %s15114_s26, %s15172_s3 }
 0x573   : > { %p10784_p11 = scmp.lt.s32.totalorder %s10782_s7, %s10778_s4 }
 0x574   : > { %p10780_p7 = pnand %p10779_p6, %p10905_p4 }
 0x575   : > { %p10785_p12 = por %p10784_p11, %p10783_p10 }
 0x576   : > { %p10781_p9 = pneg %p10780_p7 }
 0x578   : > { %p10786_p13 = pnand %p10785_p12, %p10781_p9 }
 0x57a   : > { %10789 = shalt.err (!%p10786_p13)
}
 0x57b   : > { %s10843_s9 = smov 128   ;;  %s10844_s11 = smov 8  }
 0x57c   : > { %10706 = dma.vmem_to_hbm [thread:$0]  (%p10905_p4), %s15116_s19, 16384, %s15114_s26, %s15124_s15, %s10843_s9, %s10843_s9, %s10844_s11  }
 0x57d PF: > { %p10712_p0 = scmp.ge.s32.totalorder %s10840_s17, 2  ;;  %s8254_s18 = sand.u32 1, %s10820_s12  }
 0x57e   : > { %s8255_s21 = scalar_lea.sflag [#allocation3], %s8254_s18 }
 0x57f   : > { %p10709_p1 = pnand %p10712_p0, %p10912_p8 }
 0x581   : > { %p10710_p2 = pneg %p10709_p1 }
 0x583   : > { %10815 = dma.done.wait (%p10710_p2), %s8255_s21, 16384  }
 0x584   : > { %10817 = vsyncadd (%p10710_p2), %s8255_s21, 4294950912  ;;  %s16_s17 = sadd.s32 1, %s10840_s17   ;;  %s16934_s12 = smov %s10824_s13 }
 0x585   : > { %p13_p3 = scmp.ge.s32.totalorder %s16_s17, 4   ;;  %s16935_s13 = smov %s10828_s14 }
 0x586   : > { %s16936_s14 = smov %s10918_s25  ;;  %s16937_s15 = smov %s10836_s16 }
 0x587   : > { %s16938_s16 = smov %s16940_s20  ;;  %15 = sbr.rel (!%p13_p3) target bundleno = 4 (0x4), region = 81 }
 0x58c   :  { %8260 = vsyncpa [#allocation3], 1 }
 0x58d   :  { %8262 = vsyncpa [#allocation3 + $0x1], 1 }

</bundles_post_ra>
